<compile_context>
chip_gen: v7x
topology: tpu7x:2x2x1
jax: 0.10.0
libtpu: 0.0.40
codegen_flags: <defaults>
</compile_context>

<pallas_src>
import jax
import jax.numpy as jnp
from jax.experimental import pallas as pl
from jax.experimental.pallas import tpu as pltpu

GATES = 4  # i, f, o, g


def semantic_lstm_kernel(
    captions_ref,              # (B, T)       int32
    cnn_ref,                   # (B, C)       f32
    sem_ref,                   # (B, S)       f32
    emb_wa_ref,                # (V, 4I)      bf16   emb @ wa (gate-stacked)
    wb_ref,                    # (S, 4I)      bf16   x path semantic gate
    wc_ref,                    # (4, I, H)    bf16   x path per-gate C (dense)
    ua_ref,                    # (H, 4I)      bf16   h path
    ub_ref,                    # (S, 4I)      bf16
    uc_ref,                    # (4, I, H)    bf16
    ca_ref,                    # (C, 4I)      bf16   v path
    cb_ref,                    # (S, 4I)      bf16
    cc_ref,                    # (4, I, H)    bf16
    bias_ref,                  # (4, 1, H)    f32
    wlast_ref,                 # (H, V)       bf16  (transposed torch Linear W)
    blast_ref,                 # (1, V)       f32
    out_ref,                   # (B, T-1)     int32
):
    f32 = jnp.float32
    bf16 = jnp.bfloat16
    B = cnn_ref.shape[0]
    V = emb_wa_ref.shape[0]
    I = wc_ref.shape[1]
    H = wc_ref.shape[2]
    Tm1 = out_ref.shape[1]

    def mm(a, b):
        # bf16 MXU inputs, f32 accumulation.
        return jnp.dot(a.astype(bf16), b, preferred_element_type=f32)

    sem = sem_ref[...]          # (B, S) f32
    cnn = cnn_ref[...]          # (B, C) f32  (eval: dropout_cnn is identity)

    # ---- time-invariant semantic projections (gate-stacked along lanes) ----
    bx_all = mm(sem, wb_ref[...])                     # (B, 4I)
    bh_all = mm(sem, ub_ref[...])                     # (B, 4I)
    bv_all = mm(sem, cb_ref[...])                     # (B, 4I)

    # loop-invariant visual contribution per gate, gate bias folded in
    va_all = mm(cnn, ca_ref[...]) * bv_all            # (B, 4I)
    v_con = [mm(va_all[:, k * I:(k + 1) * I], cc_ref[k]) + bias_ref[k]
             for k in range(GATES)]                   # 4 x (B, H)

    # hoisted iota (JAX does not CSE broadcast_in_dim)
    vocab_iota = jax.lax.broadcasted_iota(jnp.int32, (B, V), 1)

    # ---- initial token = captions[:, 0] ------------------------------------
    start_tok = captions_ref[:, 0:1]                  # (B, 1) int32
    onehot = (vocab_iota == start_tok).astype(bf16)   # (B, V) bf16

    h = jnp.zeros((B, H), f32)
    c = jnp.zeros((B, H), f32)

    # Static Python loop == full unroll (Tm1 small & static): gives the LLO
    # scheduler cross-step visibility; LSTM carries bound the live ranges.
    for t in range(Tm1):
        # x path: one-hot lookup fused with the gate-stacked A projection.
        xa = mm(onehot, emb_wa_ref[...]) * bx_all     # (B, 4I)
        # h path
        ha = mm(h, ua_ref[...]) * bh_all              # (B, 4I)

        # per-gate dense C matmuls (no zero padding)
        pre = [mm(xa[:, k * I:(k + 1) * I], wc_ref[k])
               + mm(ha[:, k * I:(k + 1) * I], uc_ref[k])
               + v_con[k]
               for k in range(GATES)]                 # 4 x (B, H)

        i_g = jax.nn.sigmoid(pre[0])
        f_g = jax.nn.sigmoid(pre[1])
        o_g = jax.nn.sigmoid(pre[2])
        g_g = jnp.tanh(pre[3])

        c = f_g * c + i_g * g_g
        h = o_g * jnp.tanh(c)

        logits = mm(h, wlast_ref[...]) + blast_ref[...]   # (B, V) f32

        # greedy argmax, first-max-index tie break (matches torch.argmax)
        m = jnp.max(logits, axis=-1, keepdims=True)
        idx = jnp.min(jnp.where(logits == m, vocab_iota, V),
                      axis=-1, keepdims=True)             # (B, 1) int32
        onehot = (vocab_iota == idx).astype(bf16)         # next-step token

        out_ref[:, t:t + 1] = idx                         # per-step store


# ---------------------------------------------------------------------------
# Host-side weight packing helpers
# ---------------------------------------------------------------------------
def _stack_gates(w):
    """(4, D, I) -> (D, 4*I), gates concatenated along the output lanes."""
    return jnp.concatenate([w[k] for k in range(GATES)], axis=1)


def semantic_lstm_greedy(captions, cnn_features, semantics, params):
    B, T = captions.shape
    bf16 = jnp.bfloat16
    f32 = jnp.float32

    # Pre-fold the embedding table into the gate-stacked x-path A projection.
    emb_wa = (params["emb"].astype(f32)
              @ _stack_gates(params["wa"]).astype(f32)).astype(bf16)  # (V, 4I)

    wb = _stack_gates(params["wb"]).astype(bf16)   # (S, 4I)
    wc = params["wc"].astype(bf16)                 # (4, I, H) dense per gate
    ua = _stack_gates(params["ua"]).astype(bf16)   # (H, 4I)
    ub = _stack_gates(params["ub"]).astype(bf16)   # (S, 4I)
    uc = params["uc"].astype(bf16)                 # (4, I, H)
    ca = _stack_gates(params["ca"]).astype(bf16)   # (C, 4I)
    cb = _stack_gates(params["cb"]).astype(bf16)   # (S, 4I)
    cc = params["cc"].astype(bf16)                 # (4, I, H)
    bias = params["bias"].reshape(GATES, 1, -1).astype(f32)   # (4, 1, H)
    wlast = params["wlast_t"].astype(bf16)         # (H, V)
    blast = params["blast"].astype(f32)            # (1, V)

    args = (
        captions, cnn_features, semantics,
        emb_wa, wb, wc, ua, ub, uc, ca, cb, cc,
        bias, wlast, blast,
    )
    vmem = pl.BlockSpec(memory_space=pltpu.MemorySpace.VMEM)
    return pl.pallas_call(
        semantic_lstm_kernel,
        out_shape=jax.ShapeDtypeStruct((B, T - 1), jnp.int32),
        in_specs=[vmem] * len(args),
        out_specs=vmem,
        compiler_params=pltpu.CompilerParams(
            # Headroom if vocab/hidden are scaled up (tiny at demo shapes).
            vmem_limit_bytes=32 * 1024 * 1024),
    )(*args)


def _xavier(key, shape):
    """torch.nn.init.xavier_normal_ on the last two dims."""
    fan_out, fan_in = shape[-2], shape[-1]
    std = (2.0 / (fan_in + fan_out)) ** 0.5
    return std * jax.random.normal(key, shape, jnp.float32)


def make_params(key, *, vocab, embed, inp, hid, sem, cnn):
    ks = jax.random.split(key, 16)
    return {
        # caption_embedding: Embedding(vocab, embed), default N(0, 1) init
        "emb": jax.random.normal(ks[0], (vocab, embed), jnp.float32),
        # x path (caption embedding)
        "wa": _xavier(ks[1], (GATES, embed, inp)),
        "wb": _xavier(ks[2], (GATES, sem, inp)),
        "wc": _xavier(ks[3], (GATES, inp, hid)),
        # h path (previous hidden)
        "ua": _xavier(ks[4], (GATES, hid, inp)),
        "ub": _xavier(ks[5], (GATES, sem, inp)),
        "uc": _xavier(ks[6], (GATES, inp, hid)),
        # v path (cnn features)
        "ca": _xavier(ks[7], (GATES, cnn, inp)),
        "cb": _xavier(ks[8], (GATES, sem, inp)),
        "cc": _xavier(ks[9], (GATES, inp, hid)),
        # gate biases (zeros, matching _get_bias)
        "bias": jnp.zeros((GATES, hid), jnp.float32),
        # linear_last: Linear(hidden, vocab); store W^T = (hid, vocab)
        "wlast_t": ((1.0 / hid) ** 0.5
                    * jax.random.normal(ks[10], (hid, vocab), jnp.float32)),
        "blast": jnp.zeros((1, vocab), jnp.float32),
    }


if __name__ == "__main__":
    # Small, lane-friendly shapes consistent with the module's forward.
    B, T = 8, 8                      # batch, timestep
    VOCAB, EMBED, INP, HID = 128, 128, 128, 128
    SEM, CNN = 128, 128

    key = jax.random.PRNGKey(0)
    kp, kc, kf, ks_ = jax.random.split(key, 4)

    params = make_params(kp, vocab=VOCAB, embed=EMBED, inp=INP,
                         hid=HID, sem=SEM, cnn=CNN)

    captions = jax.random.randint(kc, (B, T), 0, VOCAB, jnp.int32)
    cnn_features = jax.random.normal(kf, (B, CNN), jnp.float32)
    semantics = jax.random.normal(ks_, (B, SEM), jnp.float32)

    out = semantic_lstm_greedy(captions, cnn_features, semantics, params)
    out = jax.block_until_ready(out)

    assert out.shape == (B, T - 1), out.shape
    assert out.dtype == jnp.int32
    assert bool(jnp.all((out >= 0) & (out < VOCAB)))
    print("KERNEL_OK")
</pallas_src>

<mosaic_0001>
module attributes {stable_mosaic.version = 11 : i64} {
  func.func @semantic_lstm_kernel(%arg0: memref<8x8xi32, #tpu.memory_space<vmem>>, %arg1: memref<8x128xf32, #tpu.memory_space<vmem>>, %arg2: memref<8x128xf32, #tpu.memory_space<vmem>>, %arg3: memref<128x512xbf16, #tpu.memory_space<vmem>>, %arg4: memref<128x512xbf16, #tpu.memory_space<vmem>>, %arg5: memref<4x128x128xbf16, #tpu.memory_space<vmem>>, %arg6: memref<128x512xbf16, #tpu.memory_space<vmem>>, %arg7: memref<128x512xbf16, #tpu.memory_space<vmem>>, %arg8: memref<4x128x128xbf16, #tpu.memory_space<vmem>>, %arg9: memref<128x512xbf16, #tpu.memory_space<vmem>>, %arg10: memref<128x512xbf16, #tpu.memory_space<vmem>>, %arg11: memref<4x128x128xbf16, #tpu.memory_space<vmem>>, %arg12: memref<4x1x128xf32, #tpu.memory_space<vmem>>, %arg13: memref<128x128xbf16, #tpu.memory_space<vmem>>, %arg14: memref<1x128xf32, #tpu.memory_space<vmem>>, %arg15: memref<8x7xi32, #tpu.memory_space<vmem>>) attributes {dimension_semantics = [], scalar_prefetch = 0 : i64, scratch_operands = 0 : i64, tpu.core_type = #tpu.core_type<tc>} {
    %c0 = arith.constant 0 : index
    %c0_0 = arith.constant 0 : index
    %0 = vector.load %arg2[%c0, %c0_0] : memref<8x128xf32, #tpu.memory_space<vmem>>, vector<8x128xf32>
    %c0_1 = arith.constant 0 : index
    %c0_2 = arith.constant 0 : index
    %1 = vector.load %arg1[%c0_1, %c0_2] : memref<8x128xf32, #tpu.memory_space<vmem>>, vector<8x128xf32>
    %c0_3 = arith.constant 0 : index
    %c0_4 = arith.constant 0 : index
    %2 = vector.load %arg4[%c0_3, %c0_4] : memref<128x512xbf16, #tpu.memory_space<vmem>>, vector<128x512xbf16>
    %3 = arith.truncf %0 : vector<8x128xf32> to vector<8x128xbf16>
    %cst = arith.constant dense<0.000000e+00> : vector<8x512xf32>
    %4 = tpu.matmul %3, %2, %cst {dimension_numbers = #tpu.dot_dimension_numbers<[1], [0], [0], [1], [0, 0, 1, 1], [], []>} : vector<8x128xbf16>, vector<128x512xbf16>, vector<8x512xf32> -> vector<8x512xf32>
    %c0_5 = arith.constant 0 : index
    %c0_6 = arith.constant 0 : index
    %5 = vector.load %arg7[%c0_5, %c0_6] : memref<128x512xbf16, #tpu.memory_space<vmem>>, vector<128x512xbf16>
    %6 = arith.truncf %0 : vector<8x128xf32> to vector<8x128xbf16>
    %cst_7 = arith.constant dense<0.000000e+00> : vector<8x512xf32>
    %7 = tpu.matmul %6, %5, %cst_7 {dimension_numbers = #tpu.dot_dimension_numbers<[1], [0], [0], [1], [0, 0, 1, 1], [], []>} : vector<8x128xbf16>, vector<128x512xbf16>, vector<8x512xf32> -> vector<8x512xf32>
    %c0_8 = arith.constant 0 : index
    %c0_9 = arith.constant 0 : index
    %8 = vector.load %arg10[%c0_8, %c0_9] : memref<128x512xbf16, #tpu.memory_space<vmem>>, vector<128x512xbf16>
    %9 = arith.truncf %0 : vector<8x128xf32> to vector<8x128xbf16>
    %cst_10 = arith.constant dense<0.000000e+00> : vector<8x512xf32>
    %10 = tpu.matmul %9, %8, %cst_10 {dimension_numbers = #tpu.dot_dimension_numbers<[1], [0], [0], [1], [0, 0, 1, 1], [], []>} : vector<8x128xbf16>, vector<128x512xbf16>, vector<8x512xf32> -> vector<8x512xf32>
    %c0_11 = arith.constant 0 : index
    %c0_12 = arith.constant 0 : index
    %11 = vector.load %arg9[%c0_11, %c0_12] : memref<128x512xbf16, #tpu.memory_space<vmem>>, vector<128x512xbf16>
    %12 = arith.truncf %1 : vector<8x128xf32> to vector<8x128xbf16>
    %cst_13 = arith.constant dense<0.000000e+00> : vector<8x512xf32>
    %13 = tpu.matmul %12, %11, %cst_13 {dimension_numbers = #tpu.dot_dimension_numbers<[1], [0], [0], [1], [0, 0, 1, 1], [], []>} : vector<8x128xbf16>, vector<128x512xbf16>, vector<8x512xf32> -> vector<8x512xf32>
    %14 = arith.mulf %13, %10 : vector<8x512xf32>
    %15 = vector.extract_strided_slice %14 {offsets = [0, 0], sizes = [8, 128], strides = [1, 1]} : vector<8x512xf32> to vector<8x128xf32>
    %c0_14 = arith.constant 0 : index
    %c0_15 = arith.constant 0 : index
    %c0_16 = arith.constant 0 : index
    %16 = vector.load %arg11[%c0_14, %c0_15, %c0_16] : memref<4x128x128xbf16, #tpu.memory_space<vmem>>, vector<1x128x128xbf16>
    %17 = vector.shape_cast %16 : vector<1x128x128xbf16> to vector<128x128xbf16>
    %18 = arith.truncf %15 : vector<8x128xf32> to vector<8x128xbf16>
    %cst_17 = arith.constant dense<0.000000e+00> : vector<8x128xf32>
    %19 = tpu.matmul %18, %17, %cst_17 {dimension_numbers = #tpu.dot_dimension_numbers<[1], [0], [0], [1], [0, 0, 1, 1], [], []>} : vector<8x128xbf16>, vector<128x128xbf16>, vector<8x128xf32> -> vector<8x128xf32>
    %c0_18 = arith.constant 0 : index
    %c0_19 = arith.constant 0 : index
    %c0_20 = arith.constant 0 : index
    %20 = vector.load %arg12[%c0_18, %c0_19, %c0_20] : memref<4x1x128xf32, #tpu.memory_space<vmem>>, vector<1x1x128xf32>
    %21 = vector.shape_cast %20 : vector<1x1x128xf32> to vector<1x128xf32>
    %22 = vector.broadcast %21 : vector<1x128xf32> to vector<8x128xf32>
    %23 = arith.addf %19, %22 : vector<8x128xf32>
    %24 = vector.extract_strided_slice %14 {offsets = [0, 128], sizes = [8, 128], strides = [1, 1]} : vector<8x512xf32> to vector<8x128xf32>
    %c1 = arith.constant 1 : index
    %c0_21 = arith.constant 0 : index
    %c0_22 = arith.constant 0 : index
    %25 = vector.load %arg11[%c1, %c0_21, %c0_22] : memref<4x128x128xbf16, #tpu.memory_space<vmem>>, vector<1x128x128xbf16>
    %26 = vector.shape_cast %25 : vector<1x128x128xbf16> to vector<128x128xbf16>
    %27 = arith.truncf %24 : vector<8x128xf32> to vector<8x128xbf16>
    %cst_23 = arith.constant dense<0.000000e+00> : vector<8x128xf32>
    %28 = tpu.matmul %27, %26, %cst_23 {dimension_numbers = #tpu.dot_dimension_numbers<[1], [0], [0], [1], [0, 0, 1, 1], [], []>} : vector<8x128xbf16>, vector<128x128xbf16>, vector<8x128xf32> -> vector<8x128xf32>
    %c1_24 = arith.constant 1 : index
    %c0_25 = arith.constant 0 : index
    %c0_26 = arith.constant 0 : index
    %29 = vector.load %arg12[%c1_24, %c0_25, %c0_26] : memref<4x1x128xf32, #tpu.memory_space<vmem>>, vector<1x1x128xf32>
    %30 = vector.shape_cast %29 : vector<1x1x128xf32> to vector<1x128xf32>
    %31 = vector.broadcast %30 : vector<1x128xf32> to vector<8x128xf32>
    %32 = arith.addf %28, %31 : vector<8x128xf32>
    %33 = vector.extract_strided_slice %14 {offsets = [0, 256], sizes = [8, 128], strides = [1, 1]} : vector<8x512xf32> to vector<8x128xf32>
    %c2 = arith.constant 2 : index
    %c0_27 = arith.constant 0 : index
    %c0_28 = arith.constant 0 : index
    %34 = vector.load %arg11[%c2, %c0_27, %c0_28] : memref<4x128x128xbf16, #tpu.memory_space<vmem>>, vector<1x128x128xbf16>
    %35 = vector.shape_cast %34 : vector<1x128x128xbf16> to vector<128x128xbf16>
    %36 = arith.truncf %33 : vector<8x128xf32> to vector<8x128xbf16>
    %cst_29 = arith.constant dense<0.000000e+00> : vector<8x128xf32>
    %37 = tpu.matmul %36, %35, %cst_29 {dimension_numbers = #tpu.dot_dimension_numbers<[1], [0], [0], [1], [0, 0, 1, 1], [], []>} : vector<8x128xbf16>, vector<128x128xbf16>, vector<8x128xf32> -> vector<8x128xf32>
    %c2_30 = arith.constant 2 : index
    %c0_31 = arith.constant 0 : index
    %c0_32 = arith.constant 0 : index
    %38 = vector.load %arg12[%c2_30, %c0_31, %c0_32] : memref<4x1x128xf32, #tpu.memory_space<vmem>>, vector<1x1x128xf32>
    %39 = vector.shape_cast %38 : vector<1x1x128xf32> to vector<1x128xf32>
    %40 = vector.broadcast %39 : vector<1x128xf32> to vector<8x128xf32>
    %41 = arith.addf %37, %40 : vector<8x128xf32>
    %42 = vector.extract_strided_slice %14 {offsets = [0, 384], sizes = [8, 128], strides = [1, 1]} : vector<8x512xf32> to vector<8x128xf32>
    %c3 = arith.constant 3 : index
    %c0_33 = arith.constant 0 : index
    %c0_34 = arith.constant 0 : index
    %43 = vector.load %arg11[%c3, %c0_33, %c0_34] : memref<4x128x128xbf16, #tpu.memory_space<vmem>>, vector<1x128x128xbf16>
    %44 = vector.shape_cast %43 : vector<1x128x128xbf16> to vector<128x128xbf16>
    %45 = arith.truncf %42 : vector<8x128xf32> to vector<8x128xbf16>
    %cst_35 = arith.constant dense<0.000000e+00> : vector<8x128xf32>
    %46 = tpu.matmul %45, %44, %cst_35 {dimension_numbers = #tpu.dot_dimension_numbers<[1], [0], [0], [1], [0, 0, 1, 1], [], []>} : vector<8x128xbf16>, vector<128x128xbf16>, vector<8x128xf32> -> vector<8x128xf32>
    %c3_36 = arith.constant 3 : index
    %c0_37 = arith.constant 0 : index
    %c0_38 = arith.constant 0 : index
    %47 = vector.load %arg12[%c3_36, %c0_37, %c0_38] : memref<4x1x128xf32, #tpu.memory_space<vmem>>, vector<1x1x128xf32>
    %48 = vector.shape_cast %47 : vector<1x1x128xf32> to vector<1x128xf32>
    %49 = vector.broadcast %48 : vector<1x128xf32> to vector<8x128xf32>
    %50 = arith.addf %46, %49 : vector<8x128xf32>
    %51 = tpu.iota {dimensions = array<i32: 1>} : vector<8x128xi32>
    %c0_39 = arith.constant 0 : index
    %c0_40 = arith.constant 0 : index
    %52 = vector.load %arg0[%c0_39, %c0_40] : memref<8x8xi32, #tpu.memory_space<vmem>>, vector<8x1xi32>
    %53 = vector.broadcast %52 : vector<8x1xi32> to vector<8x128xi32>
    %54 = arith.cmpi eq, %51, %53 : vector<8x128xi32>
    %55 = arith.extui %54 : vector<8x128xi1> to vector<8x128xi32>
    %56 = arith.sitofp %55 : vector<8x128xi32> to vector<8x128xf32>
    %57 = arith.truncf %56 : vector<8x128xf32> to vector<8x128xbf16>
    %cst_41 = arith.constant 0.000000e+00 : f32
    %58 = vector.broadcast %cst_41 : f32 to vector<8x128xf32>
    %cst_42 = arith.constant 0.000000e+00 : f32
    %59 = vector.broadcast %cst_42 : f32 to vector<8x128xf32>
    %c0_43 = arith.constant 0 : index
    %c0_44 = arith.constant 0 : index
    %60 = vector.load %arg3[%c0_43, %c0_44] : memref<128x512xbf16, #tpu.memory_space<vmem>>, vector<128x512xbf16>
    %cst_45 = arith.constant dense<0.000000e+00> : vector<8x512xf32>
    %61 = tpu.matmul %57, %60, %cst_45 {dimension_numbers = #tpu.dot_dimension_numbers<[1], [0], [0], [1], [0, 0, 1, 1], [], []>} : vector<8x128xbf16>, vector<128x512xbf16>, vector<8x512xf32> -> vector<8x512xf32>
    %62 = arith.mulf %61, %4 : vector<8x512xf32>
    %c0_46 = arith.constant 0 : index
    %c0_47 = arith.constant 0 : index
    %63 = vector.load %arg6[%c0_46, %c0_47] : memref<128x512xbf16, #tpu.memory_space<vmem>>, vector<128x512xbf16>
    %64 = arith.truncf %58 : vector<8x128xf32> to vector<8x128xbf16>
    %cst_48 = arith.constant dense<0.000000e+00> : vector<8x512xf32>
    %65 = tpu.matmul %64, %63, %cst_48 {dimension_numbers = #tpu.dot_dimension_numbers<[1], [0], [0], [1], [0, 0, 1, 1], [], []>} : vector<8x128xbf16>, vector<128x512xbf16>, vector<8x512xf32> -> vector<8x512xf32>
    %66 = arith.mulf %65, %7 : vector<8x512xf32>
    %67 = vector.extract_strided_slice %62 {offsets = [0, 0], sizes = [8, 128], strides = [1, 1]} : vector<8x512xf32> to vector<8x128xf32>
    %c0_49 = arith.constant 0 : index
    %c0_50 = arith.constant 0 : index
    %c0_51 = arith.constant 0 : index
    %68 = vector.load %arg5[%c0_49, %c0_50, %c0_51] : memref<4x128x128xbf16, #tpu.memory_space<vmem>>, vector<1x128x128xbf16>
    %69 = vector.shape_cast %68 : vector<1x128x128xbf16> to vector<128x128xbf16>
    %70 = arith.truncf %67 : vector<8x128xf32> to vector<8x128xbf16>
    %cst_52 = arith.constant dense<0.000000e+00> : vector<8x128xf32>
    %71 = tpu.matmul %70, %69, %cst_52 {dimension_numbers = #tpu.dot_dimension_numbers<[1], [0], [0], [1], [0, 0, 1, 1], [], []>} : vector<8x128xbf16>, vector<128x128xbf16>, vector<8x128xf32> -> vector<8x128xf32>
    %72 = vector.extract_strided_slice %66 {offsets = [0, 0], sizes = [8, 128], strides = [1, 1]} : vector<8x512xf32> to vector<8x128xf32>
    %c0_53 = arith.constant 0 : index
    %c0_54 = arith.constant 0 : index
    %c0_55 = arith.constant 0 : index
    %73 = vector.load %arg8[%c0_53, %c0_54, %c0_55] : memref<4x128x128xbf16, #tpu.memory_space<vmem>>, vector<1x128x128xbf16>
    %74 = vector.shape_cast %73 : vector<1x128x128xbf16> to vector<128x128xbf16>
    %75 = arith.truncf %72 : vector<8x128xf32> to vector<8x128xbf16>
    %cst_56 = arith.constant dense<0.000000e+00> : vector<8x128xf32>
    %76 = tpu.matmul %75, %74, %cst_56 {dimension_numbers = #tpu.dot_dimension_numbers<[1], [0], [0], [1], [0, 0, 1, 1], [], []>} : vector<8x128xbf16>, vector<128x128xbf16>, vector<8x128xf32> -> vector<8x128xf32>
    %77 = arith.addf %71, %76 : vector<8x128xf32>
    %78 = arith.addf %77, %23 : vector<8x128xf32>
    %79 = vector.extract_strided_slice %62 {offsets = [0, 128], sizes = [8, 128], strides = [1, 1]} : vector<8x512xf32> to vector<8x128xf32>
    %c1_57 = arith.constant 1 : index
    %c0_58 = arith.constant 0 : index
    %c0_59 = arith.constant 0 : index
    %80 = vector.load %arg5[%c1_57, %c0_58, %c0_59] : memref<4x128x128xbf16, #tpu.memory_space<vmem>>, vector<1x128x128xbf16>
    %81 = vector.shape_cast %80 : vector<1x128x128xbf16> to vector<128x128xbf16>
    %82 = arith.truncf %79 : vector<8x128xf32> to vector<8x128xbf16>
    %cst_60 = arith.constant dense<0.000000e+00> : vector<8x128xf32>
    %83 = tpu.matmul %82, %81, %cst_60 {dimension_numbers = #tpu.dot_dimension_numbers<[1], [0], [0], [1], [0, 0, 1, 1], [], []>} : vector<8x128xbf16>, vector<128x128xbf16>, vector<8x128xf32> -> vector<8x128xf32>
    %84 = vector.extract_strided_slice %66 {offsets = [0, 128], sizes = [8, 128], strides = [1, 1]} : vector<8x512xf32> to vector<8x128xf32>
    %c1_61 = arith.constant 1 : index
    %c0_62 = arith.constant 0 : index
    %c0_63 = arith.constant 0 : index
    %85 = vector.load %arg8[%c1_61, %c0_62, %c0_63] : memref<4x128x128xbf16, #tpu.memory_space<vmem>>, vector<1x128x128xbf16>
    %86 = vector.shape_cast %85 : vector<1x128x128xbf16> to vector<128x128xbf16>
    %87 = arith.truncf %84 : vector<8x128xf32> to vector<8x128xbf16>
    %cst_64 = arith.constant dense<0.000000e+00> : vector<8x128xf32>
    %88 = tpu.matmul %87, %86, %cst_64 {dimension_numbers = #tpu.dot_dimension_numbers<[1], [0], [0], [1], [0, 0, 1, 1], [], []>} : vector<8x128xbf16>, vector<128x128xbf16>, vector<8x128xf32> -> vector<8x128xf32>
    %89 = arith.addf %83, %88 : vector<8x128xf32>
    %90 = arith.addf %89, %32 : vector<8x128xf32>
    %91 = vector.extract_strided_slice %62 {offsets = [0, 256], sizes = [8, 128], strides = [1, 1]} : vector<8x512xf32> to vector<8x128xf32>
    %c2_65 = arith.constant 2 : index
    %c0_66 = arith.constant 0 : index
    %c0_67 = arith.constant 0 : index
    %92 = vector.load %arg5[%c2_65, %c0_66, %c0_67] : memref<4x128x128xbf16, #tpu.memory_space<vmem>>, vector<1x128x128xbf16>
    %93 = vector.shape_cast %92 : vector<1x128x128xbf16> to vector<128x128xbf16>
    %94 = arith.truncf %91 : vector<8x128xf32> to vector<8x128xbf16>
    %cst_68 = arith.constant dense<0.000000e+00> : vector<8x128xf32>
    %95 = tpu.matmul %94, %93, %cst_68 {dimension_numbers = #tpu.dot_dimension_numbers<[1], [0], [0], [1], [0, 0, 1, 1], [], []>} : vector<8x128xbf16>, vector<128x128xbf16>, vector<8x128xf32> -> vector<8x128xf32>
    %96 = vector.extract_strided_slice %66 {offsets = [0, 256], sizes = [8, 128], strides = [1, 1]} : vector<8x512xf32> to vector<8x128xf32>
    %c2_69 = arith.constant 2 : index
    %c0_70 = arith.constant 0 : index
    %c0_71 = arith.constant 0 : index
    %97 = vector.load %arg8[%c2_69, %c0_70, %c0_71] : memref<4x128x128xbf16, #tpu.memory_space<vmem>>, vector<1x128x128xbf16>
    %98 = vector.shape_cast %97 : vector<1x128x128xbf16> to vector<128x128xbf16>
    %99 = arith.truncf %96 : vector<8x128xf32> to vector<8x128xbf16>
    %cst_72 = arith.constant dense<0.000000e+00> : vector<8x128xf32>
    %100 = tpu.matmul %99, %98, %cst_72 {dimension_numbers = #tpu.dot_dimension_numbers<[1], [0], [0], [1], [0, 0, 1, 1], [], []>} : vector<8x128xbf16>, vector<128x128xbf16>, vector<8x128xf32> -> vector<8x128xf32>
    %101 = arith.addf %95, %100 : vector<8x128xf32>
    %102 = arith.addf %101, %41 : vector<8x128xf32>
    %103 = vector.extract_strided_slice %62 {offsets = [0, 384], sizes = [8, 128], strides = [1, 1]} : vector<8x512xf32> to vector<8x128xf32>
    %c3_73 = arith.constant 3 : index
    %c0_74 = arith.constant 0 : index
    %c0_75 = arith.constant 0 : index
    %104 = vector.load %arg5[%c3_73, %c0_74, %c0_75] : memref<4x128x128xbf16, #tpu.memory_space<vmem>>, vector<1x128x128xbf16>
    %105 = vector.shape_cast %104 : vector<1x128x128xbf16> to vector<128x128xbf16>
    %106 = arith.truncf %103 : vector<8x128xf32> to vector<8x128xbf16>
    %cst_76 = arith.constant dense<0.000000e+00> : vector<8x128xf32>
    %107 = tpu.matmul %106, %105, %cst_76 {dimension_numbers = #tpu.dot_dimension_numbers<[1], [0], [0], [1], [0, 0, 1, 1], [], []>} : vector<8x128xbf16>, vector<128x128xbf16>, vector<8x128xf32> -> vector<8x128xf32>
    %108 = vector.extract_strided_slice %66 {offsets = [0, 384], sizes = [8, 128], strides = [1, 1]} : vector<8x512xf32> to vector<8x128xf32>
    %c3_77 = arith.constant 3 : index
    %c0_78 = arith.constant 0 : index
    %c0_79 = arith.constant 0 : index
    %109 = vector.load %arg8[%c3_77, %c0_78, %c0_79] : memref<4x128x128xbf16, #tpu.memory_space<vmem>>, vector<1x128x128xbf16>
    %110 = vector.shape_cast %109 : vector<1x128x128xbf16> to vector<128x128xbf16>
    %111 = arith.truncf %108 : vector<8x128xf32> to vector<8x128xbf16>
    %cst_80 = arith.constant dense<0.000000e+00> : vector<8x128xf32>
    %112 = tpu.matmul %111, %110, %cst_80 {dimension_numbers = #tpu.dot_dimension_numbers<[1], [0], [0], [1], [0, 0, 1, 1], [], []>} : vector<8x128xbf16>, vector<128x128xbf16>, vector<8x128xf32> -> vector<8x128xf32>
    %113 = arith.addf %107, %112 : vector<8x128xf32>
    %114 = arith.addf %113, %50 : vector<8x128xf32>
    %115 = arith.negf %78 : vector<8x128xf32>
    %116 = math.exp %115 : vector<8x128xf32>
    %cst_81 = arith.constant 1.000000e+00 : f32
    %117 = vector.broadcast %cst_81 : f32 to vector<8x128xf32>
    %118 = arith.addf %117, %116 : vector<8x128xf32>
    %119 = arith.divf %117, %118 : vector<8x128xf32>
    %120 = arith.negf %90 : vector<8x128xf32>
    %121 = math.exp %120 : vector<8x128xf32>
    %cst_82 = arith.constant 1.000000e+00 : f32
    %122 = vector.broadcast %cst_82 : f32 to vector<8x128xf32>
    %123 = arith.addf %122, %121 : vector<8x128xf32>
    %124 = arith.divf %122, %123 : vector<8x128xf32>
    %125 = arith.negf %102 : vector<8x128xf32>
    %126 = math.exp %125 : vector<8x128xf32>
    %cst_83 = arith.constant 1.000000e+00 : f32
    %127 = vector.broadcast %cst_83 : f32 to vector<8x128xf32>
    %128 = arith.addf %127, %126 : vector<8x128xf32>
    %129 = arith.divf %127, %128 : vector<8x128xf32>
    %130 = math.tanh %114 : vector<8x128xf32>
    %131 = arith.mulf %124, %59 : vector<8x128xf32>
    %132 = arith.mulf %119, %130 : vector<8x128xf32>
    %133 = arith.addf %131, %132 : vector<8x128xf32>
    %134 = math.tanh %133 : vector<8x128xf32>
    %135 = arith.mulf %129, %134 : vector<8x128xf32>
    %c0_84 = arith.constant 0 : index
    %c0_85 = arith.constant 0 : index
    %136 = vector.load %arg13[%c0_84, %c0_85] : memref<128x128xbf16, #tpu.memory_space<vmem>>, vector<128x128xbf16>
    %137 = arith.truncf %135 : vector<8x128xf32> to vector<8x128xbf16>
    %cst_86 = arith.constant dense<0.000000e+00> : vector<8x128xf32>
    %138 = tpu.matmul %137, %136, %cst_86 {dimension_numbers = #tpu.dot_dimension_numbers<[1], [0], [0], [1], [0, 0, 1, 1], [], []>} : vector<8x128xbf16>, vector<128x128xbf16>, vector<8x128xf32> -> vector<8x128xf32>
    %c0_87 = arith.constant 0 : index
    %c0_88 = arith.constant 0 : index
    %139 = vector.load %arg14[%c0_87, %c0_88] : memref<1x128xf32, #tpu.memory_space<vmem>>, vector<1x128xf32>
    %140 = vector.broadcast %139 : vector<1x128xf32> to vector<8x128xf32>
    %141 = arith.addf %138, %140 : vector<8x128xf32>
    %cst_89 = arith.constant dense<0xFF800000> : vector<8xf32>
    %142 = vector.multi_reduction <maximumf>, %141, %cst_89 [1] : vector<8x128xf32> to vector<8xf32>
    %143 = vector.shape_cast %142 : vector<8xf32> to vector<8x1xf32>
    %144 = vector.broadcast %143 : vector<8x1xf32> to vector<8x128xf32>
    %145 = arith.cmpf oeq, %141, %144 : vector<8x128xf32>
    %c128_i32 = arith.constant 128 : i32
    %146 = vector.broadcast %c128_i32 : i32 to vector<8x128xi32>
    %147 = arith.select %145, %51, %146 : vector<8x128xi1>, vector<8x128xi32>
    %cst_90 = arith.constant dense<2147483647> : vector<8xi32>
    %148 = vector.multi_reduction <minsi>, %147, %cst_90 [1] : vector<8x128xi32> to vector<8xi32>
    %149 = vector.shape_cast %148 : vector<8xi32> to vector<8x1xi32>
    %150 = vector.broadcast %149 : vector<8x1xi32> to vector<8x128xi32>
    %151 = arith.cmpi eq, %51, %150 : vector<8x128xi32>
    %152 = arith.extui %151 : vector<8x128xi1> to vector<8x128xi32>
    %153 = arith.sitofp %152 : vector<8x128xi32> to vector<8x128xf32>
    %154 = arith.truncf %153 : vector<8x128xf32> to vector<8x128xbf16>
    %c0_91 = arith.constant 0 : index
    %c0_92 = arith.constant 0 : index
    %155 = vector.load %arg15[%c0_91, %c0_92] : memref<8x7xi32, #tpu.memory_space<vmem>>, vector<8x1xi32>
    tpu.vector_store %arg15[%c0_91, %c0_92], %149 {strides = array<i32>} : memref<8x7xi32, #tpu.memory_space<vmem>>, vector<8x1xi32>,
    %c0_93 = arith.constant 0 : index
    %c0_94 = arith.constant 0 : index
    %156 = vector.load %arg3[%c0_93, %c0_94] : memref<128x512xbf16, #tpu.memory_space<vmem>>, vector<128x512xbf16>
    %cst_95 = arith.constant dense<0.000000e+00> : vector<8x512xf32>
    %157 = tpu.matmul %154, %156, %cst_95 {dimension_numbers = #tpu.dot_dimension_numbers<[1], [0], [0], [1], [0, 0, 1, 1], [], []>} : vector<8x128xbf16>, vector<128x512xbf16>, vector<8x512xf32> -> vector<8x512xf32>
    %158 = arith.mulf %157, %4 : vector<8x512xf32>
    %c0_96 = arith.constant 0 : index
    %c0_97 = arith.constant 0 : index
    %159 = vector.load %arg6[%c0_96, %c0_97] : memref<128x512xbf16, #tpu.memory_space<vmem>>, vector<128x512xbf16>
    %160 = arith.truncf %135 : vector<8x128xf32> to vector<8x128xbf16>
    %cst_98 = arith.constant dense<0.000000e+00> : vector<8x512xf32>
    %161 = tpu.matmul %160, %159, %cst_98 {dimension_numbers = #tpu.dot_dimension_numbers<[1], [0], [0], [1], [0, 0, 1, 1], [], []>} : vector<8x128xbf16>, vector<128x512xbf16>, vector<8x512xf32> -> vector<8x512xf32>
    %162 = arith.mulf %161, %7 : vector<8x512xf32>
    %163 = vector.extract_strided_slice %158 {offsets = [0, 0], sizes = [8, 128], strides = [1, 1]} : vector<8x512xf32> to vector<8x128xf32>
    %c0_99 = arith.constant 0 : index
    %c0_100 = arith.constant 0 : index
    %c0_101 = arith.constant 0 : index
    %164 = vector.load %arg5[%c0_99, %c0_100, %c0_101] : memref<4x128x128xbf16, #tpu.memory_space<vmem>>, vector<1x128x128xbf16>
    %165 = vector.shape_cast %164 : vector<1x128x128xbf16> to vector<128x128xbf16>
    %166 = arith.truncf %163 : vector<8x128xf32> to vector<8x128xbf16>
    %cst_102 = arith.constant dense<0.000000e+00> : vector<8x128xf32>
    %167 = tpu.matmul %166, %165, %cst_102 {dimension_numbers = #tpu.dot_dimension_numbers<[1], [0], [0], [1], [0, 0, 1, 1], [], []>} : vector<8x128xbf16>, vector<128x128xbf16>, vector<8x128xf32> -> vector<8x128xf32>
    %168 = vector.extract_strided_slice %162 {offsets = [0, 0], sizes = [8, 128], strides = [1, 1]} : vector<8x512xf32> to vector<8x128xf32>
    %c0_103 = arith.constant 0 : index
    %c0_104 = arith.constant 0 : index
    %c0_105 = arith.constant 0 : index
    %169 = vector.load %arg8[%c0_103, %c0_104, %c0_105] : memref<4x128x128xbf16, #tpu.memory_space<vmem>>, vector<1x128x128xbf16>
    %170 = vector.shape_cast %169 : vector<1x128x128xbf16> to vector<128x128xbf16>
    %171 = arith.truncf %168 : vector<8x128xf32> to vector<8x128xbf16>
    %cst_106 = arith.constant dense<0.000000e+00> : vector<8x128xf32>
    %172 = tpu.matmul %171, %170, %cst_106 {dimension_numbers = #tpu.dot_dimension_numbers<[1], [0], [0], [1], [0, 0, 1, 1], [], []>} : vector<8x128xbf16>, vector<128x128xbf16>, vector<8x128xf32> -> vector<8x128xf32>
    %173 = arith.addf %167, %172 : vector<8x128xf32>
    %174 = arith.addf %173, %23 : vector<8x128xf32>
    %175 = vector.extract_strided_slice %158 {offsets = [0, 128], sizes = [8, 128], strides = [1, 1]} : vector<8x512xf32> to vector<8x128xf32>
    %c1_107 = arith.constant 1 : index
    %c0_108 = arith.constant 0 : index
    %c0_109 = arith.constant 0 : index
    %176 = vector.load %arg5[%c1_107, %c0_108, %c0_109] : memref<4x128x128xbf16, #tpu.memory_space<vmem>>, vector<1x128x128xbf16>
    %177 = vector.shape_cast %176 : vector<1x128x128xbf16> to vector<128x128xbf16>
    %178 = arith.truncf %175 : vector<8x128xf32> to vector<8x128xbf16>
    %cst_110 = arith.constant dense<0.000000e+00> : vector<8x128xf32>
    %179 = tpu.matmul %178, %177, %cst_110 {dimension_numbers = #tpu.dot_dimension_numbers<[1], [0], [0], [1], [0, 0, 1, 1], [], []>} : vector<8x128xbf16>, vector<128x128xbf16>, vector<8x128xf32> -> vector<8x128xf32>
    %180 = vector.extract_strided_slice %162 {offsets = [0, 128], sizes = [8, 128], strides = [1, 1]} : vector<8x512xf32> to vector<8x128xf32>
    %c1_111 = arith.constant 1 : index
    %c0_112 = arith.constant 0 : index
    %c0_113 = arith.constant 0 : index
    %181 = vector.load %arg8[%c1_111, %c0_112, %c0_113] : memref<4x128x128xbf16, #tpu.memory_space<vmem>>, vector<1x128x128xbf16>
    %182 = vector.shape_cast %181 : vector<1x128x128xbf16> to vector<128x128xbf16>
    %183 = arith.truncf %180 : vector<8x128xf32> to vector<8x128xbf16>
    %cst_114 = arith.constant dense<0.000000e+00> : vector<8x128xf32>
    %184 = tpu.matmul %183, %182, %cst_114 {dimension_numbers = #tpu.dot_dimension_numbers<[1], [0], [0], [1], [0, 0, 1, 1], [], []>} : vector<8x128xbf16>, vector<128x128xbf16>, vector<8x128xf32> -> vector<8x128xf32>
    %185 = arith.addf %179, %184 : vector<8x128xf32>
    %186 = arith.addf %185, %32 : vector<8x128xf32>
    %187 = vector.extract_strided_slice %158 {offsets = [0, 256], sizes = [8, 128], strides = [1, 1]} : vector<8x512xf32> to vector<8x128xf32>
    %c2_115 = arith.constant 2 : index
    %c0_116 = arith.constant 0 : index
    %c0_117 = arith.constant 0 : index
    %188 = vector.load %arg5[%c2_115, %c0_116, %c0_117] : memref<4x128x128xbf16, #tpu.memory_space<vmem>>, vector<1x128x128xbf16>
    %189 = vector.shape_cast %188 : vector<1x128x128xbf16> to vector<128x128xbf16>
    %190 = arith.truncf %187 : vector<8x128xf32> to vector<8x128xbf16>
    %cst_118 = arith.constant dense<0.000000e+00> : vector<8x128xf32>
    %191 = tpu.matmul %190, %189, %cst_118 {dimension_numbers = #tpu.dot_dimension_numbers<[1], [0], [0], [1], [0, 0, 1, 1], [], []>} : vector<8x128xbf16>, vector<128x128xbf16>, vector<8x128xf32> -> vector<8x128xf32>
    %192 = vector.extract_strided_slice %162 {offsets = [0, 256], sizes = [8, 128], strides = [1, 1]} : vector<8x512xf32> to vector<8x128xf32>
    %c2_119 = arith.constant 2 : index
    %c0_120 = arith.constant 0 : index
    %c0_121 = arith.constant 0 : index
    %193 = vector.load %arg8[%c2_119, %c0_120, %c0_121] : memref<4x128x128xbf16, #tpu.memory_space<vmem>>, vector<1x128x128xbf16>
    %194 = vector.shape_cast %193 : vector<1x128x128xbf16> to vector<128x128xbf16>
    %195 = arith.truncf %192 : vector<8x128xf32> to vector<8x128xbf16>
    %cst_122 = arith.constant dense<0.000000e+00> : vector<8x128xf32>
    %196 = tpu.matmul %195, %194, %cst_122 {dimension_numbers = #tpu.dot_dimension_numbers<[1], [0], [0], [1], [0, 0, 1, 1], [], []>} : vector<8x128xbf16>, vector<128x128xbf16>, vector<8x128xf32> -> vector<8x128xf32>
    %197 = arith.addf %191, %196 : vector<8x128xf32>
    %198 = arith.addf %197, %41 : vector<8x128xf32>
    %199 = vector.extract_strided_slice %158 {offsets = [0, 384], sizes = [8, 128], strides = [1, 1]} : vector<8x512xf32> to vector<8x128xf32>
    %c3_123 = arith.constant 3 : index
    %c0_124 = arith.constant 0 : index
    %c0_125 = arith.constant 0 : index
    %200 = vector.load %arg5[%c3_123, %c0_124, %c0_125] : memref<4x128x128xbf16, #tpu.memory_space<vmem>>, vector<1x128x128xbf16>
    %201 = vector.shape_cast %200 : vector<1x128x128xbf16> to vector<128x128xbf16>
    %202 = arith.truncf %199 : vector<8x128xf32> to vector<8x128xbf16>
    %cst_126 = arith.constant dense<0.000000e+00> : vector<8x128xf32>
    %203 = tpu.matmul %202, %201, %cst_126 {dimension_numbers = #tpu.dot_dimension_numbers<[1], [0], [0], [1], [0, 0, 1, 1], [], []>} : vector<8x128xbf16>, vector<128x128xbf16>, vector<8x128xf32> -> vector<8x128xf32>
    %204 = vector.extract_strided_slice %162 {offsets = [0, 384], sizes = [8, 128], strides = [1, 1]} : vector<8x512xf32> to vector<8x128xf32>
    %c3_127 = arith.constant 3 : index
    %c0_128 = arith.constant 0 : index
    %c0_129 = arith.constant 0 : index
    %205 = vector.load %arg8[%c3_127, %c0_128, %c0_129] : memref<4x128x128xbf16, #tpu.memory_space<vmem>>, vector<1x128x128xbf16>
    %206 = vector.shape_cast %205 : vector<1x128x128xbf16> to vector<128x128xbf16>
    %207 = arith.truncf %204 : vector<8x128xf32> to vector<8x128xbf16>
    %cst_130 = arith.constant dense<0.000000e+00> : vector<8x128xf32>
    %208 = tpu.matmul %207, %206, %cst_130 {dimension_numbers = #tpu.dot_dimension_numbers<[1], [0], [0], [1], [0, 0, 1, 1], [], []>} : vector<8x128xbf16>, vector<128x128xbf16>, vector<8x128xf32> -> vector<8x128xf32>
    %209 = arith.addf %203, %208 : vector<8x128xf32>
    %210 = arith.addf %209, %50 : vector<8x128xf32>
    %211 = arith.negf %174 : vector<8x128xf32>
    %212 = math.exp %211 : vector<8x128xf32>
    %cst_131 = arith.constant 1.000000e+00 : f32
    %213 = vector.broadcast %cst_131 : f32 to vector<8x128xf32>
    %214 = arith.addf %213, %212 : vector<8x128xf32>
    %215 = arith.divf %213, %214 : vector<8x128xf32>
    %216 = arith.negf %186 : vector<8x128xf32>
    %217 = math.exp %216 : vector<8x128xf32>
    %cst_132 = arith.constant 1.000000e+00 : f32
    %218 = vector.broadcast %cst_132 : f32 to vector<8x128xf32>
    %219 = arith.addf %218, %217 : vector<8x128xf32>
    %220 = arith.divf %218, %219 : vector<8x128xf32>
    %221 = arith.negf %198 : vector<8x128xf32>
    %222 = math.exp %221 : vector<8x128xf32>
    %cst_133 = arith.constant 1.000000e+00 : f32
    %223 = vector.broadcast %cst_133 : f32 to vector<8x128xf32>
    %224 = arith.addf %223, %222 : vector<8x128xf32>
    %225 = arith.divf %223, %224 : vector<8x128xf32>
    %226 = math.tanh %210 : vector<8x128xf32>
    %227 = arith.mulf %220, %133 : vector<8x128xf32>
    %228 = arith.mulf %215, %226 : vector<8x128xf32>
    %229 = arith.addf %227, %228 : vector<8x128xf32>
    %230 = math.tanh %229 : vector<8x128xf32>
    %231 = arith.mulf %225, %230 : vector<8x128xf32>
    %c0_134 = arith.constant 0 : index
    %c0_135 = arith.constant 0 : index
    %232 = vector.load %arg13[%c0_134, %c0_135] : memref<128x128xbf16, #tpu.memory_space<vmem>>, vector<128x128xbf16>
    %233 = arith.truncf %231 : vector<8x128xf32> to vector<8x128xbf16>
    %cst_136 = arith.constant dense<0.000000e+00> : vector<8x128xf32>
    %234 = tpu.matmul %233, %232, %cst_136 {dimension_numbers = #tpu.dot_dimension_numbers<[1], [0], [0], [1], [0, 0, 1, 1], [], []>} : vector<8x128xbf16>, vector<128x128xbf16>, vector<8x128xf32> -> vector<8x128xf32>
    %c0_137 = arith.constant 0 : index
    %c0_138 = arith.constant 0 : index
    %235 = vector.load %arg14[%c0_137, %c0_138] : memref<1x128xf32, #tpu.memory_space<vmem>>, vector<1x128xf32>
    %236 = vector.broadcast %235 : vector<1x128xf32> to vector<8x128xf32>
    %237 = arith.addf %234, %236 : vector<8x128xf32>
    %cst_139 = arith.constant dense<0xFF800000> : vector<8xf32>
    %238 = vector.multi_reduction <maximumf>, %237, %cst_139 [1] : vector<8x128xf32> to vector<8xf32>
    %239 = vector.shape_cast %238 : vector<8xf32> to vector<8x1xf32>
    %240 = vector.broadcast %239 : vector<8x1xf32> to vector<8x128xf32>
    %241 = arith.cmpf oeq, %237, %240 : vector<8x128xf32>
    %c128_i32_140 = arith.constant 128 : i32
    %242 = vector.broadcast %c128_i32_140 : i32 to vector<8x128xi32>
    %243 = arith.select %241, %51, %242 : vector<8x128xi1>, vector<8x128xi32>
    %cst_141 = arith.constant dense<2147483647> : vector<8xi32>
    %244 = vector.multi_reduction <minsi>, %243, %cst_141 [1] : vector<8x128xi32> to vector<8xi32>
    %245 = vector.shape_cast %244 : vector<8xi32> to vector<8x1xi32>
    %246 = vector.broadcast %245 : vector<8x1xi32> to vector<8x128xi32>
    %247 = arith.cmpi eq, %51, %246 : vector<8x128xi32>
    %248 = arith.extui %247 : vector<8x128xi1> to vector<8x128xi32>
    %249 = arith.sitofp %248 : vector<8x128xi32> to vector<8x128xf32>
    %250 = arith.truncf %249 : vector<8x128xf32> to vector<8x128xbf16>
    %c0_142 = arith.constant 0 : index
    %c1_143 = arith.constant 1 : index
    %251 = vector.load %arg15[%c0_142, %c1_143] : memref<8x7xi32, #tpu.memory_space<vmem>>, vector<8x1xi32>
    tpu.vector_store %arg15[%c0_142, %c1_143], %245 {strides = array<i32>} : memref<8x7xi32, #tpu.memory_space<vmem>>, vector<8x1xi32>,
    %c0_144 = arith.constant 0 : index
    %c0_145 = arith.constant 0 : index
    %252 = vector.load %arg3[%c0_144, %c0_145] : memref<128x512xbf16, #tpu.memory_space<vmem>>, vector<128x512xbf16>
    %cst_146 = arith.constant dense<0.000000e+00> : vector<8x512xf32>
    %253 = tpu.matmul %250, %252, %cst_146 {dimension_numbers = #tpu.dot_dimension_numbers<[1], [0], [0], [1], [0, 0, 1, 1], [], []>} : vector<8x128xbf16>, vector<128x512xbf16>, vector<8x512xf32> -> vector<8x512xf32>
    %254 = arith.mulf %253, %4 : vector<8x512xf32>
    %c0_147 = arith.constant 0 : index
    %c0_148 = arith.constant 0 : index
    %255 = vector.load %arg6[%c0_147, %c0_148] : memref<128x512xbf16, #tpu.memory_space<vmem>>, vector<128x512xbf16>
    %256 = arith.truncf %231 : vector<8x128xf32> to vector<8x128xbf16>
    %cst_149 = arith.constant dense<0.000000e+00> : vector<8x512xf32>
    %257 = tpu.matmul %256, %255, %cst_149 {dimension_numbers = #tpu.dot_dimension_numbers<[1], [0], [0], [1], [0, 0, 1, 1], [], []>} : vector<8x128xbf16>, vector<128x512xbf16>, vector<8x512xf32> -> vector<8x512xf32>
    %258 = arith.mulf %257, %7 : vector<8x512xf32>
    %259 = vector.extract_strided_slice %254 {offsets = [0, 0], sizes = [8, 128], strides = [1, 1]} : vector<8x512xf32> to vector<8x128xf32>
    %c0_150 = arith.constant 0 : index
    %c0_151 = arith.constant 0 : index
    %c0_152 = arith.constant 0 : index
    %260 = vector.load %arg5[%c0_150, %c0_151, %c0_152] : memref<4x128x128xbf16, #tpu.memory_space<vmem>>, vector<1x128x128xbf16>
    %261 = vector.shape_cast %260 : vector<1x128x128xbf16> to vector<128x128xbf16>
    %262 = arith.truncf %259 : vector<8x128xf32> to vector<8x128xbf16>
    %cst_153 = arith.constant dense<0.000000e+00> : vector<8x128xf32>
    %263 = tpu.matmul %262, %261, %cst_153 {dimension_numbers = #tpu.dot_dimension_numbers<[1], [0], [0], [1], [0, 0, 1, 1], [], []>} : vector<8x128xbf16>, vector<128x128xbf16>, vector<8x128xf32> -> vector<8x128xf32>
    %264 = vector.extract_strided_slice %258 {offsets = [0, 0], sizes = [8, 128], strides = [1, 1]} : vector<8x512xf32> to vector<8x128xf32>
    %c0_154 = arith.constant 0 : index
    %c0_155 = arith.constant 0 : index
    %c0_156 = arith.constant 0 : index
    %265 = vector.load %arg8[%c0_154, %c0_155, %c0_156] : memref<4x128x128xbf16, #tpu.memory_space<vmem>>, vector<1x128x128xbf16>
    %266 = vector.shape_cast %265 : vector<1x128x128xbf16> to vector<128x128xbf16>
    %267 = arith.truncf %264 : vector<8x128xf32> to vector<8x128xbf16>
    %cst_157 = arith.constant dense<0.000000e+00> : vector<8x128xf32>
    %268 = tpu.matmul %267, %266, %cst_157 {dimension_numbers = #tpu.dot_dimension_numbers<[1], [0], [0], [1], [0, 0, 1, 1], [], []>} : vector<8x128xbf16>, vector<128x128xbf16>, vector<8x128xf32> -> vector<8x128xf32>
    %269 = arith.addf %263, %268 : vector<8x128xf32>
    %270 = arith.addf %269, %23 : vector<8x128xf32>
    %271 = vector.extract_strided_slice %254 {offsets = [0, 128], sizes = [8, 128], strides = [1, 1]} : vector<8x512xf32> to vector<8x128xf32>
    %c1_158 = arith.constant 1 : index
    %c0_159 = arith.constant 0 : index
    %c0_160 = arith.constant 0 : index
    %272 = vector.load %arg5[%c1_158, %c0_159, %c0_160] : memref<4x128x128xbf16, #tpu.memory_space<vmem>>, vector<1x128x128xbf16>
    %273 = vector.shape_cast %272 : vector<1x128x128xbf16> to vector<128x128xbf16>
    %274 = arith.truncf %271 : vector<8x128xf32> to vector<8x128xbf16>
    %cst_161 = arith.constant dense<0.000000e+00> : vector<8x128xf32>
    %275 = tpu.matmul %274, %273, %cst_161 {dimension_numbers = #tpu.dot_dimension_numbers<[1], [0], [0], [1], [0, 0, 1, 1], [], []>} : vector<8x128xbf16>, vector<128x128xbf16>, vector<8x128xf32> -> vector<8x128xf32>
    %276 = vector.extract_strided_slice %258 {offsets = [0, 128], sizes = [8, 128], strides = [1, 1]} : vector<8x512xf32> to vector<8x128xf32>
    %c1_162 = arith.constant 1 : index
    %c0_163 = arith.constant 0 : index
    %c0_164 = arith.constant 0 : index
    %277 = vector.load %arg8[%c1_162, %c0_163, %c0_164] : memref<4x128x128xbf16, #tpu.memory_space<vmem>>, vector<1x128x128xbf16>
    %278 = vector.shape_cast %277 : vector<1x128x128xbf16> to vector<128x128xbf16>
    %279 = arith.truncf %276 : vector<8x128xf32> to vector<8x128xbf16>
    %cst_165 = arith.constant dense<0.000000e+00> : vector<8x128xf32>
    %280 = tpu.matmul %279, %278, %cst_165 {dimension_numbers = #tpu.dot_dimension_numbers<[1], [0], [0], [1], [0, 0, 1, 1], [], []>} : vector<8x128xbf16>, vector<128x128xbf16>, vector<8x128xf32> -> vector<8x128xf32>
    %281 = arith.addf %275, %280 : vector<8x128xf32>
    %282 = arith.addf %281, %32 : vector<8x128xf32>
    %283 = vector.extract_strided_slice %254 {offsets = [0, 256], sizes = [8, 128], strides = [1, 1]} : vector<8x512xf32> to vector<8x128xf32>
    %c2_166 = arith.constant 2 : index
    %c0_167 = arith.constant 0 : index
    %c0_168 = arith.constant 0 : index
    %284 = vector.load %arg5[%c2_166, %c0_167, %c0_168] : memref<4x128x128xbf16, #tpu.memory_space<vmem>>, vector<1x128x128xbf16>
    %285 = vector.shape_cast %284 : vector<1x128x128xbf16> to vector<128x128xbf16>
    %286 = arith.truncf %283 : vector<8x128xf32> to vector<8x128xbf16>
    %cst_169 = arith.constant dense<0.000000e+00> : vector<8x128xf32>
    %287 = tpu.matmul %286, %285, %cst_169 {dimension_numbers = #tpu.dot_dimension_numbers<[1], [0], [0], [1], [0, 0, 1, 1], [], []>} : vector<8x128xbf16>, vector<128x128xbf16>, vector<8x128xf32> -> vector<8x128xf32>
    %288 = vector.extract_strided_slice %258 {offsets = [0, 256], sizes = [8, 128], strides = [1, 1]} : vector<8x512xf32> to vector<8x128xf32>
    %c2_170 = arith.constant 2 : index
    %c0_171 = arith.constant 0 : index
    %c0_172 = arith.constant 0 : index
    %289 = vector.load %arg8[%c2_170, %c0_171, %c0_172] : memref<4x128x128xbf16, #tpu.memory_space<vmem>>, vector<1x128x128xbf16>
    %290 = vector.shape_cast %289 : vector<1x128x128xbf16> to vector<128x128xbf16>
    %291 = arith.truncf %288 : vector<8x128xf32> to vector<8x128xbf16>
    %cst_173 = arith.constant dense<0.000000e+00> : vector<8x128xf32>
    %292 = tpu.matmul %291, %290, %cst_173 {dimension_numbers = #tpu.dot_dimension_numbers<[1], [0], [0], [1], [0, 0, 1, 1], [], []>} : vector<8x128xbf16>, vector<128x128xbf16>, vector<8x128xf32> -> vector<8x128xf32>
    %293 = arith.addf %287, %292 : vector<8x128xf32>
    %294 = arith.addf %293, %41 : vector<8x128xf32>
    %295 = vector.extract_strided_slice %254 {offsets = [0, 384], sizes = [8, 128], strides = [1, 1]} : vector<8x512xf32> to vector<8x128xf32>
    %c3_174 = arith.constant 3 : index
    %c0_175 = arith.constant 0 : index
    %c0_176 = arith.constant 0 : index
    %296 = vector.load %arg5[%c3_174, %c0_175, %c0_176] : memref<4x128x128xbf16, #tpu.memory_space<vmem>>, vector<1x128x128xbf16>
    %297 = vector.shape_cast %296 : vector<1x128x128xbf16> to vector<128x128xbf16>
    %298 = arith.truncf %295 : vector<8x128xf32> to vector<8x128xbf16>
    %cst_177 = arith.constant dense<0.000000e+00> : vector<8x128xf32>
    %299 = tpu.matmul %298, %297, %cst_177 {dimension_numbers = #tpu.dot_dimension_numbers<[1], [0], [0], [1], [0, 0, 1, 1], [], []>} : vector<8x128xbf16>, vector<128x128xbf16>, vector<8x128xf32> -> vector<8x128xf32>
    %300 = vector.extract_strided_slice %258 {offsets = [0, 384], sizes = [8, 128], strides = [1, 1]} : vector<8x512xf32> to vector<8x128xf32>
    %c3_178 = arith.constant 3 : index
    %c0_179 = arith.constant 0 : index
    %c0_180 = arith.constant 0 : index
    %301 = vector.load %arg8[%c3_178, %c0_179, %c0_180] : memref<4x128x128xbf16, #tpu.memory_space<vmem>>, vector<1x128x128xbf16>
    %302 = vector.shape_cast %301 : vector<1x128x128xbf16> to vector<128x128xbf16>
    %303 = arith.truncf %300 : vector<8x128xf32> to vector<8x128xbf16>
    %cst_181 = arith.constant dense<0.000000e+00> : vector<8x128xf32>
    %304 = tpu.matmul %303, %302, %cst_181 {dimension_numbers = #tpu.dot_dimension_numbers<[1], [0], [0], [1], [0, 0, 1, 1], [], []>} : vector<8x128xbf16>, vector<128x128xbf16>, vector<8x128xf32> -> vector<8x128xf32>
    %305 = arith.addf %299, %304 : vector<8x128xf32>
    %306 = arith.addf %305, %50 : vector<8x128xf32>
    %307 = arith.negf %270 : vector<8x128xf32>
    %308 = math.exp %307 : vector<8x128xf32>
    %cst_182 = arith.constant 1.000000e+00 : f32
    %309 = vector.broadcast %cst_182 : f32 to vector<8x128xf32>
    %310 = arith.addf %309, %308 : vector<8x128xf32>
    %311 = arith.divf %309, %310 : vector<8x128xf32>
    %312 = arith.negf %282 : vector<8x128xf32>
    %313 = math.exp %312 : vector<8x128xf32>
    %cst_183 = arith.constant 1.000000e+00 : f32
    %314 = vector.broadcast %cst_183 : f32 to vector<8x128xf32>
    %315 = arith.addf %314, %313 : vector<8x128xf32>
    %316 = arith.divf %314, %315 : vector<8x128xf32>
    %317 = arith.negf %294 : vector<8x128xf32>
    %318 = math.exp %317 : vector<8x128xf32>
    %cst_184 = arith.constant 1.000000e+00 : f32
    %319 = vector.broadcast %cst_184 : f32 to vector<8x128xf32>
    %320 = arith.addf %319, %318 : vector<8x128xf32>
    %321 = arith.divf %319, %320 : vector<8x128xf32>
    %322 = math.tanh %306 : vector<8x128xf32>
    %323 = arith.mulf %316, %229 : vector<8x128xf32>
    %324 = arith.mulf %311, %322 : vector<8x128xf32>
    %325 = arith.addf %323, %324 : vector<8x128xf32>
    %326 = math.tanh %325 : vector<8x128xf32>
    %327 = arith.mulf %321, %326 : vector<8x128xf32>
    %c0_185 = arith.constant 0 : index
    %c0_186 = arith.constant 0 : index
    %328 = vector.load %arg13[%c0_185, %c0_186] : memref<128x128xbf16, #tpu.memory_space<vmem>>, vector<128x128xbf16>
    %329 = arith.truncf %327 : vector<8x128xf32> to vector<8x128xbf16>
    %cst_187 = arith.constant dense<0.000000e+00> : vector<8x128xf32>
    %330 = tpu.matmul %329, %328, %cst_187 {dimension_numbers = #tpu.dot_dimension_numbers<[1], [0], [0], [1], [0, 0, 1, 1], [], []>} : vector<8x128xbf16>, vector<128x128xbf16>, vector<8x128xf32> -> vector<8x128xf32>
    %c0_188 = arith.constant 0 : index
    %c0_189 = arith.constant 0 : index
    %331 = vector.load %arg14[%c0_188, %c0_189] : memref<1x128xf32, #tpu.memory_space<vmem>>, vector<1x128xf32>
    %332 = vector.broadcast %331 : vector<1x128xf32> to vector<8x128xf32>
    %333 = arith.addf %330, %332 : vector<8x128xf32>
    %cst_190 = arith.constant dense<0xFF800000> : vector<8xf32>
    %334 = vector.multi_reduction <maximumf>, %333, %cst_190 [1] : vector<8x128xf32> to vector<8xf32>
    %335 = vector.shape_cast %334 : vector<8xf32> to vector<8x1xf32>
    %336 = vector.broadcast %335 : vector<8x1xf32> to vector<8x128xf32>
    %337 = arith.cmpf oeq, %333, %336 : vector<8x128xf32>
    %c128_i32_191 = arith.constant 128 : i32
    %338 = vector.broadcast %c128_i32_191 : i32 to vector<8x128xi32>
    %339 = arith.select %337, %51, %338 : vector<8x128xi1>, vector<8x128xi32>
    %cst_192 = arith.constant dense<2147483647> : vector<8xi32>
    %340 = vector.multi_reduction <minsi>, %339, %cst_192 [1] : vector<8x128xi32> to vector<8xi32>
    %341 = vector.shape_cast %340 : vector<8xi32> to vector<8x1xi32>
    %342 = vector.broadcast %341 : vector<8x1xi32> to vector<8x128xi32>
    %343 = arith.cmpi eq, %51, %342 : vector<8x128xi32>
    %344 = arith.extui %343 : vector<8x128xi1> to vector<8x128xi32>
    %345 = arith.sitofp %344 : vector<8x128xi32> to vector<8x128xf32>
    %346 = arith.truncf %345 : vector<8x128xf32> to vector<8x128xbf16>
    %c0_193 = arith.constant 0 : index
    %c2_194 = arith.constant 2 : index
    %347 = vector.load %arg15[%c0_193, %c2_194] : memref<8x7xi32, #tpu.memory_space<vmem>>, vector<8x1xi32>
    tpu.vector_store %arg15[%c0_193, %c2_194], %341 {strides = array<i32>} : memref<8x7xi32, #tpu.memory_space<vmem>>, vector<8x1xi32>,
    %c0_195 = arith.constant 0 : index
    %c0_196 = arith.constant 0 : index
    %348 = vector.load %arg3[%c0_195, %c0_196] : memref<128x512xbf16, #tpu.memory_space<vmem>>, vector<128x512xbf16>
    %cst_197 = arith.constant dense<0.000000e+00> : vector<8x512xf32>
    %349 = tpu.matmul %346, %348, %cst_197 {dimension_numbers = #tpu.dot_dimension_numbers<[1], [0], [0], [1], [0, 0, 1, 1], [], []>} : vector<8x128xbf16>, vector<128x512xbf16>, vector<8x512xf32> -> vector<8x512xf32>
    %350 = arith.mulf %349, %4 : vector<8x512xf32>
    %c0_198 = arith.constant 0 : index
    %c0_199 = arith.constant 0 : index
    %351 = vector.load %arg6[%c0_198, %c0_199] : memref<128x512xbf16, #tpu.memory_space<vmem>>, vector<128x512xbf16>
    %352 = arith.truncf %327 : vector<8x128xf32> to vector<8x128xbf16>
    %cst_200 = arith.constant dense<0.000000e+00> : vector<8x512xf32>
    %353 = tpu.matmul %352, %351, %cst_200 {dimension_numbers = #tpu.dot_dimension_numbers<[1], [0], [0], [1], [0, 0, 1, 1], [], []>} : vector<8x128xbf16>, vector<128x512xbf16>, vector<8x512xf32> -> vector<8x512xf32>
    %354 = arith.mulf %353, %7 : vector<8x512xf32>
    %355 = vector.extract_strided_slice %350 {offsets = [0, 0], sizes = [8, 128], strides = [1, 1]} : vector<8x512xf32> to vector<8x128xf32>
    %c0_201 = arith.constant 0 : index
    %c0_202 = arith.constant 0 : index
    %c0_203 = arith.constant 0 : index
    %356 = vector.load %arg5[%c0_201, %c0_202, %c0_203] : memref<4x128x128xbf16, #tpu.memory_space<vmem>>, vector<1x128x128xbf16>
    %357 = vector.shape_cast %356 : vector<1x128x128xbf16> to vector<128x128xbf16>
    %358 = arith.truncf %355 : vector<8x128xf32> to vector<8x128xbf16>
    %cst_204 = arith.constant dense<0.000000e+00> : vector<8x128xf32>
    %359 = tpu.matmul %358, %357, %cst_204 {dimension_numbers = #tpu.dot_dimension_numbers<[1], [0], [0], [1], [0, 0, 1, 1], [], []>} : vector<8x128xbf16>, vector<128x128xbf16>, vector<8x128xf32> -> vector<8x128xf32>
    %360 = vector.extract_strided_slice %354 {offsets = [0, 0], sizes = [8, 128], strides = [1, 1]} : vector<8x512xf32> to vector<8x128xf32>
    %c0_205 = arith.constant 0 : index
    %c0_206 = arith.constant 0 : index
    %c0_207 = arith.constant 0 : index
    %361 = vector.load %arg8[%c0_205, %c0_206, %c0_207] : memref<4x128x128xbf16, #tpu.memory_space<vmem>>, vector<1x128x128xbf16>
    %362 = vector.shape_cast %361 : vector<1x128x128xbf16> to vector<128x128xbf16>
    %363 = arith.truncf %360 : vector<8x128xf32> to vector<8x128xbf16>
    %cst_208 = arith.constant dense<0.000000e+00> : vector<8x128xf32>
    %364 = tpu.matmul %363, %362, %cst_208 {dimension_numbers = #tpu.dot_dimension_numbers<[1], [0], [0], [1], [0, 0, 1, 1], [], []>} : vector<8x128xbf16>, vector<128x128xbf16>, vector<8x128xf32> -> vector<8x128xf32>
    %365 = arith.addf %359, %364 : vector<8x128xf32>
    %366 = arith.addf %365, %23 : vector<8x128xf32>
    %367 = vector.extract_strided_slice %350 {offsets = [0, 128], sizes = [8, 128], strides = [1, 1]} : vector<8x512xf32> to vector<8x128xf32>
    %c1_209 = arith.constant 1 : index
    %c0_210 = arith.constant 0 : index
    %c0_211 = arith.constant 0 : index
    %368 = vector.load %arg5[%c1_209, %c0_210, %c0_211] : memref<4x128x128xbf16, #tpu.memory_space<vmem>>, vector<1x128x128xbf16>
    %369 = vector.shape_cast %368 : vector<1x128x128xbf16> to vector<128x128xbf16>
    %370 = arith.truncf %367 : vector<8x128xf32> to vector<8x128xbf16>
    %cst_212 = arith.constant dense<0.000000e+00> : vector<8x128xf32>
    %371 = tpu.matmul %370, %369, %cst_212 {dimension_numbers = #tpu.dot_dimension_numbers<[1], [0], [0], [1], [0, 0, 1, 1], [], []>} : vector<8x128xbf16>, vector<128x128xbf16>, vector<8x128xf32> -> vector<8x128xf32>
    %372 = vector.extract_strided_slice %354 {offsets = [0, 128], sizes = [8, 128], strides = [1, 1]} : vector<8x512xf32> to vector<8x128xf32>
    %c1_213 = arith.constant 1 : index
    %c0_214 = arith.constant 0 : index
    %c0_215 = arith.constant 0 : index
    %373 = vector.load %arg8[%c1_213, %c0_214, %c0_215] : memref<4x128x128xbf16, #tpu.memory_space<vmem>>, vector<1x128x128xbf16>
    %374 = vector.shape_cast %373 : vector<1x128x128xbf16> to vector<128x128xbf16>
    %375 = arith.truncf %372 : vector<8x128xf32> to vector<8x128xbf16>
    %cst_216 = arith.constant dense<0.000000e+00> : vector<8x128xf32>
    %376 = tpu.matmul %375, %374, %cst_216 {dimension_numbers = #tpu.dot_dimension_numbers<[1], [0], [0], [1], [0, 0, 1, 1], [], []>} : vector<8x128xbf16>, vector<128x128xbf16>, vector<8x128xf32> -> vector<8x128xf32>
    %377 = arith.addf %371, %376 : vector<8x128xf32>
    %378 = arith.addf %377, %32 : vector<8x128xf32>
    %379 = vector.extract_strided_slice %350 {offsets = [0, 256], sizes = [8, 128], strides = [1, 1]} : vector<8x512xf32> to vector<8x128xf32>
    %c2_217 = arith.constant 2 : index
    %c0_218 = arith.constant 0 : index
    %c0_219 = arith.constant 0 : index
    %380 = vector.load %arg5[%c2_217, %c0_218, %c0_219] : memref<4x128x128xbf16, #tpu.memory_space<vmem>>, vector<1x128x128xbf16>
    %381 = vector.shape_cast %380 : vector<1x128x128xbf16> to vector<128x128xbf16>
    %382 = arith.truncf %379 : vector<8x128xf32> to vector<8x128xbf16>
    %cst_220 = arith.constant dense<0.000000e+00> : vector<8x128xf32>
    %383 = tpu.matmul %382, %381, %cst_220 {dimension_numbers = #tpu.dot_dimension_numbers<[1], [0], [0], [1], [0, 0, 1, 1], [], []>} : vector<8x128xbf16>, vector<128x128xbf16>, vector<8x128xf32> -> vector<8x128xf32>
    %384 = vector.extract_strided_slice %354 {offsets = [0, 256], sizes = [8, 128], strides = [1, 1]} : vector<8x512xf32> to vector<8x128xf32>
    %c2_221 = arith.constant 2 : index
    %c0_222 = arith.constant 0 : index
    %c0_223 = arith.constant 0 : index
    %385 = vector.load %arg8[%c2_221, %c0_222, %c0_223] : memref<4x128x128xbf16, #tpu.memory_space<vmem>>, vector<1x128x128xbf16>
    %386 = vector.shape_cast %385 : vector<1x128x128xbf16> to vector<128x128xbf16>
    %387 = arith.truncf %384 : vector<8x128xf32> to vector<8x128xbf16>
    %cst_224 = arith.constant dense<0.000000e+00> : vector<8x128xf32>
    %388 = tpu.matmul %387, %386, %cst_224 {dimension_numbers = #tpu.dot_dimension_numbers<[1], [0], [0], [1], [0, 0, 1, 1], [], []>} : vector<8x128xbf16>, vector<128x128xbf16>, vector<8x128xf32> -> vector<8x128xf32>
    %389 = arith.addf %383, %388 : vector<8x128xf32>
    %390 = arith.addf %389, %41 : vector<8x128xf32>
    %391 = vector.extract_strided_slice %350 {offsets = [0, 384], sizes = [8, 128], strides = [1, 1]} : vector<8x512xf32> to vector<8x128xf32>
    %c3_225 = arith.constant 3 : index
    %c0_226 = arith.constant 0 : index
    %c0_227 = arith.constant 0 : index
    %392 = vector.load %arg5[%c3_225, %c0_226, %c0_227] : memref<4x128x128xbf16, #tpu.memory_space<vmem>>, vector<1x128x128xbf16>
    %393 = vector.shape_cast %392 : vector<1x128x128xbf16> to vector<128x128xbf16>
    %394 = arith.truncf %391 : vector<8x128xf32> to vector<8x128xbf16>
    %cst_228 = arith.constant dense<0.000000e+00> : vector<8x128xf32>
    %395 = tpu.matmul %394, %393, %cst_228 {dimension_numbers = #tpu.dot_dimension_numbers<[1], [0], [0], [1], [0, 0, 1, 1], [], []>} : vector<8x128xbf16>, vector<128x128xbf16>, vector<8x128xf32> -> vector<8x128xf32>
    %396 = vector.extract_strided_slice %354 {offsets = [0, 384], sizes = [8, 128], strides = [1, 1]} : vector<8x512xf32> to vector<8x128xf32>
    %c3_229 = arith.constant 3 : index
    %c0_230 = arith.constant 0 : index
    %c0_231 = arith.constant 0 : index
    %397 = vector.load %arg8[%c3_229, %c0_230, %c0_231] : memref<4x128x128xbf16, #tpu.memory_space<vmem>>, vector<1x128x128xbf16>
    %398 = vector.shape_cast %397 : vector<1x128x128xbf16> to vector<128x128xbf16>
    %399 = arith.truncf %396 : vector<8x128xf32> to vector<8x128xbf16>
    %cst_232 = arith.constant dense<0.000000e+00> : vector<8x128xf32>
    %400 = tpu.matmul %399, %398, %cst_232 {dimension_numbers = #tpu.dot_dimension_numbers<[1], [0], [0], [1], [0, 0, 1, 1], [], []>} : vector<8x128xbf16>, vector<128x128xbf16>, vector<8x128xf32> -> vector<8x128xf32>
    %401 = arith.addf %395, %400 : vector<8x128xf32>
    %402 = arith.addf %401, %50 : vector<8x128xf32>
    %403 = arith.negf %366 : vector<8x128xf32>
    %404 = math.exp %403 : vector<8x128xf32>
    %cst_233 = arith.constant 1.000000e+00 : f32
    %405 = vector.broadcast %cst_233 : f32 to vector<8x128xf32>
    %406 = arith.addf %405, %404 : vector<8x128xf32>
    %407 = arith.divf %405, %406 : vector<8x128xf32>
    %408 = arith.negf %378 : vector<8x128xf32>
    %409 = math.exp %408 : vector<8x128xf32>
    %cst_234 = arith.constant 1.000000e+00 : f32
    %410 = vector.broadcast %cst_234 : f32 to vector<8x128xf32>
    %411 = arith.addf %410, %409 : vector<8x128xf32>
    %412 = arith.divf %410, %411 : vector<8x128xf32>
    %413 = arith.negf %390 : vector<8x128xf32>
    %414 = math.exp %413 : vector<8x128xf32>
    %cst_235 = arith.constant 1.000000e+00 : f32
    %415 = vector.broadcast %cst_235 : f32 to vector<8x128xf32>
    %416 = arith.addf %415, %414 : vector<8x128xf32>
    %417 = arith.divf %415, %416 : vector<8x128xf32>
    %418 = math.tanh %402 : vector<8x128xf32>
    %419 = arith.mulf %412, %325 : vector<8x128xf32>
    %420 = arith.mulf %407, %418 : vector<8x128xf32>
    %421 = arith.addf %419, %420 : vector<8x128xf32>
    %422 = math.tanh %421 : vector<8x128xf32>
    %423 = arith.mulf %417, %422 : vector<8x128xf32>
    %c0_236 = arith.constant 0 : index
    %c0_237 = arith.constant 0 : index
    %424 = vector.load %arg13[%c0_236, %c0_237] : memref<128x128xbf16, #tpu.memory_space<vmem>>, vector<128x128xbf16>
    %425 = arith.truncf %423 : vector<8x128xf32> to vector<8x128xbf16>
    %cst_238 = arith.constant dense<0.000000e+00> : vector<8x128xf32>
    %426 = tpu.matmul %425, %424, %cst_238 {dimension_numbers = #tpu.dot_dimension_numbers<[1], [0], [0], [1], [0, 0, 1, 1], [], []>} : vector<8x128xbf16>, vector<128x128xbf16>, vector<8x128xf32> -> vector<8x128xf32>
    %c0_239 = arith.constant 0 : index
    %c0_240 = arith.constant 0 : index
    %427 = vector.load %arg14[%c0_239, %c0_240] : memref<1x128xf32, #tpu.memory_space<vmem>>, vector<1x128xf32>
    %428 = vector.broadcast %427 : vector<1x128xf32> to vector<8x128xf32>
    %429 = arith.addf %426, %428 : vector<8x128xf32>
    %cst_241 = arith.constant dense<0xFF800000> : vector<8xf32>
    %430 = vector.multi_reduction <maximumf>, %429, %cst_241 [1] : vector<8x128xf32> to vector<8xf32>
    %431 = vector.shape_cast %430 : vector<8xf32> to vector<8x1xf32>
    %432 = vector.broadcast %431 : vector<8x1xf32> to vector<8x128xf32>
    %433 = arith.cmpf oeq, %429, %432 : vector<8x128xf32>
    %c128_i32_242 = arith.constant 128 : i32
    %434 = vector.broadcast %c128_i32_242 : i32 to vector<8x128xi32>
    %435 = arith.select %433, %51, %434 : vector<8x128xi1>, vector<8x128xi32>
    %cst_243 = arith.constant dense<2147483647> : vector<8xi32>
    %436 = vector.multi_reduction <minsi>, %435, %cst_243 [1] : vector<8x128xi32> to vector<8xi32>
    %437 = vector.shape_cast %436 : vector<8xi32> to vector<8x1xi32>
    %438 = vector.broadcast %437 : vector<8x1xi32> to vector<8x128xi32>
    %439 = arith.cmpi eq, %51, %438 : vector<8x128xi32>
    %440 = arith.extui %439 : vector<8x128xi1> to vector<8x128xi32>
    %441 = arith.sitofp %440 : vector<8x128xi32> to vector<8x128xf32>
    %442 = arith.truncf %441 : vector<8x128xf32> to vector<8x128xbf16>
    %c0_244 = arith.constant 0 : index
    %c3_245 = arith.constant 3 : index
    %443 = vector.load %arg15[%c0_244, %c3_245] : memref<8x7xi32, #tpu.memory_space<vmem>>, vector<8x1xi32>
    tpu.vector_store %arg15[%c0_244, %c3_245], %437 {strides = array<i32>} : memref<8x7xi32, #tpu.memory_space<vmem>>, vector<8x1xi32>,
    %c0_246 = arith.constant 0 : index
    %c0_247 = arith.constant 0 : index
    %444 = vector.load %arg3[%c0_246, %c0_247] : memref<128x512xbf16, #tpu.memory_space<vmem>>, vector<128x512xbf16>
    %cst_248 = arith.constant dense<0.000000e+00> : vector<8x512xf32>
    %445 = tpu.matmul %442, %444, %cst_248 {dimension_numbers = #tpu.dot_dimension_numbers<[1], [0], [0], [1], [0, 0, 1, 1], [], []>} : vector<8x128xbf16>, vector<128x512xbf16>, vector<8x512xf32> -> vector<8x512xf32>
    %446 = arith.mulf %445, %4 : vector<8x512xf32>
    %c0_249 = arith.constant 0 : index
    %c0_250 = arith.constant 0 : index
    %447 = vector.load %arg6[%c0_249, %c0_250] : memref<128x512xbf16, #tpu.memory_space<vmem>>, vector<128x512xbf16>
    %448 = arith.truncf %423 : vector<8x128xf32> to vector<8x128xbf16>
    %cst_251 = arith.constant dense<0.000000e+00> : vector<8x512xf32>
    %449 = tpu.matmul %448, %447, %cst_251 {dimension_numbers = #tpu.dot_dimension_numbers<[1], [0], [0], [1], [0, 0, 1, 1], [], []>} : vector<8x128xbf16>, vector<128x512xbf16>, vector<8x512xf32> -> vector<8x512xf32>
    %450 = arith.mulf %449, %7 : vector<8x512xf32>
    %451 = vector.extract_strided_slice %446 {offsets = [0, 0], sizes = [8, 128], strides = [1, 1]} : vector<8x512xf32> to vector<8x128xf32>
    %c0_252 = arith.constant 0 : index
    %c0_253 = arith.constant 0 : index
    %c0_254 = arith.constant 0 : index
    %452 = vector.load %arg5[%c0_252, %c0_253, %c0_254] : memref<4x128x128xbf16, #tpu.memory_space<vmem>>, vector<1x128x128xbf16>
    %453 = vector.shape_cast %452 : vector<1x128x128xbf16> to vector<128x128xbf16>
    %454 = arith.truncf %451 : vector<8x128xf32> to vector<8x128xbf16>
    %cst_255 = arith.constant dense<0.000000e+00> : vector<8x128xf32>
    %455 = tpu.matmul %454, %453, %cst_255 {dimension_numbers = #tpu.dot_dimension_numbers<[1], [0], [0], [1], [0, 0, 1, 1], [], []>} : vector<8x128xbf16>, vector<128x128xbf16>, vector<8x128xf32> -> vector<8x128xf32>
    %456 = vector.extract_strided_slice %450 {offsets = [0, 0], sizes = [8, 128], strides = [1, 1]} : vector<8x512xf32> to vector<8x128xf32>
    %c0_256 = arith.constant 0 : index
    %c0_257 = arith.constant 0 : index
    %c0_258 = arith.constant 0 : index
    %457 = vector.load %arg8[%c0_256, %c0_257, %c0_258] : memref<4x128x128xbf16, #tpu.memory_space<vmem>>, vector<1x128x128xbf16>
    %458 = vector.shape_cast %457 : vector<1x128x128xbf16> to vector<128x128xbf16>
    %459 = arith.truncf %456 : vector<8x128xf32> to vector<8x128xbf16>
    %cst_259 = arith.constant dense<0.000000e+00> : vector<8x128xf32>
    %460 = tpu.matmul %459, %458, %cst_259 {dimension_numbers = #tpu.dot_dimension_numbers<[1], [0], [0], [1], [0, 0, 1, 1], [], []>} : vector<8x128xbf16>, vector<128x128xbf16>, vector<8x128xf32> -> vector<8x128xf32>
    %461 = arith.addf %455, %460 : vector<8x128xf32>
    %462 = arith.addf %461, %23 : vector<8x128xf32>
    %463 = vector.extract_strided_slice %446 {offsets = [0, 128], sizes = [8, 128], strides = [1, 1]} : vector<8x512xf32> to vector<8x128xf32>
    %c1_260 = arith.constant 1 : index
    %c0_261 = arith.constant 0 : index
    %c0_262 = arith.constant 0 : index
    %464 = vector.load %arg5[%c1_260, %c0_261, %c0_262] : memref<4x128x128xbf16, #tpu.memory_space<vmem>>, vector<1x128x128xbf16>
    %465 = vector.shape_cast %464 : vector<1x128x128xbf16> to vector<128x128xbf16>
    %466 = arith.truncf %463 : vector<8x128xf32> to vector<8x128xbf16>
    %cst_263 = arith.constant dense<0.000000e+00> : vector<8x128xf32>
    %467 = tpu.matmul %466, %465, %cst_263 {dimension_numbers = #tpu.dot_dimension_numbers<[1], [0], [0], [1], [0, 0, 1, 1], [], []>} : vector<8x128xbf16>, vector<128x128xbf16>, vector<8x128xf32> -> vector<8x128xf32>
    %468 = vector.extract_strided_slice %450 {offsets = [0, 128], sizes = [8, 128], strides = [1, 1]} : vector<8x512xf32> to vector<8x128xf32>
    %c1_264 = arith.constant 1 : index
    %c0_265 = arith.constant 0 : index
    %c0_266 = arith.constant 0 : index
    %469 = vector.load %arg8[%c1_264, %c0_265, %c0_266] : memref<4x128x128xbf16, #tpu.memory_space<vmem>>, vector<1x128x128xbf16>
    %470 = vector.shape_cast %469 : vector<1x128x128xbf16> to vector<128x128xbf16>
    %471 = arith.truncf %468 : vector<8x128xf32> to vector<8x128xbf16>
    %cst_267 = arith.constant dense<0.000000e+00> : vector<8x128xf32>
    %472 = tpu.matmul %471, %470, %cst_267 {dimension_numbers = #tpu.dot_dimension_numbers<[1], [0], [0], [1], [0, 0, 1, 1], [], []>} : vector<8x128xbf16>, vector<128x128xbf16>, vector<8x128xf32> -> vector<8x128xf32>
    %473 = arith.addf %467, %472 : vector<8x128xf32>
    %474 = arith.addf %473, %32 : vector<8x128xf32>
    %475 = vector.extract_strided_slice %446 {offsets = [0, 256], sizes = [8, 128], strides = [1, 1]} : vector<8x512xf32> to vector<8x128xf32>
    %c2_268 = arith.constant 2 : index
    %c0_269 = arith.constant 0 : index
    %c0_270 = arith.constant 0 : index
    %476 = vector.load %arg5[%c2_268, %c0_269, %c0_270] : memref<4x128x128xbf16, #tpu.memory_space<vmem>>, vector<1x128x128xbf16>
    %477 = vector.shape_cast %476 : vector<1x128x128xbf16> to vector<128x128xbf16>
    %478 = arith.truncf %475 : vector<8x128xf32> to vector<8x128xbf16>
    %cst_271 = arith.constant dense<0.000000e+00> : vector<8x128xf32>
    %479 = tpu.matmul %478, %477, %cst_271 {dimension_numbers = #tpu.dot_dimension_numbers<[1], [0], [0], [1], [0, 0, 1, 1], [], []>} : vector<8x128xbf16>, vector<128x128xbf16>, vector<8x128xf32> -> vector<8x128xf32>
    %480 = vector.extract_strided_slice %450 {offsets = [0, 256], sizes = [8, 128], strides = [1, 1]} : vector<8x512xf32> to vector<8x128xf32>
    %c2_272 = arith.constant 2 : index
    %c0_273 = arith.constant 0 : index
    %c0_274 = arith.constant 0 : index
    %481 = vector.load %arg8[%c2_272, %c0_273, %c0_274] : memref<4x128x128xbf16, #tpu.memory_space<vmem>>, vector<1x128x128xbf16>
    %482 = vector.shape_cast %481 : vector<1x128x128xbf16> to vector<128x128xbf16>
    %483 = arith.truncf %480 : vector<8x128xf32> to vector<8x128xbf16>
    %cst_275 = arith.constant dense<0.000000e+00> : vector<8x128xf32>
    %484 = tpu.matmul %483, %482, %cst_275 {dimension_numbers = #tpu.dot_dimension_numbers<[1], [0], [0], [1], [0, 0, 1, 1], [], []>} : vector<8x128xbf16>, vector<128x128xbf16>, vector<8x128xf32> -> vector<8x128xf32>
    %485 = arith.addf %479, %484 : vector<8x128xf32>
    %486 = arith.addf %485, %41 : vector<8x128xf32>
    %487 = vector.extract_strided_slice %446 {offsets = [0, 384], sizes = [8, 128], strides = [1, 1]} : vector<8x512xf32> to vector<8x128xf32>
    %c3_276 = arith.constant 3 : index
    %c0_277 = arith.constant 0 : index
    %c0_278 = arith.constant 0 : index
    %488 = vector.load %arg5[%c3_276, %c0_277, %c0_278] : memref<4x128x128xbf16, #tpu.memory_space<vmem>>, vector<1x128x128xbf16>
    %489 = vector.shape_cast %488 : vector<1x128x128xbf16> to vector<128x128xbf16>
    %490 = arith.truncf %487 : vector<8x128xf32> to vector<8x128xbf16>
    %cst_279 = arith.constant dense<0.000000e+00> : vector<8x128xf32>
    %491 = tpu.matmul %490, %489, %cst_279 {dimension_numbers = #tpu.dot_dimension_numbers<[1], [0], [0], [1], [0, 0, 1, 1], [], []>} : vector<8x128xbf16>, vector<128x128xbf16>, vector<8x128xf32> -> vector<8x128xf32>
    %492 = vector.extract_strided_slice %450 {offsets = [0, 384], sizes = [8, 128], strides = [1, 1]} : vector<8x512xf32> to vector<8x128xf32>
    %c3_280 = arith.constant 3 : index
    %c0_281 = arith.constant 0 : index
    %c0_282 = arith.constant 0 : index
    %493 = vector.load %arg8[%c3_280, %c0_281, %c0_282] : memref<4x128x128xbf16, #tpu.memory_space<vmem>>, vector<1x128x128xbf16>
    %494 = vector.shape_cast %493 : vector<1x128x128xbf16> to vector<128x128xbf16>
    %495 = arith.truncf %492 : vector<8x128xf32> to vector<8x128xbf16>
    %cst_283 = arith.constant dense<0.000000e+00> : vector<8x128xf32>
    %496 = tpu.matmul %495, %494, %cst_283 {dimension_numbers = #tpu.dot_dimension_numbers<[1], [0], [0], [1], [0, 0, 1, 1], [], []>} : vector<8x128xbf16>, vector<128x128xbf16>, vector<8x128xf32> -> vector<8x128xf32>
    %497 = arith.addf %491, %496 : vector<8x128xf32>
    %498 = arith.addf %497, %50 : vector<8x128xf32>
    %499 = arith.negf %462 : vector<8x128xf32>
    %500 = math.exp %499 : vector<8x128xf32>
    %cst_284 = arith.constant 1.000000e+00 : f32
    %501 = vector.broadcast %cst_284 : f32 to vector<8x128xf32>
    %502 = arith.addf %501, %500 : vector<8x128xf32>
    %503 = arith.divf %501, %502 : vector<8x128xf32>
    %504 = arith.negf %474 : vector<8x128xf32>
    %505 = math.exp %504 : vector<8x128xf32>
    %cst_285 = arith.constant 1.000000e+00 : f32
    %506 = vector.broadcast %cst_285 : f32 to vector<8x128xf32>
    %507 = arith.addf %506, %505 : vector<8x128xf32>
    %508 = arith.divf %506, %507 : vector<8x128xf32>
    %509 = arith.negf %486 : vector<8x128xf32>
    %510 = math.exp %509 : vector<8x128xf32>
    %cst_286 = arith.constant 1.000000e+00 : f32
    %511 = vector.broadcast %cst_286 : f32 to vector<8x128xf32>
    %512 = arith.addf %511, %510 : vector<8x128xf32>
    %513 = arith.divf %511, %512 : vector<8x128xf32>
    %514 = math.tanh %498 : vector<8x128xf32>
    %515 = arith.mulf %508, %421 : vector<8x128xf32>
    %516 = arith.mulf %503, %514 : vector<8x128xf32>
    %517 = arith.addf %515, %516 : vector<8x128xf32>
    %518 = math.tanh %517 : vector<8x128xf32>
    %519 = arith.mulf %513, %518 : vector<8x128xf32>
    %c0_287 = arith.constant 0 : index
    %c0_288 = arith.constant 0 : index
    %520 = vector.load %arg13[%c0_287, %c0_288] : memref<128x128xbf16, #tpu.memory_space<vmem>>, vector<128x128xbf16>
    %521 = arith.truncf %519 : vector<8x128xf32> to vector<8x128xbf16>
    %cst_289 = arith.constant dense<0.000000e+00> : vector<8x128xf32>
    %522 = tpu.matmul %521, %520, %cst_289 {dimension_numbers = #tpu.dot_dimension_numbers<[1], [0], [0], [1], [0, 0, 1, 1], [], []>} : vector<8x128xbf16>, vector<128x128xbf16>, vector<8x128xf32> -> vector<8x128xf32>
    %c0_290 = arith.constant 0 : index
    %c0_291 = arith.constant 0 : index
    %523 = vector.load %arg14[%c0_290, %c0_291] : memref<1x128xf32, #tpu.memory_space<vmem>>, vector<1x128xf32>
    %524 = vector.broadcast %523 : vector<1x128xf32> to vector<8x128xf32>
    %525 = arith.addf %522, %524 : vector<8x128xf32>
    %cst_292 = arith.constant dense<0xFF800000> : vector<8xf32>
    %526 = vector.multi_reduction <maximumf>, %525, %cst_292 [1] : vector<8x128xf32> to vector<8xf32>
    %527 = vector.shape_cast %526 : vector<8xf32> to vector<8x1xf32>
    %528 = vector.broadcast %527 : vector<8x1xf32> to vector<8x128xf32>
    %529 = arith.cmpf oeq, %525, %528 : vector<8x128xf32>
    %c128_i32_293 = arith.constant 128 : i32
    %530 = vector.broadcast %c128_i32_293 : i32 to vector<8x128xi32>
    %531 = arith.select %529, %51, %530 : vector<8x128xi1>, vector<8x128xi32>
    %cst_294 = arith.constant dense<2147483647> : vector<8xi32>
    %532 = vector.multi_reduction <minsi>, %531, %cst_294 [1] : vector<8x128xi32> to vector<8xi32>
    %533 = vector.shape_cast %532 : vector<8xi32> to vector<8x1xi32>
    %534 = vector.broadcast %533 : vector<8x1xi32> to vector<8x128xi32>
    %535 = arith.cmpi eq, %51, %534 : vector<8x128xi32>
    %536 = arith.extui %535 : vector<8x128xi1> to vector<8x128xi32>
    %537 = arith.sitofp %536 : vector<8x128xi32> to vector<8x128xf32>
    %538 = arith.truncf %537 : vector<8x128xf32> to vector<8x128xbf16>
    %c0_295 = arith.constant 0 : index
    %c4 = arith.constant 4 : index
    %539 = vector.load %arg15[%c0_295, %c4] : memref<8x7xi32, #tpu.memory_space<vmem>>, vector<8x1xi32>
    tpu.vector_store %arg15[%c0_295, %c4], %533 {strides = array<i32>} : memref<8x7xi32, #tpu.memory_space<vmem>>, vector<8x1xi32>,
    %c0_296 = arith.constant 0 : index
    %c0_297 = arith.constant 0 : index
    %540 = vector.load %arg3[%c0_296, %c0_297] : memref<128x512xbf16, #tpu.memory_space<vmem>>, vector<128x512xbf16>
    %cst_298 = arith.constant dense<0.000000e+00> : vector<8x512xf32>
    %541 = tpu.matmul %538, %540, %cst_298 {dimension_numbers = #tpu.dot_dimension_numbers<[1], [0], [0], [1], [0, 0, 1, 1], [], []>} : vector<8x128xbf16>, vector<128x512xbf16>, vector<8x512xf32> -> vector<8x512xf32>
    %542 = arith.mulf %541, %4 : vector<8x512xf32>
    %c0_299 = arith.constant 0 : index
    %c0_300 = arith.constant 0 : index
    %543 = vector.load %arg6[%c0_299, %c0_300] : memref<128x512xbf16, #tpu.memory_space<vmem>>, vector<128x512xbf16>
    %544 = arith.truncf %519 : vector<8x128xf32> to vector<8x128xbf16>
    %cst_301 = arith.constant dense<0.000000e+00> : vector<8x512xf32>
    %545 = tpu.matmul %544, %543, %cst_301 {dimension_numbers = #tpu.dot_dimension_numbers<[1], [0], [0], [1], [0, 0, 1, 1], [], []>} : vector<8x128xbf16>, vector<128x512xbf16>, vector<8x512xf32> -> vector<8x512xf32>
    %546 = arith.mulf %545, %7 : vector<8x512xf32>
    %547 = vector.extract_strided_slice %542 {offsets = [0, 0], sizes = [8, 128], strides = [1, 1]} : vector<8x512xf32> to vector<8x128xf32>
    %c0_302 = arith.constant 0 : index
    %c0_303 = arith.constant 0 : index
    %c0_304 = arith.constant 0 : index
    %548 = vector.load %arg5[%c0_302, %c0_303, %c0_304] : memref<4x128x128xbf16, #tpu.memory_space<vmem>>, vector<1x128x128xbf16>
    %549 = vector.shape_cast %548 : vector<1x128x128xbf16> to vector<128x128xbf16>
    %550 = arith.truncf %547 : vector<8x128xf32> to vector<8x128xbf16>
    %cst_305 = arith.constant dense<0.000000e+00> : vector<8x128xf32>
    %551 = tpu.matmul %550, %549, %cst_305 {dimension_numbers = #tpu.dot_dimension_numbers<[1], [0], [0], [1], [0, 0, 1, 1], [], []>} : vector<8x128xbf16>, vector<128x128xbf16>, vector<8x128xf32> -> vector<8x128xf32>
    %552 = vector.extract_strided_slice %546 {offsets = [0, 0], sizes = [8, 128], strides = [1, 1]} : vector<8x512xf32> to vector<8x128xf32>
    %c0_306 = arith.constant 0 : index
    %c0_307 = arith.constant 0 : index
    %c0_308 = arith.constant 0 : index
    %553 = vector.load %arg8[%c0_306, %c0_307, %c0_308] : memref<4x128x128xbf16, #tpu.memory_space<vmem>>, vector<1x128x128xbf16>
    %554 = vector.shape_cast %553 : vector<1x128x128xbf16> to vector<128x128xbf16>
    %555 = arith.truncf %552 : vector<8x128xf32> to vector<8x128xbf16>
    %cst_309 = arith.constant dense<0.000000e+00> : vector<8x128xf32>
    %556 = tpu.matmul %555, %554, %cst_309 {dimension_numbers = #tpu.dot_dimension_numbers<[1], [0], [0], [1], [0, 0, 1, 1], [], []>} : vector<8x128xbf16>, vector<128x128xbf16>, vector<8x128xf32> -> vector<8x128xf32>
    %557 = arith.addf %551, %556 : vector<8x128xf32>
    %558 = arith.addf %557, %23 : vector<8x128xf32>
    %559 = vector.extract_strided_slice %542 {offsets = [0, 128], sizes = [8, 128], strides = [1, 1]} : vector<8x512xf32> to vector<8x128xf32>
    %c1_310 = arith.constant 1 : index
    %c0_311 = arith.constant 0 : index
    %c0_312 = arith.constant 0 : index
    %560 = vector.load %arg5[%c1_310, %c0_311, %c0_312] : memref<4x128x128xbf16, #tpu.memory_space<vmem>>, vector<1x128x128xbf16>
    %561 = vector.shape_cast %560 : vector<1x128x128xbf16> to vector<128x128xbf16>
    %562 = arith.truncf %559 : vector<8x128xf32> to vector<8x128xbf16>
    %cst_313 = arith.constant dense<0.000000e+00> : vector<8x128xf32>
    %563 = tpu.matmul %562, %561, %cst_313 {dimension_numbers = #tpu.dot_dimension_numbers<[1], [0], [0], [1], [0, 0, 1, 1], [], []>} : vector<8x128xbf16>, vector<128x128xbf16>, vector<8x128xf32> -> vector<8x128xf32>
    %564 = vector.extract_strided_slice %546 {offsets = [0, 128], sizes = [8, 128], strides = [1, 1]} : vector<8x512xf32> to vector<8x128xf32>
    %c1_314 = arith.constant 1 : index
    %c0_315 = arith.constant 0 : index
    %c0_316 = arith.constant 0 : index
    %565 = vector.load %arg8[%c1_314, %c0_315, %c0_316] : memref<4x128x128xbf16, #tpu.memory_space<vmem>>, vector<1x128x128xbf16>
    %566 = vector.shape_cast %565 : vector<1x128x128xbf16> to vector<128x128xbf16>
    %567 = arith.truncf %564 : vector<8x128xf32> to vector<8x128xbf16>
    %cst_317 = arith.constant dense<0.000000e+00> : vector<8x128xf32>
    %568 = tpu.matmul %567, %566, %cst_317 {dimension_numbers = #tpu.dot_dimension_numbers<[1], [0], [0], [1], [0, 0, 1, 1], [], []>} : vector<8x128xbf16>, vector<128x128xbf16>, vector<8x128xf32> -> vector<8x128xf32>
    %569 = arith.addf %563, %568 : vector<8x128xf32>
    %570 = arith.addf %569, %32 : vector<8x128xf32>
    %571 = vector.extract_strided_slice %542 {offsets = [0, 256], sizes = [8, 128], strides = [1, 1]} : vector<8x512xf32> to vector<8x128xf32>
    %c2_318 = arith.constant 2 : index
    %c0_319 = arith.constant 0 : index
    %c0_320 = arith.constant 0 : index
    %572 = vector.load %arg5[%c2_318, %c0_319, %c0_320] : memref<4x128x128xbf16, #tpu.memory_space<vmem>>, vector<1x128x128xbf16>
    %573 = vector.shape_cast %572 : vector<1x128x128xbf16> to vector<128x128xbf16>
    %574 = arith.truncf %571 : vector<8x128xf32> to vector<8x128xbf16>
    %cst_321 = arith.constant dense<0.000000e+00> : vector<8x128xf32>
    %575 = tpu.matmul %574, %573, %cst_321 {dimension_numbers = #tpu.dot_dimension_numbers<[1], [0], [0], [1], [0, 0, 1, 1], [], []>} : vector<8x128xbf16>, vector<128x128xbf16>, vector<8x128xf32> -> vector<8x128xf32>
    %576 = vector.extract_strided_slice %546 {offsets = [0, 256], sizes = [8, 128], strides = [1, 1]} : vector<8x512xf32> to vector<8x128xf32>
    %c2_322 = arith.constant 2 : index
    %c0_323 = arith.constant 0 : index
    %c0_324 = arith.constant 0 : index
    %577 = vector.load %arg8[%c2_322, %c0_323, %c0_324] : memref<4x128x128xbf16, #tpu.memory_space<vmem>>, vector<1x128x128xbf16>
    %578 = vector.shape_cast %577 : vector<1x128x128xbf16> to vector<128x128xbf16>
    %579 = arith.truncf %576 : vector<8x128xf32> to vector<8x128xbf16>
    %cst_325 = arith.constant dense<0.000000e+00> : vector<8x128xf32>
    %580 = tpu.matmul %579, %578, %cst_325 {dimension_numbers = #tpu.dot_dimension_numbers<[1], [0], [0], [1], [0, 0, 1, 1], [], []>} : vector<8x128xbf16>, vector<128x128xbf16>, vector<8x128xf32> -> vector<8x128xf32>
    %581 = arith.addf %575, %580 : vector<8x128xf32>
    %582 = arith.addf %581, %41 : vector<8x128xf32>
    %583 = vector.extract_strided_slice %542 {offsets = [0, 384], sizes = [8, 128], strides = [1, 1]} : vector<8x512xf32> to vector<8x128xf32>
    %c3_326 = arith.constant 3 : index
    %c0_327 = arith.constant 0 : index
    %c0_328 = arith.constant 0 : index
    %584 = vector.load %arg5[%c3_326, %c0_327, %c0_328] : memref<4x128x128xbf16, #tpu.memory_space<vmem>>, vector<1x128x128xbf16>
    %585 = vector.shape_cast %584 : vector<1x128x128xbf16> to vector<128x128xbf16>
    %586 = arith.truncf %583 : vector<8x128xf32> to vector<8x128xbf16>
    %cst_329 = arith.constant dense<0.000000e+00> : vector<8x128xf32>
    %587 = tpu.matmul %586, %585, %cst_329 {dimension_numbers = #tpu.dot_dimension_numbers<[1], [0], [0], [1], [0, 0, 1, 1], [], []>} : vector<8x128xbf16>, vector<128x128xbf16>, vector<8x128xf32> -> vector<8x128xf32>
    %588 = vector.extract_strided_slice %546 {offsets = [0, 384], sizes = [8, 128], strides = [1, 1]} : vector<8x512xf32> to vector<8x128xf32>
    %c3_330 = arith.constant 3 : index
    %c0_331 = arith.constant 0 : index
    %c0_332 = arith.constant 0 : index
    %589 = vector.load %arg8[%c3_330, %c0_331, %c0_332] : memref<4x128x128xbf16, #tpu.memory_space<vmem>>, vector<1x128x128xbf16>
    %590 = vector.shape_cast %589 : vector<1x128x128xbf16> to vector<128x128xbf16>
    %591 = arith.truncf %588 : vector<8x128xf32> to vector<8x128xbf16>
    %cst_333 = arith.constant dense<0.000000e+00> : vector<8x128xf32>
    %592 = tpu.matmul %591, %590, %cst_333 {dimension_numbers = #tpu.dot_dimension_numbers<[1], [0], [0], [1], [0, 0, 1, 1], [], []>} : vector<8x128xbf16>, vector<128x128xbf16>, vector<8x128xf32> -> vector<8x128xf32>
    %593 = arith.addf %587, %592 : vector<8x128xf32>
    %594 = arith.addf %593, %50 : vector<8x128xf32>
    %595 = arith.negf %558 : vector<8x128xf32>
    %596 = math.exp %595 : vector<8x128xf32>
    %cst_334 = arith.constant 1.000000e+00 : f32
    %597 = vector.broadcast %cst_334 : f32 to vector<8x128xf32>
    %598 = arith.addf %597, %596 : vector<8x128xf32>
    %599 = arith.divf %597, %598 : vector<8x128xf32>
    %600 = arith.negf %570 : vector<8x128xf32>
    %601 = math.exp %600 : vector<8x128xf32>
    %cst_335 = arith.constant 1.000000e+00 : f32
    %602 = vector.broadcast %cst_335 : f32 to vector<8x128xf32>
    %603 = arith.addf %602, %601 : vector<8x128xf32>
    %604 = arith.divf %602, %603 : vector<8x128xf32>
    %605 = arith.negf %582 : vector<8x128xf32>
    %606 = math.exp %605 : vector<8x128xf32>
    %cst_336 = arith.constant 1.000000e+00 : f32
    %607 = vector.broadcast %cst_336 : f32 to vector<8x128xf32>
    %608 = arith.addf %607, %606 : vector<8x128xf32>
    %609 = arith.divf %607, %608 : vector<8x128xf32>
    %610 = math.tanh %594 : vector<8x128xf32>
    %611 = arith.mulf %604, %517 : vector<8x128xf32>
    %612 = arith.mulf %599, %610 : vector<8x128xf32>
    %613 = arith.addf %611, %612 : vector<8x128xf32>
    %614 = math.tanh %613 : vector<8x128xf32>
    %615 = arith.mulf %609, %614 : vector<8x128xf32>
    %c0_337 = arith.constant 0 : index
    %c0_338 = arith.constant 0 : index
    %616 = vector.load %arg13[%c0_337, %c0_338] : memref<128x128xbf16, #tpu.memory_space<vmem>>, vector<128x128xbf16>
    %617 = arith.truncf %615 : vector<8x128xf32> to vector<8x128xbf16>
    %cst_339 = arith.constant dense<0.000000e+00> : vector<8x128xf32>
    %618 = tpu.matmul %617, %616, %cst_339 {dimension_numbers = #tpu.dot_dimension_numbers<[1], [0], [0], [1], [0, 0, 1, 1], [], []>} : vector<8x128xbf16>, vector<128x128xbf16>, vector<8x128xf32> -> vector<8x128xf32>
    %c0_340 = arith.constant 0 : index
    %c0_341 = arith.constant 0 : index
    %619 = vector.load %arg14[%c0_340, %c0_341] : memref<1x128xf32, #tpu.memory_space<vmem>>, vector<1x128xf32>
    %620 = vector.broadcast %619 : vector<1x128xf32> to vector<8x128xf32>
    %621 = arith.addf %618, %620 : vector<8x128xf32>
    %cst_342 = arith.constant dense<0xFF800000> : vector<8xf32>
    %622 = vector.multi_reduction <maximumf>, %621, %cst_342 [1] : vector<8x128xf32> to vector<8xf32>
    %623 = vector.shape_cast %622 : vector<8xf32> to vector<8x1xf32>
    %624 = vector.broadcast %623 : vector<8x1xf32> to vector<8x128xf32>
    %625 = arith.cmpf oeq, %621, %624 : vector<8x128xf32>
    %c128_i32_343 = arith.constant 128 : i32
    %626 = vector.broadcast %c128_i32_343 : i32 to vector<8x128xi32>
    %627 = arith.select %625, %51, %626 : vector<8x128xi1>, vector<8x128xi32>
    %cst_344 = arith.constant dense<2147483647> : vector<8xi32>
    %628 = vector.multi_reduction <minsi>, %627, %cst_344 [1] : vector<8x128xi32> to vector<8xi32>
    %629 = vector.shape_cast %628 : vector<8xi32> to vector<8x1xi32>
    %630 = vector.broadcast %629 : vector<8x1xi32> to vector<8x128xi32>
    %631 = arith.cmpi eq, %51, %630 : vector<8x128xi32>
    %632 = arith.extui %631 : vector<8x128xi1> to vector<8x128xi32>
    %633 = arith.sitofp %632 : vector<8x128xi32> to vector<8x128xf32>
    %634 = arith.truncf %633 : vector<8x128xf32> to vector<8x128xbf16>
    %c0_345 = arith.constant 0 : index
    %c5 = arith.constant 5 : index
    %635 = vector.load %arg15[%c0_345, %c5] : memref<8x7xi32, #tpu.memory_space<vmem>>, vector<8x1xi32>
    tpu.vector_store %arg15[%c0_345, %c5], %629 {strides = array<i32>} : memref<8x7xi32, #tpu.memory_space<vmem>>, vector<8x1xi32>,
    %c0_346 = arith.constant 0 : index
    %c0_347 = arith.constant 0 : index
    %636 = vector.load %arg3[%c0_346, %c0_347] : memref<128x512xbf16, #tpu.memory_space<vmem>>, vector<128x512xbf16>
    %cst_348 = arith.constant dense<0.000000e+00> : vector<8x512xf32>
    %637 = tpu.matmul %634, %636, %cst_348 {dimension_numbers = #tpu.dot_dimension_numbers<[1], [0], [0], [1], [0, 0, 1, 1], [], []>} : vector<8x128xbf16>, vector<128x512xbf16>, vector<8x512xf32> -> vector<8x512xf32>
    %638 = arith.mulf %637, %4 : vector<8x512xf32>
    %c0_349 = arith.constant 0 : index
    %c0_350 = arith.constant 0 : index
    %639 = vector.load %arg6[%c0_349, %c0_350] : memref<128x512xbf16, #tpu.memory_space<vmem>>, vector<128x512xbf16>
    %640 = arith.truncf %615 : vector<8x128xf32> to vector<8x128xbf16>
    %cst_351 = arith.constant dense<0.000000e+00> : vector<8x512xf32>
    %641 = tpu.matmul %640, %639, %cst_351 {dimension_numbers = #tpu.dot_dimension_numbers<[1], [0], [0], [1], [0, 0, 1, 1], [], []>} : vector<8x128xbf16>, vector<128x512xbf16>, vector<8x512xf32> -> vector<8x512xf32>
    %642 = arith.mulf %641, %7 : vector<8x512xf32>
    %643 = vector.extract_strided_slice %638 {offsets = [0, 0], sizes = [8, 128], strides = [1, 1]} : vector<8x512xf32> to vector<8x128xf32>
    %c0_352 = arith.constant 0 : index
    %c0_353 = arith.constant 0 : index
    %c0_354 = arith.constant 0 : index
    %644 = vector.load %arg5[%c0_352, %c0_353, %c0_354] : memref<4x128x128xbf16, #tpu.memory_space<vmem>>, vector<1x128x128xbf16>
    %645 = vector.shape_cast %644 : vector<1x128x128xbf16> to vector<128x128xbf16>
    %646 = arith.truncf %643 : vector<8x128xf32> to vector<8x128xbf16>
    %cst_355 = arith.constant dense<0.000000e+00> : vector<8x128xf32>
    %647 = tpu.matmul %646, %645, %cst_355 {dimension_numbers = #tpu.dot_dimension_numbers<[1], [0], [0], [1], [0, 0, 1, 1], [], []>} : vector<8x128xbf16>, vector<128x128xbf16>, vector<8x128xf32> -> vector<8x128xf32>
    %648 = vector.extract_strided_slice %642 {offsets = [0, 0], sizes = [8, 128], strides = [1, 1]} : vector<8x512xf32> to vector<8x128xf32>
    %c0_356 = arith.constant 0 : index
    %c0_357 = arith.constant 0 : index
    %c0_358 = arith.constant 0 : index
    %649 = vector.load %arg8[%c0_356, %c0_357, %c0_358] : memref<4x128x128xbf16, #tpu.memory_space<vmem>>, vector<1x128x128xbf16>
    %650 = vector.shape_cast %649 : vector<1x128x128xbf16> to vector<128x128xbf16>
    %651 = arith.truncf %648 : vector<8x128xf32> to vector<8x128xbf16>
    %cst_359 = arith.constant dense<0.000000e+00> : vector<8x128xf32>
    %652 = tpu.matmul %651, %650, %cst_359 {dimension_numbers = #tpu.dot_dimension_numbers<[1], [0], [0], [1], [0, 0, 1, 1], [], []>} : vector<8x128xbf16>, vector<128x128xbf16>, vector<8x128xf32> -> vector<8x128xf32>
    %653 = arith.addf %647, %652 : vector<8x128xf32>
    %654 = arith.addf %653, %23 : vector<8x128xf32>
    %655 = vector.extract_strided_slice %638 {offsets = [0, 128], sizes = [8, 128], strides = [1, 1]} : vector<8x512xf32> to vector<8x128xf32>
    %c1_360 = arith.constant 1 : index
    %c0_361 = arith.constant 0 : index
    %c0_362 = arith.constant 0 : index
    %656 = vector.load %arg5[%c1_360, %c0_361, %c0_362] : memref<4x128x128xbf16, #tpu.memory_space<vmem>>, vector<1x128x128xbf16>
    %657 = vector.shape_cast %656 : vector<1x128x128xbf16> to vector<128x128xbf16>
    %658 = arith.truncf %655 : vector<8x128xf32> to vector<8x128xbf16>
    %cst_363 = arith.constant dense<0.000000e+00> : vector<8x128xf32>
    %659 = tpu.matmul %658, %657, %cst_363 {dimension_numbers = #tpu.dot_dimension_numbers<[1], [0], [0], [1], [0, 0, 1, 1], [], []>} : vector<8x128xbf16>, vector<128x128xbf16>, vector<8x128xf32> -> vector<8x128xf32>
    %660 = vector.extract_strided_slice %642 {offsets = [0, 128], sizes = [8, 128], strides = [1, 1]} : vector<8x512xf32> to vector<8x128xf32>
    %c1_364 = arith.constant 1 : index
    %c0_365 = arith.constant 0 : index
    %c0_366 = arith.constant 0 : index
    %661 = vector.load %arg8[%c1_364, %c0_365, %c0_366] : memref<4x128x128xbf16, #tpu.memory_space<vmem>>, vector<1x128x128xbf16>
    %662 = vector.shape_cast %661 : vector<1x128x128xbf16> to vector<128x128xbf16>
    %663 = arith.truncf %660 : vector<8x128xf32> to vector<8x128xbf16>
    %cst_367 = arith.constant dense<0.000000e+00> : vector<8x128xf32>
    %664 = tpu.matmul %663, %662, %cst_367 {dimension_numbers = #tpu.dot_dimension_numbers<[1], [0], [0], [1], [0, 0, 1, 1], [], []>} : vector<8x128xbf16>, vector<128x128xbf16>, vector<8x128xf32> -> vector<8x128xf32>
    %665 = arith.addf %659, %664 : vector<8x128xf32>
    %666 = arith.addf %665, %32 : vector<8x128xf32>
    %667 = vector.extract_strided_slice %638 {offsets = [0, 256], sizes = [8, 128], strides = [1, 1]} : vector<8x512xf32> to vector<8x128xf32>
    %c2_368 = arith.constant 2 : index
    %c0_369 = arith.constant 0 : index
    %c0_370 = arith.constant 0 : index
    %668 = vector.load %arg5[%c2_368, %c0_369, %c0_370] : memref<4x128x128xbf16, #tpu.memory_space<vmem>>, vector<1x128x128xbf16>
    %669 = vector.shape_cast %668 : vector<1x128x128xbf16> to vector<128x128xbf16>
    %670 = arith.truncf %667 : vector<8x128xf32> to vector<8x128xbf16>
    %cst_371 = arith.constant dense<0.000000e+00> : vector<8x128xf32>
    %671 = tpu.matmul %670, %669, %cst_371 {dimension_numbers = #tpu.dot_dimension_numbers<[1], [0], [0], [1], [0, 0, 1, 1], [], []>} : vector<8x128xbf16>, vector<128x128xbf16>, vector<8x128xf32> -> vector<8x128xf32>
    %672 = vector.extract_strided_slice %642 {offsets = [0, 256], sizes = [8, 128], strides = [1, 1]} : vector<8x512xf32> to vector<8x128xf32>
    %c2_372 = arith.constant 2 : index
    %c0_373 = arith.constant 0 : index
    %c0_374 = arith.constant 0 : index
    %673 = vector.load %arg8[%c2_372, %c0_373, %c0_374] : memref<4x128x128xbf16, #tpu.memory_space<vmem>>, vector<1x128x128xbf16>
    %674 = vector.shape_cast %673 : vector<1x128x128xbf16> to vector<128x128xbf16>
    %675 = arith.truncf %672 : vector<8x128xf32> to vector<8x128xbf16>
    %cst_375 = arith.constant dense<0.000000e+00> : vector<8x128xf32>
    %676 = tpu.matmul %675, %674, %cst_375 {dimension_numbers = #tpu.dot_dimension_numbers<[1], [0], [0], [1], [0, 0, 1, 1], [], []>} : vector<8x128xbf16>, vector<128x128xbf16>, vector<8x128xf32> -> vector<8x128xf32>
    %677 = arith.addf %671, %676 : vector<8x128xf32>
    %678 = arith.addf %677, %41 : vector<8x128xf32>
    %679 = vector.extract_strided_slice %638 {offsets = [0, 384], sizes = [8, 128], strides = [1, 1]} : vector<8x512xf32> to vector<8x128xf32>
    %c3_376 = arith.constant 3 : index
    %c0_377 = arith.constant 0 : index
    %c0_378 = arith.constant 0 : index
    %680 = vector.load %arg5[%c3_376, %c0_377, %c0_378] : memref<4x128x128xbf16, #tpu.memory_space<vmem>>, vector<1x128x128xbf16>
    %681 = vector.shape_cast %680 : vector<1x128x128xbf16> to vector<128x128xbf16>
    %682 = arith.truncf %679 : vector<8x128xf32> to vector<8x128xbf16>
    %cst_379 = arith.constant dense<0.000000e+00> : vector<8x128xf32>
    %683 = tpu.matmul %682, %681, %cst_379 {dimension_numbers = #tpu.dot_dimension_numbers<[1], [0], [0], [1], [0, 0, 1, 1], [], []>} : vector<8x128xbf16>, vector<128x128xbf16>, vector<8x128xf32> -> vector<8x128xf32>
    %684 = vector.extract_strided_slice %642 {offsets = [0, 384], sizes = [8, 128], strides = [1, 1]} : vector<8x512xf32> to vector<8x128xf32>
    %c3_380 = arith.constant 3 : index
    %c0_381 = arith.constant 0 : index
    %c0_382 = arith.constant 0 : index
    %685 = vector.load %arg8[%c3_380, %c0_381, %c0_382] : memref<4x128x128xbf16, #tpu.memory_space<vmem>>, vector<1x128x128xbf16>
    %686 = vector.shape_cast %685 : vector<1x128x128xbf16> to vector<128x128xbf16>
    %687 = arith.truncf %684 : vector<8x128xf32> to vector<8x128xbf16>
    %cst_383 = arith.constant dense<0.000000e+00> : vector<8x128xf32>
    %688 = tpu.matmul %687, %686, %cst_383 {dimension_numbers = #tpu.dot_dimension_numbers<[1], [0], [0], [1], [0, 0, 1, 1], [], []>} : vector<8x128xbf16>, vector<128x128xbf16>, vector<8x128xf32> -> vector<8x128xf32>
    %689 = arith.addf %683, %688 : vector<8x128xf32>
    %690 = arith.addf %689, %50 : vector<8x128xf32>
    %691 = arith.negf %654 : vector<8x128xf32>
    %692 = math.exp %691 : vector<8x128xf32>
    %cst_384 = arith.constant 1.000000e+00 : f32
    %693 = vector.broadcast %cst_384 : f32 to vector<8x128xf32>
    %694 = arith.addf %693, %692 : vector<8x128xf32>
    %695 = arith.divf %693, %694 : vector<8x128xf32>
    %696 = arith.negf %666 : vector<8x128xf32>
    %697 = math.exp %696 : vector<8x128xf32>
    %cst_385 = arith.constant 1.000000e+00 : f32
    %698 = vector.broadcast %cst_385 : f32 to vector<8x128xf32>
    %699 = arith.addf %698, %697 : vector<8x128xf32>
    %700 = arith.divf %698, %699 : vector<8x128xf32>
    %701 = arith.negf %678 : vector<8x128xf32>
    %702 = math.exp %701 : vector<8x128xf32>
    %cst_386 = arith.constant 1.000000e+00 : f32
    %703 = vector.broadcast %cst_386 : f32 to vector<8x128xf32>
    %704 = arith.addf %703, %702 : vector<8x128xf32>
    %705 = arith.divf %703, %704 : vector<8x128xf32>
    %706 = math.tanh %690 : vector<8x128xf32>
    %707 = arith.mulf %700, %613 : vector<8x128xf32>
    %708 = arith.mulf %695, %706 : vector<8x128xf32>
    %709 = arith.addf %707, %708 : vector<8x128xf32>
    %710 = math.tanh %709 : vector<8x128xf32>
    %711 = arith.mulf %705, %710 : vector<8x128xf32>
    %c0_387 = arith.constant 0 : index
    %c0_388 = arith.constant 0 : index
    %712 = vector.load %arg13[%c0_387, %c0_388] : memref<128x128xbf16, #tpu.memory_space<vmem>>, vector<128x128xbf16>
    %713 = arith.truncf %711 : vector<8x128xf32> to vector<8x128xbf16>
    %cst_389 = arith.constant dense<0.000000e+00> : vector<8x128xf32>
    %714 = tpu.matmul %713, %712, %cst_389 {dimension_numbers = #tpu.dot_dimension_numbers<[1], [0], [0], [1], [0, 0, 1, 1], [], []>} : vector<8x128xbf16>, vector<128x128xbf16>, vector<8x128xf32> -> vector<8x128xf32>
    %c0_390 = arith.constant 0 : index
    %c0_391 = arith.constant 0 : index
    %715 = vector.load %arg14[%c0_390, %c0_391] : memref<1x128xf32, #tpu.memory_space<vmem>>, vector<1x128xf32>
    %716 = vector.broadcast %715 : vector<1x128xf32> to vector<8x128xf32>
    %717 = arith.addf %714, %716 : vector<8x128xf32>
    %cst_392 = arith.constant dense<0xFF800000> : vector<8xf32>
    %718 = vector.multi_reduction <maximumf>, %717, %cst_392 [1] : vector<8x128xf32> to vector<8xf32>
    %719 = vector.shape_cast %718 : vector<8xf32> to vector<8x1xf32>
    %720 = vector.broadcast %719 : vector<8x1xf32> to vector<8x128xf32>
    %721 = arith.cmpf oeq, %717, %720 : vector<8x128xf32>
    %c128_i32_393 = arith.constant 128 : i32
    %722 = vector.broadcast %c128_i32_393 : i32 to vector<8x128xi32>
    %723 = arith.select %721, %51, %722 : vector<8x128xi1>, vector<8x128xi32>
    %cst_394 = arith.constant dense<2147483647> : vector<8xi32>
    %724 = vector.multi_reduction <minsi>, %723, %cst_394 [1] : vector<8x128xi32> to vector<8xi32>
    %725 = vector.shape_cast %724 : vector<8xi32> to vector<8x1xi32>
    %c0_395 = arith.constant 0 : index
    %c6 = arith.constant 6 : index
    %726 = vector.load %arg15[%c0_395, %c6] : memref<8x7xi32, #tpu.memory_space<vmem>>, vector<8x1xi32>
    tpu.vector_store %arg15[%c0_395, %c6], %725 {strides = array<i32>} : memref<8x7xi32, #tpu.memory_space<vmem>>, vector<8x1xi32>,
    return
  }
}

</mosaic_0001>

<bundles_post_ra>
// kernel: tpu_custom_call.1
= control target key start
LH: loop header
LB: loop body
LE: loop exit
PB: predicated region body
PF: predicated region fallthrough
CT: control target
= control target key end

     0   :  { %20 = vsyncpa [#allocation3], 0  ;;  %s19158_s0 = inlined_call_operand.hbm [shape: s32[8,8], index: 0, kind: input, shape index: {}]   ;;  %s19159_s1 = inlined_call_operand.hbm [shape: f32[8,128], index: 1, kind: input, shape index: {}]   ;;  %s19160_s2 = inlined_call_operand.hbm [shape: f32[8,128], index: 2, kind: input, shape index: {}]   ;;  %s19161_s3 = inlined_call_operand.hbm [shape: bf16[128,512], index: 3, kind: input, shape index: {}]   ;;  %s19162_s4 = inlined_call_operand.hbm [shape: bf16[128,512], index: 4, kind: input, shape index: {}]   ;;  %s19163_s5 = inlined_call_operand.hbm [shape: bf16[4,128,128], index: 5, kind: input, shape index: {}]   ;;  %s19164_s6 = inlined_call_operand.hbm [shape: bf16[128,512], index: 6, kind: input, shape index: {}]   ;;  %s19165_s7 = inlined_call_operand.hbm [shape: bf16[128,512], index: 7, kind: input, shape index: {}]   ;;  %s19166_s8 = inlined_call_operand.hbm [shape: bf16[4,128,128], index: 8, kind: input, shape index: {}]   ;;  %s19167_s9 = inlined_call_operand.hbm [shape: bf16[128,512], index: 9, kind: input, shape index: {}]   ;;  %s19168_s10 = inlined_call_operand.hbm [shape: bf16[128,512], index: 10, kind: input, shape index: {}]   ;;  %s19169_s11 = inlined_call_operand.hbm [shape: bf16[4,128,128], index: 11, kind: input, shape index: {}]   ;;  %s19170_s12 = inlined_call_operand.vmem [shape: f32[4,1,128], index: 12, kind: input, shape index: {}]   ;;  %s19171_s13 = inlined_call_operand.hbm [shape: bf16[128,128], index: 13, kind: input, shape index: {}]   ;;  %s19172_s14 = inlined_call_operand.vmem [shape: f32[1,128], index: 14, kind: input, shape index: {}]   ;;  %s19173_s15 = inlined_call_operand.hbm [shape: s32[8,7], index: 15, kind: output, shape index: {}]  }
   0x1   :  { %21 = vsyncpa [#allocation6], 0 }
   0x2   :  { %22 = vsyncpa [#allocation9], 0 }
   0x3   :  { %23 = vsyncpa [#allocation12], 0 }
   0x4   :  { %24 = vsyncpa [#allocation15], 0 }
   0x5   :  { %25 = vsyncpa [#allocation18], 0 }
   0x6   :  { %26 = vsyncpa [#allocation21], 0 }
   0x7   :  { %27 = vsyncpa [#allocation4], 0  ;;  %s17717_s18 = smov [#allocation5]   ;;  %s17718_s20 = smov [#allocation8]  }
   0x8   :  { %s44_s19 = sshll.u32 %s17717_s18, 4  ;;  %s63_s21 = sshll.u32 %s17718_s20, 4  ;;  %s45_s19 = int_to_ptr.vmem [resolvable:$true] %s44_s19  ;;  %s17819_s21 = int_to_ptr.vmem [resolvable:$true] %s63_s21 }
   0x9   :  { %s17393_s24 = scalar_lea.hbm %s19159_s1, 128 }
   0xa   :  { %p17394_p0 = scmp.ne.s32.totalorder %s19159_s1, %s17393_s24  ;;  %p17397_p1 = scmp.lt.u32.totalorder %s17393_s24, %s19159_s1 }
   0xc   :  { %p17399_p2 = pnand %p17397_p1, %p17394_p0 }
   0xe   :  { %17402 = shalt.err (!%p17399_p2)
}
   0xf   :  { %s17403_s29 = scalar_lea.vmem %s45_s19, 128  ;;  %p17408_p4 = scmp.lt.s32.totalorder %s45_s19, %s45_s19 }
  0x10   :  { %p17404_p3 = scmp.ne.s32.totalorder %s45_s19, %s17403_s29  ;;  %p17409_p5 = scmp.lt.s32.totalorder %s17403_s29, %s17403_s29 }
  0x12   :  { %p17410_p6 = por %p17409_p5, %p17408_p4 }
  0x14   :  { %p17411_p7 = pnand %p17410_p6, %p17404_p3 }
  0x16   :  { %17414 = shalt.err (!%p17411_p7)
}
  0x17   :  { %47 = dma.hbm_to_vmem [thread:$0]  %s19159_s1, 128, %s45_s19, [#allocation6]  }
  0x18   :  { %s17415_s20 = scalar_lea.hbm %s19161_s3, 4096 }
  0x19   :  { %p17416_p8 = scmp.ne.s32.totalorder %s19161_s3, %s17415_s20  ;;  %p17419_p9 = scmp.lt.u32.totalorder %s17415_s20, %s19161_s3 }
  0x1b   :  { %p17421_p10 = pnand %p17419_p9, %p17416_p8 }
  0x1d   :  { %17424 = shalt.err (!%p17421_p10)
}
  0x1e   :  { %s17425_s26 = scalar_lea.vmem %s17819_s21, 4096  ;;  %p17430_p12 = scmp.lt.s32.totalorder %s17819_s21, %s17819_s21 }
  0x1f   :  { %p17426_p11 = scmp.ne.s32.totalorder %s17819_s21, %s17425_s26  ;;  %p17431_p13 = scmp.lt.s32.totalorder %s17425_s26, %s17425_s26 }
  0x21   :  { %p17432_p0 = por %p17431_p13, %p17430_p12 }
  0x23   :  { %p17433_p1 = pnand %p17432_p0, %p17426_p11 }
  0x25   :  { %17436 = shalt.err (!%p17433_p1)
}
  0x26   :  { %s19174_s1 = smov 256   ;;  %s17720_s19 = smov 16  }
  0x27   :  { %69 = dma.hbm_to_vmem [thread:$0]  %s19161_s3, 4096, %s17819_s21, [#allocation9], %s19174_s1, %s19174_s1, %s17720_s19  }
  0x28   :  { %s17721_s29 = smov [#allocation11]   ;;  %s17437_s18 = scalar_lea.hbm %s19163_s5, 4096 }
  0x29   :  { %s87_s30 = sshll.u32 %s17721_s29, 4  ;;  %p17438_p2 = scmp.ne.s32.totalorder %s19163_s5, %s17437_s18  ;;  %s88_s30 = int_to_ptr.vmem [resolvable:$true] %s87_s30 }
  0x2a   :  { %p17441_p3 = scmp.lt.u32.totalorder %s17437_s18, %s19163_s5 }
  0x2c   :  { %p17443_p4 = pnand %p17441_p3, %p17438_p2 }
  0x2e   :  { %17446 = shalt.err (!%p17443_p4)
}
  0x2f   :  { %s17447_s25 = scalar_lea.vmem %s88_s30, 4096  ;;  %p17452_p6 = scmp.lt.s32.totalorder %s88_s30, %s88_s30 }
  0x30   :  { %p17448_p5 = scmp.ne.s32.totalorder %s88_s30, %s17447_s25  ;;  %p17453_p7 = scmp.lt.s32.totalorder %s17447_s25, %s17447_s25 }
  0x32   :  { %p17454_p8 = por %p17453_p7, %p17452_p6 }
  0x34   :  { %p17455_p9 = pnand %p17454_p8, %p17448_p5 }
  0x36   :  { %17458 = shalt.err (!%p17455_p9)
}
  0x37   :  { %s17722_s3 = smov 64   ;;  %s17723_s21 = smov 4  }
  0x38   :  { %93 = dma.hbm_to_vmem [thread:$0]  %s19163_s5, 4096, %s88_s30, [#allocation12], %s17722_s3, %s17722_s3, %s17723_s21  }
  0x39   :  { %s17724_s28 = smov [#allocation14]   ;;  %s17725_s16 = smov [#allocation17]  }
  0x3a   :  { %s111_s29 = sshll.u32 %s17724_s28, 4  ;;  %s135_s17 = sshll.u32 %s17725_s16, 4  ;;  %s112_s29 = int_to_ptr.vmem [resolvable:$true] %s111_s29  ;;  %s136_s17 = int_to_ptr.vmem [resolvable:$true] %s135_s17 }
  0x3b   :  { %s17459_s22 = scalar_lea.hbm %s19165_s7, 4096 }
  0x3c   :  { %p17460_p10 = scmp.ne.s32.totalorder %s19165_s7, %s17459_s22  ;;  %p17463_p11 = scmp.lt.u32.totalorder %s17459_s22, %s19165_s7 }
  0x3e   :  { %p17465_p12 = pnand %p17463_p11, %p17460_p10 }
  0x40   :  { %17468 = shalt.err (!%p17465_p12)
}
  0x41   :  { %s17469_s5 = scalar_lea.vmem %s112_s29, 4096  ;;  %p17474_p0 = scmp.lt.s32.totalorder %s112_s29, %s112_s29 }
  0x42   :  { %p17470_p13 = scmp.ne.s32.totalorder %s112_s29, %s17469_s5  ;;  %p17475_p1 = scmp.lt.s32.totalorder %s17469_s5, %s17469_s5 }
  0x44   :  { %p17476_p2 = por %p17475_p1, %p17474_p0 }
  0x46   :  { %p17477_p3 = pnand %p17476_p2, %p17470_p13 }
  0x48   :  { %17480 = shalt.err (!%p17477_p3)
}
  0x49   :  { %s19176_s30 = smov 256   ;;  %s17481_s16 = scalar_lea.hbm %s19167_s9, 4096 }
  0x4a   :  { %117 = dma.hbm_to_vmem [thread:$0]  %s19165_s7, 4096, %s112_s29, [#allocation15], %s19176_s30, %s19176_s30, %s17720_s19  }
  0x4b   :  { %p17482_p4 = scmp.ne.s32.totalorder %s19167_s9, %s17481_s16  ;;  %p17485_p5 = scmp.lt.u32.totalorder %s17481_s16, %s19167_s9 }
  0x4d   :  { %p17487_p6 = pnand %p17485_p5, %p17482_p4 }
  0x4f   :  { %17490 = shalt.err (!%p17487_p6)
}
  0x50   :  { %s17491_s24 = scalar_lea.vmem %s136_s17, 4096  ;;  %p17496_p8 = scmp.lt.s32.totalorder %s136_s17, %s136_s17 }
  0x51   :  { %p17492_p7 = scmp.ne.s32.totalorder %s136_s17, %s17491_s24  ;;  %p17497_p9 = scmp.lt.s32.totalorder %s17491_s24, %s17491_s24 }
  0x53   :  { %p17498_p10 = por %p17497_p9, %p17496_p8 }
  0x55   :  { %p17499_p11 = pnand %p17498_p10, %p17492_p7 }
  0x57   :  { %17502 = shalt.err (!%p17499_p11)
}
  0x58   :  { %141 = dma.hbm_to_vmem [thread:$0]  %s19167_s9, 4096, %s136_s17, [#allocation18], %s19176_s30, %s19176_s30, %s17720_s19  }
  0x59   :  { %s17726_s25 = smov [#allocation20]   ;;  %s17727_s26 = smov [#allocation2]  }
  0x5a   :  { %s159_s5 = sshll.u32 %s17726_s25, 4  ;;  %s34_s27 = sshll.u32 %s17727_s26, 4  ;;  %s160_s5 = int_to_ptr.vmem [resolvable:$true] %s159_s5  ;;  %s35_s27 = int_to_ptr.vmem [resolvable:$true] %s34_s27 }
  0x5b   :  { %s17503_s16 = scalar_lea.hbm %s19169_s11, 4096 }
  0x5c   :  { %p17504_p12 = scmp.ne.s32.totalorder %s19169_s11, %s17503_s16  ;;  %p17507_p13 = scmp.lt.u32.totalorder %s17503_s16, %s19169_s11 }
  0x5e   :  { %p17509_p0 = pnand %p17507_p13, %p17504_p12 }
  0x60   :  { %17512 = shalt.err (!%p17509_p0)
}
  0x61   :  { %s17513_s9 = scalar_lea.vmem %s160_s5, 4096  ;;  %p17518_p2 = scmp.lt.s32.totalorder %s160_s5, %s160_s5 }
  0x62   :  { %p17514_p1 = scmp.ne.s32.totalorder %s160_s5, %s17513_s9  ;;  %p17519_p3 = scmp.lt.s32.totalorder %s17513_s9, %s17513_s9 }
  0x64   :  { %p17520_p4 = por %p17519_p3, %p17518_p2 }
  0x66   :  { %p17521_p5 = pnand %p17520_p4, %p17514_p1 }
  0x68   :  { %17524 = shalt.err (!%p17521_p5)
}
  0x69   :  { %165 = dma.hbm_to_vmem [thread:$0]  %s19169_s11, 4096, %s160_s5, [#allocation21], %s17722_s3, %s17722_s3, %s17723_s21  }
  0x6a   :  { %s17525_s25 = scalar_lea.hbm %s19158_s0, 128 }
  0x6b   :  { %p17526_p6 = scmp.ne.s32.totalorder %s19158_s0, %s17525_s25  ;;  %p17529_p7 = scmp.lt.u32.totalorder %s17525_s25, %s19158_s0 }
  0x6d   :  { %p17531_p8 = pnand %p17529_p7, %p17526_p6 }
  0x6f   :  { %17534 = shalt.err (!%p17531_p8)
}
  0x70   :  { %s17535_s18 = scalar_lea.vmem %s35_s27, 128  ;;  %p17540_p10 = scmp.lt.s32.totalorder %s35_s27, %s35_s27 }
  0x71   :  { %p17536_p9 = scmp.ne.s32.totalorder %s35_s27, %s17535_s18  ;;  %p17541_p11 = scmp.lt.s32.totalorder %s17535_s18, %s17535_s18 }
  0x73   :  { %p17542_p12 = por %p17541_p11, %p17540_p10 }
  0x75   :  { %p17543_p13 = pnand %p17542_p12, %p17536_p9 }
  0x77   :  { %17546 = shalt.err (!%p17543_p13)
}
  0x78   :  { %37 = dma.hbm_to_vmem [thread:$0]  %s19158_s0, 128, %s35_s27, [#allocation3]  }
  0x79   :  { %s17728_s20 = smov [#allocation7]   ;;  %s17729_s23 = smov [#allocation10]  }
  0x7a   :  { %s54_s22 = sshll.u32 %s17728_s20, 4  ;;  %s75_s9 = sshll.u32 %s17729_s23, 4  ;;  %s55_s22 = int_to_ptr.vmem [resolvable:$true] %s54_s22  ;;  %s76_s9 = int_to_ptr.vmem [resolvable:$true] %s75_s9 }
  0x7b   :  { %s17547_s7 = scalar_lea.hbm %s19160_s2, 128 }
  0x7c   :  { %p17548_p0 = scmp.ne.s32.totalorder %s19160_s2, %s17547_s7  ;;  %p17551_p1 = scmp.lt.u32.totalorder %s17547_s7, %s19160_s2 }
  0x7e   :  { %p17553_p2 = pnand %p17551_p1, %p17548_p0 }
  0x80   :  { %17556 = shalt.err (!%p17553_p2)
}
  0x81   :  { %s17557_s0 = scalar_lea.vmem %s55_s22, 128  ;;  %p17562_p4 = scmp.lt.s32.totalorder %s55_s22, %s55_s22 }
  0x82   :  { %p17558_p3 = scmp.ne.s32.totalorder %s55_s22, %s17557_s0  ;;  %p17563_p5 = scmp.lt.s32.totalorder %s17557_s0, %s17557_s0 }
  0x84   :  { %p17564_p6 = por %p17563_p5, %p17562_p4 }
  0x86   :  { %p17565_p7 = pnand %p17564_p6, %p17558_p3 }
  0x88   :  { %17568 = shalt.err (!%p17565_p7)
}
  0x89   :  { %57 = dma.hbm_to_vmem [thread:$0]  %s19160_s2, 128, %s55_s22, [#allocation6]  }
  0x8a   :  { %s17569_s11 = scalar_lea.hbm %s19162_s4, 4096 }
  0x8b   :  { %p17570_p8 = scmp.ne.s32.totalorder %s19162_s4, %s17569_s11  ;;  %p17573_p9 = scmp.lt.u32.totalorder %s17569_s11, %s19162_s4 }
  0x8d   :  { %p17575_p10 = pnand %p17573_p9, %p17570_p8 }
  0x8f   :  { %17578 = shalt.err (!%p17575_p10)
}
  0x90   :  { %s17579_s24 = scalar_lea.vmem %s76_s9, 4096  ;;  %p17584_p12 = scmp.lt.s32.totalorder %s76_s9, %s76_s9 }
  0x91   :  { %p17580_p11 = scmp.ne.s32.totalorder %s76_s9, %s17579_s24  ;;  %p17585_p13 = scmp.lt.s32.totalorder %s17579_s24, %s17579_s24 }
  0x93   :  { %p17586_p0 = por %p17585_p13, %p17584_p12 }
  0x95   :  { %p17587_p1 = pnand %p17586_p0, %p17580_p11 }
  0x97   :  { %17590 = shalt.err (!%p17587_p1)
}
  0x98   :  { %81 = dma.hbm_to_vmem [thread:$0]  %s19162_s4, 4096, %s76_s9, [#allocation9], %s19176_s30, %s19176_s30, %s17720_s19  }
  0x99   :  { %s17730_s7 = smov [#allocation13]   ;;  %s17731_s25 = smov [#allocation16]  }
  0x9a   :  { %s99_s29 = sshll.u32 %s17730_s7, 4  ;;  %s123_s26 = sshll.u32 %s17731_s25, 4  ;;  %s100_s29 = int_to_ptr.vmem [resolvable:$true] %s99_s29  ;;  %s124_s26 = int_to_ptr.vmem [resolvable:$true] %s123_s26 }
  0x9b   :  { %s17591_s27 = scalar_lea.hbm %s19164_s6, 4096 }
  0x9c   :  { %p17592_p2 = scmp.ne.s32.totalorder %s19164_s6, %s17591_s27  ;;  %p17595_p3 = scmp.lt.u32.totalorder %s17591_s27, %s19164_s6 }
  0x9e   :  { %p17597_p4 = pnand %p17595_p3, %p17592_p2 }
  0xa0   :  { %17600 = shalt.err (!%p17597_p4)
}
  0xa1   :  { %s17601_s4 = scalar_lea.vmem %s100_s29, 4096  ;;  %p17606_p6 = scmp.lt.s32.totalorder %s100_s29, %s100_s29 }
  0xa2   :  { %p17602_p5 = scmp.ne.s32.totalorder %s100_s29, %s17601_s4  ;;  %p17607_p7 = scmp.lt.s32.totalorder %s17601_s4, %s17601_s4 }
  0xa4   :  { %p17608_p8 = por %p17607_p7, %p17606_p6 }
  0xa6   :  { %p17609_p9 = pnand %p17608_p8, %p17602_p5 }
  0xa8   :  { %17612 = shalt.err (!%p17609_p9)
}
  0xa9   :  { %105 = dma.hbm_to_vmem [thread:$0]  %s19164_s6, 4096, %s100_s29, [#allocation12], %s19176_s30, %s19176_s30, %s17720_s19  }
  0xaa   :  { %s17613_s17 = scalar_lea.hbm %s19166_s8, 4096 }
  0xab   :  { %p17614_p10 = scmp.ne.s32.totalorder %s19166_s8, %s17613_s17  ;;  %p17617_p11 = scmp.lt.u32.totalorder %s17613_s17, %s19166_s8 }
  0xad   :  { %p17619_p12 = pnand %p17617_p11, %p17614_p10 }
  0xaf   :  { %17622 = shalt.err (!%p17619_p12)
}
  0xb0   :  { %s17623_s25 = scalar_lea.vmem %s124_s26, 4096  ;;  %p17628_p0 = scmp.lt.s32.totalorder %s124_s26, %s124_s26 }
  0xb1   :  { %p17624_p13 = scmp.ne.s32.totalorder %s124_s26, %s17623_s25  ;;  %p17629_p1 = scmp.lt.s32.totalorder %s17623_s25, %s17623_s25 }
  0xb3   :  { %p17630_p2 = por %p17629_p1, %p17628_p0 }
  0xb5   :  { %p17631_p3 = pnand %p17630_p2, %p17624_p13 }
  0xb7   :  { %17634 = shalt.err (!%p17631_p3)
}
  0xb8   :  { %129 = dma.hbm_to_vmem [thread:$0]  %s19166_s8, 4096, %s124_s26, [#allocation15], %s17722_s3, %s17722_s3, %s17723_s21  }
  0xb9   :  { %s17732_s28 = smov [#allocation19]   ;;  %s17733_s27 = smov [#allocation22]  }
  0xba   :  { %s147_s0 = sshll.u32 %s17732_s28, 4  ;;  %s173_s1 = sshll.u32 %s17733_s27, 4  ;;  %s148_s0 = int_to_ptr.vmem [resolvable:$true] %s147_s0  ;;  %s174_s1 = int_to_ptr.vmem [resolvable:$true] %s173_s1 }
  0xbb   :  { %s17635_s11 = scalar_lea.hbm %s19168_s10, 4096 }
  0xbc   :  { %p17636_p4 = scmp.ne.s32.totalorder %s19168_s10, %s17635_s11  ;;  %p17639_p5 = scmp.lt.u32.totalorder %s17635_s11, %s19168_s10 }
  0xbe   :  { %p17641_p6 = pnand %p17639_p5, %p17636_p4 }
  0xc0   :  { %17644 = shalt.err (!%p17641_p6)
}
  0xc1   :  { %s17645_s8 = scalar_lea.vmem %s148_s0, 4096  ;;  %p17650_p8 = scmp.lt.s32.totalorder %s148_s0, %s148_s0 }
  0xc2   :  { %p17646_p7 = scmp.ne.s32.totalorder %s148_s0, %s17645_s8  ;;  %p17651_p9 = scmp.lt.s32.totalorder %s17645_s8, %s17645_s8 }
  0xc4   :  { %p17652_p10 = por %p17651_p9, %p17650_p8 }
  0xc6   :  { %p17653_p11 = pnand %p17652_p10, %p17646_p7 }
  0xc8   :  { %17656 = shalt.err (!%p17653_p11)
}
  0xc9   :  { %153 = dma.hbm_to_vmem [thread:$0]  %s19168_s10, 4096, %s148_s0, [#allocation18], %s19176_s30, %s19176_s30, %s17720_s19  }
  0xca   :  { %s17657_s2 = scalar_lea.hbm %s19171_s13, 1024 }
  0xcb   :  { %p17658_p12 = scmp.ne.s32.totalorder %s19171_s13, %s17657_s2  ;;  %p17661_p13 = scmp.lt.u32.totalorder %s17657_s2, %s19171_s13 }
  0xcd   :  { %p17663_p0 = pnand %p17661_p13, %p17658_p12 }
  0xcf   :  { %17666 = shalt.err (!%p17663_p0)
}
  0xd0   :  { %s17667_s29 = scalar_lea.vmem %s174_s1, 1024  ;;  %p17672_p2 = scmp.lt.s32.totalorder %s174_s1, %s174_s1 }
  0xd1   :  { %p17668_p1 = scmp.ne.s32.totalorder %s174_s1, %s17667_s29  ;;  %p17673_p3 = scmp.lt.s32.totalorder %s17667_s29, %s17667_s29 }
  0xd3   :  { %p17674_p4 = por %p17673_p3, %p17672_p2 }
  0xd5   :  { %p17675_p5 = pnand %p17674_p4, %p17668_p1 }
  0xd7   :  { %17678 = shalt.err (!%p17675_p5)
}
  0xd8   :  { %179 = dma.hbm_to_vmem [thread:$0]  %s19171_s13, 1024, %s174_s1, [#allocation21], %s17722_s3, %s17722_s3, %s17723_s21  }
  0xd9   :  { %17701 = dma.done.wait [#allocation3], 128  }
  0xda   :  { %17702 = vsyncadd [#allocation3], 4294967168 }
  0xdb   :  { %17703 = dma.done.wait [#allocation6], 256  }
  0xdc   :  { %17704 = vsyncadd [#allocation6], 4294967040 }
  0xdd   :  { %17705 = dma.done.wait [#allocation9], 8192  }
  0xde   :  { %17706 = vsyncadd [#allocation9], 4294959104 }
  0xdf   :  { %17707 = dma.done.wait [#allocation12], 8192  }
  0xe0   :  { %17708 = vsyncadd [#allocation12], 4294959104 }
  0xe1   :  { %17709 = dma.done.wait [#allocation15], 8192  }
  0xe2   :  { %17710 = vsyncadd [#allocation15], 4294959104 }
  0xe3   :  { %17711 = dma.done.wait [#allocation18], 8192  }
  0xe4   :  { %17712 = vsyncadd [#allocation18], 4294959104 }
  0xe5   :  { %17713 = dma.done.wait [#allocation21], 5120  }
  0xe6   :  { %17714 = vsyncadd [#allocation21], 4294962176  ;;  %v17734_v0 = vmov 0   ;;  %v15881_v1 = vld [vmem:[#allocation10 + $0x4] ss:$16 sps:$4 sm:$0xff]   ;;  %v222_v33 = vld [vmem:[#allocation7] sm:$0xff] }
  0xe7   :  { %449 = vmatprep.mubr.bf16.mxu0 %v17734_v0  ;;  %490 = vmatprep.mubr.bf16.mxu1 %v17734_v0  ;;  %v15883_v2 = vld [vmem:[#allocation10 + $0xc] ss:$16 sps:$4 sm:$0xff]   ;;  %v15885_v3 = vld [vmem:[#allocation10] ss:$16 sps:$4 sm:$0xff]   ;;  %v15886_v4 = vld [vmem:[#allocation10 + $0x8] ss:$16 sps:$4 sm:$0xff]   ;;  %v18015_v36 = vpack.c.bf16 %v222_v33, %v222_v33 }
  0xe8   :  { %15880 = vset.pattern.permute.xlu0 %v17734_v0  ;;  %417 = vmatprep.subr.bf16.mxu0 %v15881_v1  ;;  %v15887_v5 = vld [vmem:[#allocation10 + $0x24] ss:$16 sps:$4 sm:$0xff]   ;;  %v15889_v6 = vld [vmem:[#allocation10 + $0x2c] ss:$16 sps:$4 sm:$0xff]   ;;  %v15891_v7 = vld [vmem:[#allocation10 + $0x20] ss:$16 sps:$4 sm:$0xff]  }
  0xe9   :  { %458 = vmatprep.subr.bf16.mxu1 %v15883_v2  ;;  %418 = vmatpush1.bf16.msra.mxu0 %v15885_v3  ;;  %v15892_v8 = vld [vmem:[#allocation10 + $0x28] ss:$16 sps:$4 sm:$0xff]   ;;  %v15893_v9 = vld [vmem:[#allocation10 + $0x44] ss:$16 sps:$4 sm:$0xff]   ;;  %v15895_v10 = vld [vmem:[#allocation10 + $0x4c] ss:$16 sps:$4 sm:$0xff]  }
  0xea   :  { %459 = vmatpush1.bf16.msra.mxu1 %v15886_v4  ;;  %419 = vmatprep.subr.bf16.mxu0 %v15887_v5  ;;  %v15897_v11 = vld [vmem:[#allocation10 + $0x40] ss:$16 sps:$4 sm:$0xff]   ;;  %v15898_v12 = vld [vmem:[#allocation10 + $0x48] ss:$16 sps:$4 sm:$0xff]   ;;  %v15899_v13 = vld [vmem:[#allocation10 + $0x64] ss:$16 sps:$4 sm:$0xff]  }
  0xeb   :  { %460 = vmatprep.subr.bf16.mxu1 %v15889_v6  ;;  %v15901_v14 = vld [vmem:[#allocation10 + $0x6c] ss:$16 sps:$4 sm:$0xff]   ;;  %v15903_v15 = vld [vmem:[#allocation10 + $0x60] ss:$16 sps:$4 sm:$0xff]   ;;  %v15904_v16 = vld [vmem:[#allocation10 + $0x68] ss:$16 sps:$4 sm:$0xff]  }
  0xec   :  { %v15905_v17 = vld [vmem:[#allocation10 + $0x84] ss:$16 sps:$4 sm:$0xff]   ;;  %v15907_v18 = vld [vmem:[#allocation10 + $0x8c] ss:$16 sps:$4 sm:$0xff]   ;;  %v15909_v19 = vld [vmem:[#allocation10 + $0x80] ss:$16 sps:$4 sm:$0xff]  }
  0xed   :  { %420 = vmatpush1.bf16.msra.mxu0 %v15891_v7  ;;  %v15910_v20 = vld [vmem:[#allocation10 + $0x88] ss:$16 sps:$4 sm:$0xff]   ;;  %v15911_v21 = vld [vmem:[#allocation10 + $0xa4] ss:$16 sps:$4 sm:$0xff]   ;;  %v15913_v22 = vld [vmem:[#allocation10 + $0xac] ss:$16 sps:$4 sm:$0xff]  }
  0xee   :  { %461 = vmatpush1.bf16.msra.mxu1 %v15892_v8  ;;  %421 = vmatprep.subr.bf16.mxu0 %v15893_v9  ;;  %v15915_v23 = vld [vmem:[#allocation10 + $0xa0] ss:$16 sps:$4 sm:$0xff]   ;;  %v15916_v24 = vld [vmem:[#allocation10 + $0xa8] ss:$16 sps:$4 sm:$0xff]   ;;  %v15917_v25 = vld [vmem:[#allocation10 + $0xc4] ss:$16 sps:$4 sm:$0xff]  }
  0xef   :  { %462 = vmatprep.subr.bf16.mxu1 %v15895_v10  ;;  %v15919_v26 = vld [vmem:[#allocation10 + $0xcc] ss:$16 sps:$4 sm:$0xff]   ;;  %v15921_v27 = vld [vmem:[#allocation10 + $0xc0] ss:$16 sps:$4 sm:$0xff]   ;;  %v15922_v28 = vld [vmem:[#allocation10 + $0xc8] ss:$16 sps:$4 sm:$0xff]  }
  0xf0   :  { %v15923_v29 = vld [vmem:[#allocation10 + $0xe4] ss:$16 sps:$4 sm:$0xff]   ;;  %v15925_v30 = vld [vmem:[#allocation10 + $0xec] ss:$16 sps:$4 sm:$0xff]   ;;  %v15927_v31 = vld [vmem:[#allocation10 + $0xe0] ss:$16 sps:$4 sm:$0xff]  }
  0xf1   :  { %422 = vmatpush1.bf16.msra.mxu0 %v15897_v11  ;;  %v15928_v32 = vld [vmem:[#allocation10 + $0xe8] ss:$16 sps:$4 sm:$0xff]   ;;  %v15931_v34 = vld [vmem:[#allocation14 + $0x4] ss:$16 sps:$4 sm:$0xff]   ;;  %v15934_v35 = vld [vmem:[#allocation14 + $0xc] ss:$16 sps:$4 sm:$0xff]  }
  0xf2   :  { %463 = vmatpush1.bf16.msra.mxu1 %v15898_v12  ;;  %423 = vmatprep.subr.bf16.mxu0 %v15899_v13  ;;  %v15929_v37 = vld [vmem:[#allocation14] ss:$16 sps:$4 sm:$0xff]   ;;  %v15932_v38 = vld [vmem:[#allocation14 + $0x8] ss:$16 sps:$4 sm:$0xff]   ;;  %v15937_v39 = vld [vmem:[#allocation14 + $0x24] ss:$16 sps:$4 sm:$0xff]  }
  0xf3   :  { %464 = vmatprep.subr.bf16.mxu1 %v15901_v14  ;;  %v15940_v40 = vld [vmem:[#allocation14 + $0x2c] ss:$16 sps:$4 sm:$0xff]   ;;  %v15935_v41 = vld [vmem:[#allocation14 + $0x20] ss:$16 sps:$4 sm:$0xff]   ;;  %v15938_v42 = vld [vmem:[#allocation14 + $0x28] ss:$16 sps:$4 sm:$0xff]  }
  0xf4   :  { %v15943_v43 = vld [vmem:[#allocation14 + $0x44] ss:$16 sps:$4 sm:$0xff]   ;;  %v15946_v44 = vld [vmem:[#allocation14 + $0x4c] ss:$16 sps:$4 sm:$0xff]   ;;  %v15941_v45 = vld [vmem:[#allocation14 + $0x40] ss:$16 sps:$4 sm:$0xff]  }
  0xf5   :  { %424 = vmatpush1.bf16.msra.mxu0 %v15903_v15  ;;  %v15944_v46 = vld [vmem:[#allocation14 + $0x48] ss:$16 sps:$4 sm:$0xff]   ;;  %v15949_v47 = vld [vmem:[#allocation14 + $0x64] ss:$16 sps:$4 sm:$0xff]   ;;  %v15952_v48 = vld [vmem:[#allocation14 + $0x6c] ss:$16 sps:$4 sm:$0xff]  }
  0xf6   :  { %465 = vmatpush1.bf16.msra.mxu1 %v15904_v16  ;;  %425 = vmatprep.subr.bf16.mxu0 %v15905_v17  ;;  %v15947_v49 = vld [vmem:[#allocation14 + $0x60] ss:$16 sps:$4 sm:$0xff]   ;;  %v15950_v50 = vld [vmem:[#allocation14 + $0x68] ss:$16 sps:$4 sm:$0xff]   ;;  %v15955_v51 = vld [vmem:[#allocation14 + $0x84] ss:$16 sps:$4 sm:$0xff]  }
  0xf7   :  { %466 = vmatprep.subr.bf16.mxu1 %v15907_v18  ;;  %v15958_v52 = vld [vmem:[#allocation14 + $0x8c] ss:$16 sps:$4 sm:$0xff]   ;;  %v15953_v53 = vld [vmem:[#allocation14 + $0x80] ss:$16 sps:$4 sm:$0xff]   ;;  %v15956_v54 = vld [vmem:[#allocation14 + $0x88] ss:$16 sps:$4 sm:$0xff]  }
  0xf8   :  { %v15961_v55 = vld [vmem:[#allocation14 + $0xa4] ss:$16 sps:$4 sm:$0xff]   ;;  %v15964_v56 = vld [vmem:[#allocation14 + $0xac] ss:$16 sps:$4 sm:$0xff]   ;;  %v15959_v57 = vld [vmem:[#allocation14 + $0xa0] ss:$16 sps:$4 sm:$0xff]  }
  0xf9   :  { %426 = vmatpush1.bf16.msra.mxu0 %v15909_v19  ;;  %v15962_v58 = vld [vmem:[#allocation14 + $0xa8] ss:$16 sps:$4 sm:$0xff]   ;;  %v15967_v59 = vld [vmem:[#allocation14 + $0xc4] ss:$16 sps:$4 sm:$0xff]   ;;  %v15970_v60 = vld [vmem:[#allocation14 + $0xcc] ss:$16 sps:$4 sm:$0xff]  }
  0xfa   :  { %467 = vmatpush1.bf16.msra.mxu1 %v15910_v20  ;;  %427 = vmatprep.subr.bf16.mxu0 %v15911_v21  ;;  %v15965_v61 = vld [vmem:[#allocation14 + $0xc0] ss:$16 sps:$4 sm:$0xff]   ;;  %v15968_v62 = vld [vmem:[#allocation14 + $0xc8] ss:$16 sps:$4 sm:$0xff]   ;;  %v15973_v63 = vld [vmem:[#allocation14 + $0xe4] ss:$16 sps:$4 sm:$0xff]  }
  0xfb   :  { %468 = vmatprep.subr.bf16.mxu1 %v15913_v22  ;;  %v15976_v1 = vld [vmem:[#allocation14 + $0xec] ss:$16 sps:$4 sm:$0xff]   ;;  %v15971_v2 = vld [vmem:[#allocation14 + $0xe0] ss:$16 sps:$4 sm:$0xff]   ;;  %v15974_v3 = vld [vmem:[#allocation14 + $0xe8] ss:$16 sps:$4 sm:$0xff]  }
  0xfc   :  { %v15979_v4 = vld [vmem:[#allocation19 + $0x4] ss:$16 sps:$4 sm:$0xff]   ;;  %v15982_v5 = vld [vmem:[#allocation19 + $0xc] ss:$16 sps:$4 sm:$0xff]   ;;  %v15977_v6 = vld [vmem:[#allocation19] ss:$16 sps:$4 sm:$0xff]  }
  0xfd   :  { %428 = vmatpush1.bf16.msra.mxu0 %v15915_v23  ;;  %v15980_v7 = vld [vmem:[#allocation19 + $0x8] ss:$16 sps:$4 sm:$0xff]   ;;  %v15985_v8 = vld [vmem:[#allocation19 + $0x24] ss:$16 sps:$4 sm:$0xff]   ;;  %v15988_v9 = vld [vmem:[#allocation19 + $0x2c] ss:$16 sps:$4 sm:$0xff]  }
  0xfe   :  { %469 = vmatpush1.bf16.msra.mxu1 %v15916_v24  ;;  %429 = vmatprep.subr.bf16.mxu0 %v15917_v25  ;;  %v15983_v10 = vld [vmem:[#allocation19 + $0x20] ss:$16 sps:$4 sm:$0xff]   ;;  %v15986_v11 = vld [vmem:[#allocation19 + $0x28] ss:$16 sps:$4 sm:$0xff]   ;;  %v15991_v12 = vld [vmem:[#allocation19 + $0x44] ss:$16 sps:$4 sm:$0xff]  }
  0xff   :  { %470 = vmatprep.subr.bf16.mxu1 %v15919_v26  ;;  %v15994_v13 = vld [vmem:[#allocation19 + $0x4c] ss:$16 sps:$4 sm:$0xff]   ;;  %v15989_v14 = vld [vmem:[#allocation19 + $0x40] ss:$16 sps:$4 sm:$0xff]   ;;  %v15992_v15 = vld [vmem:[#allocation19 + $0x48] ss:$16 sps:$4 sm:$0xff]  }
 0x100   :  { %v15997_v16 = vld [vmem:[#allocation19 + $0x64] ss:$16 sps:$4 sm:$0xff]   ;;  %v16000_v17 = vld [vmem:[#allocation19 + $0x6c] ss:$16 sps:$4 sm:$0xff]   ;;  %v15995_v18 = vld [vmem:[#allocation19 + $0x60] ss:$16 sps:$4 sm:$0xff]  }
 0x101   :  { %430 = vmatpush1.bf16.msra.mxu0 %v15921_v27  ;;  %v15998_v19 = vld [vmem:[#allocation19 + $0x68] ss:$16 sps:$4 sm:$0xff]   ;;  %v16003_v20 = vld [vmem:[#allocation19 + $0x84] ss:$16 sps:$4 sm:$0xff]   ;;  %v16006_v21 = vld [vmem:[#allocation19 + $0x8c] ss:$16 sps:$4 sm:$0xff]  }
 0x102   :  { %471 = vmatpush1.bf16.msra.mxu1 %v15922_v28  ;;  %431 = vmatprep.subr.bf16.mxu0 %v15923_v29  ;;  %v16001_v22 = vld [vmem:[#allocation19 + $0x80] ss:$16 sps:$4 sm:$0xff]   ;;  %v16004_v23 = vld [vmem:[#allocation19 + $0x88] ss:$16 sps:$4 sm:$0xff]   ;;  %v16009_v24 = vld [vmem:[#allocation19 + $0xa4] ss:$16 sps:$4 sm:$0xff]  }
 0x103   :  { %472 = vmatprep.subr.bf16.mxu1 %v15925_v30  ;;  %v16012_v25 = vld [vmem:[#allocation19 + $0xac] ss:$16 sps:$4 sm:$0xff]   ;;  %v16007_v26 = vld [vmem:[#allocation19 + $0xa0] ss:$16 sps:$4 sm:$0xff]   ;;  %v16010_v27 = vld [vmem:[#allocation19 + $0xa8] ss:$16 sps:$4 sm:$0xff]  }
 0x104   :  { %v16015_v28 = vld [vmem:[#allocation19 + $0xc4] ss:$16 sps:$4 sm:$0xff]   ;;  %v16018_v29 = vld [vmem:[#allocation19 + $0xcc] ss:$16 sps:$4 sm:$0xff]   ;;  %v16013_v30 = vld [vmem:[#allocation19 + $0xc0] ss:$16 sps:$4 sm:$0xff]  }
 0x105   :  { %432 = vmatpush1.bf16.msra.mxu0 %v15927_v31  ;;  %v16016_v31 = vld [vmem:[#allocation19 + $0xc8] ss:$16 sps:$4 sm:$0xff]   ;;  %v16024_v33 = vld [vmem:[#allocation19 + $0xec] ss:$16 sps:$4 sm:$0xff]   ;;  %vm17736_vm0 = vmmov 0   ;;  %vm3354_vm5 = vcmask 7168  }
 0x106   :  { %473 = vmatpush1.bf16.msra.mxu1 %v15928_v32  ;;  %691 = vmatprep.subr.bf16.mxu0 %v15931_v34  ;;  %v16021_v32 = vld [vmem:[#allocation19 + $0xe4] ss:$16 sps:$4 sm:$0xff]   ;;  %v16019_v34 = vld [vmem:[#allocation19 + $0xe0] ss:$16 sps:$4 sm:$0xff]   ;;  %vm4914_vm10 = vcmask 15368   ;;  %vm6474_vm15 = vcmask 23568  }
 0x107   :  { %732 = vmatprep.subr.bf16.mxu1 %v15934_v35  ;;  %v16022_v35 = vld [vmem:[#allocation19 + $0xe8] ss:$16 sps:$4 sm:$0xff]  }
 0x108   :  { %450 = vmatmul.mubr.bf16.vlgmr.msra.gmra.mrb[0].mxu0 %v18015_v36 }
 0x109   :  { %491 = vmatmul.mubr.bf16.vlgmr.msra.gmra.mrb[0].mxu1 %v18015_v36  ;;  %692 = vmatpush1.bf16.msra.mxu0 %v15929_v37  ;;  %v16027_v37 = vld [vmem:[#allocation17 + $0x4] ss:$16 sps:$4 sm:$0xff]  }
 0x10a   :  { %733 = vmatpush1.bf16.msra.mxu1 %v15932_v38  ;;  %693 = vmatprep.subr.bf16.mxu0 %v15937_v39  ;;  %v16030_v38 = vld [vmem:[#allocation17 + $0xc] ss:$16 sps:$4 sm:$0xff]   ;;  %v16025_v39 = vld [vmem:[#allocation17] ss:$16 sps:$4 sm:$0xff]  }
 0x10b   :  { %734 = vmatprep.subr.bf16.mxu1 %v15940_v40  ;;  %723 = vmatprep.mubr.bf16.mxu0 %v17734_v0  ;;  %v16028_v40 = vld [vmem:[#allocation17 + $0x8] ss:$16 sps:$4 sm:$0xff]  }
 0x10c   :  { %764 = vmatprep.mubr.bf16.mxu1 %v17734_v0 }
 0x10d   :  { %694 = vmatpush1.bf16.msra.mxu0 %v15935_v41  ;;  %v16033_v41 = vld [vmem:[#allocation17 + $0x24] ss:$16 sps:$4 sm:$0xff]  }
 0x10e   :  { %735 = vmatpush1.bf16.msra.mxu1 %v15938_v42  ;;  %695 = vmatprep.subr.bf16.mxu0 %v15943_v43  ;;  %v16036_v42 = vld [vmem:[#allocation17 + $0x2c] ss:$16 sps:$4 sm:$0xff]   ;;  %v16031_v43 = vld [vmem:[#allocation17 + $0x20] ss:$16 sps:$4 sm:$0xff]  }
 0x10f   :  { %736 = vmatprep.subr.bf16.mxu1 %v15946_v44  ;;  %v16034_v44 = vld [vmem:[#allocation17 + $0x28] ss:$16 sps:$4 sm:$0xff]  }
 0x111   :  { %696 = vmatpush1.bf16.msra.mxu0 %v15941_v45  ;;  %v16039_v45 = vld [vmem:[#allocation17 + $0x44] ss:$16 sps:$4 sm:$0xff]  }
 0x112   :  { %737 = vmatpush1.bf16.msra.mxu1 %v15944_v46  ;;  %697 = vmatprep.subr.bf16.mxu0 %v15949_v47  ;;  %v16042_v46 = vld [vmem:[#allocation17 + $0x4c] ss:$16 sps:$4 sm:$0xff]   ;;  %v16037_v47 = vld [vmem:[#allocation17 + $0x40] ss:$16 sps:$4 sm:$0xff]  }
 0x113   :  { %738 = vmatprep.subr.bf16.mxu1 %v15952_v48  ;;  %v16040_v48 = vld [vmem:[#allocation17 + $0x48] ss:$16 sps:$4 sm:$0xff]  }
 0x115   :  { %698 = vmatpush1.bf16.msra.mxu0 %v15947_v49  ;;  %v16045_v49 = vld [vmem:[#allocation17 + $0x64] ss:$16 sps:$4 sm:$0xff]  }
 0x116   :  { %739 = vmatpush1.bf16.msra.mxu1 %v15950_v50  ;;  %699 = vmatprep.subr.bf16.mxu0 %v15955_v51  ;;  %v16048_v50 = vld [vmem:[#allocation17 + $0x6c] ss:$16 sps:$4 sm:$0xff]   ;;  %v16043_v51 = vld [vmem:[#allocation17 + $0x60] ss:$16 sps:$4 sm:$0xff]  }
 0x117   :  { %740 = vmatprep.subr.bf16.mxu1 %v15958_v52  ;;  %v16051_v52 = vld [vmem:[#allocation17 + $0x84] ss:$16 sps:$4 sm:$0xff]  }
 0x119   :  { %700 = vmatpush1.bf16.msra.mxu0 %v15953_v53  ;;  %v16054_v53 = vld [vmem:[#allocation17 + $0x8c] ss:$16 sps:$4 sm:$0xff]  }
 0x11a   :  { %741 = vmatpush1.bf16.msra.mxu1 %v15956_v54  ;;  %701 = vmatprep.subr.bf16.mxu0 %v15961_v55  ;;  %v16049_v54 = vld [vmem:[#allocation17 + $0x80] ss:$16 sps:$4 sm:$0xff]   ;;  %v16052_v55 = vld [vmem:[#allocation17 + $0x88] ss:$16 sps:$4 sm:$0xff]  }
 0x11b   :  { %742 = vmatprep.subr.bf16.mxu1 %v15964_v56  ;;  %v16057_v56 = vld [vmem:[#allocation17 + $0xa4] ss:$16 sps:$4 sm:$0xff]  }
 0x11d   :  { %702 = vmatpush1.bf16.msra.mxu0 %v15959_v57  ;;  %v16060_v57 = vld [vmem:[#allocation17 + $0xac] ss:$16 sps:$4 sm:$0xff]  }
 0x11e   :  { %743 = vmatpush1.bf16.msra.mxu1 %v15962_v58  ;;  %703 = vmatprep.subr.bf16.mxu0 %v15967_v59  ;;  %v16055_v58 = vld [vmem:[#allocation17 + $0xa0] ss:$16 sps:$4 sm:$0xff]   ;;  %v16058_v59 = vld [vmem:[#allocation17 + $0xa8] ss:$16 sps:$4 sm:$0xff]  }
 0x11f   :  { %744 = vmatprep.subr.bf16.mxu1 %v15970_v60  ;;  %v16063_v60 = vld [vmem:[#allocation17 + $0xc4] ss:$16 sps:$4 sm:$0xff]  }
 0x121   :  { %704 = vmatpush1.bf16.msra.mxu0 %v15965_v61  ;;  %v16066_v61 = vld [vmem:[#allocation17 + $0xcc] ss:$16 sps:$4 sm:$0xff]  }
 0x122   :  { %745 = vmatpush1.bf16.msra.mxu1 %v15968_v62  ;;  %705 = vmatprep.subr.bf16.mxu0 %v15973_v63  ;;  %v16061_v62 = vld [vmem:[#allocation17 + $0xc0] ss:$16 sps:$4 sm:$0xff]   ;;  %v16064_v63 = vld [vmem:[#allocation17 + $0xc8] ss:$16 sps:$4 sm:$0xff]  }
 0x123   :  { %746 = vmatprep.subr.bf16.mxu1 %v15976_v1  ;;  %v16069_v1 = vld [vmem:[#allocation17 + $0xe4] ss:$16 sps:$4 sm:$0xff]  }
 0x125   :  { %706 = vmatpush1.bf16.msra.mxu0 %v15971_v2  ;;  %v16072_v2 = vld [vmem:[#allocation17 + $0xec] ss:$16 sps:$4 sm:$0xff]  }
 0x126   :  { %747 = vmatpush1.bf16.msra.mxu1 %v15974_v3  ;;  %965 = vmatprep.subr.bf16.mxu0 %v15979_v4  ;;  %v16067_v3 = vld [vmem:[#allocation17 + $0xe0] ss:$16 sps:$4 sm:$0xff]   ;;  %v16070_v4 = vld [vmem:[#allocation17 + $0xe8] ss:$16 sps:$4 sm:$0xff]  }
 0x127   :  { %1006 = vmatprep.subr.bf16.mxu1 %v15982_v5  ;;  %v223_v5 = vld [vmem:[#allocation5] sm:$0xff] }
 0x128   :  { %724 = vmatmul.mubr.bf16.vlgmr.msra.gmra.mrb[4].mxu0 %v18015_v36 }
 0x129   :  { %765 = vmatmul.mubr.bf16.vlgmr.msra.gmra.mrb[4].mxu1 %v18015_v36  ;;  %966 = vmatpush1.bf16.msra.mxu0 %v15977_v6  ;;  %v1079_v6 = vpack.c.bf16 %v223_v5, %v223_v5  ;;  %v16094_v5 = vld [vmem:[#allocation20 + $0xd0] sm:$0xff]  }
 0x12a   :  { %1007 = vmatpush1.bf16.msra.mxu1 %v15980_v7  ;;  %967 = vmatprep.subr.bf16.mxu0 %v15985_v8  ;;  %v1782_v7 = vld [vmem:[#allocation2] sm:$0xff]  ;;  %v16073_v8 = vld [vmem:[#allocation20] sm:$0xff]  }
 0x12b   :  { %1008 = vmatprep.subr.bf16.mxu1 %v15988_v9  ;;  %997 = vmatprep.mubr.bf16.mxu0 %v17734_v0  ;;  %v16074_v9 = vld [vmem:[#allocation20 + $0x40] sm:$0xff]  }
 0x12c   :  { %1038 = vmatprep.mubr.bf16.mxu1 %v17734_v0  ;;  %1784 = vperm.xlu0 %15880, %v1782_v7   ;;  %v16096_v7 = vld [vmem:[#allocation20 + $0xd8] sm:$0xff]  }
 0x12d   :  { %968 = vmatpush1.bf16.msra.mxu0 %v15983_v10  ;;  %v17735_v10 = vmov 0.0  }
 0x12e   :  { %1009 = vmatpush1.bf16.msra.mxu1 %v15986_v11  ;;  %969 = vmatprep.subr.bf16.mxu0 %v15991_v12  ;;  %v16075_v11 = vld [vmem:[#allocation20 + $0x8] sm:$0xff]  }
 0x12f   :  { %1010 = vmatprep.subr.bf16.mxu1 %v15994_v13  ;;  %v16076_v12 = vld [vmem:[#allocation20 + $0x48] sm:$0xff]   ;;  %v16077_v13 = vld [vmem:[#allocation20 + $0x10] sm:$0xff]  }
 0x131   :  { %970 = vmatpush1.bf16.msra.mxu0 %v15989_v14  ;;  %v16078_v14 = vld [vmem:[#allocation20 + $0x50] sm:$0xff]  }
 0x132   :  { %1011 = vmatpush1.bf16.msra.mxu1 %v15992_v15  ;;  %971 = vmatprep.subr.bf16.mxu0 %v15997_v16  ;;  %v16079_v15 = vld [vmem:[#allocation20 + $0x18] sm:$0xff]  }
 0x133   :  { %1012 = vmatprep.subr.bf16.mxu1 %v16000_v17  ;;  %v16080_v16 = vld [vmem:[#allocation20 + $0x58] sm:$0xff]   ;;  %v16081_v17 = vld [vmem:[#allocation20 + $0x20] sm:$0xff]  }
 0x135   :  { %972 = vmatpush1.bf16.msra.mxu0 %v15995_v18  ;;  %v16082_v18 = vld [vmem:[#allocation20 + $0x60] sm:$0xff]  }
 0x136   :  { %1013 = vmatpush1.bf16.msra.mxu1 %v15998_v19  ;;  %973 = vmatprep.subr.bf16.mxu0 %v16003_v20  ;;  %v16083_v19 = vld [vmem:[#allocation20 + $0x28] sm:$0xff]  }
 0x137   :  { %1014 = vmatprep.subr.bf16.mxu1 %v16006_v21  ;;  %v16084_v20 = vld [vmem:[#allocation20 + $0x68] sm:$0xff]   ;;  %v16085_v21 = vld [vmem:[#allocation20 + $0x30] sm:$0xff]  }
 0x139   :  { %974 = vmatpush1.bf16.msra.mxu0 %v16001_v22  ;;  %v16086_v22 = vld [vmem:[#allocation20 + $0x70] sm:$0xff]  }
 0x13a   :  { %1015 = vmatpush1.bf16.msra.mxu1 %v16004_v23  ;;  %975 = vmatprep.subr.bf16.mxu0 %v16009_v24  ;;  %v16087_v23 = vld [vmem:[#allocation20 + $0x38] sm:$0xff]  }
 0x13b   :  { %1016 = vmatprep.subr.bf16.mxu1 %v16012_v25  ;;  %v16088_v24 = vld [vmem:[#allocation20 + $0x78] sm:$0xff]  }
 0x13d   :  { %976 = vmatpush1.bf16.msra.mxu0 %v16007_v26 }
 0x13e   :  { %1017 = vmatpush1.bf16.msra.mxu1 %v16010_v27  ;;  %977 = vmatprep.subr.bf16.mxu0 %v16015_v28 }
 0x13f   :  { %1018 = vmatprep.subr.bf16.mxu1 %v16018_v29 }
 0x141   :  { %978 = vmatpush1.bf16.msra.mxu0 %v16013_v30 }
 0x142   :  { %1019 = vmatpush1.bf16.msra.mxu1 %v16016_v31  ;;  %979 = vmatprep.subr.bf16.mxu0 %v16021_v32 }
 0x143   :  { %1020 = vmatprep.subr.bf16.mxu1 %v16024_v33 }
 0x145   :  { %980 = vmatpush1.bf16.msra.mxu0 %v16019_v34 }
 0x146   :  { %1021 = vmatpush1.bf16.msra.mxu1 %v16022_v35  ;;  %1240 = vmatprep.subr.bf16.mxu0 %v16027_v37 }
 0x147   :  { %1281 = vmatprep.subr.bf16.mxu1 %v16030_v38 }
 0x148   :  { %998 = vmatmul.mubr.bf16.vlgmr.msra.gmra.mrb[8].mxu0 %v18015_v36 }
 0x149   :  { %1039 = vmatmul.mubr.bf16.vlgmr.msra.gmra.mrb[8].mxu1 %v18015_v36  ;;  %1241 = vmatpush1.bf16.msra.mxu0 %v16025_v39  ;;  %v16046_v36 = vld [vmem:[#allocation17 + $0x68] ss:$16 sps:$4 sm:$0xff]  }
 0x14a   :  { %1282 = vmatpush1.bf16.msra.mxu1 %v16028_v40  ;;  %1242 = vmatprep.subr.bf16.mxu0 %v16033_v41 }
 0x14b   :  { %1283 = vmatprep.subr.bf16.mxu1 %v16036_v42  ;;  %1272 = vmatprep.mubr.bf16.mxu0 %v17734_v0 }
 0x14c   :  { %1313 = vmatprep.mubr.bf16.mxu1 %v17734_v0 }
 0x14d   :  { %1243 = vmatpush1.bf16.msra.mxu0 %v16031_v43 }
 0x14e   :  { %1284 = vmatpush1.bf16.msra.mxu1 %v16034_v44  ;;  %1244 = vmatprep.subr.bf16.mxu0 %v16039_v45 }
 0x14f   :  { %1285 = vmatprep.subr.bf16.mxu1 %v16042_v46 }
 0x151   :  { %1245 = vmatpush1.bf16.msra.mxu0 %v16037_v47 }
 0x152   :  { %1286 = vmatpush1.bf16.msra.mxu1 %v16040_v48  ;;  %1246 = vmatprep.subr.bf16.mxu0 %v16045_v49 }
 0x153   :  { %1287 = vmatprep.subr.bf16.mxu1 %v16048_v50 }
 0x155   :  { %1247 = vmatpush1.bf16.msra.mxu0 %v16043_v51 }
 0x156   :  { %1288 = vmatpush1.bf16.msra.mxu1 %v16046_v36  ;;  %1248 = vmatprep.subr.bf16.mxu0 %v16051_v52  ;;  %v16089_v36 = vld [vmem:[#allocation20 + $0x80] sm:$0xff]  }
 0x157   :  { %1289 = vmatprep.subr.bf16.mxu1 %v16054_v53 }
 0x159   :  { %1249 = vmatpush1.bf16.msra.mxu0 %v16049_v54 }
 0x15a   :  { %1290 = vmatpush1.bf16.msra.mxu1 %v16052_v55  ;;  %1250 = vmatprep.subr.bf16.mxu0 %v16057_v56  ;;  %v16090_v56 = vld [vmem:[#allocation20 + $0xc0] sm:$0xff]  }
 0x15b   :  { %1291 = vmatprep.subr.bf16.mxu1 %v16060_v57 }
 0x15d   :  { %1251 = vmatpush1.bf16.msra.mxu0 %v16055_v58 }
 0x15e   :  { %1292 = vmatpush1.bf16.msra.mxu1 %v16058_v59  ;;  %1252 = vmatprep.subr.bf16.mxu0 %v16063_v60 }
 0x15f   :  { %1293 = vmatprep.subr.bf16.mxu1 %v16066_v61 }
 0x161   :  { %1253 = vmatpush1.bf16.msra.mxu0 %v16061_v62 }
 0x162   :  { %1294 = vmatpush1.bf16.msra.mxu1 %v16064_v63  ;;  %1254 = vmatprep.subr.bf16.mxu0 %v16069_v1 }
 0x163   :  { %1295 = vmatprep.subr.bf16.mxu1 %v16072_v2  ;;  %v16091_v2 = vld [vmem:[#allocation20 + $0x88] sm:$0xff]  }
 0x165   :  { %1255 = vmatpush1.bf16.msra.mxu0 %v16067_v3  ;;  %v16092_v3 = vld [vmem:[#allocation20 + $0xc8] sm:$0xff]  }
 0x166   :  { %1296 = vmatpush1.bf16.msra.mxu1 %v16070_v4  ;;  %14518 = vmatprep.subr.bf16.mxu0 %v17735_v10  ;;  %v16093_v4 = vld [vmem:[#allocation20 + $0x90] sm:$0xff]  }
 0x167   :  { %14538 = vmatprep.subr.bf16.mxu1 %v17735_v10 }
 0x168   :  { %1273 = vmatmul.mubr.bf16.vlgmr.msra.gmra.mrb[12].mxu0 %v1079_v6 }
 0x169   :  { %1314 = vmatmul.mubr.bf16.vlgmr.msra.gmra.mrb[12].mxu1 %v1079_v6  ;;  %14519 = vmatpush3.bf16.msra.mxu0 %v16073_v8  ;;  %v16095_v6 = vld [vmem:[#allocation20 + $0x98] sm:$0xff]   ;;  %v16097_v8 = vld [vmem:[#allocation20 + $0xa0] sm:$0xff]  }
 0x16a   :  { %14539 = vmatpush3.bf16.msra.mxu1 %v16074_v9  ;;  %14520 = vmatprep.subr.bf16.mxu0 %v17735_v10  ;;  %v16098_v9 = vld [vmem:[#allocation20 + $0xe0] sm:$0xff]  }
 0x16b   :  { %14540 = vmatprep.subr.bf16.mxu1 %v17735_v10  ;;  %14534 = vmatprep.mubr.msk.bf16.mxu0 %vm17736_vm0, %v17735_v10 }
 0x16c   :  { %14554 = vmatprep.mubr.msk.bf16.mxu1 %vm17736_vm0, %v17735_v10 }
 0x16d   :  { %14521 = vmatpush3.bf16.msra.mxu0 %v16075_v11  ;;  %v16099_v11 = vld [vmem:[#allocation20 + $0xa8] sm:$0xff]  }
 0x16e   :  { %14541 = vmatpush3.bf16.msra.mxu1 %v16076_v12  ;;  %14522 = vmatprep.subr.bf16.mxu0 %v17735_v10  ;;  %v16100_v12 = vld [vmem:[#allocation20 + $0xe8] sm:$0xff]  }
 0x16f   :  { %14542 = vmatprep.subr.bf16.mxu1 %v17735_v10 }
 0x171   :  { %14523 = vmatpush3.bf16.msra.mxu0 %v16077_v13  ;;  %v16101_v13 = vld [vmem:[#allocation20 + $0xb0] sm:$0xff]  }
 0x172   :  { %14543 = vmatpush3.bf16.msra.mxu1 %v16078_v14  ;;  %14524 = vmatprep.subr.bf16.mxu0 %v17735_v10  ;;  %v16102_v14 = vld [vmem:[#allocation20 + $0xf0] sm:$0xff]  }
 0x173   :  { %14544 = vmatprep.subr.bf16.mxu1 %v17735_v10 }
 0x175   :  { %14525 = vmatpush3.bf16.msra.mxu0 %v16079_v15  ;;  %v16103_v15 = vld [vmem:[#allocation20 + $0xb8] sm:$0xff]  }
 0x176   :  { %14545 = vmatpush3.bf16.msra.mxu1 %v16080_v16  ;;  %14526 = vmatprep.subr.bf16.mxu0 %v17735_v10  ;;  %v1780_v16 = vlaneseq }
 0x177   :  { %14546 = vmatprep.subr.bf16.mxu1 %v17735_v10 }
 0x179   :  { %14527 = vmatpush3.bf16.msra.mxu0 %v16081_v17  ;;  %v16104_v17 = vld [vmem:[#allocation20 + $0xf8] sm:$0xff]  }
 0x17a   :  { %14547 = vmatpush3.bf16.msra.mxu1 %v16082_v18  ;;  %14528 = vmatprep.subr.bf16.mxu0 %v17735_v10  ;;  %v16107_v18 = vld [vmem:[#allocation8 + $0x4] ss:$16 sps:$4 sm:$0xff]  }
 0x17b   :  { %14548 = vmatprep.subr.bf16.mxu1 %v17735_v10 }
 0x17d   :  { %14529 = vmatpush3.bf16.msra.mxu0 %v16083_v19  ;;  %v16110_v19 = vld [vmem:[#allocation8 + $0xc] ss:$16 sps:$4 sm:$0xff]  }
 0x17e   :  { %14549 = vmatpush3.bf16.msra.mxu1 %v16084_v20  ;;  %14530 = vmatprep.subr.bf16.mxu0 %v17735_v10  ;;  %v16105_v20 = vld [vmem:[#allocation8] ss:$16 sps:$4 sm:$0xff]  }
 0x17f   :  { %14550 = vmatprep.subr.bf16.mxu1 %v17735_v10 }
 0x181   :  { %14531 = vmatpush3.bf16.msra.mxu0 %v16085_v21  ;;  %v18089_v21 = vand.u32 127, %v1780_v16  ;;  %v16171_v16 = vld [vmem:[#allocation13 + $0x60] ss:$16 sps:$4 sm:$0xff]  }
 0x182   :  { %14551 = vmatpush3.bf16.msra.mxu1 %v16086_v22  ;;  %14532 = vmatprep.subr.bf16.mxu0 %v17735_v10  ;;  %v16108_v22 = vld [vmem:[#allocation8 + $0x8] ss:$16 sps:$4 sm:$0xff]  }
 0x183   :  { %14552 = vmatprep.subr.bf16.mxu1 %v17735_v10 }
 0x185   :  { %14533 = vmatpush3.bf16.msra.mxu0 %v16087_v23  ;;  %v16113_v23 = vld [vmem:[#allocation8 + $0x24] ss:$16 sps:$4 sm:$0xff]  }
 0x186   :  { %14553 = vmatpush3.bf16.msra.mxu1 %v16088_v24  ;;  %14558 = vmatprep.subr.bf16.mxu0 %v17735_v10  ;;  %v16116_v24 = vld [vmem:[#allocation8 + $0x2c] ss:$16 sps:$4 sm:$0xff]  }
 0x187   :  { %14578 = vmatprep.subr.bf16.mxu1 %v17735_v10 }
 0x1db   :  { %v18051_v25 = vpop.f32.mrb[0].mxu0 }
 0x1dc   :  { %v18053_v26 = vpop.f32.mrb[0].mxu1  ;;  %v18055_v27 = vpop.f32.mrb[1].mxu0 }
 0x1dd   :  { %v18057_v28 = vpop.f32.mrb[1].mxu1  ;;  %v455_v29 = vpop.f32.mrb[2].mxu0 }
 0x1de   :  { %v496_v30 = vpop.f32.mrb[2].mxu1  ;;  %v456_v31 = vpop.f32.mrb[3].mxu0 }
 0x1df   :  { %v497_v32 = vpop.f32.mrb[3].mxu1  ;;  %v16111_v31 = vld [vmem:[#allocation8 + $0x20] ss:$16 sps:$4 sm:$0xff]  }
 0x1e0   :  { %v16114_v32 = vld [vmem:[#allocation8 + $0x28] ss:$16 sps:$4 sm:$0xff]  }
 0x1fb   :  { %v18059_v33 = vpop.f32.mrb[4].mxu0 }
 0x1fc   :  { %v18061_v34 = vpop.f32.mrb[4].mxu1  ;;  %v18063_v35 = vpop.f32.mrb[5].mxu0 }
 0x1fd   :  { %v18065_v37 = vpop.f32.mrb[5].mxu1  ;;  %v729_v38 = vpop.f32.mrb[6].mxu0 }
 0x1fe   :  { %v770_v39 = vpop.f32.mrb[6].mxu1  ;;  %v730_v40 = vpop.f32.mrb[7].mxu0  ;;  %v16119_v38 = vld [vmem:[#allocation8 + $0x44] ss:$16 sps:$4 sm:$0xff]  }
 0x1ff   :  { %v771_v41 = vpop.f32.mrb[7].mxu1  ;;  %v16122_v39 = vld [vmem:[#allocation8 + $0x4c] ss:$16 sps:$4 sm:$0xff]   ;;  %v16117_v40 = vld [vmem:[#allocation8 + $0x40] ss:$16 sps:$4 sm:$0xff]  }
 0x200   :  { %v16120_v41 = vld [vmem:[#allocation8 + $0x48] ss:$16 sps:$4 sm:$0xff]  }
 0x21b   :  { %v999_v42 = vpop.f32.mrb[8].mxu0 }
 0x21c   :  { %v1040_v43 = vpop.f32.mrb[8].mxu1  ;;  %v1001_v44 = vpop.f32.mrb[9].mxu0 }
 0x21d   :  { %v1042_v45 = vpop.f32.mrb[9].mxu1  ;;  %v1003_v46 = vpop.f32.mrb[10].mxu0 }
 0x21e   :  { %v1044_v47 = vpop.f32.mrb[10].mxu1  ;;  %v1004_v48 = vpop.f32.mrb[11].mxu0  ;;  %v16131_v46 = vld [vmem:[#allocation8 + $0x84] ss:$16 sps:$4 sm:$0xff]  }
 0x21f   :  { %v1045_v49 = vpop.f32.mrb[11].mxu1  ;;  %v16134_v47 = vld [vmem:[#allocation8 + $0x8c] ss:$16 sps:$4 sm:$0xff]   ;;  %v16129_v48 = vld [vmem:[#allocation8 + $0x80] ss:$16 sps:$4 sm:$0xff]  }
 0x220   :  { %v16132_v49 = vld [vmem:[#allocation8 + $0x88] ss:$16 sps:$4 sm:$0xff]  }
 0x23b   :  { %v1274_v50 = vpop.f32.mrb[12].mxu0 }
 0x23c   :  { %v1315_v51 = vpop.f32.mrb[12].mxu1  ;;  %v1322_v52 = vmul.f32 %v1274_v50, %v999_v42  ;;  %v1276_v54 = vpop.f32.mrb[13].mxu0  ;;  %v16125_v42 = vld [vmem:[#allocation8 + $0x64] ss:$16 sps:$4 sm:$0xff]  }
 0x23d   :  { %v18067_v53 = vmul.f32 %v1315_v51, %v1040_v43  ;;  %v1317_v55 = vpop.f32.mrb[13].mxu1  ;;  %v1323_v57 = vmul.f32 %v1276_v54, %v1001_v44  ;;  %v1278_v59 = vpop.f32.mrb[14].mxu0  ;;  %v16128_v43 = vld [vmem:[#allocation8 + $0x6c] ss:$16 sps:$4 sm:$0xff]   ;;  %v16123_v44 = vld [vmem:[#allocation8 + $0x60] ss:$16 sps:$4 sm:$0xff]  }
 0x23e   :  { %v18069_v58 = vmul.f32 %v1317_v55, %v1042_v45  ;;  %v1319_v60 = vpop.f32.mrb[14].mxu1  ;;  %v1342_v61 = vpack.c.bf16 %v1322_v52, %v1322_v52  ;;  %v1279_v62 = vpop.f32.mrb[15].mxu0  ;;  %v16126_v45 = vld [vmem:[#allocation8 + $0x68] ss:$16 sps:$4 sm:$0xff]   ;;  %v16137_v50 = vld [vmem:[#allocation8 + $0xa4] ss:$16 sps:$4 sm:$0xff]  }
 0x23f   :  { %v1320_v63 = vpop.f32.mrb[15].mxu1  ;;  %v1455_v1 = vpack.c.bf16 %v1323_v57, %v1323_v57  ;;  %v1569_v29 = vpack.c.bf16 %v18067_v53, %v18067_v53  ;;  %v16140_v51 = vld [vmem:[#allocation8 + $0xac] ss:$16 sps:$4 sm:$0xff]   ;;  %v1785_v52 = vpop.permute.xlu0 %1784  ;;  %v16138_v53 = vld [vmem:[#allocation8 + $0xa8] ss:$16 sps:$4 sm:$0xff]  }
 0x240   :  { %14535 = vmatmul.mubr.bf16.vlgmr.msra.gmra.mrb[16].mxu0 %v1342_v61  ;;  %v1683_v30 = vpack.c.bf16 %v18069_v58, %v18069_v58  ;;  %v16143_v54 = vld [vmem:[#allocation8 + $0xc4] ss:$16 sps:$4 sm:$0xff]   ;;  %v16146_v55 = vld [vmem:[#allocation8 + $0xcc] ss:$16 sps:$4 sm:$0xff]   ;;  %vm1786_vm1 = vcmp.eq.s32.totalorder %v18089_v21, %v1785_v52  ;;  %v16144_v57 = vld [vmem:[#allocation8 + $0xc8] ss:$16 sps:$4 sm:$0xff]  }
 0x241   :  { %14559 = vmatpush3.bf16.msra.mxu0 %v16089_v36  ;;  %14555 = vmatmul.mubr.bf16.vlgmr.msra.gmra.mrb[16].mxu1 %v1455_v1  ;;  %v16135_v36 = vld [vmem:[#allocation8 + $0xa0] ss:$16 sps:$4 sm:$0xff]   ;;  %v16149_v58 = vld [vmem:[#allocation8 + $0xe4] ss:$16 sps:$4 sm:$0xff]   ;;  %vm18098_vm2 = vmpackc.low %vm1786_vm1, %vm1786_vm1 }
 0x242   :  { %14579 = vmatpush3.bf16.msra.mxu1 %v16090_v56  ;;  %14560 = vmatprep.subr.bf16.mxu0 %v17735_v10  ;;  %v16141_v56 = vld [vmem:[#allocation8 + $0xc0] ss:$16 sps:$4 sm:$0xff]   ;;  %v16152_v60 = vld [vmem:[#allocation8 + $0xec] ss:$16 sps:$4 sm:$0xff]   ;;  %v16150_v62 = vld [vmem:[#allocation8 + $0xe8] ss:$16 sps:$4 sm:$0xff]  }
 0x243   :  { %14580 = vmatprep.subr.bf16.mxu1 %v17735_v10  ;;  %14574 = vmatprep.mubr.msk.bf16.mxu0 %vm17736_vm0, %v17735_v10  ;;  %v16147_v61 = vld [vmem:[#allocation8 + $0xe0] ss:$16 sps:$4 sm:$0xff]   ;;  %v16155_v63 = vld [vmem:[#allocation13 + $0x4] ss:$16 sps:$4 sm:$0xff]   ;;  %v16158_v1 = vld [vmem:[#allocation13 + $0xc] ss:$16 sps:$4 sm:$0xff]  }
 0x244   :  { %14594 = vmatprep.mubr.msk.bf16.mxu1 %vm17736_vm0, %v17735_v10  ;;  %v16211_v52 = vld [vmem:[#allocation16 + $0x8] sm:$0xff]  }
 0x245   :  { %14561 = vmatpush3.bf16.msra.mxu0 %v16091_v2  ;;  %v16153_v2 = vld [vmem:[#allocation13] ss:$16 sps:$4 sm:$0xff]  }
 0x246   :  { %14581 = vmatpush3.bf16.msra.mxu1 %v16092_v3  ;;  %14562 = vmatprep.subr.bf16.mxu0 %v17735_v10  ;;  %v16156_v3 = vld [vmem:[#allocation13 + $0x8] ss:$16 sps:$4 sm:$0xff]  }
 0x247   :  { %14582 = vmatprep.subr.bf16.mxu1 %v17735_v10 }
 0x249   :  { %14563 = vmatpush3.bf16.msra.mxu0 %v16093_v4  ;;  %v16161_v4 = vld [vmem:[#allocation13 + $0x24] ss:$16 sps:$4 sm:$0xff]  }
 0x24a   :  { %14583 = vmatpush3.bf16.msra.mxu1 %v16094_v5  ;;  %14564 = vmatprep.subr.bf16.mxu0 %v17735_v10  ;;  %v16164_v5 = vld [vmem:[#allocation13 + $0x2c] ss:$16 sps:$4 sm:$0xff]  }
 0x24b   :  { %14584 = vmatprep.subr.bf16.mxu1 %v17735_v10 }
 0x24d   :  { %14565 = vmatpush3.bf16.msra.mxu0 %v16095_v6  ;;  %v16159_v6 = vld [vmem:[#allocation13 + $0x20] ss:$16 sps:$4 sm:$0xff]  }
 0x24e   :  { %14585 = vmatpush3.bf16.msra.mxu1 %v16096_v7  ;;  %14566 = vmatprep.subr.bf16.mxu0 %v17735_v10  ;;  %v17737_v7 = vmov 1.0|1.0  }
 0x24f   :  { %14586 = vmatprep.subr.bf16.mxu1 %v17735_v10 }
 0x251   :  { %14567 = vmatpush3.bf16.msra.mxu0 %v16097_v8  ;;  %v16162_v8 = vld [vmem:[#allocation13 + $0x28] ss:$16 sps:$4 sm:$0xff]  }
 0x252   :  { %14587 = vmatpush3.bf16.msra.mxu1 %v16098_v9  ;;  %14568 = vmatprep.subr.bf16.mxu0 %v17735_v10  ;;  %v16167_v9 = vld [vmem:[#allocation13 + $0x44] ss:$16 sps:$4 sm:$0xff]  }
 0x253   :  { %14588 = vmatprep.subr.bf16.mxu1 %v17735_v10 }
 0x255   :  { %14569 = vmatpush3.bf16.msra.mxu0 %v16099_v11  ;;  %v16170_v11 = vld [vmem:[#allocation13 + $0x4c] ss:$16 sps:$4 sm:$0xff]  }
 0x256   :  { %14589 = vmatpush3.bf16.msra.mxu1 %v16100_v12  ;;  %14570 = vmatprep.subr.bf16.mxu0 %v17735_v10  ;;  %v16165_v12 = vld [vmem:[#allocation13 + $0x40] ss:$16 sps:$4 sm:$0xff]  }
 0x257   :  { %14590 = vmatprep.subr.bf16.mxu1 %v17735_v10 }
 0x259   :  { %14571 = vmatpush3.bf16.msra.mxu0 %v16101_v13  ;;  %v16168_v13 = vld [vmem:[#allocation13 + $0x48] ss:$16 sps:$4 sm:$0xff]  }
 0x25a   :  { %14591 = vmatpush3.bf16.msra.mxu1 %v16102_v14  ;;  %14572 = vmatprep.subr.bf16.mxu0 %v17735_v10  ;;  %v16173_v14 = vld [vmem:[#allocation13 + $0x64] ss:$16 sps:$4 sm:$0xff]  }
 0x25b   :  { %14592 = vmatprep.subr.bf16.mxu1 %v17735_v10 }
 0x25d   :  { %14573 = vmatpush3.bf16.msra.mxu0 %v16103_v15  ;;  %v16176_v15 = vld [vmem:[#allocation13 + $0x6c] ss:$16 sps:$4 sm:$0xff]  }
 0x25e   :  { %14593 = vmatpush3.bf16.msra.mxu1 %v16104_v17  ;;  %1982 = vmatprep.subr.bf16.mxu0 %v16107_v18  ;;  %v16174_v17 = vld [vmem:[#allocation13 + $0x68] ss:$16 sps:$4 sm:$0xff]   ;;  %v16179_v18 = vld [vmem:[#allocation13 + $0x84] ss:$16 sps:$4 sm:$0xff]  }
 0x25f   :  { %2023 = vmatprep.subr.bf16.mxu1 %v16110_v19  ;;  %v16182_v19 = vld [vmem:[#allocation13 + $0x8c] ss:$16 sps:$4 sm:$0xff]  }
 0x260   :  { %14575 = vmatmul.mubr.bf16.vlgmr.msra.gmra.mrb[20].mxu0 %v1569_v29  ;;  %v16183_v29 = vld [vmem:[#allocation13 + $0xa0] ss:$16 sps:$4 sm:$0xff]  }
 0x261   :  { %14595 = vmatmul.mubr.bf16.vlgmr.msra.gmra.mrb[20].mxu1 %v1683_v30  ;;  %1983 = vmatpush1.bf16.msra.mxu0 %v16105_v20  ;;  %v16177_v20 = vld [vmem:[#allocation13 + $0x80] ss:$16 sps:$4 sm:$0xff]   ;;  %v16186_v30 = vld [vmem:[#allocation13 + $0xa8] ss:$16 sps:$4 sm:$0xff]  }
 0x262   :  { %2024 = vmatpush1.bf16.msra.mxu1 %v16108_v22  ;;  %1984 = vmatprep.subr.bf16.mxu0 %v16113_v23  ;;  %v16180_v22 = vld [vmem:[#allocation13 + $0x88] ss:$16 sps:$4 sm:$0xff]   ;;  %v16185_v23 = vld [vmem:[#allocation13 + $0xa4] ss:$16 sps:$4 sm:$0xff]  }
 0x263   :  { %2025 = vmatprep.subr.bf16.mxu1 %v16116_v24  ;;  %2014 = vmatprep.mubr.bf16.mxu0 %v17734_v0  ;;  %v16188_v24 = vld [vmem:[#allocation13 + $0xac] ss:$16 sps:$4 sm:$0xff]  }
 0x264   :  { %2055 = vmatprep.mubr.bf16.mxu1 %v17734_v0 }
 0x265   :  { %1985 = vmatpush1.bf16.msra.mxu0 %v16111_v31  ;;  %v16191_v31 = vld [vmem:[#allocation13 + $0xc4] ss:$16 sps:$4 sm:$0xff]  }
 0x266   :  { %2026 = vmatpush1.bf16.msra.mxu1 %v16114_v32  ;;  %1986 = vmatprep.subr.bf16.mxu0 %v16119_v38  ;;  %v16194_v32 = vld [vmem:[#allocation13 + $0xcc] ss:$16 sps:$4 sm:$0xff]   ;;  %v16189_v38 = vld [vmem:[#allocation13 + $0xc0] ss:$16 sps:$4 sm:$0xff]  }
 0x267   :  { %2027 = vmatprep.subr.bf16.mxu1 %v16122_v39  ;;  %v16192_v39 = vld [vmem:[#allocation13 + $0xc8] ss:$16 sps:$4 sm:$0xff]  }
 0x269   :  { %1987 = vmatpush1.bf16.msra.mxu0 %v16117_v40  ;;  %v16197_v40 = vld [vmem:[#allocation13 + $0xe4] ss:$16 sps:$4 sm:$0xff]  }
 0x26a   :  { %2028 = vmatpush1.bf16.msra.mxu1 %v16120_v41  ;;  %1988 = vmatprep.subr.bf16.mxu0 %v16125_v42  ;;  %v16195_v41 = vld [vmem:[#allocation13 + $0xe0] ss:$16 sps:$4 sm:$0xff]   ;;  %v16200_v42 = vld [vmem:[#allocation13 + $0xec] ss:$16 sps:$4 sm:$0xff]  }
 0x26b   :  { %2029 = vmatprep.subr.bf16.mxu1 %v16128_v43  ;;  %v16198_v43 = vld [vmem:[#allocation13 + $0xe8] ss:$16 sps:$4 sm:$0xff]  }
 0x26d   :  { %1989 = vmatpush1.bf16.msra.mxu0 %v16123_v44  ;;  %v16201_v44 = vld [vmem:[#allocation11] sm:$0xff]  }
 0x26e   :  { %2030 = vmatpush1.bf16.msra.mxu1 %v16126_v45  ;;  %1990 = vmatprep.subr.bf16.mxu0 %v16131_v46  ;;  %v16202_v45 = vld [vmem:[#allocation11 + $0x8] sm:$0xff]   ;;  %v16203_v46 = vld [vmem:[#allocation11 + $0x10] sm:$0xff]  }
 0x26f   :  { %2031 = vmatprep.subr.bf16.mxu1 %v16134_v47  ;;  %v16204_v47 = vld [vmem:[#allocation11 + $0x18] sm:$0xff]  }
 0x271   :  { %1991 = vmatpush1.bf16.msra.mxu0 %v16129_v48  ;;  %v16205_v48 = vld [vmem:[#allocation11 + $0x20] sm:$0xff]  }
 0x272   :  { %2032 = vmatpush1.bf16.msra.mxu1 %v16132_v49  ;;  %1992 = vmatprep.subr.bf16.mxu0 %v16137_v50  ;;  %v16206_v49 = vld [vmem:[#allocation11 + $0x28] sm:$0xff]   ;;  %v16207_v50 = vld [vmem:[#allocation11 + $0x30] sm:$0xff]  }
 0x273   :  { %2033 = vmatprep.subr.bf16.mxu1 %v16140_v51  ;;  %v16208_v51 = vld [vmem:[#allocation11 + $0x38] sm:$0xff]  }
 0x275   :  { %1993 = vmatpush1.bf16.msra.mxu0 %v16135_v36  ;;  %v16209_v36 = vld [vmem:[#allocation16] sm:$0xff]  }
 0x276   :  { %2034 = vmatpush1.bf16.msra.mxu1 %v16138_v53  ;;  %1994 = vmatprep.subr.bf16.mxu0 %v16143_v54  ;;  %v16213_v53 = vld [vmem:[#allocation16 + $0x10] sm:$0xff]   ;;  %v16215_v54 = vld [vmem:[#allocation16 + $0x18] sm:$0xff]  }
 0x277   :  { %2035 = vmatprep.subr.bf16.mxu1 %v16146_v55  ;;  %v16217_v55 = vld [vmem:[#allocation16 + $0x20] sm:$0xff]  }
 0x279   :  { %1995 = vmatpush1.bf16.msra.mxu0 %v16141_v56  ;;  %v16219_v56 = vld [vmem:[#allocation16 + $0x28] sm:$0xff]  }
 0x27a   :  { %2036 = vmatpush1.bf16.msra.mxu1 %v16144_v57  ;;  %1996 = vmatprep.subr.bf16.mxu0 %v16149_v58  ;;  %v16221_v57 = vld [vmem:[#allocation16 + $0x30] sm:$0xff]   ;;  %v16223_v58 = vld [vmem:[#allocation16 + $0x38] sm:$0xff]  }
 0x27b   :  { %2037 = vmatprep.subr.bf16.mxu1 %v16152_v60 }
 0x27d   :  { %1997 = vmatpush1.bf16.msra.mxu0 %v16147_v61 }
 0x27e   :  { %2038 = vmatpush1.bf16.msra.mxu1 %v16150_v62  ;;  %2260 = vmatprep.subr.bf16.mxu0 %v16155_v63 }
 0x27f   :  { %2301 = vmatprep.subr.bf16.mxu1 %v16158_v1 }
 0x280   :  { %12934 = vmatmul.mubr.msk.bf16.vlgmr.msra.gmra.mrb[24].mxu0 %vm18098_vm2, %v17737_v7 }
 0x281   :  { %12936 = vmatmul.mubr.msk.bf16.vlgmr.msra.gmra.mrb[24].mxu1 %vm18098_vm2, %v17737_v7  ;;  %2261 = vmatpush1.bf16.msra.mxu0 %v16153_v2 }
 0x282   :  { %2302 = vmatpush1.bf16.msra.mxu1 %v16156_v3  ;;  %2262 = vmatprep.subr.bf16.mxu0 %v16161_v4 }
 0x283   :  { %2303 = vmatprep.subr.bf16.mxu1 %v16164_v5  ;;  %2292 = vmatprep.mubr.bf16.mxu0 %v17734_v0 }
 0x284   :  { %2333 = vmatprep.mubr.bf16.mxu1 %v17734_v0 }
 0x285   :  { %2263 = vmatpush1.bf16.msra.mxu0 %v16159_v6 }
 0x286   :  { %2304 = vmatpush1.bf16.msra.mxu1 %v16162_v8  ;;  %2264 = vmatprep.subr.bf16.mxu0 %v16167_v9 }
 0x287   :  { %2305 = vmatprep.subr.bf16.mxu1 %v16170_v11 }
 0x289   :  { %2265 = vmatpush1.bf16.msra.mxu0 %v16165_v12 }
 0x28a   :  { %2306 = vmatpush1.bf16.msra.mxu1 %v16168_v13  ;;  %2266 = vmatprep.subr.bf16.mxu0 %v16173_v14 }
 0x28b   :  { %2307 = vmatprep.subr.bf16.mxu1 %v16176_v15  ;;  %v16210_v15 = vld [vmem:[#allocation11 + $0x40] sm:$0xff]  }
 0x28d   :  { %2267 = vmatpush1.bf16.msra.mxu0 %v16171_v16 }
 0x28e   :  { %2308 = vmatpush1.bf16.msra.mxu1 %v16174_v17  ;;  %2268 = vmatprep.subr.bf16.mxu0 %v16179_v18 }
 0x28f   :  { %2309 = vmatprep.subr.bf16.mxu1 %v16182_v19 }
 0x291   :  { %2269 = vmatpush1.bf16.msra.mxu0 %v16177_v20 }
 0x292   :  { %2310 = vmatpush1.bf16.msra.mxu1 %v16180_v22  ;;  %2270 = vmatprep.subr.bf16.mxu0 %v16185_v23 }
 0x293   :  { %2311 = vmatprep.subr.bf16.mxu1 %v16188_v24 }
 0x295   :  { %2271 = vmatpush1.bf16.msra.mxu0 %v16183_v29 }
 0x296   :  { %2312 = vmatpush1.bf16.msra.mxu1 %v16186_v30  ;;  %2272 = vmatprep.subr.bf16.mxu0 %v16191_v31 }
 0x297   :  { %2313 = vmatprep.subr.bf16.mxu1 %v16194_v32 }
 0x299   :  { %2273 = vmatpush1.bf16.msra.mxu0 %v16189_v38  ;;  %v16212_v38 = vld [vmem:[#allocation11 + $0x48] sm:$0xff]  }
 0x29a   :  { %2314 = vmatpush1.bf16.msra.mxu1 %v16192_v39  ;;  %2274 = vmatprep.subr.bf16.mxu0 %v16197_v40  ;;  %v16214_v39 = vld [vmem:[#allocation11 + $0x50] sm:$0xff]   ;;  %v16216_v40 = vld [vmem:[#allocation11 + $0x58] sm:$0xff]  }
 0x29b   :  { %2315 = vmatprep.subr.bf16.mxu1 %v16200_v42  ;;  %v16220_v42 = vld [vmem:[#allocation11 + $0x68] sm:$0xff]  }
 0x29d   :  { %2275 = vmatpush1.bf16.msra.mxu0 %v16195_v41  ;;  %v16218_v41 = vld [vmem:[#allocation11 + $0x60] sm:$0xff]  }
 0x29e   :  { %2316 = vmatpush1.bf16.msra.mxu1 %v16198_v43  ;;  %14598 = vmatprep.subr.bf16.mxu0 %v17735_v10  ;;  %v16222_v43 = vld [vmem:[#allocation11 + $0x70] sm:$0xff]  }
 0x29f   :  { %14618 = vmatprep.subr.bf16.mxu1 %v17735_v10 }
 0x2a0   :  { %2293 = vmatmul.mubr.bf16.vlgmr.msra.gmra.mrb[28].mxu0 %v17734_v0 }
 0x2a1   :  { %2334 = vmatmul.mubr.bf16.vlgmr.msra.gmra.mrb[28].mxu1 %v17734_v0  ;;  %14614 = vmatprep.mubr.msk.bf16.mxu0 %vm17736_vm0, %v17735_v10 }
 0x2a2   :  { %14634 = vmatprep.mubr.msk.bf16.mxu1 %vm17736_vm0, %v17735_v10  ;;  %14619 = vmatpush3.bf16.msra.mxu1 %v16201_v44  ;;  %v16224_v44 = vld [vmem:[#allocation11 + $0x78] sm:$0xff]  }
 0x2a3   :  { %14620 = vmatprep.subr.bf16.mxu1 %v17735_v10  ;;  %14599 = vmatpush3.bf16.msra.mxu0 %v16209_v36 }
 0x2a4   :  { %14600 = vmatprep.subr.bf16.mxu0 %v17735_v10 }
 0x2a6   :  { %14621 = vmatpush3.bf16.msra.mxu1 %v16202_v45 }
 0x2a7   :  { %14622 = vmatprep.subr.bf16.mxu1 %v17735_v10  ;;  %14601 = vmatpush3.bf16.msra.mxu0 %v16211_v52  ;;  %v16225_v52 = vld [vmem:[#allocation16 + $0x40] sm:$0xff]  }
 0x2a8   :  { %14602 = vmatprep.subr.bf16.mxu0 %v17735_v10 }
 0x2aa   :  { %14623 = vmatpush3.bf16.msra.mxu1 %v16203_v46 }
 0x2ab   :  { %14624 = vmatprep.subr.bf16.mxu1 %v17735_v10  ;;  %14603 = vmatpush3.bf16.msra.mxu0 %v16213_v53  ;;  %v16226_v53 = vld [vmem:[#allocation11 + $0x80] sm:$0xff]  }
 0x2ac   :  { %14604 = vmatprep.subr.bf16.mxu0 %v17735_v10 }
 0x2ae   :  { %14625 = vmatpush3.bf16.msra.mxu1 %v16204_v47 }
 0x2af   :  { %14626 = vmatprep.subr.bf16.mxu1 %v17735_v10  ;;  %14605 = vmatpush3.bf16.msra.mxu0 %v16215_v54 }
 0x2b0   :  { %14606 = vmatprep.subr.bf16.mxu0 %v17735_v10 }
 0x2b2   :  { %14627 = vmatpush3.bf16.msra.mxu1 %v16205_v48 }
 0x2b3   :  { %14628 = vmatprep.subr.bf16.mxu1 %v17735_v10  ;;  %14607 = vmatpush3.bf16.msra.mxu0 %v16217_v55 }
 0x2b4   :  { %14608 = vmatprep.subr.bf16.mxu0 %v17735_v10 }
 0x2b6   :  { %14629 = vmatpush3.bf16.msra.mxu1 %v16206_v49 }
 0x2b7   :  { %14630 = vmatprep.subr.bf16.mxu1 %v17735_v10  ;;  %14609 = vmatpush3.bf16.msra.mxu0 %v16219_v56 }
 0x2b8   :  { %14610 = vmatprep.subr.bf16.mxu0 %v17735_v10 }
 0x2ba   :  { %14631 = vmatpush3.bf16.msra.mxu1 %v16207_v50 }
 0x2bb   :  { %14632 = vmatprep.subr.bf16.mxu1 %v17735_v10  ;;  %14611 = vmatpush3.bf16.msra.mxu0 %v16221_v57 }
 0x2bc   :  { %14612 = vmatprep.subr.bf16.mxu0 %v17735_v10 }
 0x2be   :  { %14633 = vmatpush3.bf16.msra.mxu1 %v16208_v51 }
 0x2bf   :  { %14658 = vmatprep.subr.bf16.mxu1 %v17735_v10  ;;  %14613 = vmatpush3.bf16.msra.mxu0 %v16223_v58 }
 0x2c0   :  { %14638 = vmatprep.subr.bf16.mxu0 %v17735_v10 }
 0x313   :  { %v18134_v59 = vpop.f32.mrb[16].mxu0 }
 0x314   :  { %v14536_v60 = vpop.f32.mrb[17].mxu0  ;;  %v18136_v61 = vpop.f32.mrb[16].mxu1 }
 0x315   :  { %v1435_v62 = vpop.f32.mrb[18].mxu0  ;;  %v14556_v63 = vpop.f32.mrb[17].mxu1 }
 0x316   :  { %v14537_v1 = vpop.f32.mrb[19].mxu0  ;;  %v1549_v2 = vpop.f32.mrb[18].mxu1  ;;  %v16227_v62 = vld [vmem:[#allocation16 + $0x48] sm:$0xff]  }
 0x317   :  { %v14557_v3 = vpop.f32.mrb[19].mxu1  ;;  %v16228_v63 = vld [vmem:[#allocation11 + $0x88] sm:$0xff]   ;;  %v16229_v1 = vld [vmem:[#allocation16 + $0x50] sm:$0xff]  }
 0x318   :  { %v16230_v2 = vld [vmem:[#allocation11 + $0x90] sm:$0xff]   ;;  %v16231_v3 = vld [vmem:[#allocation16 + $0x58] sm:$0xff]  }
 0x333   :  { %v18138_v4 = vpop.f32.mrb[20].mxu0 }
 0x334   :  { %v14576_v5 = vpop.f32.mrb[21].mxu0  ;;  %v18140_v6 = vpop.f32.mrb[20].mxu1 }
 0x335   :  { %v1663_v8 = vpop.f32.mrb[22].mxu0  ;;  %v14596_v9 = vpop.f32.mrb[21].mxu1  ;;  %v16232_v5 = vld [vmem:[#allocation11 + $0x98] sm:$0xff]  }
 0x336   :  { %v14577_v11 = vpop.f32.mrb[23].mxu0  ;;  %v1777_v12 = vpop.f32.mrb[22].mxu1  ;;  %v16233_v8 = vld [vmem:[#allocation16 + $0x60] sm:$0xff]  }
 0x337   :  { %v14597_v13 = vpop.f32.mrb[23].mxu1  ;;  %v16234_v9 = vld [vmem:[#allocation11 + $0xa0] sm:$0xff]   ;;  %v16235_v11 = vld [vmem:[#allocation16 + $0x68] sm:$0xff]  }
 0x338   :  { %v16236_v12 = vld [vmem:[#allocation11 + $0xa8] sm:$0xff]   ;;  %v16237_v13 = vld [vmem:[#allocation16 + $0x70] sm:$0xff]  }
 0x353   :  { %v2016_v14 = vpop.f32.mrb[24].mxu0 }
 0x354   :  { %v2064_v16 = vmul.f32 %v2016_v14, %v18051_v25  ;;  %v2018_v17 = vpop.f32.mrb[25].mxu0  ;;  %v2057_v18 = vpop.f32.mrb[24].mxu1  ;;  %v16238_v14 = vld [vmem:[#allocation11 + $0xb0] sm:$0xff]  }
 0x355   :  { %v2065_v19 = vmul.f32 %v2018_v17, %v18055_v27  ;;  %v18145_v20 = vmul.f32 %v2057_v18, %v18053_v26  ;;  %v2020_v22 = vpop.f32.mrb[26].mxu0  ;;  %v2059_v23 = vpop.f32.mrb[25].mxu1  ;;  %v16241_v17 = vld [vmem:[#allocation16 + $0x80] sm:$0xff]  }
 0x356   :  { %v2362_v24 = vpack.c.bf16 %v2064_v16, %v2064_v16  ;;  %v18148_v29 = vmul.f32 %v2059_v23, %v18057_v28  ;;  %v2021_v30 = vpop.f32.mrb[27].mxu0  ;;  %v2061_v31 = vpop.f32.mrb[26].mxu1  ;;  %v16240_v16 = vld [vmem:[#allocation11 + $0xb8] sm:$0xff]   ;;  %v16242_v18 = vld [vmem:[#allocation11 + $0xc0] sm:$0xff]   ;;  %v16243_v23 = vld [vmem:[#allocation16 + $0x88] sm:$0xff]  }
 0x357   :  { %v2062_v32 = vpop.f32.mrb[27].mxu1  ;;  %v2574_v54 = vpack.c.bf16 %v2065_v19, %v2065_v19  ;;  %v2787_v19 = vpack.c.bf16 %v18145_v20, %v18145_v20  ;;  %v16245_v20 = vld [vmem:[#allocation16 + $0x90] sm:$0xff]   ;;  %v16247_v31 = vld [vmem:[#allocation16 + $0x98] sm:$0xff]  }
 0x358   :  { %14635 = vmatmul.mubr.bf16.vlgmr.msra.gmra.mrb[32].mxu1 %v2362_v24  ;;  %v16244_v24 = vld [vmem:[#allocation11 + $0xc8] sm:$0xff]   ;;  %v16246_v30 = vld [vmem:[#allocation11 + $0xd0] sm:$0xff]   ;;  %v16248_v32 = vld [vmem:[#allocation11 + $0xd8] sm:$0xff]  }
 0x359   :  { %14659 = vmatpush3.bf16.msra.mxu1 %v16210_v15  ;;  %14674 = vmatprep.mubr.msk.bf16.mxu1 %vm17736_vm0, %v17735_v10  ;;  %v16239_v15 = vld [vmem:[#allocation16 + $0x78] sm:$0xff]  }
 0x35a   :  { %14660 = vmatprep.subr.bf16.mxu1 %v17735_v10 }
 0x35d   :  { %14661 = vmatpush3.bf16.msra.mxu1 %v16212_v38  ;;  %v16249_v38 = vld [vmem:[#allocation16 + $0xa0] sm:$0xff]  }
 0x35e   :  { %14662 = vmatprep.subr.bf16.mxu1 %v17735_v10 }
 0x361   :  { %14663 = vmatpush3.bf16.msra.mxu1 %v16214_v39  ;;  %v16250_v39 = vld [vmem:[#allocation11 + $0xe0] sm:$0xff]  }
 0x362   :  { %14664 = vmatprep.subr.bf16.mxu1 %v17735_v10 }
 0x365   :  { %14665 = vmatpush3.bf16.msra.mxu1 %v16216_v40  ;;  %v16251_v40 = vld [vmem:[#allocation16 + $0xa8] sm:$0xff]  }
 0x366   :  { %14666 = vmatprep.subr.bf16.mxu1 %v17735_v10 }
 0x369   :  { %14667 = vmatpush3.bf16.msra.mxu1 %v16218_v41  ;;  %v16252_v41 = vld [vmem:[#allocation11 + $0xe8] sm:$0xff]  }
 0x36a   :  { %14668 = vmatprep.subr.bf16.mxu1 %v17735_v10 }
 0x36d   :  { %14669 = vmatpush3.bf16.msra.mxu1 %v16220_v42  ;;  %v16253_v42 = vld [vmem:[#allocation16 + $0xb0] sm:$0xff]  }
 0x36e   :  { %14670 = vmatprep.subr.bf16.mxu1 %v17735_v10 }
 0x371   :  { %14671 = vmatpush3.bf16.msra.mxu1 %v16222_v43  ;;  %v16254_v43 = vld [vmem:[#allocation11 + $0xf0] sm:$0xff]  }
 0x372   :  { %14672 = vmatprep.subr.bf16.mxu1 %v17735_v10 }
 0x373   :  { %v2294_v45 = vpop.f32.mrb[28].mxu0 }
 0x374   :  { %v2342_v46 = vmul.f32 %v2294_v45, %v18059_v33  ;;  %v2296_v47 = vpop.f32.mrb[29].mxu0  ;;  %v2335_v48 = vpop.f32.mrb[28].mxu1  ;;  %v16256_v45 = vld [vmem:[#allocation11 + $0xf8] sm:$0xff]  }
 0x375   :  { %v18161_v49 = vmul.f32 %v2296_v47, %v18063_v35  ;;  %v18164_v50 = vmul.f32 %v2335_v48, %v18061_v34  ;;  %14673 = vmatpush3.bf16.msra.mxu1 %v16224_v44  ;;  %v2298_v51 = vpop.f32.mrb[30].mxu0  ;;  %v2337_v36 = vpop.f32.mrb[29].mxu1  ;;  %v16255_v44 = vld [vmem:[#allocation16 + $0xb8] sm:$0xff]   ;;  %v3000_v47 = vpack.c.bf16 %v18148_v29, %v18148_v29 }
 0x376   :  { %v2379_v55 = vpack.c.bf16 %v2342_v46, %v2342_v46  ;;  %v18167_v56 = vmul.f32 %v2337_v36, %v18065_v37  ;;  %v2299_v57 = vpop.f32.mrb[31].mxu0  ;;  %14698 = vmatprep.subr.bf16.mxu1 %v17735_v10  ;;  %v2339_v58 = vpop.f32.mrb[30].mxu1  ;;  %v16257_v46 = vld [vmem:[#allocation16 + $0xc0] sm:$0xff]   ;;  %v16259_v51 = vld [vmem:[#allocation16 + $0xd0] sm:$0xff]   ;;  %v16260_v29 = vld [vmem:[#allocation16 + $0xd8] sm:$0xff]  }
 0x377   :  { %v2340_v60 = vpop.f32.mrb[31].mxu1  ;;  %v2592_v22 = vpack.c.bf16 %v18161_v49, %v18161_v49  ;;  %v2805_v48 = vpack.c.bf16 %v18164_v50, %v18164_v50  ;;  %v16258_v49 = vld [vmem:[#allocation16 + $0xc8] sm:$0xff]   ;;  %v16261_v50 = vld [vmem:[#allocation16 + $0xe0] sm:$0xff]  }
 0x378   :  { %14675 = vmatmul.mubr.bf16.vlgmr.msra.gmra.mrb[36].mxu1 %v2574_v54  ;;  %14615 = vmatmul.mubr.bf16.vlgmr.msra.gmra.mrb[32].mxu0 %v2379_v55  ;;  %v16262_v36 = vld [vmem:[#allocation16 + $0xe8] sm:$0xff]   ;;  %v3018_v54 = vpack.c.bf16 %v18167_v56, %v18167_v56  ;;  %v16265_v60 = vld [vmem:[#allocation22] sm:$0xff]   ;;  %v16268_v56 = vld [vmem:[#allocation22 + $0x18] sm:$0xff]  }
 0x379   :  { %14639 = vmatpush3.bf16.msra.mxu0 %v16225_v52  ;;  %14699 = vmatpush3.bf16.msra.mxu1 %v16226_v53  ;;  %v16263_v52 = vld [vmem:[#allocation16 + $0xf0] sm:$0xff]   ;;  %v16264_v53 = vld [vmem:[#allocation16 + $0xf8] sm:$0xff]  }
 0x37a   :  { %14640 = vmatprep.subr.bf16.mxu0 %v17735_v10  ;;  %14700 = vmatprep.subr.bf16.mxu1 %v17735_v10 }
 0x37b   :  { %14654 = vmatprep.mubr.msk.bf16.mxu0 %vm17736_vm0, %v17735_v10  ;;  %14714 = vmatprep.mubr.msk.bf16.mxu1 %vm17736_vm0, %v17735_v10 }
 0x37d   :  { %14641 = vmatpush3.bf16.msra.mxu0 %v16227_v62  ;;  %14701 = vmatpush3.bf16.msra.mxu1 %v16228_v63  ;;  %v16266_v63 = vld [vmem:[#allocation22 + $0x8] sm:$0xff]  }
 0x37e   :  { %14642 = vmatprep.subr.bf16.mxu0 %v17735_v10  ;;  %14702 = vmatprep.subr.bf16.mxu1 %v17735_v10 }
 0x381   :  { %14643 = vmatpush3.bf16.msra.mxu0 %v16229_v1  ;;  %14703 = vmatpush3.bf16.msra.mxu1 %v16230_v2  ;;  %v16267_v1 = vld [vmem:[#allocation22 + $0x10] sm:$0xff]   ;;  %v16269_v2 = vld [vmem:[#allocation22 + $0x20] sm:$0xff]  }
 0x382   :  { %14644 = vmatprep.subr.bf16.mxu0 %v17735_v10  ;;  %14704 = vmatprep.subr.bf16.mxu1 %v17735_v10 }
 0x385   :  { %14645 = vmatpush3.bf16.msra.mxu0 %v16231_v3  ;;  %14705 = vmatpush3.bf16.msra.mxu1 %v16232_v5  ;;  %v16270_v3 = vld [vmem:[#allocation22 + $0x28] sm:$0xff]   ;;  %v16271_v5 = vld [vmem:[#allocation22 + $0x30] sm:$0xff]  }
 0x386   :  { %14646 = vmatprep.subr.bf16.mxu0 %v17735_v10  ;;  %14706 = vmatprep.subr.bf16.mxu1 %v17735_v10 }
 0x389   :  { %14647 = vmatpush3.bf16.msra.mxu0 %v16233_v8  ;;  %14707 = vmatpush3.bf16.msra.mxu1 %v16234_v9  ;;  %v16272_v8 = vld [vmem:[#allocation22 + $0x38] sm:$0xff]  }
 0x38a   :  { %14648 = vmatprep.subr.bf16.mxu0 %v17735_v10  ;;  %14708 = vmatprep.subr.bf16.mxu1 %v17735_v10 }
 0x38d   :  { %14649 = vmatpush3.bf16.msra.mxu0 %v16235_v11  ;;  %14709 = vmatpush3.bf16.msra.mxu1 %v16236_v12 }
 0x38e   :  { %14650 = vmatprep.subr.bf16.mxu0 %v17735_v10  ;;  %14710 = vmatprep.subr.bf16.mxu1 %v17735_v10 }
 0x391   :  { %14651 = vmatpush3.bf16.msra.mxu0 %v16237_v13  ;;  %14711 = vmatpush3.bf16.msra.mxu1 %v16238_v14 }
 0x392   :  { %14652 = vmatprep.subr.bf16.mxu0 %v17735_v10  ;;  %14712 = vmatprep.subr.bf16.mxu1 %v17735_v10 }
 0x395   :  { %14653 = vmatpush3.bf16.msra.mxu0 %v16239_v15  ;;  %14713 = vmatpush3.bf16.msra.mxu1 %v16240_v16 }
 0x396   :  { %14678 = vmatprep.subr.bf16.mxu0 %v17735_v10  ;;  %14738 = vmatprep.subr.bf16.mxu1 %v17735_v10 }
 0x398   :  { %14655 = vmatmul.mubr.bf16.vlgmr.msra.gmra.mrb[36].mxu0 %v2592_v22  ;;  %14715 = vmatmul.mubr.bf16.vlgmr.msra.gmra.mrb[40].mxu1 %v2787_v19 }
 0x399   :  { %14679 = vmatpush3.bf16.msra.mxu0 %v16241_v17  ;;  %14739 = vmatpush3.bf16.msra.mxu1 %v16242_v18 }
 0x39a   :  { %14680 = vmatprep.subr.bf16.mxu0 %v17735_v10  ;;  %14740 = vmatprep.subr.bf16.mxu1 %v17735_v10 }
 0x39b   :  { %14694 = vmatprep.mubr.msk.bf16.mxu0 %vm17736_vm0, %v17735_v10  ;;  %14754 = vmatprep.mubr.msk.bf16.mxu1 %vm17736_vm0, %v17735_v10 }
 0x39d   :  { %14681 = vmatpush3.bf16.msra.mxu0 %v16243_v23  ;;  %14741 = vmatpush3.bf16.msra.mxu1 %v16244_v24 }
 0x39e   :  { %14682 = vmatprep.subr.bf16.mxu0 %v17735_v10  ;;  %14742 = vmatprep.subr.bf16.mxu1 %v17735_v10 }
 0x3a1   :  { %14683 = vmatpush3.bf16.msra.mxu0 %v16245_v20  ;;  %14743 = vmatpush3.bf16.msra.mxu1 %v16246_v30 }
 0x3a2   :  { %14684 = vmatprep.subr.bf16.mxu0 %v17735_v10  ;;  %14744 = vmatprep.subr.bf16.mxu1 %v17735_v10 }
 0x3a5   :  { %14685 = vmatpush3.bf16.msra.mxu0 %v16247_v31  ;;  %14745 = vmatpush3.bf16.msra.mxu1 %v16248_v32 }
 0x3a6   :  { %14686 = vmatprep.subr.bf16.mxu0 %v17735_v10  ;;  %14746 = vmatprep.subr.bf16.mxu1 %v17735_v10 }
 0x3a9   :  { %14687 = vmatpush3.bf16.msra.mxu0 %v16249_v38  ;;  %14747 = vmatpush3.bf16.msra.mxu1 %v16250_v39 }
 0x3aa   :  { %14688 = vmatprep.subr.bf16.mxu0 %v17735_v10  ;;  %14748 = vmatprep.subr.bf16.mxu1 %v17735_v10 }
 0x3ad   :  { %14689 = vmatpush3.bf16.msra.mxu0 %v16251_v40  ;;  %14749 = vmatpush3.bf16.msra.mxu1 %v16252_v41 }
 0x3ae   :  { %14690 = vmatprep.subr.bf16.mxu0 %v17735_v10  ;;  %14750 = vmatprep.subr.bf16.mxu1 %v17735_v10 }
 0x3b1   :  { %14691 = vmatpush3.bf16.msra.mxu0 %v16253_v42  ;;  %14751 = vmatpush3.bf16.msra.mxu1 %v16254_v43 }
 0x3b2   :  { %14692 = vmatprep.subr.bf16.mxu0 %v17735_v10  ;;  %14752 = vmatprep.subr.bf16.mxu1 %v17735_v10 }
 0x3b5   :  { %14693 = vmatpush3.bf16.msra.mxu0 %v16255_v44  ;;  %14753 = vmatpush3.bf16.msra.mxu1 %v16256_v45 }
 0x3b6   :  { %14718 = vmatprep.subr.bf16.mxu0 %v17735_v10 }
 0x3b8   :  { %14695 = vmatmul.mubr.bf16.vlgmr.msra.gmra.mrb[40].mxu0 %v2805_v48  ;;  %14755 = vmatmul.mubr.bf16.vlgmr.msra.gmra.mrb[44].mxu1 %v3000_v47  ;;  %v12871_v48 = vld [vmem:[%s19170_s12 + $0x1] ss:$0 sm:$0xff] }
 0x3b9   :  { %14719 = vmatpush3.bf16.msra.mxu0 %v16257_v46  ;;  %14734 = vmatprep.mubr.msk.bf16.mxu0 %vm17736_vm0, %v17735_v10 }
 0x3ba   :  { %14720 = vmatprep.subr.bf16.mxu0 %v17735_v10  ;;  %3580 = vmatprep.mubr.bf16.mxu1 %v17734_v0 }
 0x3bd   :  { %14721 = vmatpush3.bf16.msra.mxu0 %v16258_v49  ;;  %v12861_v49 = vld [vmem:[%s19170_s12] ss:$0 sm:$0xff] }
 0x3be   :  { %14722 = vmatprep.subr.bf16.mxu0 %v17735_v10 }
 0x3c1   :  { %14723 = vmatpush3.bf16.msra.mxu0 %v16259_v51  ;;  %v18246_v51 = vadd.f32 %v12871_v48, %v18136_v61  ;;  %v16279_v48 = vld [vmem:[#allocation8 + $0x20] ss:$16 sps:$4 sm:$0xff]  }
 0x3c2   :  { %14724 = vmatprep.subr.bf16.mxu0 %v17735_v10 }
 0x3c5   :  { %14725 = vmatpush3.bf16.msra.mxu0 %v16260_v29  ;;  %v18249_v29 = vadd.f32 %v12861_v49, %v18134_v59  ;;  %v16282_v49 = vld [vmem:[#allocation8 + $0x28] ss:$16 sps:$4 sm:$0xff]  }
 0x3c6   :  { %14726 = vmatprep.subr.bf16.mxu0 %v17735_v10 }
 0x3c9   :  { %14727 = vmatpush3.bf16.msra.mxu0 %v16261_v50 }
 0x3ca   :  { %14728 = vmatprep.subr.bf16.mxu0 %v17735_v10 }
 0x3cd   :  { %14729 = vmatpush3.bf16.msra.mxu0 %v16262_v36 }
 0x3ce   :  { %14730 = vmatprep.subr.bf16.mxu0 %v17735_v10 }
 0x3d1   :  { %14731 = vmatpush3.bf16.msra.mxu0 %v16263_v52 }
 0x3d2   :  { %14732 = vmatprep.subr.bf16.mxu0 %v17735_v10 }
 0x3d5   :  { %14733 = vmatpush3.bf16.msra.mxu0 %v16264_v53 }
 0x3d6   :  { %14758 = vmatprep.subr.bf16.mxu0 %v17735_v10 }
 0x3d8   :  { %14735 = vmatmul.mubr.bf16.vlgmr.msra.gmra.mrb[44].mxu0 %v3018_v54  ;;  %v12881_v54 = vld [vmem:[%s19170_s12 + $0x2] ss:$0 sm:$0xff] }
 0x3d9   :  { %14774 = vmatprep.mubr.msk.bf16.mxu0 %vm17736_vm0, %v17735_v10  ;;  %14759 = vmatpush3.bf16.msra.mxu0 %v16265_v60 }
 0x3da   :  { %14760 = vmatprep.subr.bf16.mxu0 %v17735_v10 }
 0x3dd   :  { %14761 = vmatpush3.bf16.msra.mxu0 %v16266_v63 }
 0x3de   :  { %14762 = vmatprep.subr.bf16.mxu0 %v17735_v10 }
 0x3e1   :  { %14763 = vmatpush3.bf16.msra.mxu0 %v16267_v1 }
 0x3e2   :  { %14764 = vmatprep.subr.bf16.mxu0 %v17735_v10 }
 0x3e5   :  { %14765 = vmatpush3.bf16.msra.mxu0 %v16268_v56 }
 0x3e6   :  { %14766 = vmatprep.subr.bf16.mxu0 %v17735_v10 }
 0x3e9   :  { %14767 = vmatpush3.bf16.msra.mxu0 %v16269_v2 }
 0x3ea   :  { %14768 = vmatprep.subr.bf16.mxu0 %v17735_v10 }
 0x3ed   :  { %14769 = vmatpush3.bf16.msra.mxu0 %v16270_v3 }
 0x3ee   :  { %14770 = vmatprep.subr.bf16.mxu0 %v17735_v10 }
 0x3f1   :  { %14771 = vmatpush3.bf16.msra.mxu0 %v16271_v5 }
 0x3f2   :  { %14772 = vmatprep.subr.bf16.mxu0 %v17735_v10 }
 0x3f5   :  { %14773 = vmatpush3.bf16.msra.mxu0 %v16272_v8 }
 0x42b   :  { %v2550_v55 = vpop.f32.mrb[32].mxu1 }
 0x42c   :  { %v14636_v57 = vpop.f32.mrb[33].mxu1 }
 0x42d   :  { %v2553_v58 = vpop.f32.mrb[34].mxu1 }
 0x42e   :  { %v14637_v62 = vpop.f32.mrb[35].mxu1  ;;  %v12891_v58 = vld [vmem:[%s19170_s12 + $0x3] ss:$0 sm:$0xff] }
 0x42f   :  { %v18264_v56 = vadd.f32 %v12891_v58, %v18140_v6  ;;  %v16299_v58 = vld [vmem:[#allocation8 + $0x84] ss:$16 sps:$4 sm:$0xff]  }
 0x44b   :  { %v2763_v9 = vpop.f32.mrb[36].mxu1  ;;  %v2462_v11 = vpop.f32.mrb[32].mxu0 }
 0x44c   :  { %v2551_v12 = vadd.f32 %v2550_v55, %v2462_v11  ;;  %v14676_v13 = vpop.f32.mrb[37].mxu1  ;;  %v14616_v14 = vpop.f32.mrb[33].mxu0  ;;  %v18257_v55 = vadd.f32 %v12881_v54, %v18138_v4  ;;  %v16293_v54 = vld [vmem:[#allocation8 + $0x64] ss:$16 sps:$4 sm:$0xff]  }
 0x44d   :  { %v2766_v15 = vpop.f32.mrb[38].mxu1  ;;  %v2465_v16 = vpop.f32.mrb[34].mxu0 }
 0x44e   :  { %v14677_v17 = vpop.f32.mrb[39].mxu1  ;;  %v14617_v18 = vpop.f32.mrb[35].mxu0  ;;  %v2556_v36 = vadd.f32 %v2551_v12, %v18249_v29 }
 0x450   :  { %v13033_v53 = vmul.f32 -1.442695, %v2556_v36  ;;  %v16290_v36 = vld [vmem:[#allocation8 + $0x4c] ss:$16 sps:$4 sm:$0xff]  }
 0x46b   :  { %v2675_v19 = vpop.f32.mrb[36].mxu0  ;;  %v2976_v22 = vpop.f32.mrb[40].mxu1 }
 0x46c   :  { %v2764_v23 = vadd.f32 %v2763_v9, %v2675_v19  ;;  %v14656_v24 = vpop.f32.mrb[37].mxu0  ;;  %v14716_v20 = vpop.f32.mrb[41].mxu1 }
 0x46d   :  { %v2678_v30 = vpop.f32.mrb[38].mxu0  ;;  %v2979_v31 = vpop.f32.mrb[42].mxu1 }
 0x46e   :  { %v14657_v32 = vpop.f32.mrb[39].mxu0  ;;  %v14717_v38 = vpop.f32.mrb[43].mxu1  ;;  %v2769_v50 = vadd.f32 %v2764_v23, %v18246_v51  ;;  %v13036_v23 = vld [vmem:[%s19172_s14] ss:$0 sm:$0xff] }
 0x470   :  { %v13034_v52 = vmul.f32 -1.442695, %v2769_v50  ;;  %v16287_v50 = vld [vmem:[#allocation8 + $0x44] ss:$16 sps:$4 sm:$0xff]  }
 0x472   :  { %17281 = vpow2.f32 %v13034_v52  ;;  %v16285_v52 = vld [vmem:[#allocation8 + $0x40] ss:$16 sps:$4 sm:$0xff]  }
 0x473   :  { %17283 = vpow2.f32 %v13033_v53  ;;  %v16288_v53 = vld [vmem:[#allocation8 + $0x48] ss:$16 sps:$4 sm:$0xff]  }
 0x47c   :  { %v17282_v57 = vpop.eup %17281 }
 0x47d   :  { %v17284_v59 = vpop.eup %17283  ;;  %v3205_v62 = vadd.f32 1.0, %v17282_v57  ;;  %v16291_v57 = vld [vmem:[#allocation8 + $0x60] ss:$16 sps:$4 sm:$0xff]  }
 0x47e   :  { %v3199_v63 = vadd.f32 1.0, %v17284_v59  ;;  %v16294_v59 = vld [vmem:[#allocation8 + $0x68] ss:$16 sps:$4 sm:$0xff]  }
 0x48b   :  { %v2888_v39 = vpop.f32.mrb[40].mxu0  ;;  %v3189_v40 = vpop.f32.mrb[44].mxu1 }
 0x48c   :  { %v2977_v41 = vadd.f32 %v2976_v22, %v2888_v39  ;;  %v14696_v42 = vpop.f32.mrb[41].mxu0  ;;  %v14756_v43 = vpop.f32.mrb[45].mxu1 }
 0x48d   :  { %v2891_v44 = vpop.f32.mrb[42].mxu0  ;;  %v3192_v45 = vpop.f32.mrb[46].mxu1  ;;  %v16273_v42 = vld [vmem:[#allocation8] ss:$16 sps:$4 sm:$0xff]   ;;  %v16275_v43 = vld [vmem:[#allocation8 + $0x4] ss:$16 sps:$4 sm:$0xff]  }
 0x48e   :  { %v14697_v46 = vpop.f32.mrb[43].mxu0  ;;  %v14757_v47 = vpop.f32.mrb[47].mxu1  ;;  %v2982_v61 = vadd.f32 %v2977_v41, %v18257_v55  ;;  %v16276_v44 = vld [vmem:[#allocation8 + $0x8] ss:$16 sps:$4 sm:$0xff]   ;;  %v16278_v45 = vld [vmem:[#allocation8 + $0xc] ss:$16 sps:$4 sm:$0xff]   ;;  %3548 = vmatprep.subr.bf16.mxu1 %v16275_v43 }
 0x48f   :  { %v16281_v46 = vld [vmem:[#allocation8 + $0x24] ss:$16 sps:$4 sm:$0xff]   ;;  %v16284_v47 = vld [vmem:[#allocation8 + $0x2c] ss:$16 sps:$4 sm:$0xff]   ;;  %3589 = vmatprep.subr.bf16.mxu0 %v16278_v45  ;;  %3549 = vmatpush1.bf16.msra.mxu1 %v16273_v42  ;;  %v16327_v43 = vld [vmem:[#allocation13 + $0x20] ss:$16 sps:$4 sm:$0xff]  }
 0x490   :  { %v13035_v60 = vmul.f32 -1.442695, %v2982_v61  ;;  %3550 = vmatprep.subr.bf16.mxu1 %v16281_v46  ;;  %v16296_v61 = vld [vmem:[#allocation8 + $0x6c] ss:$16 sps:$4 sm:$0xff]   ;;  %v16335_v45 = vld [vmem:[#allocation13 + $0x44] ss:$16 sps:$4 sm:$0xff]  }
 0x491   :  { %v16332_v42 = vld [vmem:[#allocation13 + $0x2c] ss:$16 sps:$4 sm:$0xff]  }
 0x492   :  { %17285 = vpow2.f32 %v13035_v60  ;;  %v16302_v60 = vld [vmem:[#allocation8 + $0x8c] ss:$16 sps:$4 sm:$0xff]  }
 0x493   :  { %17287 = vrcp.f32 %v3205_v62  ;;  %3551 = vmatpush1.bf16.msra.mxu1 %v16279_v48  ;;  %v16297_v62 = vld [vmem:[#allocation8 + $0x80] ss:$16 sps:$4 sm:$0xff]   ;;  %v16338_v46 = vld [vmem:[#allocation13 + $0x4c] ss:$16 sps:$4 sm:$0xff]   ;;  %v16336_v48 = vld [vmem:[#allocation13 + $0x48] ss:$16 sps:$4 sm:$0xff]  }
 0x494   :  { %17289 = vrcp.f32 %v3199_v63  ;;  %3552 = vmatprep.subr.bf16.mxu1 %v16287_v50  ;;  %v16300_v63 = vld [vmem:[#allocation8 + $0x88] ss:$16 sps:$4 sm:$0xff]   ;;  %v16344_v50 = vld [vmem:[#allocation13 + $0x6c] ss:$16 sps:$4 sm:$0xff]  }
 0x497   :  { %3553 = vmatpush1.bf16.msra.mxu1 %v16285_v52  ;;  %v16342_v52 = vld [vmem:[#allocation13 + $0x68] ss:$16 sps:$4 sm:$0xff]  }
 0x498   :  { %3554 = vmatprep.subr.bf16.mxu1 %v16293_v54  ;;  %v16350_v54 = vld [vmem:[#allocation13 + $0x8c] ss:$16 sps:$4 sm:$0xff]  }
 0x49b   :  { %3555 = vmatpush1.bf16.msra.mxu1 %v16291_v57  ;;  %v16348_v57 = vld [vmem:[#allocation13 + $0x88] ss:$16 sps:$4 sm:$0xff]  }
 0x49c   :  { %v17286_v9 = vpop.eup %17285  ;;  %3556 = vmatprep.subr.bf16.mxu1 %v16299_v58  ;;  %v16356_v58 = vld [vmem:[#allocation13 + $0xac] ss:$16 sps:$4 sm:$0xff]  }
 0x49d   :  { %v17288_v11 = vpop.eup %17287  ;;  %v3211_v14 = vadd.f32 1.0, %v17286_v9  ;;  %v16309_v9 = vld [vmem:[#allocation8 + $0xc0] ss:$16 sps:$4 sm:$0xff]  }
 0x49e   :  { %v17290_v12 = vpop.eup %17289  ;;  %v3215_v15 = vmul.f32 0.0, %v17288_v11  ;;  %v16312_v11 = vld [vmem:[#allocation8 + $0xc8] ss:$16 sps:$4 sm:$0xff]  }
 0x49f   :  { %3557 = vmatpush1.bf16.msra.mxu1 %v16297_v62  ;;  %v16354_v62 = vld [vmem:[#allocation13 + $0xa8] ss:$16 sps:$4 sm:$0xff]  }
 0x4ab   :  { %v3101_v1 = vpop.f32.mrb[44].mxu0 }
 0x4ac   :  { %v3190_v2 = vadd.f32 %v3189_v40, %v3101_v1  ;;  %v14736_v3 = vpop.f32.mrb[45].mxu0  ;;  %v16305_v1 = vld [vmem:[#allocation8 + $0xa4] ss:$16 sps:$4 sm:$0xff]  }
 0x4ad   :  { %v3104_v4 = vpop.f32.mrb[46].mxu0  ;;  %v16303_v3 = vld [vmem:[#allocation8 + $0xa0] ss:$16 sps:$4 sm:$0xff]   ;;  %3558 = vmatprep.subr.bf16.mxu1 %v16305_v1  ;;  %v16362_v1 = vld [vmem:[#allocation13 + $0xcc] ss:$16 sps:$4 sm:$0xff]  }
 0x4ae   :  { %v3195_v5 = vadd.f32 %v3190_v2, %v18264_v56  ;;  %v14737_v8 = vpop.f32.mrb[47].mxu0  ;;  %v16308_v2 = vld [vmem:[#allocation8 + $0xac] ss:$16 sps:$4 sm:$0xff]   ;;  %v16306_v4 = vld [vmem:[#allocation8 + $0xa8] ss:$16 sps:$4 sm:$0xff]   ;;  %3559 = vmatpush1.bf16.msra.mxu1 %v16303_v3 }
 0x4af   :  { %v16314_v8 = vld [vmem:[#allocation8 + $0xcc] ss:$16 sps:$4 sm:$0xff]   ;;  %v16360_v3 = vld [vmem:[#allocation13 + $0xc8] ss:$16 sps:$4 sm:$0xff]  }
 0x4b0   :  { %17291 = vtanh.f32 %v3195_v5  ;;  %v16311_v5 = vld [vmem:[#allocation8 + $0xc4] ss:$16 sps:$4 sm:$0xff]  }
 0x4b1   :  { %17293 = vrcp.f32 %v3211_v14  ;;  %3560 = vmatprep.subr.bf16.mxu1 %v16311_v5  ;;  %v16368_v5 = vld [vmem:[#allocation13 + $0xec] ss:$16 sps:$4 sm:$0xff]  }
 0x4b2   :  { %3561 = vmatpush1.bf16.msra.mxu1 %v16309_v9  ;;  %v16366_v9 = vld [vmem:[#allocation13 + $0xe8] ss:$16 sps:$4 sm:$0xff]  }
 0x4ba   :  { %v17292_v13 = vpop.eup %17291 }
 0x4bb   :  { %v3216_v16 = vmul.f32 %v17292_v13, %v17290_v12  ;;  %v17294_v6 = vpop.eup %17293 }
 0x4bd   :  { %v18267_v17 = vadd.f32 %v3216_v16, %v3215_v15  ;;  %v16317_v16 = vld [vmem:[#allocation8 + $0xe4] ss:$16 sps:$4 sm:$0xff]  }
 0x4be   :  { %3562 = vmatprep.subr.bf16.mxu1 %v16317_v16  ;;  %v16375_v16 = vld [vmem:[#allocation11 + $0x30] sm:$0xff]  }
 0x4bf   :  { %17295 = vtanh.f32 %v18267_v17 }
 0x4c9   :  { %v17296_v18 = vpop.eup %17295 }
 0x4ca   :  { %v3219_v19 = vmul.f32 %v17296_v18, %v17294_v6  ;;  %v16320_v6 = vld [vmem:[#allocation8 + $0xec] ss:$16 sps:$4 sm:$0xff]   ;;  %v16315_v18 = vld [vmem:[#allocation8 + $0xe0] ss:$16 sps:$4 sm:$0xff]  }
 0x4cb   :  { %3563 = vmatpush1.bf16.msra.mxu1 %v16315_v18  ;;  %v16377_v18 = vld [vmem:[#allocation16] sm:$0xff]  }
 0x4cc   :  { %v18270_v22 = vpack.c.bf16 %v3219_v19, %v3219_v19  ;;  %v16318_v19 = vld [vmem:[#allocation8 + $0xe8] ss:$16 sps:$4 sm:$0xff]  }
 0x4ce   :  { %14775 = vmatmul.mubr.bf16.vlgmr.msra.gmra.mrb[48].mxu0 %v18270_v22 }
 0x4cf   :  { %3621 = vmatprep.mubr.bf16.mxu0 %v17734_v0  ;;  %3590 = vmatpush1.bf16.msra.mxu0 %v16276_v44  ;;  %v16330_v44 = vld [vmem:[#allocation13 + $0x28] ss:$16 sps:$4 sm:$0xff]  }
 0x4d0   :  { %3591 = vmatprep.subr.bf16.mxu0 %v16284_v47  ;;  %v16333_v47 = vld [vmem:[#allocation13 + $0x40] ss:$16 sps:$4 sm:$0xff]  }
 0x4d3   :  { %3592 = vmatpush1.bf16.msra.mxu0 %v16282_v49  ;;  %v16341_v49 = vld [vmem:[#allocation13 + $0x64] ss:$16 sps:$4 sm:$0xff]  }
 0x4d4   :  { %3593 = vmatprep.subr.bf16.mxu0 %v16290_v36  ;;  %v16339_v36 = vld [vmem:[#allocation13 + $0x60] ss:$16 sps:$4 sm:$0xff]  }
 0x4d7   :  { %3594 = vmatpush1.bf16.msra.mxu0 %v16288_v53  ;;  %v16347_v53 = vld [vmem:[#allocation13 + $0x84] ss:$16 sps:$4 sm:$0xff]  }
 0x4d8   :  { %3595 = vmatprep.subr.bf16.mxu0 %v16296_v61  ;;  %v16345_v61 = vld [vmem:[#allocation13 + $0x80] ss:$16 sps:$4 sm:$0xff]  }
 0x4db   :  { %3596 = vmatpush1.bf16.msra.mxu0 %v16294_v59  ;;  %v16353_v59 = vld [vmem:[#allocation13 + $0xa4] ss:$16 sps:$4 sm:$0xff]  }
 0x4dc   :  { %3597 = vmatprep.subr.bf16.mxu0 %v16302_v60  ;;  %v16351_v60 = vld [vmem:[#allocation13 + $0xa0] ss:$16 sps:$4 sm:$0xff]  }
 0x4df   :  { %3598 = vmatpush1.bf16.msra.mxu0 %v16300_v63  ;;  %v16359_v63 = vld [vmem:[#allocation13 + $0xc4] ss:$16 sps:$4 sm:$0xff]  }
 0x4e0   :  { %3599 = vmatprep.subr.bf16.mxu0 %v16308_v2  ;;  %v16357_v2 = vld [vmem:[#allocation13 + $0xc0] ss:$16 sps:$4 sm:$0xff]  }
 0x4e3   :  { %3600 = vmatpush1.bf16.msra.mxu0 %v16306_v4  ;;  %v16365_v4 = vld [vmem:[#allocation13 + $0xe4] ss:$16 sps:$4 sm:$0xff]  }
 0x4e4   :  { %3601 = vmatprep.subr.bf16.mxu0 %v16314_v8  ;;  %v16363_v8 = vld [vmem:[#allocation13 + $0xe0] ss:$16 sps:$4 sm:$0xff]  }
 0x4e7   :  { %3602 = vmatpush1.bf16.msra.mxu0 %v16312_v11  ;;  %v16369_v11 = vld [vmem:[#allocation11] sm:$0xff]  }
 0x4e8   :  { %3603 = vmatprep.subr.bf16.mxu0 %v16320_v6  ;;  %v16376_v6 = vld [vmem:[#allocation11 + $0x38] sm:$0xff]  }
 0x4eb   :  { %3604 = vmatpush1.bf16.msra.mxu0 %v16318_v19  ;;  %v16379_v19 = vld [vmem:[#allocation16 + $0x8] sm:$0xff]  }
 0x5a1   :  { %v3326_v24 = vpop.f32.mrb[48].mxu0 }
 0x5a2   :  { %v3327_v20 = vadd.f32 %v13036_v23, %v3326_v24  ;;  %v14776_v30 = vpop.f32.mrb[49].mxu0  ;;  %v16323_v23 = vld [vmem:[#allocation13 + $0x4] ss:$16 sps:$4 sm:$0xff]   ;;  %v16326_v24 = vld [vmem:[#allocation13 + $0xc] ss:$16 sps:$4 sm:$0xff]  }
 0x5a3   :  { %v3329_v31 = vpop.f32.mrb[50].mxu0  ;;  %3826 = vmatprep.subr.bf16.mxu1 %v16323_v23  ;;  %3867 = vmatprep.subr.bf16.mxu0 %v16326_v24  ;;  %v16381_v23 = vld [vmem:[#allocation16 + $0x10] sm:$0xff]   ;;  %v16383_v24 = vld [vmem:[#allocation16 + $0x18] sm:$0xff]  }
 0x5a4   :  { %3332 = vmax.xlane.f32.xlu0 %v3327_v20  ;;  %v14777_v32 = vpop.f32.mrb[51].mxu0 }
 0x631   :  { %v3333_v38 = vpop.xlane.xlu0 %3332 }
 0x632   :  { %vm3334_vm3 = vcmp.eq.f32.partialorder %v3327_v20, %v3333_v38 }
 0x633   :  { %v3335_v39 = vsel %vm3334_vm3, %v18089_v21, 128 }
 0x634   :  { %v3337_v40 = vshra.s32 %v3335_v39, 16  ;;  %v3336_v12 = vand.u32 65535, %v3335_v39  ;;  %v16321_v39 = vld [vmem:[#allocation13] ss:$16 sps:$4 sm:$0xff]  }
 0x636   :  { %v18278_v41 = vcvt.s32.f32 %v3337_v40  ;;  %v3338_v14 = vcvt.s32.f32 %v3336_v12  ;;  %v16324_v40 = vld [vmem:[#allocation13 + $0x8] ss:$16 sps:$4 sm:$0xff]  }
 0x637   :  { %v16370_v12 = vld [vmem:[#allocation11 + $0x8] sm:$0xff]  }
 0x638   :  { %3340 = vmin.xlane.f32.xlu1 %v18278_v41 }
 0x6c5   :  { %v3341_v13 = vpop.xlane.xlu1 %3340 }
 0x6c6   :  { %vm3342_vm4 = vcmp.eq.f32.partialorder %v18278_v41, %v3341_v13  ;;  %v3347_v20 = vcvt.f32.s32 %v3341_v13  ;;  %v16329_v41 = vld [vmem:[#allocation13 + $0x24] ss:$16 sps:$4 sm:$0xff]  }
 0x6c7   :  { %v3343_v15 = vsel %vm3342_vm4, %v3338_v14, inf  ;;  %v16371_v13 = vld [vmem:[#allocation11 + $0x10] sm:$0xff]   ;;  %v16372_v14 = vld [vmem:[#allocation11 + $0x18] sm:$0xff]  }
 0x6c8   :  { %3344 = vmin.xlane.f32.xlu1 %v3343_v15  ;;  %v3348_v31 = vshll.u32 %v3347_v20, 16  ;;  %v16374_v15 = vld [vmem:[#allocation11 + $0x28] sm:$0xff]   ;;  %v16385_v20 = vld [vmem:[#allocation16 + $0x20] sm:$0xff]  }
 0x755   :  { %v3345_v30 = vpop.xlane.xlu1 %3344 }
 0x756   :  { %v3346_v32 = vcvt.f32.s32 %v3345_v30  ;;  %v16387_v30 = vld [vmem:[#allocation16 + $0x28] sm:$0xff]  }
 0x758   :  { %v3349_v38 = vadd.s32 %v3348_v31, %v3346_v32  ;;  %v16389_v31 = vld [vmem:[#allocation16 + $0x30] sm:$0xff]   ;;  %v16391_v32 = vld [vmem:[#allocation16 + $0x38] sm:$0xff]  }
 0x75a   :  { %vm3350_vm6 = vcmp.eq.s32.totalorder %v18089_v21, %v3349_v38  ;;  %3355 = vst.msk [vmem:[#allocation23] sm:$0xff] %vm3354_vm5, %v3349_v38  ;;  %vm8034_vm5 = vcmask 31768  }
 0x75b   :  { %vm13078_vm7 = vmpackc.low %vm3350_vm6, %vm3350_vm6 }
 0x75c   :  { %13079 = vmatmul.mubr.msk.bf16.vlgmr.msra.gmra.mrb[48].mxu1 %vm13078_vm7, %v17737_v7  ;;  %13081 = vmatmul.mubr.msk.bf16.vlgmr.msra.gmra.mrb[52].mxu0 %vm13078_vm7, %v17737_v7 }
 0x75d   :  { %3827 = vmatpush1.bf16.msra.mxu1 %v16321_v39  ;;  %3868 = vmatpush1.bf16.msra.mxu0 %v16324_v40 }
 0x75e   :  { %3828 = vmatprep.subr.bf16.mxu1 %v16329_v41  ;;  %3869 = vmatprep.subr.bf16.mxu0 %v16332_v42 }
 0x75f   :  { %3858 = vmatprep.mubr.bf16.mxu1 %v17734_v0  ;;  %3899 = vmatprep.mubr.bf16.mxu0 %v17734_v0 }
 0x761   :  { %3829 = vmatpush1.bf16.msra.mxu1 %v16327_v43  ;;  %3870 = vmatpush1.bf16.msra.mxu0 %v16330_v44 }
 0x762   :  { %3830 = vmatprep.subr.bf16.mxu1 %v16335_v45  ;;  %3871 = vmatprep.subr.bf16.mxu0 %v16338_v46 }
 0x765   :  { %3831 = vmatpush1.bf16.msra.mxu1 %v16333_v47  ;;  %3872 = vmatpush1.bf16.msra.mxu0 %v16336_v48  ;;  %v16378_v48 = vld [vmem:[#allocation11 + $0x40] sm:$0xff]  }
 0x766   :  { %3832 = vmatprep.subr.bf16.mxu1 %v16341_v49  ;;  %3873 = vmatprep.subr.bf16.mxu0 %v16344_v50 }
 0x769   :  { %3833 = vmatpush1.bf16.msra.mxu1 %v16339_v36  ;;  %3874 = vmatpush1.bf16.msra.mxu0 %v16342_v52  ;;  %v16380_v52 = vld [vmem:[#allocation11 + $0x48] sm:$0xff]  }
 0x76a   :  { %3834 = vmatprep.subr.bf16.mxu1 %v16347_v53  ;;  %3875 = vmatprep.subr.bf16.mxu0 %v16350_v54  ;;  %v16382_v53 = vld [vmem:[#allocation11 + $0x50] sm:$0xff]   ;;  %v16384_v54 = vld [vmem:[#allocation11 + $0x58] sm:$0xff]  }
 0x76d   :  { %3835 = vmatpush1.bf16.msra.mxu1 %v16345_v61  ;;  %3876 = vmatpush1.bf16.msra.mxu0 %v16348_v57  ;;  %v16386_v61 = vld [vmem:[#allocation11 + $0x60] sm:$0xff]   ;;  %v16388_v57 = vld [vmem:[#allocation11 + $0x68] sm:$0xff]  }
 0x76e   :  { %3836 = vmatprep.subr.bf16.mxu1 %v16353_v59  ;;  %3877 = vmatprep.subr.bf16.mxu0 %v16356_v58  ;;  %v16390_v59 = vld [vmem:[#allocation11 + $0x70] sm:$0xff]   ;;  %v16392_v58 = vld [vmem:[#allocation11 + $0x78] sm:$0xff]  }
 0x771   :  { %3837 = vmatpush1.bf16.msra.mxu1 %v16351_v60  ;;  %3878 = vmatpush1.bf16.msra.mxu0 %v16354_v62 }
 0x772   :  { %3838 = vmatprep.subr.bf16.mxu1 %v16359_v63  ;;  %3879 = vmatprep.subr.bf16.mxu0 %v16362_v1 }
 0x775   :  { %3839 = vmatpush1.bf16.msra.mxu1 %v16357_v2  ;;  %3880 = vmatpush1.bf16.msra.mxu0 %v16360_v3 }
 0x776   :  { %3840 = vmatprep.subr.bf16.mxu1 %v16365_v4  ;;  %3881 = vmatprep.subr.bf16.mxu0 %v16368_v5 }
 0x779   :  { %3841 = vmatpush1.bf16.msra.mxu1 %v16363_v8  ;;  %3882 = vmatpush1.bf16.msra.mxu0 %v16366_v9 }
 0x77a   :  { %14798 = vmatprep.subr.bf16.mxu0 %v17735_v10  ;;  %14778 = vmatprep.subr.bf16.mxu1 %v17735_v10 }
 0x77c   :  { %3859 = vmatmul.mubr.bf16.vlgmr.msra.gmra.mrb[52].mxu1 %v18270_v22  ;;  %3900 = vmatmul.mubr.bf16.vlgmr.msra.gmra.mrb[56].mxu0 %v18270_v22  ;;  %v16373_v22 = vld [vmem:[#allocation11 + $0x20] sm:$0xff]  }
 0x77d   :  { %14799 = vmatpush3.bf16.msra.mxu0 %v16369_v11  ;;  %14814 = vmatprep.mubr.msk.bf16.mxu0 %vm17736_vm0, %v17735_v10  ;;  %v16393_v11 = vld [vmem:[#allocation16 + $0x40] sm:$0xff]  }
 0x77e   :  { %14800 = vmatprep.subr.bf16.mxu0 %v17735_v10  ;;  %14794 = vmatprep.mubr.msk.bf16.mxu1 %vm17736_vm0, %v17735_v10 }
 0x77f   :  { %14779 = vmatpush3.bf16.msra.mxu1 %v16377_v18  ;;  %v16397_v18 = vld [vmem:[#allocation16 + $0x50] sm:$0xff]  }
 0x780   :  { %14780 = vmatprep.subr.bf16.mxu1 %v17735_v10 }
 0x781   :  { %14801 = vmatpush3.bf16.msra.mxu0 %v16370_v12  ;;  %v16394_v12 = vld [vmem:[#allocation11 + $0x80] sm:$0xff]  }
 0x782   :  { %14802 = vmatprep.subr.bf16.mxu0 %v17735_v10 }
 0x783   :  { %14781 = vmatpush3.bf16.msra.mxu1 %v16379_v19  ;;  %v16398_v19 = vld [vmem:[#allocation11 + $0x90] sm:$0xff]  }
 0x784   :  { %14782 = vmatprep.subr.bf16.mxu1 %v17735_v10 }
 0x785   :  { %14803 = vmatpush3.bf16.msra.mxu0 %v16371_v13 }
 0x786   :  { %14804 = vmatprep.subr.bf16.mxu0 %v17735_v10 }
 0x787   :  { %14783 = vmatpush3.bf16.msra.mxu1 %v16381_v23  ;;  %v16399_v23 = vld [vmem:[#allocation16 + $0x58] sm:$0xff]  }
 0x788   :  { %14784 = vmatprep.subr.bf16.mxu1 %v17735_v10 }
 0x789   :  { %14805 = vmatpush3.bf16.msra.mxu0 %v16372_v14 }
 0x78a   :  { %14806 = vmatprep.subr.bf16.mxu0 %v17735_v10 }
 0x78b   :  { %14785 = vmatpush3.bf16.msra.mxu1 %v16383_v24  ;;  %v16400_v24 = vld [vmem:[#allocation11 + $0x98] sm:$0xff]  }
 0x78c   :  { %14786 = vmatprep.subr.bf16.mxu1 %v17735_v10 }
 0x78d   :  { %14807 = vmatpush3.bf16.msra.mxu0 %v16373_v22 }
 0x78e   :  { %14808 = vmatprep.subr.bf16.mxu0 %v17735_v10 }
 0x78f   :  { %14787 = vmatpush3.bf16.msra.mxu1 %v16385_v20  ;;  %v16401_v20 = vld [vmem:[#allocation16 + $0x60] sm:$0xff]  }
 0x790   :  { %14788 = vmatprep.subr.bf16.mxu1 %v17735_v10 }
 0x791   :  { %14809 = vmatpush3.bf16.msra.mxu0 %v16374_v15 }
 0x792   :  { %14810 = vmatprep.subr.bf16.mxu0 %v17735_v10 }
 0x793   :  { %14789 = vmatpush3.bf16.msra.mxu1 %v16387_v30  ;;  %v16402_v30 = vld [vmem:[#allocation11 + $0xa0] sm:$0xff]  }
 0x794   :  { %14790 = vmatprep.subr.bf16.mxu1 %v17735_v10 }
 0x795   :  { %14811 = vmatpush3.bf16.msra.mxu0 %v16375_v16  ;;  %v16395_v16 = vld [vmem:[#allocation16 + $0x48] sm:$0xff]  }
 0x796   :  { %14812 = vmatprep.subr.bf16.mxu0 %v17735_v10 }
 0x797   :  { %14791 = vmatpush3.bf16.msra.mxu1 %v16389_v31  ;;  %v16403_v31 = vld [vmem:[#allocation16 + $0x68] sm:$0xff]  }
 0x798   :  { %14792 = vmatprep.subr.bf16.mxu1 %v17735_v10 }
 0x799   :  { %14813 = vmatpush3.bf16.msra.mxu0 %v16376_v6  ;;  %v16396_v6 = vld [vmem:[#allocation11 + $0x88] sm:$0xff]  }
 0x79a   :  { %14838 = vmatprep.subr.bf16.mxu0 %v17735_v10 }
 0x79b   :  { %14793 = vmatpush3.bf16.msra.mxu1 %v16391_v32  ;;  %v16404_v32 = vld [vmem:[#allocation11 + $0xa8] sm:$0xff]  }
 0x79c   :  { %14818 = vmatprep.subr.bf16.mxu1 %v17735_v10 }
 0x82f   :  { %v3582_v38 = vpop.f32.mrb[48].mxu1  ;;  %v3623_v39 = vpop.f32.mrb[52].mxu0 }
 0x830   :  { %v3630_v40 = vmul.f32 %v3582_v38, %v18051_v25  ;;  %v18313_v41 = vmul.f32 %v3623_v39, %v18053_v26  ;;  %v3584_v42 = vpop.f32.mrb[49].mxu1  ;;  %v3625_v43 = vpop.f32.mrb[53].mxu0  ;;  %v16405_v38 = vld [vmem:[#allocation16 + $0x70] sm:$0xff]  }
 0x831   :  { %v3631_v44 = vmul.f32 %v3584_v42, %v18055_v27  ;;  %v18317_v45 = vmul.f32 %v3625_v43, %v18057_v28  ;;  %v3586_v46 = vpop.f32.mrb[50].mxu1  ;;  %v3627_v47 = vpop.f32.mrb[54].mxu0  ;;  %v16406_v39 = vld [vmem:[#allocation11 + $0xb0] sm:$0xff]   ;;  %v16408_v42 = vld [vmem:[#allocation11 + $0xb8] sm:$0xff]   ;;  %v16409_v43 = vld [vmem:[#allocation16 + $0x80] sm:$0xff]  }
 0x832   :  { %v3928_v49 = vpack.c.bf16 %v3630_v40, %v3630_v40  ;;  %v3587_v50 = vpop.f32.mrb[51].mxu1  ;;  %v3628_v36 = vpop.f32.mrb[55].mxu0  ;;  %v16407_v40 = vld [vmem:[#allocation16 + $0x78] sm:$0xff]   ;;  %v4350_v46 = vpack.c.bf16 %v18313_v41, %v18313_v41  ;;  %v16413_v41 = vld [vmem:[#allocation16 + $0x90] sm:$0xff]  }
 0x833   :  { %v4139_v13 = vpack.c.bf16 %v3631_v44, %v3631_v44  ;;  %v16410_v44 = vld [vmem:[#allocation11 + $0xc0] sm:$0xff]   ;;  %v16414_v50 = vld [vmem:[#allocation11 + $0xd0] sm:$0xff]   ;;  %v16415_v36 = vld [vmem:[#allocation16 + $0x98] sm:$0xff]  }
 0x834   :  { %14815 = vmatmul.mubr.bf16.vlgmr.msra.gmra.mrb[60].mxu0 %v3928_v49  ;;  %v16412_v49 = vld [vmem:[#allocation11 + $0xc8] sm:$0xff]  }
 0x835   :  { %14839 = vmatpush3.bf16.msra.mxu0 %v16378_v48  ;;  %14854 = vmatprep.mubr.msk.bf16.mxu0 %vm17736_vm0, %v17735_v10  ;;  %v16411_v48 = vld [vmem:[#allocation16 + $0x88] sm:$0xff]  }
 0x836   :  { %14840 = vmatprep.subr.bf16.mxu0 %v17735_v10 }
 0x839   :  { %14841 = vmatpush3.bf16.msra.mxu0 %v16380_v52  ;;  %v16416_v52 = vld [vmem:[#allocation11 + $0xd8] sm:$0xff]  }
 0x83a   :  { %14842 = vmatprep.subr.bf16.mxu0 %v17735_v10 }
 0x83d   :  { %14843 = vmatpush3.bf16.msra.mxu0 %v16382_v53  ;;  %v16417_v53 = vld [vmem:[#allocation16 + $0xa0] sm:$0xff]  }
 0x83e   :  { %14844 = vmatprep.subr.bf16.mxu0 %v17735_v10 }
 0x841   :  { %14845 = vmatpush3.bf16.msra.mxu0 %v16384_v54  ;;  %v16418_v54 = vld [vmem:[#allocation11 + $0xe0] sm:$0xff]  }
 0x842   :  { %14846 = vmatprep.subr.bf16.mxu0 %v17735_v10 }
 0x845   :  { %14847 = vmatpush3.bf16.msra.mxu0 %v16386_v61  ;;  %v16419_v61 = vld [vmem:[#allocation16 + $0xa8] sm:$0xff]  }
 0x846   :  { %14848 = vmatprep.subr.bf16.mxu0 %v17735_v10 }
 0x849   :  { %14849 = vmatpush3.bf16.msra.mxu0 %v16388_v57  ;;  %v16420_v57 = vld [vmem:[#allocation11 + $0xe8] sm:$0xff]  }
 0x84a   :  { %14850 = vmatprep.subr.bf16.mxu0 %v17735_v10 }
 0x84d   :  { %14851 = vmatpush3.bf16.msra.mxu0 %v16390_v59  ;;  %v16421_v59 = vld [vmem:[#allocation16 + $0xb0] sm:$0xff]  }
 0x84e   :  { %14852 = vmatprep.subr.bf16.mxu0 %v17735_v10 }
 0x84f   :  { %v3860_v60 = vpop.f32.mrb[52].mxu1  ;;  %v3901_v62 = vpop.f32.mrb[56].mxu0 }
 0x850   :  { %v3908_v63 = vmul.f32 %v3860_v60, %v18059_v33  ;;  %v18330_v1 = vmul.f32 %v3901_v62, %v18061_v34  ;;  %v3862_v2 = vpop.f32.mrb[53].mxu1  ;;  %v3903_v3 = vpop.f32.mrb[57].mxu0  ;;  %v16423_v60 = vld [vmem:[#allocation16 + $0xb8] sm:$0xff]  }
 0x851   :  { %v18333_v4 = vmul.f32 %v3862_v2, %v18063_v35  ;;  %v18336_v5 = vmul.f32 %v3903_v3, %v18065_v37  ;;  %v3864_v8 = vpop.f32.mrb[54].mxu1  ;;  %v3905_v9 = vpop.f32.mrb[58].mxu0  ;;  %14853 = vmatpush3.bf16.msra.mxu0 %v16392_v58  ;;  %v16422_v58 = vld [vmem:[#allocation11 + $0xf0] sm:$0xff]   ;;  %v16424_v62 = vld [vmem:[#allocation11 + $0xf8] sm:$0xff]   ;;  %v4561_v2 = vpack.c.bf16 %v18317_v45, %v18317_v45 }
 0x852   :  { %v3945_v14 = vpack.c.bf16 %v3908_v63, %v3908_v63  ;;  %v3865_v22 = vpop.f32.mrb[55].mxu1  ;;  %v3906_v15 = vpop.f32.mrb[59].mxu0  ;;  %14878 = vmatprep.subr.bf16.mxu0 %v17735_v10  ;;  %v16425_v63 = vld [vmem:[#allocation16 + $0xc0] sm:$0xff]   ;;  %v4367_v3 = vpack.c.bf16 %v18330_v1, %v18330_v1  ;;  %v16427_v8 = vld [vmem:[#allocation16 + $0xd0] sm:$0xff]   ;;  %v16428_v45 = vld [vmem:[#allocation16 + $0xd8] sm:$0xff]  }
 0x853   :  { %v4156_v47 = vpack.c.bf16 %v18333_v4, %v18333_v4  ;;  %v16426_v4 = vld [vmem:[#allocation16 + $0xc8] sm:$0xff]   ;;  %v16429_v1 = vld [vmem:[#allocation16 + $0xe0] sm:$0xff]  }
 0x854   :  { %14795 = vmatmul.mubr.bf16.vlgmr.msra.gmra.mrb[56].mxu1 %v3945_v14  ;;  %14855 = vmatmul.mubr.bf16.vlgmr.msra.gmra.mrb[64].mxu0 %v4139_v13  ;;  %v16430_v9 = vld [vmem:[#allocation16 + $0xe8] sm:$0xff]   ;;  %v4578_v13 = vpack.c.bf16 %v18336_v5, %v18336_v5  ;;  %v16436_v5 = vld [vmem:[#allocation22 + $0x18] sm:$0xff]  }
 0x855   :  { %14819 = vmatpush3.bf16.msra.mxu1 %v16393_v11  ;;  %14879 = vmatpush3.bf16.msra.mxu0 %v16394_v12  ;;  %v16431_v11 = vld [vmem:[#allocation16 + $0xf0] sm:$0xff]   ;;  %v16432_v12 = vld [vmem:[#allocation16 + $0xf8] sm:$0xff]  }
 0x856   :  { %14820 = vmatprep.subr.bf16.mxu1 %v17735_v10  ;;  %14880 = vmatprep.subr.bf16.mxu0 %v17735_v10 }
 0x857   :  { %14834 = vmatprep.mubr.msk.bf16.mxu1 %vm17736_vm0, %v17735_v10  ;;  %14894 = vmatprep.mubr.msk.bf16.mxu0 %vm17736_vm0, %v17735_v10 }
 0x859   :  { %14821 = vmatpush3.bf16.msra.mxu1 %v16395_v16  ;;  %14881 = vmatpush3.bf16.msra.mxu0 %v16396_v6  ;;  %v16433_v16 = vld [vmem:[#allocation22] sm:$0xff]  }
 0x85a   :  { %14822 = vmatprep.subr.bf16.mxu1 %v17735_v10  ;;  %14882 = vmatprep.subr.bf16.mxu0 %v17735_v10 }
 0x85d   :  { %14823 = vmatpush3.bf16.msra.mxu1 %v16397_v18  ;;  %14883 = vmatpush3.bf16.msra.mxu0 %v16398_v19  ;;  %v16434_v18 = vld [vmem:[#allocation22 + $0x8] sm:$0xff]   ;;  %v16435_v19 = vld [vmem:[#allocation22 + $0x10] sm:$0xff]  }
 0x85e   :  { %14824 = vmatprep.subr.bf16.mxu1 %v17735_v10  ;;  %14884 = vmatprep.subr.bf16.mxu0 %v17735_v10 }
 0x861   :  { %14825 = vmatpush3.bf16.msra.mxu1 %v16399_v23  ;;  %14885 = vmatpush3.bf16.msra.mxu0 %v16400_v24  ;;  %v16437_v23 = vld [vmem:[#allocation22 + $0x20] sm:$0xff]   ;;  %v16438_v24 = vld [vmem:[#allocation22 + $0x28] sm:$0xff]  }
 0x862   :  { %14826 = vmatprep.subr.bf16.mxu1 %v17735_v10  ;;  %14886 = vmatprep.subr.bf16.mxu0 %v17735_v10 }
 0x865   :  { %14827 = vmatpush3.bf16.msra.mxu1 %v16401_v20  ;;  %14887 = vmatpush3.bf16.msra.mxu0 %v16402_v30  ;;  %v16439_v20 = vld [vmem:[#allocation22 + $0x30] sm:$0xff]   ;;  %v16440_v30 = vld [vmem:[#allocation22 + $0x38] sm:$0xff]  }
 0x866   :  { %14828 = vmatprep.subr.bf16.mxu1 %v17735_v10  ;;  %14888 = vmatprep.subr.bf16.mxu0 %v17735_v10 }
 0x869   :  { %14829 = vmatpush3.bf16.msra.mxu1 %v16403_v31  ;;  %14889 = vmatpush3.bf16.msra.mxu0 %v16404_v32 }
 0x86a   :  { %14830 = vmatprep.subr.bf16.mxu1 %v17735_v10  ;;  %14890 = vmatprep.subr.bf16.mxu0 %v17735_v10 }
 0x86d   :  { %14831 = vmatpush3.bf16.msra.mxu1 %v16405_v38  ;;  %14891 = vmatpush3.bf16.msra.mxu0 %v16406_v39 }
 0x86e   :  { %14832 = vmatprep.subr.bf16.mxu1 %v17735_v10  ;;  %14892 = vmatprep.subr.bf16.mxu0 %v17735_v10 }
 0x871   :  { %14833 = vmatpush3.bf16.msra.mxu1 %v16407_v40  ;;  %14893 = vmatpush3.bf16.msra.mxu0 %v16408_v42 }
 0x872   :  { %14858 = vmatprep.subr.bf16.mxu1 %v17735_v10  ;;  %14918 = vmatprep.subr.bf16.mxu0 %v17735_v10 }
 0x874   :  { %14835 = vmatmul.mubr.bf16.vlgmr.msra.gmra.mrb[60].mxu1 %v4156_v47  ;;  %14895 = vmatmul.mubr.bf16.vlgmr.msra.gmra.mrb[68].mxu0 %v4350_v46 }
 0x875   :  { %14859 = vmatpush3.bf16.msra.mxu1 %v16409_v43  ;;  %14919 = vmatpush3.bf16.msra.mxu0 %v16410_v44 }
 0x876   :  { %14860 = vmatprep.subr.bf16.mxu1 %v17735_v10  ;;  %14920 = vmatprep.subr.bf16.mxu0 %v17735_v10 }
 0x877   :  { %14874 = vmatprep.mubr.msk.bf16.mxu1 %vm17736_vm0, %v17735_v10  ;;  %14934 = vmatprep.mubr.msk.bf16.mxu0 %vm17736_vm0, %v17735_v10 }
 0x879   :  { %14861 = vmatpush3.bf16.msra.mxu1 %v16411_v48  ;;  %14921 = vmatpush3.bf16.msra.mxu0 %v16412_v49 }
 0x87a   :  { %14862 = vmatprep.subr.bf16.mxu1 %v17735_v10  ;;  %14922 = vmatprep.subr.bf16.mxu0 %v17735_v10 }
 0x87d   :  { %14863 = vmatpush3.bf16.msra.mxu1 %v16413_v41  ;;  %14923 = vmatpush3.bf16.msra.mxu0 %v16414_v50 }
 0x87e   :  { %14864 = vmatprep.subr.bf16.mxu1 %v17735_v10  ;;  %14924 = vmatprep.subr.bf16.mxu0 %v17735_v10 }
 0x881   :  { %14865 = vmatpush3.bf16.msra.mxu1 %v16415_v36  ;;  %14925 = vmatpush3.bf16.msra.mxu0 %v16416_v52 }
 0x882   :  { %14866 = vmatprep.subr.bf16.mxu1 %v17735_v10  ;;  %14926 = vmatprep.subr.bf16.mxu0 %v17735_v10 }
 0x885   :  { %14867 = vmatpush3.bf16.msra.mxu1 %v16417_v53  ;;  %14927 = vmatpush3.bf16.msra.mxu0 %v16418_v54 }
 0x886   :  { %14868 = vmatprep.subr.bf16.mxu1 %v17735_v10  ;;  %14928 = vmatprep.subr.bf16.mxu0 %v17735_v10 }
 0x889   :  { %14869 = vmatpush3.bf16.msra.mxu1 %v16419_v61  ;;  %14929 = vmatpush3.bf16.msra.mxu0 %v16420_v57 }
 0x88a   :  { %14870 = vmatprep.subr.bf16.mxu1 %v17735_v10  ;;  %14930 = vmatprep.subr.bf16.mxu0 %v17735_v10 }
 0x88d   :  { %14871 = vmatpush3.bf16.msra.mxu1 %v16421_v59  ;;  %14931 = vmatpush3.bf16.msra.mxu0 %v16422_v58 }
 0x88e   :  { %14872 = vmatprep.subr.bf16.mxu1 %v17735_v10  ;;  %14932 = vmatprep.subr.bf16.mxu0 %v17735_v10 }
 0x891   :  { %14873 = vmatpush3.bf16.msra.mxu1 %v16423_v60  ;;  %14933 = vmatpush3.bf16.msra.mxu0 %v16424_v62 }
 0x892   :  { %14898 = vmatprep.subr.bf16.mxu1 %v17735_v10 }
 0x894   :  { %14875 = vmatmul.mubr.bf16.vlgmr.msra.gmra.mrb[64].mxu1 %v4367_v3  ;;  %14935 = vmatmul.mubr.bf16.vlgmr.msra.gmra.mrb[72].mxu0 %v4561_v2 }
 0x895   :  { %14899 = vmatpush3.bf16.msra.mxu1 %v16425_v63  ;;  %14914 = vmatprep.mubr.msk.bf16.mxu1 %vm17736_vm0, %v17735_v10 }
 0x896   :  { %14900 = vmatprep.subr.bf16.mxu1 %v17735_v10  ;;  %5140 = vmatprep.mubr.bf16.mxu0 %v17734_v0 }
 0x899   :  { %14901 = vmatpush3.bf16.msra.mxu1 %v16426_v4 }
 0x89a   :  { %14902 = vmatprep.subr.bf16.mxu1 %v17735_v10 }
 0x89d   :  { %14903 = vmatpush3.bf16.msra.mxu1 %v16427_v8 }
 0x89e   :  { %14904 = vmatprep.subr.bf16.mxu1 %v17735_v10 }
 0x8a1   :  { %14905 = vmatpush3.bf16.msra.mxu1 %v16428_v45 }
 0x8a2   :  { %14906 = vmatprep.subr.bf16.mxu1 %v17735_v10 }
 0x8a5   :  { %14907 = vmatpush3.bf16.msra.mxu1 %v16429_v1 }
 0x8a6   :  { %14908 = vmatprep.subr.bf16.mxu1 %v17735_v10 }
 0x8a9   :  { %14909 = vmatpush3.bf16.msra.mxu1 %v16430_v9 }
 0x8aa   :  { %14910 = vmatprep.subr.bf16.mxu1 %v17735_v10 }
 0x8ad   :  { %14911 = vmatpush3.bf16.msra.mxu1 %v16431_v11 }
 0x8ae   :  { %14912 = vmatprep.subr.bf16.mxu1 %v17735_v10 }
 0x8b1   :  { %14913 = vmatpush3.bf16.msra.mxu1 %v16432_v12 }
 0x8b2   :  { %14938 = vmatprep.subr.bf16.mxu1 %v17735_v10 }
 0x8b4   :  { %14915 = vmatmul.mubr.bf16.vlgmr.msra.gmra.mrb[68].mxu1 %v4578_v13 }
 0x8b5   :  { %14954 = vmatprep.mubr.msk.bf16.mxu1 %vm17736_vm0, %v17735_v10  ;;  %14939 = vmatpush3.bf16.msra.mxu1 %v16433_v16 }
 0x8b6   :  { %14940 = vmatprep.subr.bf16.mxu1 %v17735_v10 }
 0x8b9   :  { %14941 = vmatpush3.bf16.msra.mxu1 %v16434_v18 }
 0x8ba   :  { %14942 = vmatprep.subr.bf16.mxu1 %v17735_v10 }
 0x8bd   :  { %14943 = vmatpush3.bf16.msra.mxu1 %v16435_v19 }
 0x8be   :  { %14944 = vmatprep.subr.bf16.mxu1 %v17735_v10 }
 0x8c1   :  { %14945 = vmatpush3.bf16.msra.mxu1 %v16436_v5 }
 0x8c2   :  { %14946 = vmatprep.subr.bf16.mxu1 %v17735_v10 }
 0x8c5   :  { %14947 = vmatpush3.bf16.msra.mxu1 %v16437_v23 }
 0x8c6   :  { %14948 = vmatprep.subr.bf16.mxu1 %v17735_v10 }
 0x8c9   :  { %14949 = vmatpush3.bf16.msra.mxu1 %v16438_v24 }
 0x8ca   :  { %14950 = vmatprep.subr.bf16.mxu1 %v17735_v10 }
 0x8cd   :  { %14951 = vmatpush3.bf16.msra.mxu1 %v16439_v20 }
 0x8ce   :  { %14952 = vmatprep.subr.bf16.mxu1 %v17735_v10 }
 0x8d1   :  { %14953 = vmatpush3.bf16.msra.mxu1 %v16440_v30 }
 0x907   :  { %v4116_v14 = vpop.f32.mrb[60].mxu0 }
 0x908   :  { %v14816_v22 = vpop.f32.mrb[61].mxu0 }
 0x909   :  { %v4119_v15 = vpop.f32.mrb[62].mxu0 }
 0x90a   :  { %v14817_v6 = vpop.f32.mrb[63].mxu0 }
 0x927   :  { %v4028_v31 = vpop.f32.mrb[56].mxu1  ;;  %v4327_v32 = vpop.f32.mrb[64].mxu0 }
 0x928   :  { %v4117_v38 = vadd.f32 %v4116_v14, %v4028_v31  ;;  %v14796_v39 = vpop.f32.mrb[57].mxu1  ;;  %v14856_v40 = vpop.f32.mrb[65].mxu0 }
 0x929   :  { %v4031_v42 = vpop.f32.mrb[58].mxu1  ;;  %v4330_v43 = vpop.f32.mrb[66].mxu0 }
 0x92a   :  { %v14797_v44 = vpop.f32.mrb[59].mxu1  ;;  %v14857_v46 = vpop.f32.mrb[67].mxu0  ;;  %v4122_v8 = vadd.f32 %v4117_v38, %v18249_v29 }
 0x92b   :  { %v13181_v46 = vld [vmem:[%s19172_s14] ss:$0 sm:$0xff] }
 0x92c   :  { %v13178_v1 = vmul.f32 -1.442695, %v4122_v8  ;;  %v16456_v8 = vld [vmem:[#allocation8 + $0x48] ss:$16 sps:$4 sm:$0xff]  }
 0x947   :  { %v4239_v47 = vpop.f32.mrb[60].mxu1  ;;  %v4538_v48 = vpop.f32.mrb[68].mxu0 }
 0x948   :  { %v4328_v49 = vadd.f32 %v4327_v32, %v4239_v47  ;;  %v14836_v41 = vpop.f32.mrb[61].mxu1  ;;  %v14896_v50 = vpop.f32.mrb[69].mxu0 }
 0x949   :  { %v4242_v36 = vpop.f32.mrb[62].mxu1  ;;  %v4541_v52 = vpop.f32.mrb[70].mxu0 }
 0x94a   :  { %v14837_v53 = vpop.f32.mrb[63].mxu1  ;;  %v14897_v54 = vpop.f32.mrb[71].mxu0  ;;  %v4333_v4 = vadd.f32 %v4328_v49, %v18246_v51 }
 0x94b   :  { %v16441_v54 = vld [vmem:[#allocation8] ss:$16 sps:$4 sm:$0xff]  }
 0x94c   :  { %v13179_v45 = vmul.f32 -1.442695, %v4333_v4  ;;  %v16453_v4 = vld [vmem:[#allocation8 + $0x40] ss:$16 sps:$4 sm:$0xff]  }
 0x94e   :  { %17297 = vpow2.f32 %v13179_v45  ;;  %v16461_v45 = vld [vmem:[#allocation8 + $0x64] ss:$16 sps:$4 sm:$0xff]  }
 0x94f   :  { %17299 = vpow2.f32 %v13178_v1  ;;  %v16464_v1 = vld [vmem:[#allocation8 + $0x6c] ss:$16 sps:$4 sm:$0xff]  }
 0x958   :  { %v17298_v11 = vpop.eup %17297 }
 0x959   :  { %v17300_v12 = vpop.eup %17299  ;;  %v4765_v14 = vadd.f32 1.0, %v17298_v11  ;;  %v16462_v11 = vld [vmem:[#allocation8 + $0x68] ss:$16 sps:$4 sm:$0xff]  }
 0x95a   :  { %v4759_v22 = vadd.f32 1.0, %v17300_v12  ;;  %v16467_v12 = vld [vmem:[#allocation8 + $0x84] ss:$16 sps:$4 sm:$0xff]  }
 0x967   :  { %v4450_v61 = vpop.f32.mrb[64].mxu1  ;;  %v4749_v57 = vpop.f32.mrb[72].mxu0 }
 0x968   :  { %v4539_v59 = vadd.f32 %v4538_v48, %v4450_v61  ;;  %v14876_v58 = vpop.f32.mrb[65].mxu1  ;;  %v14936_v60 = vpop.f32.mrb[73].mxu0  ;;  %v16443_v61 = vld [vmem:[#allocation8 + $0x4] ss:$16 sps:$4 sm:$0xff]  }
 0x969   :  { %v4453_v62 = vpop.f32.mrb[66].mxu1  ;;  %v4752_v63 = vpop.f32.mrb[74].mxu0  ;;  %v16449_v58 = vld [vmem:[#allocation8 + $0x24] ss:$16 sps:$4 sm:$0xff]   ;;  %5108 = vmatprep.subr.bf16.mxu0 %v16443_v61  ;;  %v16452_v60 = vld [vmem:[#allocation8 + $0x2c] ss:$16 sps:$4 sm:$0xff]  }
 0x96a   :  { %v14877_v2 = vpop.f32.mrb[67].mxu1  ;;  %v14937_v3 = vpop.f32.mrb[75].mxu0  ;;  %v4544_v9 = vadd.f32 %v4539_v59, %v18257_v55  ;;  %v16446_v59 = vld [vmem:[#allocation8 + $0xc] ss:$16 sps:$4 sm:$0xff]   ;;  %5109 = vmatpush1.bf16.msra.mxu0 %v16441_v54  ;;  %v16447_v62 = vld [vmem:[#allocation8 + $0x20] ss:$16 sps:$4 sm:$0xff]  }
 0x96b   :  { %5149 = vmatprep.subr.bf16.mxu1 %v16446_v59  ;;  %5110 = vmatprep.subr.bf16.mxu0 %v16449_v58  ;;  %v16450_v63 = vld [vmem:[#allocation8 + $0x28] ss:$16 sps:$4 sm:$0xff]   ;;  %v16455_v2 = vld [vmem:[#allocation8 + $0x44] ss:$16 sps:$4 sm:$0xff]   ;;  %v16458_v3 = vld [vmem:[#allocation8 + $0x4c] ss:$16 sps:$4 sm:$0xff]  }
 0x96c   :  { %v13180_v13 = vmul.f32 -1.442695, %v4544_v9  ;;  %v16459_v9 = vld [vmem:[#allocation8 + $0x60] ss:$16 sps:$4 sm:$0xff]   ;;  %v16500_v54 = vld [vmem:[#allocation13 + $0x2c] ss:$16 sps:$4 sm:$0xff]  }
 0x96d   :  { %v16495_v61 = vld [vmem:[#allocation13 + $0x20] ss:$16 sps:$4 sm:$0xff]   ;;  %v16503_v59 = vld [vmem:[#allocation13 + $0x44] ss:$16 sps:$4 sm:$0xff]   ;;  %v16506_v58 = vld [vmem:[#allocation13 + $0x4c] ss:$16 sps:$4 sm:$0xff]  }
 0x96e   :  { %17301 = vpow2.f32 %v13180_v13  ;;  %5111 = vmatpush1.bf16.msra.mxu0 %v16447_v62  ;;  %v16470_v13 = vld [vmem:[#allocation8 + $0x8c] ss:$16 sps:$4 sm:$0xff]   ;;  %v16504_v62 = vld [vmem:[#allocation13 + $0x48] ss:$16 sps:$4 sm:$0xff]  }
 0x96f   :  { %17303 = vrcp.f32 %v4765_v14  ;;  %5112 = vmatprep.subr.bf16.mxu0 %v16455_v2  ;;  %v16465_v14 = vld [vmem:[#allocation8 + $0x80] ss:$16 sps:$4 sm:$0xff]   ;;  %v16512_v2 = vld [vmem:[#allocation13 + $0x6c] ss:$16 sps:$4 sm:$0xff]  }
 0x970   :  { %17305 = vrcp.f32 %v4759_v22  ;;  %v16468_v22 = vld [vmem:[#allocation8 + $0x88] ss:$16 sps:$4 sm:$0xff]  }
 0x972   :  { %5113 = vmatpush1.bf16.msra.mxu0 %v16453_v4  ;;  %v16510_v4 = vld [vmem:[#allocation13 + $0x68] ss:$16 sps:$4 sm:$0xff]  }
 0x973   :  { %5114 = vmatprep.subr.bf16.mxu0 %v16461_v45  ;;  %v16518_v45 = vld [vmem:[#allocation13 + $0x8c] ss:$16 sps:$4 sm:$0xff]  }
 0x976   :  { %5115 = vmatpush1.bf16.msra.mxu0 %v16459_v9  ;;  %v16516_v9 = vld [vmem:[#allocation13 + $0x88] ss:$16 sps:$4 sm:$0xff]  }
 0x977   :  { %5116 = vmatprep.subr.bf16.mxu0 %v16467_v12  ;;  %v16524_v12 = vld [vmem:[#allocation13 + $0xac] ss:$16 sps:$4 sm:$0xff]  }
 0x978   :  { %v17302_v23 = vpop.eup %17301 }
 0x979   :  { %v17304_v24 = vpop.eup %17303  ;;  %v4771_v31 = vadd.f32 1.0, %v17302_v23  ;;  %v16477_v23 = vld [vmem:[#allocation8 + $0xc0] ss:$16 sps:$4 sm:$0xff]  }
 0x97a   :  { %v17306_v20 = vpop.eup %17305  ;;  %v4775_v32 = vmul.f32 %v17304_v24, %v18267_v17  ;;  %5117 = vmatpush1.bf16.msra.mxu0 %v16465_v14  ;;  %v16480_v24 = vld [vmem:[#allocation8 + $0xc8] ss:$16 sps:$4 sm:$0xff]  }
 0x97b   :  { %v16522_v14 = vld [vmem:[#allocation13 + $0xa8] ss:$16 sps:$4 sm:$0xff]  }
 0x987   :  { %v4661_v15 = vpop.f32.mrb[68].mxu1 }
 0x988   :  { %v4750_v16 = vadd.f32 %v4749_v57, %v4661_v15  ;;  %v14916_v6 = vpop.f32.mrb[69].mxu1  ;;  %v16444_v57 = vld [vmem:[#allocation8 + $0x8] ss:$16 sps:$4 sm:$0xff]   ;;  %v16473_v15 = vld [vmem:[#allocation8 + $0xa4] ss:$16 sps:$4 sm:$0xff]  }
 0x989   :  { %v4664_v18 = vpop.f32.mrb[70].mxu1  ;;  %v16471_v6 = vld [vmem:[#allocation8 + $0xa0] ss:$16 sps:$4 sm:$0xff]   ;;  %5118 = vmatprep.subr.bf16.mxu0 %v16473_v15  ;;  %v16530_v15 = vld [vmem:[#allocation13 + $0xcc] ss:$16 sps:$4 sm:$0xff]  }
 0x98a   :  { %v4755_v19 = vadd.f32 %v4750_v16, %v18264_v56  ;;  %v14917_v5 = vpop.f32.mrb[71].mxu1  ;;  %v16476_v16 = vld [vmem:[#allocation8 + $0xac] ss:$16 sps:$4 sm:$0xff]   ;;  %v16474_v18 = vld [vmem:[#allocation8 + $0xa8] ss:$16 sps:$4 sm:$0xff]   ;;  %5119 = vmatpush1.bf16.msra.mxu0 %v16471_v6 }
 0x98b   :  { %v16482_v5 = vld [vmem:[#allocation8 + $0xcc] ss:$16 sps:$4 sm:$0xff]   ;;  %v16528_v6 = vld [vmem:[#allocation13 + $0xc8] ss:$16 sps:$4 sm:$0xff]  }
 0x98c   :  { %17307 = vtanh.f32 %v4755_v19  ;;  %v16479_v19 = vld [vmem:[#allocation8 + $0xc4] ss:$16 sps:$4 sm:$0xff]  }
 0x98d   :  { %17309 = vrcp.f32 %v4771_v31  ;;  %5120 = vmatprep.subr.bf16.mxu0 %v16479_v19  ;;  %v16536_v19 = vld [vmem:[#allocation13 + $0xec] ss:$16 sps:$4 sm:$0xff]  }
 0x98e   :  { %5121 = vmatpush1.bf16.msra.mxu0 %v16477_v23  ;;  %v16534_v23 = vld [vmem:[#allocation13 + $0xe8] ss:$16 sps:$4 sm:$0xff]  }
 0x996   :  { %v17308_v30 = vpop.eup %17307 }
 0x997   :  { %v4776_v38 = vmul.f32 %v17308_v30, %v17306_v20  ;;  %v17310_v40 = vpop.eup %17309 }
 0x999   :  { %v18413_v39 = vadd.f32 %v4776_v38, %v4775_v32  ;;  %v16485_v38 = vld [vmem:[#allocation8 + $0xe4] ss:$16 sps:$4 sm:$0xff]  }
 0x99a   :  { %5122 = vmatprep.subr.bf16.mxu0 %v16485_v38  ;;  %v16543_v38 = vld [vmem:[#allocation11 + $0x30] sm:$0xff]  }
 0x99b   :  { %17311 = vtanh.f32 %v18413_v39 }
 0x9a5   :  { %v17312_v42 = vpop.eup %17311 }
 0x9a6   :  { %v4779_v43 = vmul.f32 %v17312_v42, %v17310_v40  ;;  %v16488_v40 = vld [vmem:[#allocation8 + $0xec] ss:$16 sps:$4 sm:$0xff]   ;;  %v16483_v42 = vld [vmem:[#allocation8 + $0xe0] ss:$16 sps:$4 sm:$0xff]  }
 0x9a7   :  { %5123 = vmatpush1.bf16.msra.mxu0 %v16483_v42  ;;  %v16545_v42 = vld [vmem:[#allocation16] sm:$0xff]  }
 0x9a8   :  { %v18416_v44 = vpack.c.bf16 %v4779_v43, %v4779_v43  ;;  %v16486_v43 = vld [vmem:[#allocation8 + $0xe8] ss:$16 sps:$4 sm:$0xff]  }
 0x9aa   :  { %14955 = vmatmul.mubr.bf16.vlgmr.msra.gmra.mrb[72].mxu1 %v18416_v44 }
 0x9ab   :  { %5181 = vmatprep.mubr.bf16.mxu1 %v17734_v0  ;;  %5150 = vmatpush1.bf16.msra.mxu1 %v16444_v57  ;;  %v16498_v57 = vld [vmem:[#allocation13 + $0x28] ss:$16 sps:$4 sm:$0xff]  }
 0x9ac   :  { %5151 = vmatprep.subr.bf16.mxu1 %v16452_v60  ;;  %v16501_v60 = vld [vmem:[#allocation13 + $0x40] ss:$16 sps:$4 sm:$0xff]  }
 0x9af   :  { %5152 = vmatpush1.bf16.msra.mxu1 %v16450_v63  ;;  %v16509_v63 = vld [vmem:[#allocation13 + $0x64] ss:$16 sps:$4 sm:$0xff]  }
 0x9b0   :  { %5153 = vmatprep.subr.bf16.mxu1 %v16458_v3  ;;  %v16507_v3 = vld [vmem:[#allocation13 + $0x60] ss:$16 sps:$4 sm:$0xff]  }
 0x9b3   :  { %5154 = vmatpush1.bf16.msra.mxu1 %v16456_v8  ;;  %v16515_v8 = vld [vmem:[#allocation13 + $0x84] ss:$16 sps:$4 sm:$0xff]  }
 0x9b4   :  { %5155 = vmatprep.subr.bf16.mxu1 %v16464_v1  ;;  %v16513_v1 = vld [vmem:[#allocation13 + $0x80] ss:$16 sps:$4 sm:$0xff]  }
 0x9b7   :  { %5156 = vmatpush1.bf16.msra.mxu1 %v16462_v11  ;;  %v16521_v11 = vld [vmem:[#allocation13 + $0xa4] ss:$16 sps:$4 sm:$0xff]  }
 0x9b8   :  { %5157 = vmatprep.subr.bf16.mxu1 %v16470_v13  ;;  %v16519_v13 = vld [vmem:[#allocation13 + $0xa0] ss:$16 sps:$4 sm:$0xff]  }
 0x9bb   :  { %5158 = vmatpush1.bf16.msra.mxu1 %v16468_v22  ;;  %v16527_v22 = vld [vmem:[#allocation13 + $0xc4] ss:$16 sps:$4 sm:$0xff]  }
 0x9bc   :  { %5159 = vmatprep.subr.bf16.mxu1 %v16476_v16  ;;  %v16525_v16 = vld [vmem:[#allocation13 + $0xc0] ss:$16 sps:$4 sm:$0xff]  }
 0x9bf   :  { %5160 = vmatpush1.bf16.msra.mxu1 %v16474_v18  ;;  %v16533_v18 = vld [vmem:[#allocation13 + $0xe4] ss:$16 sps:$4 sm:$0xff]  }
 0x9c0   :  { %5161 = vmatprep.subr.bf16.mxu1 %v16482_v5  ;;  %v16531_v5 = vld [vmem:[#allocation13 + $0xe0] ss:$16 sps:$4 sm:$0xff]  }
 0x9c3   :  { %5162 = vmatpush1.bf16.msra.mxu1 %v16480_v24  ;;  %v16537_v24 = vld [vmem:[#allocation11] sm:$0xff]  }
 0x9c4   :  { %5163 = vmatprep.subr.bf16.mxu1 %v16488_v40  ;;  %v16544_v40 = vld [vmem:[#allocation11 + $0x38] sm:$0xff]  }
 0x9c7   :  { %5164 = vmatpush1.bf16.msra.mxu1 %v16486_v43  ;;  %v16547_v43 = vld [vmem:[#allocation16 + $0x8] sm:$0xff]  }
 0xa7d   :  { %v4886_v17 = vpop.f32.mrb[72].mxu1 }
 0xa7e   :  { %v4887_v47 = vadd.f32 %v13181_v46, %v4886_v17  ;;  %v14956_v48 = vpop.f32.mrb[73].mxu1  ;;  %v16491_v46 = vld [vmem:[#allocation13 + $0x4] ss:$16 sps:$4 sm:$0xff]   ;;  %v16494_v17 = vld [vmem:[#allocation13 + $0xc] ss:$16 sps:$4 sm:$0xff]  }
 0xa7f   :  { %v4889_v49 = vpop.f32.mrb[74].mxu1  ;;  %5386 = vmatprep.subr.bf16.mxu0 %v16491_v46  ;;  %5427 = vmatprep.subr.bf16.mxu1 %v16494_v17  ;;  %v16549_v46 = vld [vmem:[#allocation16 + $0x10] sm:$0xff]   ;;  %v16551_v17 = vld [vmem:[#allocation16 + $0x18] sm:$0xff]  }
 0xa80   :  { %4892 = vmax.xlane.f32.xlu1 %v4887_v47  ;;  %v14957_v41 = vpop.f32.mrb[75].mxu1 }
 0xb0d   :  { %v4893_v50 = vpop.xlane.xlu1 %4892 }
 0xb0e   :  { %vm4894_vm8 = vcmp.eq.f32.partialorder %v4887_v47, %v4893_v50 }
 0xb0f   :  { %v4895_v36 = vsel %vm4894_vm8, %v18089_v21, 128 }
 0xb10   :  { %v4897_v52 = vshra.s32 %v4895_v36, 16  ;;  %v4896_v20 = vand.u32 65535, %v4895_v36  ;;  %v16489_v36 = vld [vmem:[#allocation13] ss:$16 sps:$4 sm:$0xff]  }
 0xb12   :  { %v18424_v53 = vcvt.s32.f32 %v4897_v52  ;;  %v4898_v31 = vcvt.s32.f32 %v4896_v20  ;;  %v16492_v52 = vld [vmem:[#allocation13 + $0x8] ss:$16 sps:$4 sm:$0xff]  }
 0xb13   :  { %v16538_v20 = vld [vmem:[#allocation11 + $0x8] sm:$0xff]  }
 0xb14   :  { %4900 = vmin.xlane.f32.xlu1 %v18424_v53 }
 0xba1   :  { %v4901_v30 = vpop.xlane.xlu1 %4900 }
 0xba2   :  { %vm4902_vm9 = vcmp.eq.f32.partialorder %v18424_v53, %v4901_v30  ;;  %v4907_v47 = vcvt.f32.s32 %v4901_v30  ;;  %v16497_v53 = vld [vmem:[#allocation13 + $0x24] ss:$16 sps:$4 sm:$0xff]  }
 0xba3   :  { %v4903_v32 = vsel %vm4902_vm9, %v4898_v31, inf  ;;  %v16539_v30 = vld [vmem:[#allocation11 + $0x10] sm:$0xff]   ;;  %v16540_v31 = vld [vmem:[#allocation11 + $0x18] sm:$0xff]  }
 0xba4   :  { %4904 = vmin.xlane.f32.xlu1 %v4903_v32  ;;  %v4908_v49 = vshll.u32 %v4907_v47, 16  ;;  %v16542_v32 = vld [vmem:[#allocation11 + $0x28] sm:$0xff]   ;;  %v16553_v47 = vld [vmem:[#allocation16 + $0x20] sm:$0xff]  }
 0xc31   :  { %v4905_v48 = vpop.xlane.xlu1 %4904 }
 0xc32   :  { %v4906_v41 = vcvt.f32.s32 %v4905_v48  ;;  %v16555_v48 = vld [vmem:[#allocation16 + $0x28] sm:$0xff]  }
 0xc34   :  { %v4909_v50 = vadd.s32 %v4908_v49, %v4906_v41  ;;  %v16557_v49 = vld [vmem:[#allocation16 + $0x30] sm:$0xff]   ;;  %v16559_v41 = vld [vmem:[#allocation16 + $0x38] sm:$0xff]  }
 0xc36   :  { %vm4910_vm11 = vcmp.eq.s32.totalorder %v18089_v21, %v4909_v50  ;;  %4915 = vst.msk [vmem:[#allocation23] sm:$0xff] %vm4914_vm10, %v4909_v50  ;;  %vm9594_vm10 = vcmask 39968  }
 0xc37   :  { %vm13223_vm12 = vmpackc.low %vm4910_vm11, %vm4910_vm11 }
 0xc38   :  { %13224 = vmatmul.mubr.msk.bf16.vlgmr.msra.gmra.mrb[76].mxu0 %vm13223_vm12, %v17737_v7  ;;  %13226 = vmatmul.mubr.msk.bf16.vlgmr.msra.gmra.mrb[76].mxu1 %vm13223_vm12, %v17737_v7 }
 0xc39   :  { %5387 = vmatpush1.bf16.msra.mxu0 %v16489_v36  ;;  %5428 = vmatpush1.bf16.msra.mxu1 %v16492_v52 }
 0xc3a   :  { %5388 = vmatprep.subr.bf16.mxu0 %v16497_v53  ;;  %5429 = vmatprep.subr.bf16.mxu1 %v16500_v54 }
 0xc3b   :  { %5418 = vmatprep.mubr.bf16.mxu0 %v17734_v0  ;;  %5459 = vmatprep.mubr.bf16.mxu1 %v17734_v0 }
 0xc3d   :  { %5389 = vmatpush1.bf16.msra.mxu0 %v16495_v61  ;;  %5430 = vmatpush1.bf16.msra.mxu1 %v16498_v57 }
 0xc3e   :  { %5390 = vmatprep.subr.bf16.mxu0 %v16503_v59  ;;  %5431 = vmatprep.subr.bf16.mxu1 %v16506_v58 }
 0xc41   :  { %5391 = vmatpush1.bf16.msra.mxu0 %v16501_v60  ;;  %5432 = vmatpush1.bf16.msra.mxu1 %v16504_v62  ;;  %v16546_v62 = vld [vmem:[#allocation11 + $0x40] sm:$0xff]  }
 0xc42   :  { %5392 = vmatprep.subr.bf16.mxu0 %v16509_v63  ;;  %5433 = vmatprep.subr.bf16.mxu1 %v16512_v2 }
 0xc45   :  { %5393 = vmatpush1.bf16.msra.mxu0 %v16507_v3  ;;  %5434 = vmatpush1.bf16.msra.mxu1 %v16510_v4  ;;  %v16548_v4 = vld [vmem:[#allocation11 + $0x48] sm:$0xff]  }
 0xc46   :  { %5394 = vmatprep.subr.bf16.mxu0 %v16515_v8  ;;  %5435 = vmatprep.subr.bf16.mxu1 %v16518_v45  ;;  %v16550_v8 = vld [vmem:[#allocation11 + $0x50] sm:$0xff]   ;;  %v16552_v45 = vld [vmem:[#allocation11 + $0x58] sm:$0xff]  }
 0xc49   :  { %5395 = vmatpush1.bf16.msra.mxu0 %v16513_v1  ;;  %5436 = vmatpush1.bf16.msra.mxu1 %v16516_v9  ;;  %v16554_v1 = vld [vmem:[#allocation11 + $0x60] sm:$0xff]   ;;  %v16556_v9 = vld [vmem:[#allocation11 + $0x68] sm:$0xff]  }
 0xc4a   :  { %5396 = vmatprep.subr.bf16.mxu0 %v16521_v11  ;;  %5437 = vmatprep.subr.bf16.mxu1 %v16524_v12  ;;  %v16558_v11 = vld [vmem:[#allocation11 + $0x70] sm:$0xff]   ;;  %v16560_v12 = vld [vmem:[#allocation11 + $0x78] sm:$0xff]  }
 0xc4d   :  { %5397 = vmatpush1.bf16.msra.mxu0 %v16519_v13  ;;  %5438 = vmatpush1.bf16.msra.mxu1 %v16522_v14 }
 0xc4e   :  { %5398 = vmatprep.subr.bf16.mxu0 %v16527_v22  ;;  %5439 = vmatprep.subr.bf16.mxu1 %v16530_v15 }
 0xc51   :  { %5399 = vmatpush1.bf16.msra.mxu0 %v16525_v16  ;;  %5440 = vmatpush1.bf16.msra.mxu1 %v16528_v6 }
 0xc52   :  { %5400 = vmatprep.subr.bf16.mxu0 %v16533_v18  ;;  %5441 = vmatprep.subr.bf16.mxu1 %v16536_v19 }
 0xc55   :  { %5401 = vmatpush1.bf16.msra.mxu0 %v16531_v5  ;;  %5442 = vmatpush1.bf16.msra.mxu1 %v16534_v23 }
 0xc56   :  { %14978 = vmatprep.subr.bf16.mxu1 %v17735_v10  ;;  %14958 = vmatprep.subr.bf16.mxu0 %v17735_v10 }
 0xc58   :  { %5419 = vmatmul.mubr.bf16.vlgmr.msra.gmra.mrb[80].mxu0 %v18416_v44  ;;  %5460 = vmatmul.mubr.bf16.vlgmr.msra.gmra.mrb[80].mxu1 %v18416_v44  ;;  %v16541_v44 = vld [vmem:[#allocation11 + $0x20] sm:$0xff]  }
 0xc59   :  { %14979 = vmatpush3.bf16.msra.mxu1 %v16537_v24  ;;  %14994 = vmatprep.mubr.msk.bf16.mxu1 %vm17736_vm0, %v17735_v10  ;;  %v16561_v24 = vld [vmem:[#allocation16 + $0x40] sm:$0xff]  }
 0xc5a   :  { %14980 = vmatprep.subr.bf16.mxu1 %v17735_v10  ;;  %14974 = vmatprep.mubr.msk.bf16.mxu0 %vm17736_vm0, %v17735_v10 }
 0xc5b   :  { %14959 = vmatpush3.bf16.msra.mxu0 %v16545_v42  ;;  %v16565_v42 = vld [vmem:[#allocation16 + $0x50] sm:$0xff]  }
 0xc5c   :  { %14960 = vmatprep.subr.bf16.mxu0 %v17735_v10 }
 0xc5d   :  { %14981 = vmatpush3.bf16.msra.mxu1 %v16538_v20  ;;  %v16562_v20 = vld [vmem:[#allocation11 + $0x80] sm:$0xff]  }
 0xc5e   :  { %14982 = vmatprep.subr.bf16.mxu1 %v17735_v10 }
 0xc5f   :  { %14961 = vmatpush3.bf16.msra.mxu0 %v16547_v43  ;;  %v16566_v43 = vld [vmem:[#allocation11 + $0x90] sm:$0xff]  }
 0xc60   :  { %14962 = vmatprep.subr.bf16.mxu0 %v17735_v10 }
 0xc61   :  { %14983 = vmatpush3.bf16.msra.mxu1 %v16539_v30 }
 0xc62   :  { %14984 = vmatprep.subr.bf16.mxu1 %v17735_v10 }
 0xc63   :  { %14963 = vmatpush3.bf16.msra.mxu0 %v16549_v46  ;;  %v16567_v46 = vld [vmem:[#allocation16 + $0x58] sm:$0xff]  }
 0xc64   :  { %14964 = vmatprep.subr.bf16.mxu0 %v17735_v10 }
 0xc65   :  { %14985 = vmatpush3.bf16.msra.mxu1 %v16540_v31 }
 0xc66   :  { %14986 = vmatprep.subr.bf16.mxu1 %v17735_v10 }
 0xc67   :  { %14965 = vmatpush3.bf16.msra.mxu0 %v16551_v17  ;;  %v16568_v17 = vld [vmem:[#allocation11 + $0x98] sm:$0xff]  }
 0xc68   :  { %14966 = vmatprep.subr.bf16.mxu0 %v17735_v10 }
 0xc69   :  { %14987 = vmatpush3.bf16.msra.mxu1 %v16541_v44 }
 0xc6a   :  { %14988 = vmatprep.subr.bf16.mxu1 %v17735_v10 }
 0xc6b   :  { %14967 = vmatpush3.bf16.msra.mxu0 %v16553_v47  ;;  %v16569_v47 = vld [vmem:[#allocation16 + $0x60] sm:$0xff]  }
 0xc6c   :  { %14968 = vmatprep.subr.bf16.mxu0 %v17735_v10 }
 0xc6d   :  { %14989 = vmatpush3.bf16.msra.mxu1 %v16542_v32 }
 0xc6e   :  { %14990 = vmatprep.subr.bf16.mxu1 %v17735_v10 }
 0xc6f   :  { %14969 = vmatpush3.bf16.msra.mxu0 %v16555_v48  ;;  %v16570_v48 = vld [vmem:[#allocation11 + $0xa0] sm:$0xff]  }
 0xc70   :  { %14970 = vmatprep.subr.bf16.mxu0 %v17735_v10 }
 0xc71   :  { %14991 = vmatpush3.bf16.msra.mxu1 %v16543_v38  ;;  %v16563_v38 = vld [vmem:[#allocation16 + $0x48] sm:$0xff]  }
 0xc72   :  { %14992 = vmatprep.subr.bf16.mxu1 %v17735_v10 }
 0xc73   :  { %14971 = vmatpush3.bf16.msra.mxu0 %v16557_v49  ;;  %v16571_v49 = vld [vmem:[#allocation16 + $0x68] sm:$0xff]  }
 0xc74   :  { %14972 = vmatprep.subr.bf16.mxu0 %v17735_v10 }
 0xc75   :  { %14993 = vmatpush3.bf16.msra.mxu1 %v16544_v40  ;;  %v16564_v40 = vld [vmem:[#allocation11 + $0x88] sm:$0xff]  }
 0xc76   :  { %15018 = vmatprep.subr.bf16.mxu1 %v17735_v10 }
 0xc77   :  { %14973 = vmatpush3.bf16.msra.mxu0 %v16559_v41  ;;  %v16572_v41 = vld [vmem:[#allocation11 + $0xa8] sm:$0xff]  }
 0xc78   :  { %14998 = vmatprep.subr.bf16.mxu0 %v17735_v10 }
 0xd0b   :  { %v5142_v50 = vpop.f32.mrb[76].mxu0  ;;  %v5183_v36 = vpop.f32.mrb[76].mxu1 }
 0xd0c   :  { %v5190_v52 = vmul.f32 %v5142_v50, %v18051_v25  ;;  %v18459_v53 = vmul.f32 %v5183_v36, %v18053_v26  ;;  %v5144_v54 = vpop.f32.mrb[77].mxu0  ;;  %v5185_v61 = vpop.f32.mrb[77].mxu1  ;;  %v16573_v50 = vld [vmem:[#allocation16 + $0x70] sm:$0xff]  }
 0xd0d   :  { %v5191_v57 = vmul.f32 %v5144_v54, %v18055_v27  ;;  %v18463_v59 = vmul.f32 %v5185_v61, %v18057_v28  ;;  %v5146_v58 = vpop.f32.mrb[78].mxu0  ;;  %v5187_v60 = vpop.f32.mrb[78].mxu1  ;;  %v16574_v36 = vld [vmem:[#allocation11 + $0xb0] sm:$0xff]   ;;  %v16576_v54 = vld [vmem:[#allocation11 + $0xb8] sm:$0xff]   ;;  %v16577_v61 = vld [vmem:[#allocation16 + $0x80] sm:$0xff]  }
 0xd0e   :  { %v5488_v63 = vpack.c.bf16 %v5190_v52, %v5190_v52  ;;  %v5147_v2 = vpop.f32.mrb[79].mxu0  ;;  %v5188_v3 = vpop.f32.mrb[79].mxu1  ;;  %v16575_v52 = vld [vmem:[#allocation16 + $0x78] sm:$0xff]   ;;  %v5910_v58 = vpack.c.bf16 %v18459_v53, %v18459_v53  ;;  %v16581_v53 = vld [vmem:[#allocation16 + $0x90] sm:$0xff]  }
 0xd0f   :  { %v5699_v30 = vpack.c.bf16 %v5191_v57, %v5191_v57  ;;  %v16578_v57 = vld [vmem:[#allocation11 + $0xc0] sm:$0xff]   ;;  %v16582_v2 = vld [vmem:[#allocation11 + $0xd0] sm:$0xff]   ;;  %v16583_v3 = vld [vmem:[#allocation16 + $0x98] sm:$0xff]  }
 0xd10   :  { %14995 = vmatmul.mubr.bf16.vlgmr.msra.gmra.mrb[84].mxu1 %v5488_v63  ;;  %v16580_v63 = vld [vmem:[#allocation11 + $0xc8] sm:$0xff]  }
 0xd11   :  { %15019 = vmatpush3.bf16.msra.mxu1 %v16546_v62  ;;  %15034 = vmatprep.mubr.msk.bf16.mxu1 %vm17736_vm0, %v17735_v10  ;;  %v16579_v62 = vld [vmem:[#allocation16 + $0x88] sm:$0xff]  }
 0xd12   :  { %15020 = vmatprep.subr.bf16.mxu1 %v17735_v10 }
 0xd15   :  { %15021 = vmatpush3.bf16.msra.mxu1 %v16548_v4  ;;  %v16584_v4 = vld [vmem:[#allocation11 + $0xd8] sm:$0xff]  }
 0xd16   :  { %15022 = vmatprep.subr.bf16.mxu1 %v17735_v10 }
 0xd19   :  { %15023 = vmatpush3.bf16.msra.mxu1 %v16550_v8  ;;  %v16585_v8 = vld [vmem:[#allocation16 + $0xa0] sm:$0xff]  }
 0xd1a   :  { %15024 = vmatprep.subr.bf16.mxu1 %v17735_v10 }
 0xd1d   :  { %15025 = vmatpush3.bf16.msra.mxu1 %v16552_v45  ;;  %v16586_v45 = vld [vmem:[#allocation11 + $0xe0] sm:$0xff]  }
 0xd1e   :  { %15026 = vmatprep.subr.bf16.mxu1 %v17735_v10 }
 0xd21   :  { %15027 = vmatpush3.bf16.msra.mxu1 %v16554_v1  ;;  %v16587_v1 = vld [vmem:[#allocation16 + $0xa8] sm:$0xff]  }
 0xd22   :  { %15028 = vmatprep.subr.bf16.mxu1 %v17735_v10 }
 0xd25   :  { %15029 = vmatpush3.bf16.msra.mxu1 %v16556_v9  ;;  %v16588_v9 = vld [vmem:[#allocation11 + $0xe8] sm:$0xff]  }
 0xd26   :  { %15030 = vmatprep.subr.bf16.mxu1 %v17735_v10 }
 0xd29   :  { %15031 = vmatpush3.bf16.msra.mxu1 %v16558_v11  ;;  %v16589_v11 = vld [vmem:[#allocation16 + $0xb0] sm:$0xff]  }
 0xd2a   :  { %15032 = vmatprep.subr.bf16.mxu1 %v17735_v10 }
 0xd2b   :  { %v5420_v13 = vpop.f32.mrb[80].mxu0  ;;  %v5461_v14 = vpop.f32.mrb[80].mxu1 }
 0xd2c   :  { %v5468_v22 = vmul.f32 %v5420_v13, %v18059_v33  ;;  %v18476_v15 = vmul.f32 %v5461_v14, %v18061_v34  ;;  %v5422_v16 = vpop.f32.mrb[81].mxu0  ;;  %v5463_v6 = vpop.f32.mrb[81].mxu1  ;;  %v16591_v13 = vld [vmem:[#allocation16 + $0xb8] sm:$0xff]  }
 0xd2d   :  { %v18479_v18 = vmul.f32 %v5422_v16, %v18063_v35  ;;  %v18482_v19 = vmul.f32 %v5463_v6, %v18065_v37  ;;  %v5424_v5 = vpop.f32.mrb[82].mxu0  ;;  %v5465_v23 = vpop.f32.mrb[82].mxu1  ;;  %15033 = vmatpush3.bf16.msra.mxu1 %v16560_v12  ;;  %v16590_v12 = vld [vmem:[#allocation11 + $0xf0] sm:$0xff]   ;;  %v16592_v14 = vld [vmem:[#allocation11 + $0xf8] sm:$0xff]   ;;  %v6121_v16 = vpack.c.bf16 %v18463_v59, %v18463_v59 }
 0xd2e   :  { %v5505_v31 = vpack.c.bf16 %v5468_v22, %v5468_v22  ;;  %v5425_v44 = vpop.f32.mrb[83].mxu0  ;;  %v5466_v32 = vpop.f32.mrb[83].mxu1  ;;  %15058 = vmatprep.subr.bf16.mxu1 %v17735_v10  ;;  %v16593_v22 = vld [vmem:[#allocation16 + $0xc0] sm:$0xff]   ;;  %v5927_v6 = vpack.c.bf16 %v18476_v15, %v18476_v15  ;;  %v16595_v5 = vld [vmem:[#allocation16 + $0xd0] sm:$0xff]   ;;  %v16596_v59 = vld [vmem:[#allocation16 + $0xd8] sm:$0xff]  }
 0xd2f   :  { %v5716_v60 = vpack.c.bf16 %v18479_v18, %v18479_v18  ;;  %v16594_v18 = vld [vmem:[#allocation16 + $0xc8] sm:$0xff]   ;;  %v16597_v15 = vld [vmem:[#allocation16 + $0xe0] sm:$0xff]  }
 0xd30   :  { %14975 = vmatmul.mubr.bf16.vlgmr.msra.gmra.mrb[84].mxu0 %v5505_v31  ;;  %15035 = vmatmul.mubr.bf16.vlgmr.msra.gmra.mrb[88].mxu1 %v5699_v30  ;;  %v16598_v23 = vld [vmem:[#allocation16 + $0xe8] sm:$0xff]   ;;  %v6138_v30 = vpack.c.bf16 %v18482_v19, %v18482_v19  ;;  %v16604_v19 = vld [vmem:[#allocation22 + $0x18] sm:$0xff]  }
 0xd31   :  { %14999 = vmatpush3.bf16.msra.mxu0 %v16561_v24  ;;  %15059 = vmatpush3.bf16.msra.mxu1 %v16562_v20  ;;  %v16599_v24 = vld [vmem:[#allocation16 + $0xf0] sm:$0xff]   ;;  %v16600_v20 = vld [vmem:[#allocation16 + $0xf8] sm:$0xff]  }
 0xd32   :  { %15000 = vmatprep.subr.bf16.mxu0 %v17735_v10  ;;  %15060 = vmatprep.subr.bf16.mxu1 %v17735_v10 }
 0xd33   :  { %15014 = vmatprep.mubr.msk.bf16.mxu0 %vm17736_vm0, %v17735_v10  ;;  %15074 = vmatprep.mubr.msk.bf16.mxu1 %vm17736_vm0, %v17735_v10 }
 0xd35   :  { %15001 = vmatpush3.bf16.msra.mxu0 %v16563_v38  ;;  %15061 = vmatpush3.bf16.msra.mxu1 %v16564_v40  ;;  %v16601_v38 = vld [vmem:[#allocation22] sm:$0xff]  }
 0xd36   :  { %15002 = vmatprep.subr.bf16.mxu0 %v17735_v10  ;;  %15062 = vmatprep.subr.bf16.mxu1 %v17735_v10 }
 0xd39   :  { %15003 = vmatpush3.bf16.msra.mxu0 %v16565_v42  ;;  %15063 = vmatpush3.bf16.msra.mxu1 %v16566_v43  ;;  %v16602_v42 = vld [vmem:[#allocation22 + $0x8] sm:$0xff]   ;;  %v16603_v43 = vld [vmem:[#allocation22 + $0x10] sm:$0xff]  }
 0xd3a   :  { %15004 = vmatprep.subr.bf16.mxu0 %v17735_v10  ;;  %15064 = vmatprep.subr.bf16.mxu1 %v17735_v10 }
 0xd3d   :  { %15005 = vmatpush3.bf16.msra.mxu0 %v16567_v46  ;;  %15065 = vmatpush3.bf16.msra.mxu1 %v16568_v17  ;;  %v16605_v46 = vld [vmem:[#allocation22 + $0x20] sm:$0xff]   ;;  %v16606_v17 = vld [vmem:[#allocation22 + $0x28] sm:$0xff]  }
 0xd3e   :  { %15006 = vmatprep.subr.bf16.mxu0 %v17735_v10  ;;  %15066 = vmatprep.subr.bf16.mxu1 %v17735_v10 }
 0xd41   :  { %15007 = vmatpush3.bf16.msra.mxu0 %v16569_v47  ;;  %15067 = vmatpush3.bf16.msra.mxu1 %v16570_v48  ;;  %v16607_v47 = vld [vmem:[#allocation22 + $0x30] sm:$0xff]   ;;  %v16608_v48 = vld [vmem:[#allocation22 + $0x38] sm:$0xff]  }
 0xd42   :  { %15008 = vmatprep.subr.bf16.mxu0 %v17735_v10  ;;  %15068 = vmatprep.subr.bf16.mxu1 %v17735_v10 }
 0xd45   :  { %15009 = vmatpush3.bf16.msra.mxu0 %v16571_v49  ;;  %15069 = vmatpush3.bf16.msra.mxu1 %v16572_v41 }
 0xd46   :  { %15010 = vmatprep.subr.bf16.mxu0 %v17735_v10  ;;  %15070 = vmatprep.subr.bf16.mxu1 %v17735_v10 }
 0xd49   :  { %15011 = vmatpush3.bf16.msra.mxu0 %v16573_v50  ;;  %15071 = vmatpush3.bf16.msra.mxu1 %v16574_v36 }
 0xd4a   :  { %15012 = vmatprep.subr.bf16.mxu0 %v17735_v10  ;;  %15072 = vmatprep.subr.bf16.mxu1 %v17735_v10 }
 0xd4d   :  { %15013 = vmatpush3.bf16.msra.mxu0 %v16575_v52  ;;  %15073 = vmatpush3.bf16.msra.mxu1 %v16576_v54 }
 0xd4e   :  { %15038 = vmatprep.subr.bf16.mxu0 %v17735_v10  ;;  %15098 = vmatprep.subr.bf16.mxu1 %v17735_v10 }
 0xd50   :  { %15015 = vmatmul.mubr.bf16.vlgmr.msra.gmra.mrb[88].mxu0 %v5716_v60  ;;  %15075 = vmatmul.mubr.bf16.vlgmr.msra.gmra.mrb[92].mxu1 %v5910_v58 }
 0xd51   :  { %15039 = vmatpush3.bf16.msra.mxu0 %v16577_v61  ;;  %15099 = vmatpush3.bf16.msra.mxu1 %v16578_v57 }
 0xd52   :  { %15040 = vmatprep.subr.bf16.mxu0 %v17735_v10  ;;  %15100 = vmatprep.subr.bf16.mxu1 %v17735_v10 }
 0xd53   :  { %15054 = vmatprep.mubr.msk.bf16.mxu0 %vm17736_vm0, %v17735_v10  ;;  %15114 = vmatprep.mubr.msk.bf16.mxu1 %vm17736_vm0, %v17735_v10 }
 0xd55   :  { %15041 = vmatpush3.bf16.msra.mxu0 %v16579_v62  ;;  %15101 = vmatpush3.bf16.msra.mxu1 %v16580_v63 }
 0xd56   :  { %15042 = vmatprep.subr.bf16.mxu0 %v17735_v10  ;;  %15102 = vmatprep.subr.bf16.mxu1 %v17735_v10 }
 0xd59   :  { %15043 = vmatpush3.bf16.msra.mxu0 %v16581_v53  ;;  %15103 = vmatpush3.bf16.msra.mxu1 %v16582_v2 }
 0xd5a   :  { %15044 = vmatprep.subr.bf16.mxu0 %v17735_v10  ;;  %15104 = vmatprep.subr.bf16.mxu1 %v17735_v10 }
 0xd5d   :  { %15045 = vmatpush3.bf16.msra.mxu0 %v16583_v3  ;;  %15105 = vmatpush3.bf16.msra.mxu1 %v16584_v4 }
 0xd5e   :  { %15046 = vmatprep.subr.bf16.mxu0 %v17735_v10  ;;  %15106 = vmatprep.subr.bf16.mxu1 %v17735_v10 }
 0xd61   :  { %15047 = vmatpush3.bf16.msra.mxu0 %v16585_v8  ;;  %15107 = vmatpush3.bf16.msra.mxu1 %v16586_v45 }
 0xd62   :  { %15048 = vmatprep.subr.bf16.mxu0 %v17735_v10  ;;  %15108 = vmatprep.subr.bf16.mxu1 %v17735_v10 }
 0xd65   :  { %15049 = vmatpush3.bf16.msra.mxu0 %v16587_v1  ;;  %15109 = vmatpush3.bf16.msra.mxu1 %v16588_v9 }
 0xd66   :  { %15050 = vmatprep.subr.bf16.mxu0 %v17735_v10  ;;  %15110 = vmatprep.subr.bf16.mxu1 %v17735_v10 }
 0xd69   :  { %15051 = vmatpush3.bf16.msra.mxu0 %v16589_v11  ;;  %15111 = vmatpush3.bf16.msra.mxu1 %v16590_v12 }
 0xd6a   :  { %15052 = vmatprep.subr.bf16.mxu0 %v17735_v10  ;;  %15112 = vmatprep.subr.bf16.mxu1 %v17735_v10 }
 0xd6d   :  { %15053 = vmatpush3.bf16.msra.mxu0 %v16591_v13  ;;  %15113 = vmatpush3.bf16.msra.mxu1 %v16592_v14 }
 0xd6e   :  { %15078 = vmatprep.subr.bf16.mxu0 %v17735_v10 }
 0xd70   :  { %15055 = vmatmul.mubr.bf16.vlgmr.msra.gmra.mrb[92].mxu0 %v5927_v6  ;;  %15115 = vmatmul.mubr.bf16.vlgmr.msra.gmra.mrb[96].mxu1 %v6121_v16 }
 0xd71   :  { %15079 = vmatpush3.bf16.msra.mxu0 %v16593_v22  ;;  %15094 = vmatprep.mubr.msk.bf16.mxu0 %vm17736_vm0, %v17735_v10 }
 0xd72   :  { %15080 = vmatprep.subr.bf16.mxu0 %v17735_v10  ;;  %6700 = vmatprep.mubr.bf16.mxu1 %v17734_v0 }
 0xd75   :  { %15081 = vmatpush3.bf16.msra.mxu0 %v16594_v18 }
 0xd76   :  { %15082 = vmatprep.subr.bf16.mxu0 %v17735_v10 }
 0xd79   :  { %15083 = vmatpush3.bf16.msra.mxu0 %v16595_v5 }
 0xd7a   :  { %15084 = vmatprep.subr.bf16.mxu0 %v17735_v10 }
 0xd7d   :  { %15085 = vmatpush3.bf16.msra.mxu0 %v16596_v59 }
 0xd7e   :  { %15086 = vmatprep.subr.bf16.mxu0 %v17735_v10 }
 0xd81   :  { %15087 = vmatpush3.bf16.msra.mxu0 %v16597_v15 }
 0xd82   :  { %15088 = vmatprep.subr.bf16.mxu0 %v17735_v10 }
 0xd85   :  { %15089 = vmatpush3.bf16.msra.mxu0 %v16598_v23 }
 0xd86   :  { %15090 = vmatprep.subr.bf16.mxu0 %v17735_v10 }
 0xd89   :  { %15091 = vmatpush3.bf16.msra.mxu0 %v16599_v24 }
 0xd8a   :  { %15092 = vmatprep.subr.bf16.mxu0 %v17735_v10 }
 0xd8d   :  { %15093 = vmatpush3.bf16.msra.mxu0 %v16600_v20 }
 0xd8e   :  { %15118 = vmatprep.subr.bf16.mxu0 %v17735_v10 }
 0xd90   :  { %15095 = vmatmul.mubr.bf16.vlgmr.msra.gmra.mrb[96].mxu0 %v6138_v30 }
 0xd91   :  { %15134 = vmatprep.mubr.msk.bf16.mxu0 %vm17736_vm0, %v17735_v10  ;;  %15119 = vmatpush3.bf16.msra.mxu0 %v16601_v38 }
 0xd92   :  { %15120 = vmatprep.subr.bf16.mxu0 %v17735_v10 }
 0xd95   :  { %15121 = vmatpush3.bf16.msra.mxu0 %v16602_v42 }
 0xd96   :  { %15122 = vmatprep.subr.bf16.mxu0 %v17735_v10 }
 0xd99   :  { %15123 = vmatpush3.bf16.msra.mxu0 %v16603_v43 }
 0xd9a   :  { %15124 = vmatprep.subr.bf16.mxu0 %v17735_v10 }
 0xd9d   :  { %15125 = vmatpush3.bf16.msra.mxu0 %v16604_v19 }
 0xd9e   :  { %15126 = vmatprep.subr.bf16.mxu0 %v17735_v10 }
 0xda1   :  { %15127 = vmatpush3.bf16.msra.mxu0 %v16605_v46 }
 0xda2   :  { %15128 = vmatprep.subr.bf16.mxu0 %v17735_v10 }
 0xda5   :  { %15129 = vmatpush3.bf16.msra.mxu0 %v16606_v17 }
 0xda6   :  { %15130 = vmatprep.subr.bf16.mxu0 %v17735_v10 }
 0xda9   :  { %15131 = vmatpush3.bf16.msra.mxu0 %v16607_v47 }
 0xdaa   :  { %15132 = vmatprep.subr.bf16.mxu0 %v17735_v10 }
 0xdad   :  { %15133 = vmatpush3.bf16.msra.mxu0 %v16608_v48 }
 0xde3   :  { %v5676_v31 = vpop.f32.mrb[84].mxu1 }
 0xde4   :  { %v14996_v44 = vpop.f32.mrb[85].mxu1 }
 0xde5   :  { %v5679_v32 = vpop.f32.mrb[86].mxu1 }
 0xde6   :  { %v14997_v40 = vpop.f32.mrb[87].mxu1 }
 0xe03   :  { %v5588_v49 = vpop.f32.mrb[84].mxu0  ;;  %v5887_v41 = vpop.f32.mrb[88].mxu1 }
 0xe04   :  { %v5677_v50 = vadd.f32 %v5676_v31, %v5588_v49  ;;  %v14976_v36 = vpop.f32.mrb[85].mxu0  ;;  %v15036_v52 = vpop.f32.mrb[89].mxu1 }
 0xe05   :  { %v5591_v54 = vpop.f32.mrb[86].mxu0  ;;  %v5890_v61 = vpop.f32.mrb[90].mxu1 }
 0xe06   :  { %v14977_v57 = vpop.f32.mrb[87].mxu0  ;;  %v15037_v58 = vpop.f32.mrb[91].mxu1  ;;  %v5682_v5 = vadd.f32 %v5677_v50, %v18249_v29 }
 0xe07   :  { %v13326_v58 = vld [vmem:[%s19172_s14] ss:$0 sm:$0xff] }
 0xe08   :  { %v13323_v15 = vmul.f32 -1.442695, %v5682_v5  ;;  %v16624_v5 = vld [vmem:[#allocation8 + $0x48] ss:$16 sps:$4 sm:$0xff]  }
 0xe23   :  { %v5799_v60 = vpop.f32.mrb[88].mxu0  ;;  %v6098_v62 = vpop.f32.mrb[92].mxu1 }
 0xe24   :  { %v5888_v63 = vadd.f32 %v5887_v41, %v5799_v60  ;;  %v15016_v53 = vpop.f32.mrb[89].mxu0  ;;  %v15076_v2 = vpop.f32.mrb[93].mxu1 }
 0xe25   :  { %v5802_v3 = vpop.f32.mrb[90].mxu0  ;;  %v6101_v4 = vpop.f32.mrb[94].mxu1 }
 0xe26   :  { %v15017_v8 = vpop.f32.mrb[91].mxu0  ;;  %v15077_v45 = vpop.f32.mrb[95].mxu1  ;;  %v5893_v18 = vadd.f32 %v5888_v63, %v18246_v51 }
 0xe27   :  { %v16609_v45 = vld [vmem:[#allocation8] ss:$16 sps:$4 sm:$0xff]  }
 0xe28   :  { %v13324_v59 = vmul.f32 -1.442695, %v5893_v18  ;;  %v16621_v18 = vld [vmem:[#allocation8 + $0x40] ss:$16 sps:$4 sm:$0xff]  }
 0xe2a   :  { %17313 = vpow2.f32 %v13324_v59  ;;  %v16629_v59 = vld [vmem:[#allocation8 + $0x64] ss:$16 sps:$4 sm:$0xff]  }
 0xe2b   :  { %17315 = vpow2.f32 %v13323_v15  ;;  %v16632_v15 = vld [vmem:[#allocation8 + $0x6c] ss:$16 sps:$4 sm:$0xff]  }
 0xe34   :  { %v17314_v24 = vpop.eup %17313 }
 0xe35   :  { %v17316_v20 = vpop.eup %17315  ;;  %v6325_v31 = vadd.f32 1.0, %v17314_v24  ;;  %v16630_v24 = vld [vmem:[#allocation8 + $0x68] ss:$16 sps:$4 sm:$0xff]  }
 0xe36   :  { %v6319_v44 = vadd.f32 1.0, %v17316_v20  ;;  %v16635_v20 = vld [vmem:[#allocation8 + $0x84] ss:$16 sps:$4 sm:$0xff]  }
 0xe43   :  { %v6010_v1 = vpop.f32.mrb[92].mxu0  ;;  %v6309_v9 = vpop.f32.mrb[96].mxu1 }
 0xe44   :  { %v6099_v11 = vadd.f32 %v6098_v62, %v6010_v1  ;;  %v15056_v12 = vpop.f32.mrb[93].mxu0  ;;  %v15116_v13 = vpop.f32.mrb[97].mxu1  ;;  %v16611_v1 = vld [vmem:[#allocation8 + $0x4] ss:$16 sps:$4 sm:$0xff]  }
 0xe45   :  { %v6013_v14 = vpop.f32.mrb[94].mxu0  ;;  %v6312_v22 = vpop.f32.mrb[98].mxu1  ;;  %v16617_v12 = vld [vmem:[#allocation8 + $0x24] ss:$16 sps:$4 sm:$0xff]   ;;  %6668 = vmatprep.subr.bf16.mxu1 %v16611_v1  ;;  %v16620_v13 = vld [vmem:[#allocation8 + $0x2c] ss:$16 sps:$4 sm:$0xff]  }
 0xe46   :  { %v15057_v16 = vpop.f32.mrb[95].mxu0  ;;  %v15117_v6 = vpop.f32.mrb[99].mxu1  ;;  %v6104_v23 = vadd.f32 %v6099_v11, %v18257_v55  ;;  %v16614_v11 = vld [vmem:[#allocation8 + $0xc] ss:$16 sps:$4 sm:$0xff]   ;;  %6669 = vmatpush1.bf16.msra.mxu1 %v16609_v45  ;;  %v16615_v14 = vld [vmem:[#allocation8 + $0x20] ss:$16 sps:$4 sm:$0xff]  }
 0xe47   :  { %6709 = vmatprep.subr.bf16.mxu0 %v16614_v11  ;;  %6670 = vmatprep.subr.bf16.mxu1 %v16617_v12  ;;  %v16618_v22 = vld [vmem:[#allocation8 + $0x28] ss:$16 sps:$4 sm:$0xff]   ;;  %v16623_v16 = vld [vmem:[#allocation8 + $0x44] ss:$16 sps:$4 sm:$0xff]   ;;  %v16626_v6 = vld [vmem:[#allocation8 + $0x4c] ss:$16 sps:$4 sm:$0xff]  }
 0xe48   :  { %v13325_v30 = vmul.f32 -1.442695, %v6104_v23  ;;  %v16627_v23 = vld [vmem:[#allocation8 + $0x60] ss:$16 sps:$4 sm:$0xff]   ;;  %v16668_v45 = vld [vmem:[#allocation13 + $0x2c] ss:$16 sps:$4 sm:$0xff]  }
 0xe49   :  { %v16663_v1 = vld [vmem:[#allocation13 + $0x20] ss:$16 sps:$4 sm:$0xff]   ;;  %v16671_v11 = vld [vmem:[#allocation13 + $0x44] ss:$16 sps:$4 sm:$0xff]   ;;  %v16674_v12 = vld [vmem:[#allocation13 + $0x4c] ss:$16 sps:$4 sm:$0xff]  }
 0xe4a   :  { %17317 = vpow2.f32 %v13325_v30  ;;  %6671 = vmatpush1.bf16.msra.mxu1 %v16615_v14  ;;  %v16638_v30 = vld [vmem:[#allocation8 + $0x8c] ss:$16 sps:$4 sm:$0xff]   ;;  %v16672_v14 = vld [vmem:[#allocation13 + $0x48] ss:$16 sps:$4 sm:$0xff]  }
 0xe4b   :  { %17319 = vrcp.f32 %v6325_v31  ;;  %6672 = vmatprep.subr.bf16.mxu1 %v16623_v16  ;;  %v16633_v31 = vld [vmem:[#allocation8 + $0x80] ss:$16 sps:$4 sm:$0xff]   ;;  %v16680_v16 = vld [vmem:[#allocation13 + $0x6c] ss:$16 sps:$4 sm:$0xff]  }
 0xe4c   :  { %17321 = vrcp.f32 %v6319_v44  ;;  %v16636_v44 = vld [vmem:[#allocation8 + $0x88] ss:$16 sps:$4 sm:$0xff]  }
 0xe4e   :  { %6673 = vmatpush1.bf16.msra.mxu1 %v16621_v18  ;;  %v16678_v18 = vld [vmem:[#allocation13 + $0x68] ss:$16 sps:$4 sm:$0xff]  }
 0xe4f   :  { %6674 = vmatprep.subr.bf16.mxu1 %v16629_v59  ;;  %v16686_v59 = vld [vmem:[#allocation13 + $0x8c] ss:$16 sps:$4 sm:$0xff]  }
 0xe52   :  { %6675 = vmatpush1.bf16.msra.mxu1 %v16627_v23  ;;  %v16684_v23 = vld [vmem:[#allocation13 + $0x88] ss:$16 sps:$4 sm:$0xff]  }
 0xe53   :  { %6676 = vmatprep.subr.bf16.mxu1 %v16635_v20  ;;  %v16692_v20 = vld [vmem:[#allocation13 + $0xac] ss:$16 sps:$4 sm:$0xff]  }
 0xe54   :  { %v17318_v46 = vpop.eup %17317 }
 0xe55   :  { %v17320_v17 = vpop.eup %17319  ;;  %v6331_v49 = vadd.f32 1.0, %v17318_v46  ;;  %v16645_v46 = vld [vmem:[#allocation8 + $0xc0] ss:$16 sps:$4 sm:$0xff]  }
 0xe56   :  { %v17322_v47 = vpop.eup %17321  ;;  %v6335_v41 = vmul.f32 %v17320_v17, %v18413_v39  ;;  %6677 = vmatpush1.bf16.msra.mxu1 %v16633_v31  ;;  %v16648_v17 = vld [vmem:[#allocation8 + $0xc8] ss:$16 sps:$4 sm:$0xff]  }
 0xe57   :  { %v16690_v31 = vld [vmem:[#allocation13 + $0xa8] ss:$16 sps:$4 sm:$0xff]  }
 0xe63   :  { %v6221_v32 = vpop.f32.mrb[96].mxu0 }
 0xe64   :  { %v6310_v38 = vadd.f32 %v6309_v9, %v6221_v32  ;;  %v15096_v40 = vpop.f32.mrb[97].mxu0  ;;  %v16612_v9 = vld [vmem:[#allocation8 + $0x8] ss:$16 sps:$4 sm:$0xff]   ;;  %v16641_v32 = vld [vmem:[#allocation8 + $0xa4] ss:$16 sps:$4 sm:$0xff]  }
 0xe65   :  { %v6224_v42 = vpop.f32.mrb[98].mxu0  ;;  %v16639_v40 = vld [vmem:[#allocation8 + $0xa0] ss:$16 sps:$4 sm:$0xff]   ;;  %6678 = vmatprep.subr.bf16.mxu1 %v16641_v32  ;;  %v16698_v32 = vld [vmem:[#allocation13 + $0xcc] ss:$16 sps:$4 sm:$0xff]  }
 0xe66   :  { %v6315_v43 = vadd.f32 %v6310_v38, %v18264_v56  ;;  %v15097_v19 = vpop.f32.mrb[99].mxu0  ;;  %v16644_v38 = vld [vmem:[#allocation8 + $0xac] ss:$16 sps:$4 sm:$0xff]   ;;  %v16642_v42 = vld [vmem:[#allocation8 + $0xa8] ss:$16 sps:$4 sm:$0xff]   ;;  %6679 = vmatpush1.bf16.msra.mxu1 %v16639_v40 }
 0xe67   :  { %v16650_v19 = vld [vmem:[#allocation8 + $0xcc] ss:$16 sps:$4 sm:$0xff]   ;;  %v16696_v40 = vld [vmem:[#allocation13 + $0xc8] ss:$16 sps:$4 sm:$0xff]  }
 0xe68   :  { %17323 = vtanh.f32 %v6315_v43  ;;  %v16647_v43 = vld [vmem:[#allocation8 + $0xc4] ss:$16 sps:$4 sm:$0xff]  }
 0xe69   :  { %17325 = vrcp.f32 %v6331_v49  ;;  %6680 = vmatprep.subr.bf16.mxu1 %v16647_v43  ;;  %v16704_v43 = vld [vmem:[#allocation13 + $0xec] ss:$16 sps:$4 sm:$0xff]  }
 0xe6a   :  { %6681 = vmatpush1.bf16.msra.mxu1 %v16645_v46  ;;  %v16702_v46 = vld [vmem:[#allocation13 + $0xe8] ss:$16 sps:$4 sm:$0xff]  }
 0xe72   :  { %v17324_v48 = vpop.eup %17323 }
 0xe73   :  { %v6336_v50 = vmul.f32 %v17324_v48, %v17322_v47  ;;  %v17326_v52 = vpop.eup %17325 }
 0xe75   :  { %v18559_v36 = vadd.f32 %v6336_v50, %v6335_v41  ;;  %v16653_v50 = vld [vmem:[#allocation8 + $0xe4] ss:$16 sps:$4 sm:$0xff]  }
 0xe76   :  { %6682 = vmatprep.subr.bf16.mxu1 %v16653_v50  ;;  %v16711_v50 = vld [vmem:[#allocation11 + $0x30] sm:$0xff]  }
 0xe77   :  { %17327 = vtanh.f32 %v18559_v36 }
 0xe81   :  { %v17328_v54 = vpop.eup %17327 }
 0xe82   :  { %v6339_v61 = vmul.f32 %v17328_v54, %v17326_v52  ;;  %v16656_v52 = vld [vmem:[#allocation8 + $0xec] ss:$16 sps:$4 sm:$0xff]   ;;  %v16651_v54 = vld [vmem:[#allocation8 + $0xe0] ss:$16 sps:$4 sm:$0xff]  }
 0xe83   :  { %6683 = vmatpush1.bf16.msra.mxu1 %v16651_v54  ;;  %v16713_v54 = vld [vmem:[#allocation16] sm:$0xff]  }
 0xe84   :  { %v18562_v57 = vpack.c.bf16 %v6339_v61, %v6339_v61  ;;  %v16654_v61 = vld [vmem:[#allocation8 + $0xe8] ss:$16 sps:$4 sm:$0xff]  }
 0xe86   :  { %15135 = vmatmul.mubr.bf16.vlgmr.msra.gmra.mrb[100].mxu0 %v18562_v57 }
 0xe87   :  { %6741 = vmatprep.mubr.bf16.mxu0 %v17734_v0  ;;  %6710 = vmatpush1.bf16.msra.mxu0 %v16612_v9  ;;  %v16666_v9 = vld [vmem:[#allocation13 + $0x28] ss:$16 sps:$4 sm:$0xff]  }
 0xe88   :  { %6711 = vmatprep.subr.bf16.mxu0 %v16620_v13  ;;  %v16669_v13 = vld [vmem:[#allocation13 + $0x40] ss:$16 sps:$4 sm:$0xff]  }
 0xe8b   :  { %6712 = vmatpush1.bf16.msra.mxu0 %v16618_v22  ;;  %v16677_v22 = vld [vmem:[#allocation13 + $0x64] ss:$16 sps:$4 sm:$0xff]  }
 0xe8c   :  { %6713 = vmatprep.subr.bf16.mxu0 %v16626_v6  ;;  %v16675_v6 = vld [vmem:[#allocation13 + $0x60] ss:$16 sps:$4 sm:$0xff]  }
 0xe8f   :  { %6714 = vmatpush1.bf16.msra.mxu0 %v16624_v5  ;;  %v16683_v5 = vld [vmem:[#allocation13 + $0x84] ss:$16 sps:$4 sm:$0xff]  }
 0xe90   :  { %6715 = vmatprep.subr.bf16.mxu0 %v16632_v15  ;;  %v16681_v15 = vld [vmem:[#allocation13 + $0x80] ss:$16 sps:$4 sm:$0xff]  }
 0xe93   :  { %6716 = vmatpush1.bf16.msra.mxu0 %v16630_v24  ;;  %v16689_v24 = vld [vmem:[#allocation13 + $0xa4] ss:$16 sps:$4 sm:$0xff]  }
 0xe94   :  { %6717 = vmatprep.subr.bf16.mxu0 %v16638_v30  ;;  %v16687_v30 = vld [vmem:[#allocation13 + $0xa0] ss:$16 sps:$4 sm:$0xff]  }
 0xe97   :  { %6718 = vmatpush1.bf16.msra.mxu0 %v16636_v44  ;;  %v16695_v44 = vld [vmem:[#allocation13 + $0xc4] ss:$16 sps:$4 sm:$0xff]  }
 0xe98   :  { %6719 = vmatprep.subr.bf16.mxu0 %v16644_v38  ;;  %v16693_v38 = vld [vmem:[#allocation13 + $0xc0] ss:$16 sps:$4 sm:$0xff]  }
 0xe9b   :  { %6720 = vmatpush1.bf16.msra.mxu0 %v16642_v42  ;;  %v16701_v42 = vld [vmem:[#allocation13 + $0xe4] ss:$16 sps:$4 sm:$0xff]  }
 0xe9c   :  { %6721 = vmatprep.subr.bf16.mxu0 %v16650_v19  ;;  %v16699_v19 = vld [vmem:[#allocation13 + $0xe0] ss:$16 sps:$4 sm:$0xff]  }
 0xe9f   :  { %6722 = vmatpush1.bf16.msra.mxu0 %v16648_v17  ;;  %v16705_v17 = vld [vmem:[#allocation11] sm:$0xff]  }
 0xea0   :  { %6723 = vmatprep.subr.bf16.mxu0 %v16656_v52  ;;  %v16712_v52 = vld [vmem:[#allocation11 + $0x38] sm:$0xff]  }
 0xea3   :  { %6724 = vmatpush1.bf16.msra.mxu0 %v16654_v61  ;;  %v16715_v61 = vld [vmem:[#allocation16 + $0x8] sm:$0xff]  }
 0xf59   :  { %v6446_v39 = vpop.f32.mrb[100].mxu0 }
 0xf5a   :  { %v6447_v60 = vadd.f32 %v13326_v58, %v6446_v39  ;;  %v15136_v62 = vpop.f32.mrb[101].mxu0  ;;  %v16659_v58 = vld [vmem:[#allocation13 + $0x4] ss:$16 sps:$4 sm:$0xff]   ;;  %v16662_v39 = vld [vmem:[#allocation13 + $0xc] ss:$16 sps:$4 sm:$0xff]  }
 0xf5b   :  { %v6449_v63 = vpop.f32.mrb[102].mxu0  ;;  %6946 = vmatprep.subr.bf16.mxu1 %v16659_v58  ;;  %6987 = vmatprep.subr.bf16.mxu0 %v16662_v39  ;;  %v16717_v58 = vld [vmem:[#allocation16 + $0x10] sm:$0xff]   ;;  %v16719_v39 = vld [vmem:[#allocation16 + $0x18] sm:$0xff]  }
 0xf5c   :  { %6452 = vmax.xlane.f32.xlu1 %v6447_v60  ;;  %v15137_v53 = vpop.f32.mrb[103].mxu0 }
 0xfe9   :  { %v6453_v2 = vpop.xlane.xlu1 %6452 }
 0xfea   :  { %vm6454_vm13 = vcmp.eq.f32.partialorder %v6447_v60, %v6453_v2 }
 0xfeb   :  { %v6455_v3 = vsel %vm6454_vm13, %v18089_v21, 128 }
 0xfec   :  { %v6457_v4 = vshra.s32 %v6455_v3, 16  ;;  %v6456_v47 = vand.u32 65535, %v6455_v3  ;;  %v16657_v3 = vld [vmem:[#allocation13] ss:$16 sps:$4 sm:$0xff]  }
 0xfee   :  { %v18570_v8 = vcvt.s32.f32 %v6457_v4  ;;  %v6458_v49 = vcvt.s32.f32 %v6456_v47  ;;  %v16660_v4 = vld [vmem:[#allocation13 + $0x8] ss:$16 sps:$4 sm:$0xff]  }
 0xfef   :  { %v16706_v47 = vld [vmem:[#allocation11 + $0x8] sm:$0xff]  }
 0xff0   :  { %6460 = vmin.xlane.f32.xlu1 %v18570_v8 }
0x107d   :  { %v6461_v48 = vpop.xlane.xlu1 %6460 }
0x107e   :  { %vm6462_vm14 = vcmp.eq.f32.partialorder %v18570_v8, %v6461_v48  ;;  %v6467_v60 = vcvt.f32.s32 %v6461_v48  ;;  %v16665_v8 = vld [vmem:[#allocation13 + $0x24] ss:$16 sps:$4 sm:$0xff]  }
0x107f   :  { %v6463_v41 = vsel %vm6462_vm14, %v6458_v49, inf  ;;  %v16707_v48 = vld [vmem:[#allocation11 + $0x10] sm:$0xff]   ;;  %v16708_v49 = vld [vmem:[#allocation11 + $0x18] sm:$0xff]  }
0x1080   :  { %6464 = vmin.xlane.f32.xlu1 %v6463_v41  ;;  %v6468_v63 = vshll.u32 %v6467_v60, 16  ;;  %v16710_v41 = vld [vmem:[#allocation11 + $0x28] sm:$0xff]   ;;  %v16721_v60 = vld [vmem:[#allocation16 + $0x20] sm:$0xff]  }
0x110d   :  { %v6465_v62 = vpop.xlane.xlu1 %6464 }
0x110e   :  { %v6466_v53 = vcvt.f32.s32 %v6465_v62  ;;  %v16723_v62 = vld [vmem:[#allocation16 + $0x28] sm:$0xff]  }
0x1110   :  { %v6469_v2 = vadd.s32 %v6468_v63, %v6466_v53  ;;  %v16725_v63 = vld [vmem:[#allocation16 + $0x30] sm:$0xff]   ;;  %v16727_v53 = vld [vmem:[#allocation16 + $0x38] sm:$0xff]  }
0x1112   :  { %vm6470_vm1 = vcmp.eq.s32.totalorder %v18089_v21, %v6469_v2  ;;  %6475 = vst.msk [vmem:[#allocation23] sm:$0xff] %vm6474_vm15, %v6469_v2  ;;  %vm11154_vm15 = vcmask 48168  }
0x1113   :  { %vm13368_vm2 = vmpackc.low %vm6470_vm1, %vm6470_vm1 }
0x1114   :  { %13369 = vmatmul.mubr.msk.bf16.vlgmr.msra.gmra.mrb[100].mxu1 %vm13368_vm2, %v17737_v7  ;;  %13371 = vmatmul.mubr.msk.bf16.vlgmr.msra.gmra.mrb[104].mxu0 %vm13368_vm2, %v17737_v7 }
0x1115   :  { %6947 = vmatpush1.bf16.msra.mxu1 %v16657_v3  ;;  %6988 = vmatpush1.bf16.msra.mxu0 %v16660_v4 }
0x1116   :  { %6948 = vmatprep.subr.bf16.mxu1 %v16665_v8  ;;  %6989 = vmatprep.subr.bf16.mxu0 %v16668_v45 }
0x1117   :  { %6978 = vmatprep.mubr.bf16.mxu1 %v17734_v0  ;;  %7019 = vmatprep.mubr.bf16.mxu0 %v17734_v0 }
0x1119   :  { %6949 = vmatpush1.bf16.msra.mxu1 %v16663_v1  ;;  %6990 = vmatpush1.bf16.msra.mxu0 %v16666_v9 }
0x111a   :  { %6950 = vmatprep.subr.bf16.mxu1 %v16671_v11  ;;  %6991 = vmatprep.subr.bf16.mxu0 %v16674_v12 }
0x111d   :  { %6951 = vmatpush1.bf16.msra.mxu1 %v16669_v13  ;;  %6992 = vmatpush1.bf16.msra.mxu0 %v16672_v14  ;;  %v16714_v14 = vld [vmem:[#allocation11 + $0x40] sm:$0xff]  }
0x111e   :  { %6952 = vmatprep.subr.bf16.mxu1 %v16677_v22  ;;  %6993 = vmatprep.subr.bf16.mxu0 %v16680_v16 }
0x1121   :  { %6953 = vmatpush1.bf16.msra.mxu1 %v16675_v6  ;;  %6994 = vmatpush1.bf16.msra.mxu0 %v16678_v18  ;;  %v16716_v18 = vld [vmem:[#allocation11 + $0x48] sm:$0xff]  }
0x1122   :  { %6954 = vmatprep.subr.bf16.mxu1 %v16683_v5  ;;  %6995 = vmatprep.subr.bf16.mxu0 %v16686_v59  ;;  %v16718_v5 = vld [vmem:[#allocation11 + $0x50] sm:$0xff]   ;;  %v16720_v59 = vld [vmem:[#allocation11 + $0x58] sm:$0xff]  }
0x1125   :  { %6955 = vmatpush1.bf16.msra.mxu1 %v16681_v15  ;;  %6996 = vmatpush1.bf16.msra.mxu0 %v16684_v23  ;;  %v16722_v15 = vld [vmem:[#allocation11 + $0x60] sm:$0xff]   ;;  %v16724_v23 = vld [vmem:[#allocation11 + $0x68] sm:$0xff]  }
0x1126   :  { %6956 = vmatprep.subr.bf16.mxu1 %v16689_v24  ;;  %6997 = vmatprep.subr.bf16.mxu0 %v16692_v20  ;;  %v16726_v24 = vld [vmem:[#allocation11 + $0x70] sm:$0xff]   ;;  %v16728_v20 = vld [vmem:[#allocation11 + $0x78] sm:$0xff]  }
0x1129   :  { %6957 = vmatpush1.bf16.msra.mxu1 %v16687_v30  ;;  %6998 = vmatpush1.bf16.msra.mxu0 %v16690_v31 }
0x112a   :  { %6958 = vmatprep.subr.bf16.mxu1 %v16695_v44  ;;  %6999 = vmatprep.subr.bf16.mxu0 %v16698_v32 }
0x112d   :  { %6959 = vmatpush1.bf16.msra.mxu1 %v16693_v38  ;;  %7000 = vmatpush1.bf16.msra.mxu0 %v16696_v40 }
0x112e   :  { %6960 = vmatprep.subr.bf16.mxu1 %v16701_v42  ;;  %7001 = vmatprep.subr.bf16.mxu0 %v16704_v43 }
0x1131   :  { %6961 = vmatpush1.bf16.msra.mxu1 %v16699_v19  ;;  %7002 = vmatpush1.bf16.msra.mxu0 %v16702_v46 }
0x1132   :  { %15158 = vmatprep.subr.bf16.mxu0 %v17735_v10  ;;  %15138 = vmatprep.subr.bf16.mxu1 %v17735_v10 }
0x1134   :  { %6979 = vmatmul.mubr.bf16.vlgmr.msra.gmra.mrb[104].mxu1 %v18562_v57  ;;  %7020 = vmatmul.mubr.bf16.vlgmr.msra.gmra.mrb[108].mxu0 %v18562_v57  ;;  %v16709_v57 = vld [vmem:[#allocation11 + $0x20] sm:$0xff]  }
0x1135   :  { %15159 = vmatpush3.bf16.msra.mxu0 %v16705_v17  ;;  %15174 = vmatprep.mubr.msk.bf16.mxu0 %vm17736_vm0, %v17735_v10  ;;  %v16729_v17 = vld [vmem:[#allocation16 + $0x40] sm:$0xff]  }
0x1136   :  { %15160 = vmatprep.subr.bf16.mxu0 %v17735_v10  ;;  %15154 = vmatprep.mubr.msk.bf16.mxu1 %vm17736_vm0, %v17735_v10 }
0x1137   :  { %15139 = vmatpush3.bf16.msra.mxu1 %v16713_v54  ;;  %v16733_v54 = vld [vmem:[#allocation16 + $0x50] sm:$0xff]  }
0x1138   :  { %15140 = vmatprep.subr.bf16.mxu1 %v17735_v10 }
0x1139   :  { %15161 = vmatpush3.bf16.msra.mxu0 %v16706_v47  ;;  %v16730_v47 = vld [vmem:[#allocation11 + $0x80] sm:$0xff]  }
0x113a   :  { %15162 = vmatprep.subr.bf16.mxu0 %v17735_v10 }
0x113b   :  { %15141 = vmatpush3.bf16.msra.mxu1 %v16715_v61  ;;  %v16734_v61 = vld [vmem:[#allocation11 + $0x90] sm:$0xff]  }
0x113c   :  { %15142 = vmatprep.subr.bf16.mxu1 %v17735_v10 }
0x113d   :  { %15163 = vmatpush3.bf16.msra.mxu0 %v16707_v48 }
0x113e   :  { %15164 = vmatprep.subr.bf16.mxu0 %v17735_v10 }
0x113f   :  { %15143 = vmatpush3.bf16.msra.mxu1 %v16717_v58  ;;  %v16735_v58 = vld [vmem:[#allocation16 + $0x58] sm:$0xff]  }
0x1140   :  { %15144 = vmatprep.subr.bf16.mxu1 %v17735_v10 }
0x1141   :  { %15165 = vmatpush3.bf16.msra.mxu0 %v16708_v49 }
0x1142   :  { %15166 = vmatprep.subr.bf16.mxu0 %v17735_v10 }
0x1143   :  { %15145 = vmatpush3.bf16.msra.mxu1 %v16719_v39  ;;  %v16736_v39 = vld [vmem:[#allocation11 + $0x98] sm:$0xff]  }
0x1144   :  { %15146 = vmatprep.subr.bf16.mxu1 %v17735_v10 }
0x1145   :  { %15167 = vmatpush3.bf16.msra.mxu0 %v16709_v57 }
0x1146   :  { %15168 = vmatprep.subr.bf16.mxu0 %v17735_v10 }
0x1147   :  { %15147 = vmatpush3.bf16.msra.mxu1 %v16721_v60  ;;  %v16737_v60 = vld [vmem:[#allocation16 + $0x60] sm:$0xff]  }
0x1148   :  { %15148 = vmatprep.subr.bf16.mxu1 %v17735_v10 }
0x1149   :  { %15169 = vmatpush3.bf16.msra.mxu0 %v16710_v41 }
0x114a   :  { %15170 = vmatprep.subr.bf16.mxu0 %v17735_v10 }
0x114b   :  { %15149 = vmatpush3.bf16.msra.mxu1 %v16723_v62  ;;  %v16738_v62 = vld [vmem:[#allocation11 + $0xa0] sm:$0xff]  }
0x114c   :  { %15150 = vmatprep.subr.bf16.mxu1 %v17735_v10 }
0x114d   :  { %15171 = vmatpush3.bf16.msra.mxu0 %v16711_v50  ;;  %v16731_v50 = vld [vmem:[#allocation16 + $0x48] sm:$0xff]  }
0x114e   :  { %15172 = vmatprep.subr.bf16.mxu0 %v17735_v10 }
0x114f   :  { %15151 = vmatpush3.bf16.msra.mxu1 %v16725_v63  ;;  %v16739_v63 = vld [vmem:[#allocation16 + $0x68] sm:$0xff]  }
0x1150   :  { %15152 = vmatprep.subr.bf16.mxu1 %v17735_v10 }
0x1151   :  { %15173 = vmatpush3.bf16.msra.mxu0 %v16712_v52  ;;  %v16732_v52 = vld [vmem:[#allocation11 + $0x88] sm:$0xff]  }
0x1152   :  { %15198 = vmatprep.subr.bf16.mxu0 %v17735_v10 }
0x1153   :  { %15153 = vmatpush3.bf16.msra.mxu1 %v16727_v53  ;;  %v16740_v53 = vld [vmem:[#allocation11 + $0xa8] sm:$0xff]  }
0x1154   :  { %15178 = vmatprep.subr.bf16.mxu1 %v17735_v10 }
0x11e7   :  { %v6702_v2 = vpop.f32.mrb[100].mxu1  ;;  %v6743_v3 = vpop.f32.mrb[104].mxu0 }
0x11e8   :  { %v6750_v4 = vmul.f32 %v6702_v2, %v18051_v25  ;;  %v18605_v8 = vmul.f32 %v6743_v3, %v18053_v26  ;;  %v6704_v45 = vpop.f32.mrb[101].mxu1  ;;  %v6745_v1 = vpop.f32.mrb[105].mxu0  ;;  %v16741_v2 = vld [vmem:[#allocation16 + $0x70] sm:$0xff]  }
0x11e9   :  { %v6751_v9 = vmul.f32 %v6704_v45, %v18055_v27  ;;  %v18609_v11 = vmul.f32 %v6745_v1, %v18057_v28  ;;  %v6706_v12 = vpop.f32.mrb[102].mxu1  ;;  %v6747_v13 = vpop.f32.mrb[106].mxu0  ;;  %v16742_v3 = vld [vmem:[#allocation11 + $0xb0] sm:$0xff]   ;;  %v16744_v45 = vld [vmem:[#allocation11 + $0xb8] sm:$0xff]   ;;  %v16745_v1 = vld [vmem:[#allocation16 + $0x80] sm:$0xff]  }
0x11ea   :  { %v7048_v22 = vpack.c.bf16 %v6750_v4, %v6750_v4  ;;  %v6707_v16 = vpop.f32.mrb[103].mxu1  ;;  %v6748_v6 = vpop.f32.mrb[107].mxu0  ;;  %v16743_v4 = vld [vmem:[#allocation16 + $0x78] sm:$0xff]   ;;  %v7470_v12 = vpack.c.bf16 %v18605_v8, %v18605_v8  ;;  %v16749_v8 = vld [vmem:[#allocation16 + $0x90] sm:$0xff]  }
0x11eb   :  { %v7259_v48 = vpack.c.bf16 %v6751_v9, %v6751_v9  ;;  %v16746_v9 = vld [vmem:[#allocation11 + $0xc0] sm:$0xff]   ;;  %v16750_v16 = vld [vmem:[#allocation11 + $0xd0] sm:$0xff]   ;;  %v16751_v6 = vld [vmem:[#allocation16 + $0x98] sm:$0xff]  }
0x11ec   :  { %15175 = vmatmul.mubr.bf16.vlgmr.msra.gmra.mrb[112].mxu0 %v7048_v22  ;;  %v16748_v22 = vld [vmem:[#allocation11 + $0xc8] sm:$0xff]  }
0x11ed   :  { %15199 = vmatpush3.bf16.msra.mxu0 %v16714_v14  ;;  %15214 = vmatprep.mubr.msk.bf16.mxu0 %vm17736_vm0, %v17735_v10  ;;  %v16747_v14 = vld [vmem:[#allocation16 + $0x88] sm:$0xff]  }
0x11ee   :  { %15200 = vmatprep.subr.bf16.mxu0 %v17735_v10 }
0x11f1   :  { %15201 = vmatpush3.bf16.msra.mxu0 %v16716_v18  ;;  %v16752_v18 = vld [vmem:[#allocation11 + $0xd8] sm:$0xff]  }
0x11f2   :  { %15202 = vmatprep.subr.bf16.mxu0 %v17735_v10 }
0x11f5   :  { %15203 = vmatpush3.bf16.msra.mxu0 %v16718_v5  ;;  %v16753_v5 = vld [vmem:[#allocation16 + $0xa0] sm:$0xff]  }
0x11f6   :  { %15204 = vmatprep.subr.bf16.mxu0 %v17735_v10 }
0x11f9   :  { %15205 = vmatpush3.bf16.msra.mxu0 %v16720_v59  ;;  %v16754_v59 = vld [vmem:[#allocation11 + $0xe0] sm:$0xff]  }
0x11fa   :  { %15206 = vmatprep.subr.bf16.mxu0 %v17735_v10 }
0x11fd   :  { %15207 = vmatpush3.bf16.msra.mxu0 %v16722_v15  ;;  %v16755_v15 = vld [vmem:[#allocation16 + $0xa8] sm:$0xff]  }
0x11fe   :  { %15208 = vmatprep.subr.bf16.mxu0 %v17735_v10 }
0x1201   :  { %15209 = vmatpush3.bf16.msra.mxu0 %v16724_v23  ;;  %v16756_v23 = vld [vmem:[#allocation11 + $0xe8] sm:$0xff]  }
0x1202   :  { %15210 = vmatprep.subr.bf16.mxu0 %v17735_v10 }
0x1205   :  { %15211 = vmatpush3.bf16.msra.mxu0 %v16726_v24  ;;  %v16757_v24 = vld [vmem:[#allocation16 + $0xb0] sm:$0xff]  }
0x1206   :  { %15212 = vmatprep.subr.bf16.mxu0 %v17735_v10 }
0x1207   :  { %v6980_v30 = vpop.f32.mrb[104].mxu1  ;;  %v7021_v31 = vpop.f32.mrb[108].mxu0 }
0x1208   :  { %v7028_v44 = vmul.f32 %v6980_v30, %v18059_v33  ;;  %v18622_v32 = vmul.f32 %v7021_v31, %v18061_v34  ;;  %v6982_v38 = vpop.f32.mrb[105].mxu1  ;;  %v7023_v40 = vpop.f32.mrb[109].mxu0  ;;  %v16759_v30 = vld [vmem:[#allocation16 + $0xb8] sm:$0xff]  }
0x1209   :  { %v18625_v42 = vmul.f32 %v6982_v38, %v18063_v35  ;;  %v18628_v43 = vmul.f32 %v7023_v40, %v18065_v37  ;;  %v6984_v19 = vpop.f32.mrb[106].mxu1  ;;  %v7025_v46 = vpop.f32.mrb[110].mxu0  ;;  %15213 = vmatpush3.bf16.msra.mxu0 %v16728_v20  ;;  %v16758_v20 = vld [vmem:[#allocation11 + $0xf0] sm:$0xff]   ;;  %v16760_v31 = vld [vmem:[#allocation11 + $0xf8] sm:$0xff]   ;;  %v7681_v38 = vpack.c.bf16 %v18609_v11, %v18609_v11 }
0x120a   :  { %v7065_v49 = vpack.c.bf16 %v7028_v44, %v7028_v44  ;;  %v6985_v57 = vpop.f32.mrb[107].mxu1  ;;  %v7026_v41 = vpop.f32.mrb[111].mxu0  ;;  %15238 = vmatprep.subr.bf16.mxu0 %v17735_v10  ;;  %v16761_v44 = vld [vmem:[#allocation16 + $0xc0] sm:$0xff]   ;;  %v7487_v40 = vpack.c.bf16 %v18622_v32, %v18622_v32  ;;  %v16763_v19 = vld [vmem:[#allocation16 + $0xd0] sm:$0xff]   ;;  %v16764_v11 = vld [vmem:[#allocation16 + $0xd8] sm:$0xff]  }
0x120b   :  { %v7276_v13 = vpack.c.bf16 %v18625_v42, %v18625_v42  ;;  %v16762_v42 = vld [vmem:[#allocation16 + $0xc8] sm:$0xff]   ;;  %v16765_v32 = vld [vmem:[#allocation16 + $0xe0] sm:$0xff]  }
0x120c   :  { %15155 = vmatmul.mubr.bf16.vlgmr.msra.gmra.mrb[108].mxu1 %v7065_v49  ;;  %15215 = vmatmul.mubr.bf16.vlgmr.msra.gmra.mrb[116].mxu0 %v7259_v48  ;;  %v16766_v46 = vld [vmem:[#allocation16 + $0xe8] sm:$0xff]   ;;  %v7698_v48 = vpack.c.bf16 %v18628_v43, %v18628_v43  ;;  %v16772_v43 = vld [vmem:[#allocation22 + $0x18] sm:$0xff]  }
0x120d   :  { %15179 = vmatpush3.bf16.msra.mxu1 %v16729_v17  ;;  %15239 = vmatpush3.bf16.msra.mxu0 %v16730_v47  ;;  %v16767_v17 = vld [vmem:[#allocation16 + $0xf0] sm:$0xff]   ;;  %v16768_v47 = vld [vmem:[#allocation16 + $0xf8] sm:$0xff]  }
0x120e   :  { %15180 = vmatprep.subr.bf16.mxu1 %v17735_v10  ;;  %15240 = vmatprep.subr.bf16.mxu0 %v17735_v10 }
0x120f   :  { %15194 = vmatprep.mubr.msk.bf16.mxu1 %vm17736_vm0, %v17735_v10  ;;  %15254 = vmatprep.mubr.msk.bf16.mxu0 %vm17736_vm0, %v17735_v10 }
0x1211   :  { %15181 = vmatpush3.bf16.msra.mxu1 %v16731_v50  ;;  %15241 = vmatpush3.bf16.msra.mxu0 %v16732_v52  ;;  %v16769_v50 = vld [vmem:[#allocation22] sm:$0xff]  }
0x1212   :  { %15182 = vmatprep.subr.bf16.mxu1 %v17735_v10  ;;  %15242 = vmatprep.subr.bf16.mxu0 %v17735_v10 }
0x1215   :  { %15183 = vmatpush3.bf16.msra.mxu1 %v16733_v54  ;;  %15243 = vmatpush3.bf16.msra.mxu0 %v16734_v61  ;;  %v16770_v54 = vld [vmem:[#allocation22 + $0x8] sm:$0xff]   ;;  %v16771_v61 = vld [vmem:[#allocation22 + $0x10] sm:$0xff]  }
0x1216   :  { %15184 = vmatprep.subr.bf16.mxu1 %v17735_v10  ;;  %15244 = vmatprep.subr.bf16.mxu0 %v17735_v10 }
0x1219   :  { %15185 = vmatpush3.bf16.msra.mxu1 %v16735_v58  ;;  %15245 = vmatpush3.bf16.msra.mxu0 %v16736_v39  ;;  %v16773_v58 = vld [vmem:[#allocation22 + $0x20] sm:$0xff]   ;;  %v16774_v39 = vld [vmem:[#allocation22 + $0x28] sm:$0xff]  }
0x121a   :  { %15186 = vmatprep.subr.bf16.mxu1 %v17735_v10  ;;  %15246 = vmatprep.subr.bf16.mxu0 %v17735_v10 }
0x121d   :  { %15187 = vmatpush3.bf16.msra.mxu1 %v16737_v60  ;;  %15247 = vmatpush3.bf16.msra.mxu0 %v16738_v62  ;;  %v16775_v60 = vld [vmem:[#allocation22 + $0x30] sm:$0xff]   ;;  %v16776_v62 = vld [vmem:[#allocation22 + $0x38] sm:$0xff]  }
0x121e   :  { %15188 = vmatprep.subr.bf16.mxu1 %v17735_v10  ;;  %15248 = vmatprep.subr.bf16.mxu0 %v17735_v10 }
0x1221   :  { %15189 = vmatpush3.bf16.msra.mxu1 %v16739_v63  ;;  %15249 = vmatpush3.bf16.msra.mxu0 %v16740_v53 }
0x1222   :  { %15190 = vmatprep.subr.bf16.mxu1 %v17735_v10  ;;  %15250 = vmatprep.subr.bf16.mxu0 %v17735_v10 }
0x1225   :  { %15191 = vmatpush3.bf16.msra.mxu1 %v16741_v2  ;;  %15251 = vmatpush3.bf16.msra.mxu0 %v16742_v3 }
0x1226   :  { %15192 = vmatprep.subr.bf16.mxu1 %v17735_v10  ;;  %15252 = vmatprep.subr.bf16.mxu0 %v17735_v10 }
0x1229   :  { %15193 = vmatpush3.bf16.msra.mxu1 %v16743_v4  ;;  %15253 = vmatpush3.bf16.msra.mxu0 %v16744_v45 }
0x122a   :  { %15218 = vmatprep.subr.bf16.mxu1 %v17735_v10  ;;  %15278 = vmatprep.subr.bf16.mxu0 %v17735_v10 }
0x122c   :  { %15195 = vmatmul.mubr.bf16.vlgmr.msra.gmra.mrb[112].mxu1 %v7276_v13  ;;  %15255 = vmatmul.mubr.bf16.vlgmr.msra.gmra.mrb[120].mxu0 %v7470_v12 }
0x122d   :  { %15219 = vmatpush3.bf16.msra.mxu1 %v16745_v1  ;;  %15279 = vmatpush3.bf16.msra.mxu0 %v16746_v9 }
0x122e   :  { %15220 = vmatprep.subr.bf16.mxu1 %v17735_v10  ;;  %15280 = vmatprep.subr.bf16.mxu0 %v17735_v10 }
0x122f   :  { %15234 = vmatprep.mubr.msk.bf16.mxu1 %vm17736_vm0, %v17735_v10  ;;  %15294 = vmatprep.mubr.msk.bf16.mxu0 %vm17736_vm0, %v17735_v10 }
0x1231   :  { %15221 = vmatpush3.bf16.msra.mxu1 %v16747_v14  ;;  %15281 = vmatpush3.bf16.msra.mxu0 %v16748_v22 }
0x1232   :  { %15222 = vmatprep.subr.bf16.mxu1 %v17735_v10  ;;  %15282 = vmatprep.subr.bf16.mxu0 %v17735_v10 }
0x1235   :  { %15223 = vmatpush3.bf16.msra.mxu1 %v16749_v8  ;;  %15283 = vmatpush3.bf16.msra.mxu0 %v16750_v16 }
0x1236   :  { %15224 = vmatprep.subr.bf16.mxu1 %v17735_v10  ;;  %15284 = vmatprep.subr.bf16.mxu0 %v17735_v10 }
0x1239   :  { %15225 = vmatpush3.bf16.msra.mxu1 %v16751_v6  ;;  %15285 = vmatpush3.bf16.msra.mxu0 %v16752_v18 }
0x123a   :  { %15226 = vmatprep.subr.bf16.mxu1 %v17735_v10  ;;  %15286 = vmatprep.subr.bf16.mxu0 %v17735_v10 }
0x123d   :  { %15227 = vmatpush3.bf16.msra.mxu1 %v16753_v5  ;;  %15287 = vmatpush3.bf16.msra.mxu0 %v16754_v59 }
0x123e   :  { %15228 = vmatprep.subr.bf16.mxu1 %v17735_v10  ;;  %15288 = vmatprep.subr.bf16.mxu0 %v17735_v10 }
0x1241   :  { %15229 = vmatpush3.bf16.msra.mxu1 %v16755_v15  ;;  %15289 = vmatpush3.bf16.msra.mxu0 %v16756_v23 }
0x1242   :  { %15230 = vmatprep.subr.bf16.mxu1 %v17735_v10  ;;  %15290 = vmatprep.subr.bf16.mxu0 %v17735_v10 }
0x1245   :  { %15231 = vmatpush3.bf16.msra.mxu1 %v16757_v24  ;;  %15291 = vmatpush3.bf16.msra.mxu0 %v16758_v20 }
0x1246   :  { %15232 = vmatprep.subr.bf16.mxu1 %v17735_v10  ;;  %15292 = vmatprep.subr.bf16.mxu0 %v17735_v10 }
0x1249   :  { %15233 = vmatpush3.bf16.msra.mxu1 %v16759_v30  ;;  %15293 = vmatpush3.bf16.msra.mxu0 %v16760_v31 }
0x124a   :  { %15258 = vmatprep.subr.bf16.mxu1 %v17735_v10 }
0x124c   :  { %15235 = vmatmul.mubr.bf16.vlgmr.msra.gmra.mrb[116].mxu1 %v7487_v40  ;;  %15295 = vmatmul.mubr.bf16.vlgmr.msra.gmra.mrb[124].mxu0 %v7681_v38 }
0x124d   :  { %15259 = vmatpush3.bf16.msra.mxu1 %v16761_v44  ;;  %15274 = vmatprep.mubr.msk.bf16.mxu1 %vm17736_vm0, %v17735_v10 }
0x124e   :  { %15260 = vmatprep.subr.bf16.mxu1 %v17735_v10  ;;  %8260 = vmatprep.mubr.bf16.mxu0 %v17734_v0 }
0x1251   :  { %15261 = vmatpush3.bf16.msra.mxu1 %v16762_v42 }
0x1252   :  { %15262 = vmatprep.subr.bf16.mxu1 %v17735_v10 }
0x1255   :  { %15263 = vmatpush3.bf16.msra.mxu1 %v16763_v19 }
0x1256   :  { %15264 = vmatprep.subr.bf16.mxu1 %v17735_v10 }
0x1259   :  { %15265 = vmatpush3.bf16.msra.mxu1 %v16764_v11 }
0x125a   :  { %15266 = vmatprep.subr.bf16.mxu1 %v17735_v10 }
0x125d   :  { %15267 = vmatpush3.bf16.msra.mxu1 %v16765_v32 }
0x125e   :  { %15268 = vmatprep.subr.bf16.mxu1 %v17735_v10 }
0x1261   :  { %15269 = vmatpush3.bf16.msra.mxu1 %v16766_v46 }
0x1262   :  { %15270 = vmatprep.subr.bf16.mxu1 %v17735_v10 }
0x1265   :  { %15271 = vmatpush3.bf16.msra.mxu1 %v16767_v17 }
0x1266   :  { %15272 = vmatprep.subr.bf16.mxu1 %v17735_v10 }
0x1269   :  { %15273 = vmatpush3.bf16.msra.mxu1 %v16768_v47 }
0x126a   :  { %15298 = vmatprep.subr.bf16.mxu1 %v17735_v10 }
0x126c   :  { %15275 = vmatmul.mubr.bf16.vlgmr.msra.gmra.mrb[120].mxu1 %v7698_v48 }
0x126d   :  { %15314 = vmatprep.mubr.msk.bf16.mxu1 %vm17736_vm0, %v17735_v10  ;;  %15299 = vmatpush3.bf16.msra.mxu1 %v16769_v50 }
0x126e   :  { %15300 = vmatprep.subr.bf16.mxu1 %v17735_v10 }
0x1271   :  { %15301 = vmatpush3.bf16.msra.mxu1 %v16770_v54 }
0x1272   :  { %15302 = vmatprep.subr.bf16.mxu1 %v17735_v10 }
0x1275   :  { %15303 = vmatpush3.bf16.msra.mxu1 %v16771_v61 }
0x1276   :  { %15304 = vmatprep.subr.bf16.mxu1 %v17735_v10 }
0x1279   :  { %15305 = vmatpush3.bf16.msra.mxu1 %v16772_v43 }
0x127a   :  { %15306 = vmatprep.subr.bf16.mxu1 %v17735_v10 }
0x127d   :  { %15307 = vmatpush3.bf16.msra.mxu1 %v16773_v58 }
0x127e   :  { %15308 = vmatprep.subr.bf16.mxu1 %v17735_v10 }
0x1281   :  { %15309 = vmatpush3.bf16.msra.mxu1 %v16774_v39 }
0x1282   :  { %15310 = vmatprep.subr.bf16.mxu1 %v17735_v10 }
0x1285   :  { %15311 = vmatpush3.bf16.msra.mxu1 %v16775_v60 }
0x1286   :  { %15312 = vmatprep.subr.bf16.mxu1 %v17735_v10 }
0x1289   :  { %15313 = vmatpush3.bf16.msra.mxu1 %v16776_v62 }
0x12bf   :  { %v7236_v49 = vpop.f32.mrb[112].mxu0 }
0x12c0   :  { %v15176_v57 = vpop.f32.mrb[113].mxu0 }
0x12c1   :  { %v7239_v41 = vpop.f32.mrb[114].mxu0 }
0x12c2   :  { %v15177_v52 = vpop.f32.mrb[115].mxu0 }
0x12df   :  { %v7148_v63 = vpop.f32.mrb[108].mxu1  ;;  %v7447_v53 = vpop.f32.mrb[116].mxu0 }
0x12e0   :  { %v7237_v2 = vadd.f32 %v7236_v49, %v7148_v63  ;;  %v15156_v3 = vpop.f32.mrb[109].mxu1  ;;  %v15216_v4 = vpop.f32.mrb[117].mxu0 }
0x12e1   :  { %v7151_v45 = vpop.f32.mrb[110].mxu1  ;;  %v7450_v1 = vpop.f32.mrb[118].mxu0 }
0x12e2   :  { %v15157_v9 = vpop.f32.mrb[111].mxu1  ;;  %v15217_v12 = vpop.f32.mrb[119].mxu0  ;;  %v7242_v19 = vadd.f32 %v7237_v2, %v18249_v29 }
0x12e3   :  { %v13471_v12 = vld [vmem:[%s19172_s14] ss:$0 sm:$0xff] }
0x12e4   :  { %v13468_v32 = vmul.f32 -1.442695, %v7242_v19  ;;  %v16792_v19 = vld [vmem:[#allocation8 + $0x48] ss:$16 sps:$4 sm:$0xff]  }
0x12ff   :  { %v7359_v13 = vpop.f32.mrb[112].mxu1  ;;  %v7658_v14 = vpop.f32.mrb[120].mxu0 }
0x1300   :  { %v7448_v22 = vadd.f32 %v7447_v53, %v7359_v13  ;;  %v15196_v8 = vpop.f32.mrb[113].mxu1  ;;  %v15256_v16 = vpop.f32.mrb[121].mxu0 }
0x1301   :  { %v7362_v6 = vpop.f32.mrb[114].mxu1  ;;  %v7661_v18 = vpop.f32.mrb[122].mxu0 }
0x1302   :  { %v15197_v5 = vpop.f32.mrb[115].mxu1  ;;  %v15257_v59 = vpop.f32.mrb[123].mxu0  ;;  %v7453_v42 = vadd.f32 %v7448_v22, %v18246_v51 }
0x1303   :  { %v16777_v59 = vld [vmem:[#allocation8] ss:$16 sps:$4 sm:$0xff]  }
0x1304   :  { %v13469_v11 = vmul.f32 -1.442695, %v7453_v42  ;;  %v16789_v42 = vld [vmem:[#allocation8 + $0x40] ss:$16 sps:$4 sm:$0xff]  }
0x1306   :  { %17329 = vpow2.f32 %v13469_v11  ;;  %v16797_v11 = vld [vmem:[#allocation8 + $0x64] ss:$16 sps:$4 sm:$0xff]  }
0x1307   :  { %17331 = vpow2.f32 %v13468_v32  ;;  %v16800_v32 = vld [vmem:[#allocation8 + $0x6c] ss:$16 sps:$4 sm:$0xff]  }
0x1310   :  { %v17330_v17 = vpop.eup %17329 }
0x1311   :  { %v17332_v47 = vpop.eup %17331  ;;  %v7885_v49 = vadd.f32 1.0, %v17330_v17  ;;  %v16798_v17 = vld [vmem:[#allocation8 + $0x68] ss:$16 sps:$4 sm:$0xff]  }
0x1312   :  { %v7879_v57 = vadd.f32 1.0, %v17332_v47  ;;  %v16803_v47 = vld [vmem:[#allocation8 + $0x84] ss:$16 sps:$4 sm:$0xff]  }
0x131f   :  { %v7570_v15 = vpop.f32.mrb[116].mxu1  ;;  %v7869_v23 = vpop.f32.mrb[124].mxu0 }
0x1320   :  { %v7659_v24 = vadd.f32 %v7658_v14, %v7570_v15  ;;  %v15236_v20 = vpop.f32.mrb[117].mxu1  ;;  %v15296_v30 = vpop.f32.mrb[125].mxu0  ;;  %v16779_v15 = vld [vmem:[#allocation8 + $0x4] ss:$16 sps:$4 sm:$0xff]  }
0x1321   :  { %v7573_v31 = vpop.f32.mrb[118].mxu1  ;;  %v7872_v44 = vpop.f32.mrb[126].mxu0  ;;  %v16785_v20 = vld [vmem:[#allocation8 + $0x24] ss:$16 sps:$4 sm:$0xff]   ;;  %8228 = vmatprep.subr.bf16.mxu0 %v16779_v15  ;;  %v16788_v30 = vld [vmem:[#allocation8 + $0x2c] ss:$16 sps:$4 sm:$0xff]  }
0x1322   :  { %v15237_v38 = vpop.f32.mrb[119].mxu1  ;;  %v15297_v40 = vpop.f32.mrb[127].mxu0  ;;  %v7664_v46 = vadd.f32 %v7659_v24, %v18257_v55  ;;  %v16782_v24 = vld [vmem:[#allocation8 + $0xc] ss:$16 sps:$4 sm:$0xff]   ;;  %8229 = vmatpush1.bf16.msra.mxu0 %v16777_v59  ;;  %v16783_v31 = vld [vmem:[#allocation8 + $0x20] ss:$16 sps:$4 sm:$0xff]  }
0x1323   :  { %8269 = vmatprep.subr.bf16.mxu1 %v16782_v24  ;;  %8230 = vmatprep.subr.bf16.mxu0 %v16785_v20  ;;  %v16786_v44 = vld [vmem:[#allocation8 + $0x28] ss:$16 sps:$4 sm:$0xff]   ;;  %v16791_v38 = vld [vmem:[#allocation8 + $0x44] ss:$16 sps:$4 sm:$0xff]   ;;  %v16794_v40 = vld [vmem:[#allocation8 + $0x4c] ss:$16 sps:$4 sm:$0xff]  }
0x1324   :  { %v13470_v48 = vmul.f32 -1.442695, %v7664_v46  ;;  %v16795_v46 = vld [vmem:[#allocation8 + $0x60] ss:$16 sps:$4 sm:$0xff]   ;;  %v16836_v59 = vld [vmem:[#allocation13 + $0x2c] ss:$16 sps:$4 sm:$0xff]  }
0x1325   :  { %v16831_v15 = vld [vmem:[#allocation13 + $0x20] ss:$16 sps:$4 sm:$0xff]   ;;  %v16839_v24 = vld [vmem:[#allocation13 + $0x44] ss:$16 sps:$4 sm:$0xff]   ;;  %v16842_v20 = vld [vmem:[#allocation13 + $0x4c] ss:$16 sps:$4 sm:$0xff]  }
0x1326   :  { %17333 = vpow2.f32 %v13470_v48  ;;  %8231 = vmatpush1.bf16.msra.mxu0 %v16783_v31  ;;  %v16806_v48 = vld [vmem:[#allocation8 + $0x8c] ss:$16 sps:$4 sm:$0xff]   ;;  %v16840_v31 = vld [vmem:[#allocation13 + $0x48] ss:$16 sps:$4 sm:$0xff]  }
0x1327   :  { %17335 = vrcp.f32 %v7885_v49  ;;  %8232 = vmatprep.subr.bf16.mxu0 %v16791_v38  ;;  %v16801_v49 = vld [vmem:[#allocation8 + $0x80] ss:$16 sps:$4 sm:$0xff]   ;;  %v16848_v38 = vld [vmem:[#allocation13 + $0x6c] ss:$16 sps:$4 sm:$0xff]  }
0x1328   :  { %17337 = vrcp.f32 %v7879_v57  ;;  %v16804_v57 = vld [vmem:[#allocation8 + $0x88] ss:$16 sps:$4 sm:$0xff]  }
0x132a   :  { %8233 = vmatpush1.bf16.msra.mxu0 %v16789_v42  ;;  %v16846_v42 = vld [vmem:[#allocation13 + $0x68] ss:$16 sps:$4 sm:$0xff]  }
0x132b   :  { %8234 = vmatprep.subr.bf16.mxu0 %v16797_v11  ;;  %v16854_v11 = vld [vmem:[#allocation13 + $0x8c] ss:$16 sps:$4 sm:$0xff]  }
0x132e   :  { %8235 = vmatpush1.bf16.msra.mxu0 %v16795_v46  ;;  %v16852_v46 = vld [vmem:[#allocation13 + $0x88] ss:$16 sps:$4 sm:$0xff]  }
0x132f   :  { %8236 = vmatprep.subr.bf16.mxu0 %v16803_v47  ;;  %v16860_v47 = vld [vmem:[#allocation13 + $0xac] ss:$16 sps:$4 sm:$0xff]  }
0x1330   :  { %v17334_v58 = vpop.eup %17333 }
0x1331   :  { %v17336_v39 = vpop.eup %17335  ;;  %v7891_v63 = vadd.f32 1.0, %v17334_v58  ;;  %v16813_v58 = vld [vmem:[#allocation8 + $0xc0] ss:$16 sps:$4 sm:$0xff]  }
0x1332   :  { %v17338_v60 = vpop.eup %17337  ;;  %v7895_v53 = vmul.f32 %v17336_v39, %v18559_v36  ;;  %8237 = vmatpush1.bf16.msra.mxu0 %v16801_v49  ;;  %v16816_v39 = vld [vmem:[#allocation8 + $0xc8] ss:$16 sps:$4 sm:$0xff]  }
0x1333   :  { %v16858_v49 = vld [vmem:[#allocation13 + $0xa8] ss:$16 sps:$4 sm:$0xff]  }
0x133f   :  { %v7781_v41 = vpop.f32.mrb[120].mxu1 }
0x1340   :  { %v7870_v50 = vadd.f32 %v7869_v23, %v7781_v41  ;;  %v15276_v52 = vpop.f32.mrb[121].mxu1  ;;  %v16780_v23 = vld [vmem:[#allocation8 + $0x8] ss:$16 sps:$4 sm:$0xff]   ;;  %v16809_v41 = vld [vmem:[#allocation8 + $0xa4] ss:$16 sps:$4 sm:$0xff]  }
0x1341   :  { %v7784_v54 = vpop.f32.mrb[122].mxu1  ;;  %v16807_v52 = vld [vmem:[#allocation8 + $0xa0] ss:$16 sps:$4 sm:$0xff]   ;;  %8238 = vmatprep.subr.bf16.mxu0 %v16809_v41  ;;  %v16866_v41 = vld [vmem:[#allocation13 + $0xcc] ss:$16 sps:$4 sm:$0xff]  }
0x1342   :  { %v7875_v61 = vadd.f32 %v7870_v50, %v18264_v56  ;;  %v15277_v43 = vpop.f32.mrb[123].mxu1  ;;  %v16812_v50 = vld [vmem:[#allocation8 + $0xac] ss:$16 sps:$4 sm:$0xff]   ;;  %v16810_v54 = vld [vmem:[#allocation8 + $0xa8] ss:$16 sps:$4 sm:$0xff]   ;;  %8239 = vmatpush1.bf16.msra.mxu0 %v16807_v52 }
0x1343   :  { %v16818_v43 = vld [vmem:[#allocation8 + $0xcc] ss:$16 sps:$4 sm:$0xff]   ;;  %v16864_v52 = vld [vmem:[#allocation13 + $0xc8] ss:$16 sps:$4 sm:$0xff]  }
0x1344   :  { %17339 = vtanh.f32 %v7875_v61  ;;  %v16815_v61 = vld [vmem:[#allocation8 + $0xc4] ss:$16 sps:$4 sm:$0xff]  }
0x1345   :  { %17341 = vrcp.f32 %v7891_v63  ;;  %8240 = vmatprep.subr.bf16.mxu0 %v16815_v61  ;;  %v16872_v61 = vld [vmem:[#allocation13 + $0xec] ss:$16 sps:$4 sm:$0xff]  }
0x1346   :  { %8241 = vmatpush1.bf16.msra.mxu0 %v16813_v58  ;;  %v16870_v58 = vld [vmem:[#allocation13 + $0xe8] ss:$16 sps:$4 sm:$0xff]  }
0x134e   :  { %v17340_v62 = vpop.eup %17339 }
0x134f   :  { %v7896_v2 = vmul.f32 %v17340_v62, %v17338_v60  ;;  %v17342_v4 = vpop.eup %17341 }
0x1351   :  { %v18705_v3 = vadd.f32 %v7896_v2, %v7895_v53  ;;  %v16821_v2 = vld [vmem:[#allocation8 + $0xe4] ss:$16 sps:$4 sm:$0xff]  }
0x1352   :  { %8242 = vmatprep.subr.bf16.mxu0 %v16821_v2  ;;  %v16879_v2 = vld [vmem:[#allocation11 + $0x30] sm:$0xff]  }
0x1353   :  { %17343 = vtanh.f32 %v18705_v3 }
0x135d   :  { %v17344_v45 = vpop.eup %17343 }
0x135e   :  { %v7899_v1 = vmul.f32 %v17344_v45, %v17342_v4  ;;  %v16824_v4 = vld [vmem:[#allocation8 + $0xec] ss:$16 sps:$4 sm:$0xff]   ;;  %v16819_v45 = vld [vmem:[#allocation8 + $0xe0] ss:$16 sps:$4 sm:$0xff]  }
0x135f   :  { %8243 = vmatpush1.bf16.msra.mxu0 %v16819_v45  ;;  %v16881_v45 = vld [vmem:[#allocation16] sm:$0xff]  }
0x1360   :  { %v18708_v9 = vpack.c.bf16 %v7899_v1, %v7899_v1  ;;  %v16822_v1 = vld [vmem:[#allocation8 + $0xe8] ss:$16 sps:$4 sm:$0xff]  }
0x1362   :  { %15315 = vmatmul.mubr.bf16.vlgmr.msra.gmra.mrb[124].mxu1 %v18708_v9 }
0x1363   :  { %8301 = vmatprep.mubr.bf16.mxu1 %v17734_v0  ;;  %8270 = vmatpush1.bf16.msra.mxu1 %v16780_v23  ;;  %v16834_v23 = vld [vmem:[#allocation13 + $0x28] ss:$16 sps:$4 sm:$0xff]  }
0x1364   :  { %8271 = vmatprep.subr.bf16.mxu1 %v16788_v30  ;;  %v16837_v30 = vld [vmem:[#allocation13 + $0x40] ss:$16 sps:$4 sm:$0xff]  }
0x1367   :  { %8272 = vmatpush1.bf16.msra.mxu1 %v16786_v44  ;;  %v16845_v44 = vld [vmem:[#allocation13 + $0x64] ss:$16 sps:$4 sm:$0xff]  }
0x1368   :  { %8273 = vmatprep.subr.bf16.mxu1 %v16794_v40  ;;  %v16843_v40 = vld [vmem:[#allocation13 + $0x60] ss:$16 sps:$4 sm:$0xff]  }
0x136b   :  { %8274 = vmatpush1.bf16.msra.mxu1 %v16792_v19  ;;  %v16851_v19 = vld [vmem:[#allocation13 + $0x84] ss:$16 sps:$4 sm:$0xff]  }
0x136c   :  { %8275 = vmatprep.subr.bf16.mxu1 %v16800_v32  ;;  %v16849_v32 = vld [vmem:[#allocation13 + $0x80] ss:$16 sps:$4 sm:$0xff]  }
0x136f   :  { %8276 = vmatpush1.bf16.msra.mxu1 %v16798_v17  ;;  %v16857_v17 = vld [vmem:[#allocation13 + $0xa4] ss:$16 sps:$4 sm:$0xff]  }
0x1370   :  { %8277 = vmatprep.subr.bf16.mxu1 %v16806_v48  ;;  %v16855_v48 = vld [vmem:[#allocation13 + $0xa0] ss:$16 sps:$4 sm:$0xff]  }
0x1373   :  { %8278 = vmatpush1.bf16.msra.mxu1 %v16804_v57  ;;  %v16863_v57 = vld [vmem:[#allocation13 + $0xc4] ss:$16 sps:$4 sm:$0xff]  }
0x1374   :  { %8279 = vmatprep.subr.bf16.mxu1 %v16812_v50  ;;  %v16861_v50 = vld [vmem:[#allocation13 + $0xc0] ss:$16 sps:$4 sm:$0xff]  }
0x1377   :  { %8280 = vmatpush1.bf16.msra.mxu1 %v16810_v54  ;;  %v16869_v54 = vld [vmem:[#allocation13 + $0xe4] ss:$16 sps:$4 sm:$0xff]  }
0x1378   :  { %8281 = vmatprep.subr.bf16.mxu1 %v16818_v43  ;;  %v16867_v43 = vld [vmem:[#allocation13 + $0xe0] ss:$16 sps:$4 sm:$0xff]  }
0x137b   :  { %8282 = vmatpush1.bf16.msra.mxu1 %v16816_v39  ;;  %v16873_v39 = vld [vmem:[#allocation11] sm:$0xff]  }
0x137c   :  { %8283 = vmatprep.subr.bf16.mxu1 %v16824_v4  ;;  %v16880_v4 = vld [vmem:[#allocation11 + $0x38] sm:$0xff]  }
0x137f   :  { %8284 = vmatpush1.bf16.msra.mxu1 %v16822_v1  ;;  %v16883_v1 = vld [vmem:[#allocation16 + $0x8] sm:$0xff]  }
0x1435   :  { %v8006_v36 = vpop.f32.mrb[124].mxu1 }
0x1436   :  { %v8007_v13 = vadd.f32 %v13471_v12, %v8006_v36  ;;  %v15316_v14 = vpop.f32.mrb[125].mxu1  ;;  %v16827_v12 = vld [vmem:[#allocation13 + $0x4] ss:$16 sps:$4 sm:$0xff]   ;;  %v16830_v36 = vld [vmem:[#allocation13 + $0xc] ss:$16 sps:$4 sm:$0xff]  }
0x1437   :  { %v8009_v22 = vpop.f32.mrb[126].mxu1  ;;  %8506 = vmatprep.subr.bf16.mxu0 %v16827_v12  ;;  %8547 = vmatprep.subr.bf16.mxu1 %v16830_v36  ;;  %v16885_v12 = vld [vmem:[#allocation16 + $0x10] sm:$0xff]   ;;  %v16887_v36 = vld [vmem:[#allocation16 + $0x18] sm:$0xff]  }
0x1438   :  { %8012 = vmax.xlane.f32.xlu1 %v8007_v13  ;;  %v15317_v8 = vpop.f32.mrb[127].mxu1 }
0x14c5   :  { %v8013_v16 = vpop.xlane.xlu1 %8012 }
0x14c6   :  { %vm8014_vm3 = vcmp.eq.f32.partialorder %v8007_v13, %v8013_v16 }
0x14c7   :  { %v8015_v6 = vsel %vm8014_vm3, %v18089_v21, 128 }
0x14c8   :  { %v8017_v18 = vshra.s32 %v8015_v6, 16  ;;  %v8016_v60 = vand.u32 65535, %v8015_v6  ;;  %v16825_v6 = vld [vmem:[#allocation13] ss:$16 sps:$4 sm:$0xff]  }
0x14ca   :  { %v18716_v5 = vcvt.s32.f32 %v8017_v18  ;;  %v8018_v63 = vcvt.s32.f32 %v8016_v60  ;;  %v16828_v18 = vld [vmem:[#allocation13 + $0x8] ss:$16 sps:$4 sm:$0xff]  }
0x14cb   :  { %v16874_v60 = vld [vmem:[#allocation11 + $0x8] sm:$0xff]  }
0x14cc   :  { %8020 = vmin.xlane.f32.xlu0 %v18716_v5 }
0x1559   :  { %v8021_v62 = vpop.xlane.xlu0 %8020 }
0x155a   :  { %vm8022_vm4 = vcmp.eq.f32.partialorder %v18716_v5, %v8021_v62  ;;  %v8027_v13 = vcvt.f32.s32 %v8021_v62  ;;  %v16833_v5 = vld [vmem:[#allocation13 + $0x24] ss:$16 sps:$4 sm:$0xff]  }
0x155b   :  { %v8023_v53 = vsel %vm8022_vm4, %v8018_v63, inf  ;;  %v16875_v62 = vld [vmem:[#allocation11 + $0x10] sm:$0xff]   ;;  %v16876_v63 = vld [vmem:[#allocation11 + $0x18] sm:$0xff]   ;;  %vm12710_vm4 = vcmask 56368  }
0x155c   :  { %8024 = vmin.xlane.f32.xlu1 %v8023_v53  ;;  %v8028_v22 = vshll.u32 %v8027_v13, 16  ;;  %v16878_v53 = vld [vmem:[#allocation11 + $0x28] sm:$0xff]   ;;  %v16889_v13 = vld [vmem:[#allocation16 + $0x20] sm:$0xff]  }
0x15e9   :  { %v8025_v14 = vpop.xlane.xlu1 %8024 }
0x15ea   :  { %v8026_v8 = vcvt.f32.s32 %v8025_v14  ;;  %v16891_v14 = vld [vmem:[#allocation16 + $0x28] sm:$0xff]  }
0x15ec   :  { %v8029_v16 = vadd.s32 %v8028_v22, %v8026_v8  ;;  %v16893_v22 = vld [vmem:[#allocation16 + $0x30] sm:$0xff]   ;;  %v16895_v8 = vld [vmem:[#allocation16 + $0x38] sm:$0xff]  }
0x15ee   :  { %vm8030_vm6 = vcmp.eq.s32.totalorder %v18089_v21, %v8029_v16  ;;  %8035 = vst.msk [vmem:[#allocation23] sm:$0xff] %vm8034_vm5, %v8029_v16 }
0x15ef   :  { %vm13513_vm7 = vmpackc.low %vm8030_vm6, %vm8030_vm6 }
0x15f0   :  { %13514 = vmatmul.mubr.msk.bf16.vlgmr.msra.gmra.mrb[128].mxu0 %vm13513_vm7, %v17737_v7  ;;  %13516 = vmatmul.mubr.msk.bf16.vlgmr.msra.gmra.mrb[128].mxu1 %vm13513_vm7, %v17737_v7 }
0x15f1   :  { %8507 = vmatpush1.bf16.msra.mxu0 %v16825_v6  ;;  %8548 = vmatpush1.bf16.msra.mxu1 %v16828_v18 }
0x15f2   :  { %8508 = vmatprep.subr.bf16.mxu0 %v16833_v5  ;;  %8549 = vmatprep.subr.bf16.mxu1 %v16836_v59 }
0x15f3   :  { %8538 = vmatprep.mubr.bf16.mxu0 %v17734_v0  ;;  %8579 = vmatprep.mubr.bf16.mxu1 %v17734_v0 }
0x15f5   :  { %8509 = vmatpush1.bf16.msra.mxu0 %v16831_v15  ;;  %8550 = vmatpush1.bf16.msra.mxu1 %v16834_v23 }
0x15f6   :  { %8510 = vmatprep.subr.bf16.mxu0 %v16839_v24  ;;  %8551 = vmatprep.subr.bf16.mxu1 %v16842_v20 }
0x15f9   :  { %8511 = vmatpush1.bf16.msra.mxu0 %v16837_v30  ;;  %8552 = vmatpush1.bf16.msra.mxu1 %v16840_v31  ;;  %v16882_v31 = vld [vmem:[#allocation11 + $0x40] sm:$0xff]  }
0x15fa   :  { %8512 = vmatprep.subr.bf16.mxu0 %v16845_v44  ;;  %8553 = vmatprep.subr.bf16.mxu1 %v16848_v38 }
0x15fd   :  { %8513 = vmatpush1.bf16.msra.mxu0 %v16843_v40  ;;  %8554 = vmatpush1.bf16.msra.mxu1 %v16846_v42  ;;  %v16884_v42 = vld [vmem:[#allocation11 + $0x48] sm:$0xff]  }
0x15fe   :  { %8514 = vmatprep.subr.bf16.mxu0 %v16851_v19  ;;  %8555 = vmatprep.subr.bf16.mxu1 %v16854_v11  ;;  %v16886_v19 = vld [vmem:[#allocation11 + $0x50] sm:$0xff]   ;;  %v16888_v11 = vld [vmem:[#allocation11 + $0x58] sm:$0xff]  }
0x1601   :  { %8515 = vmatpush1.bf16.msra.mxu0 %v16849_v32  ;;  %8556 = vmatpush1.bf16.msra.mxu1 %v16852_v46  ;;  %v16890_v32 = vld [vmem:[#allocation11 + $0x60] sm:$0xff]   ;;  %v16892_v46 = vld [vmem:[#allocation11 + $0x68] sm:$0xff]  }
0x1602   :  { %8516 = vmatprep.subr.bf16.mxu0 %v16857_v17  ;;  %8557 = vmatprep.subr.bf16.mxu1 %v16860_v47  ;;  %v16894_v17 = vld [vmem:[#allocation11 + $0x70] sm:$0xff]   ;;  %v16896_v47 = vld [vmem:[#allocation11 + $0x78] sm:$0xff]  }
0x1605   :  { %8517 = vmatpush1.bf16.msra.mxu0 %v16855_v48  ;;  %8558 = vmatpush1.bf16.msra.mxu1 %v16858_v49 }
0x1606   :  { %8518 = vmatprep.subr.bf16.mxu0 %v16863_v57  ;;  %8559 = vmatprep.subr.bf16.mxu1 %v16866_v41 }
0x1609   :  { %8519 = vmatpush1.bf16.msra.mxu0 %v16861_v50  ;;  %8560 = vmatpush1.bf16.msra.mxu1 %v16864_v52 }
0x160a   :  { %8520 = vmatprep.subr.bf16.mxu0 %v16869_v54  ;;  %8561 = vmatprep.subr.bf16.mxu1 %v16872_v61 }
0x160d   :  { %8521 = vmatpush1.bf16.msra.mxu0 %v16867_v43  ;;  %8562 = vmatpush1.bf16.msra.mxu1 %v16870_v58 }
0x160e   :  { %15338 = vmatprep.subr.bf16.mxu1 %v17735_v10  ;;  %15318 = vmatprep.subr.bf16.mxu0 %v17735_v10 }
0x1610   :  { %8539 = vmatmul.mubr.bf16.vlgmr.msra.gmra.mrb[132].mxu0 %v18708_v9  ;;  %8580 = vmatmul.mubr.bf16.vlgmr.msra.gmra.mrb[132].mxu1 %v18708_v9  ;;  %v16877_v9 = vld [vmem:[#allocation11 + $0x20] sm:$0xff]  }
0x1611   :  { %15339 = vmatpush3.bf16.msra.mxu1 %v16873_v39  ;;  %15354 = vmatprep.mubr.msk.bf16.mxu1 %vm17736_vm0, %v17735_v10  ;;  %v16897_v39 = vld [vmem:[#allocation16 + $0x40] sm:$0xff]  }
0x1612   :  { %15340 = vmatprep.subr.bf16.mxu1 %v17735_v10  ;;  %15334 = vmatprep.mubr.msk.bf16.mxu0 %vm17736_vm0, %v17735_v10 }
0x1613   :  { %15319 = vmatpush3.bf16.msra.mxu0 %v16881_v45  ;;  %v16901_v45 = vld [vmem:[#allocation16 + $0x50] sm:$0xff]  }
0x1614   :  { %15320 = vmatprep.subr.bf16.mxu0 %v17735_v10 }
0x1615   :  { %15341 = vmatpush3.bf16.msra.mxu1 %v16874_v60  ;;  %v16898_v60 = vld [vmem:[#allocation11 + $0x80] sm:$0xff]  }
0x1616   :  { %15342 = vmatprep.subr.bf16.mxu1 %v17735_v10 }
0x1617   :  { %15321 = vmatpush3.bf16.msra.mxu0 %v16883_v1  ;;  %v16902_v1 = vld [vmem:[#allocation11 + $0x90] sm:$0xff]  }
0x1618   :  { %15322 = vmatprep.subr.bf16.mxu0 %v17735_v10 }
0x1619   :  { %15343 = vmatpush3.bf16.msra.mxu1 %v16875_v62 }
0x161a   :  { %15344 = vmatprep.subr.bf16.mxu1 %v17735_v10 }
0x161b   :  { %15323 = vmatpush3.bf16.msra.mxu0 %v16885_v12  ;;  %v16903_v12 = vld [vmem:[#allocation16 + $0x58] sm:$0xff]  }
0x161c   :  { %15324 = vmatprep.subr.bf16.mxu0 %v17735_v10 }
0x161d   :  { %15345 = vmatpush3.bf16.msra.mxu1 %v16876_v63 }
0x161e   :  { %15346 = vmatprep.subr.bf16.mxu1 %v17735_v10 }
0x161f   :  { %15325 = vmatpush3.bf16.msra.mxu0 %v16887_v36  ;;  %v16904_v36 = vld [vmem:[#allocation11 + $0x98] sm:$0xff]  }
0x1620   :  { %15326 = vmatprep.subr.bf16.mxu0 %v17735_v10 }
0x1621   :  { %15347 = vmatpush3.bf16.msra.mxu1 %v16877_v9 }
0x1622   :  { %15348 = vmatprep.subr.bf16.mxu1 %v17735_v10 }
0x1623   :  { %15327 = vmatpush3.bf16.msra.mxu0 %v16889_v13  ;;  %v16905_v13 = vld [vmem:[#allocation16 + $0x60] sm:$0xff]  }
0x1624   :  { %15328 = vmatprep.subr.bf16.mxu0 %v17735_v10 }
0x1625   :  { %15349 = vmatpush3.bf16.msra.mxu1 %v16878_v53 }
0x1626   :  { %15350 = vmatprep.subr.bf16.mxu1 %v17735_v10 }
0x1627   :  { %15329 = vmatpush3.bf16.msra.mxu0 %v16891_v14  ;;  %v16906_v14 = vld [vmem:[#allocation11 + $0xa0] sm:$0xff]  }
0x1628   :  { %15330 = vmatprep.subr.bf16.mxu0 %v17735_v10 }
0x1629   :  { %15351 = vmatpush3.bf16.msra.mxu1 %v16879_v2  ;;  %v16899_v2 = vld [vmem:[#allocation16 + $0x48] sm:$0xff]  }
0x162a   :  { %15352 = vmatprep.subr.bf16.mxu1 %v17735_v10 }
0x162b   :  { %15331 = vmatpush3.bf16.msra.mxu0 %v16893_v22  ;;  %v16907_v22 = vld [vmem:[#allocation16 + $0x68] sm:$0xff]  }
0x162c   :  { %15332 = vmatprep.subr.bf16.mxu0 %v17735_v10 }
0x162d   :  { %15353 = vmatpush3.bf16.msra.mxu1 %v16880_v4  ;;  %v16900_v4 = vld [vmem:[#allocation11 + $0x88] sm:$0xff]  }
0x162e   :  { %15378 = vmatprep.subr.bf16.mxu1 %v17735_v10 }
0x162f   :  { %15333 = vmatpush3.bf16.msra.mxu0 %v16895_v8  ;;  %v16908_v8 = vld [vmem:[#allocation11 + $0xa8] sm:$0xff]  }
0x1630   :  { %15358 = vmatprep.subr.bf16.mxu0 %v17735_v10 }
0x16c3   :  { %v8262_v16 = vpop.f32.mrb[128].mxu0  ;;  %v8303_v6 = vpop.f32.mrb[128].mxu1 }
0x16c4   :  { %v8310_v18 = vmul.f32 %v8262_v16, %v18051_v25  ;;  %v18751_v5 = vmul.f32 %v8303_v6, %v18053_v26  ;;  %v8264_v59 = vpop.f32.mrb[129].mxu0  ;;  %v8305_v15 = vpop.f32.mrb[129].mxu1  ;;  %v16909_v16 = vld [vmem:[#allocation16 + $0x70] sm:$0xff]  }
0x16c5   :  { %v8311_v23 = vmul.f32 %v8264_v59, %v18055_v27  ;;  %v18755_v24 = vmul.f32 %v8305_v15, %v18057_v28  ;;  %v8266_v20 = vpop.f32.mrb[130].mxu0  ;;  %v8307_v30 = vpop.f32.mrb[130].mxu1  ;;  %v16910_v6 = vld [vmem:[#allocation11 + $0xb0] sm:$0xff]   ;;  %v16912_v59 = vld [vmem:[#allocation11 + $0xb8] sm:$0xff]   ;;  %v16913_v15 = vld [vmem:[#allocation16 + $0x80] sm:$0xff]  }
0x16c6   :  { %v8608_v44 = vpack.c.bf16 %v8310_v18, %v8310_v18  ;;  %v8267_v38 = vpop.f32.mrb[131].mxu0  ;;  %v8308_v40 = vpop.f32.mrb[131].mxu1  ;;  %v16911_v18 = vld [vmem:[#allocation16 + $0x78] sm:$0xff]   ;;  %v9030_v20 = vpack.c.bf16 %v18751_v5, %v18751_v5  ;;  %v16917_v5 = vld [vmem:[#allocation16 + $0x90] sm:$0xff]  }
0x16c7   :  { %v8819_v62 = vpack.c.bf16 %v8311_v23, %v8311_v23  ;;  %v16914_v23 = vld [vmem:[#allocation11 + $0xc0] sm:$0xff]   ;;  %v16918_v38 = vld [vmem:[#allocation11 + $0xd0] sm:$0xff]   ;;  %v16919_v40 = vld [vmem:[#allocation16 + $0x98] sm:$0xff]  }
0x16c8   :  { %15355 = vmatmul.mubr.bf16.vlgmr.msra.gmra.mrb[136].mxu1 %v8608_v44  ;;  %v16916_v44 = vld [vmem:[#allocation11 + $0xc8] sm:$0xff]  }
0x16c9   :  { %15379 = vmatpush3.bf16.msra.mxu1 %v16882_v31  ;;  %15394 = vmatprep.mubr.msk.bf16.mxu1 %vm17736_vm0, %v17735_v10  ;;  %v16915_v31 = vld [vmem:[#allocation16 + $0x88] sm:$0xff]  }
0x16ca   :  { %15380 = vmatprep.subr.bf16.mxu1 %v17735_v10 }
0x16cd   :  { %15381 = vmatpush3.bf16.msra.mxu1 %v16884_v42  ;;  %v16920_v42 = vld [vmem:[#allocation11 + $0xd8] sm:$0xff]  }
0x16ce   :  { %15382 = vmatprep.subr.bf16.mxu1 %v17735_v10 }
0x16d1   :  { %15383 = vmatpush3.bf16.msra.mxu1 %v16886_v19  ;;  %v16921_v19 = vld [vmem:[#allocation16 + $0xa0] sm:$0xff]  }
0x16d2   :  { %15384 = vmatprep.subr.bf16.mxu1 %v17735_v10 }
0x16d5   :  { %15385 = vmatpush3.bf16.msra.mxu1 %v16888_v11  ;;  %v16922_v11 = vld [vmem:[#allocation11 + $0xe0] sm:$0xff]  }
0x16d6   :  { %15386 = vmatprep.subr.bf16.mxu1 %v17735_v10 }
0x16d9   :  { %15387 = vmatpush3.bf16.msra.mxu1 %v16890_v32  ;;  %v16923_v32 = vld [vmem:[#allocation16 + $0xa8] sm:$0xff]  }
0x16da   :  { %15388 = vmatprep.subr.bf16.mxu1 %v17735_v10 }
0x16dd   :  { %15389 = vmatpush3.bf16.msra.mxu1 %v16892_v46  ;;  %v16924_v46 = vld [vmem:[#allocation11 + $0xe8] sm:$0xff]  }
0x16de   :  { %15390 = vmatprep.subr.bf16.mxu1 %v17735_v10 }
0x16e1   :  { %15391 = vmatpush3.bf16.msra.mxu1 %v16894_v17  ;;  %v16925_v17 = vld [vmem:[#allocation16 + $0xb0] sm:$0xff]  }
0x16e2   :  { %15392 = vmatprep.subr.bf16.mxu1 %v17735_v10 }
0x16e3   :  { %v8540_v48 = vpop.f32.mrb[132].mxu0  ;;  %v8581_v49 = vpop.f32.mrb[132].mxu1 }
0x16e4   :  { %v8588_v57 = vmul.f32 %v8540_v48, %v18059_v33  ;;  %v18768_v41 = vmul.f32 %v8581_v49, %v18061_v34  ;;  %v8542_v50 = vpop.f32.mrb[133].mxu0  ;;  %v8583_v52 = vpop.f32.mrb[133].mxu1  ;;  %v16927_v48 = vld [vmem:[#allocation16 + $0xb8] sm:$0xff]  }
0x16e5   :  { %v18771_v54 = vmul.f32 %v8542_v50, %v18063_v35  ;;  %v18774_v61 = vmul.f32 %v8583_v52, %v18065_v37  ;;  %v8544_v43 = vpop.f32.mrb[134].mxu0  ;;  %v8585_v58 = vpop.f32.mrb[134].mxu1  ;;  %15393 = vmatpush3.bf16.msra.mxu1 %v16896_v47  ;;  %v16926_v47 = vld [vmem:[#allocation11 + $0xf0] sm:$0xff]   ;;  %v16928_v49 = vld [vmem:[#allocation11 + $0xf8] sm:$0xff]   ;;  %v9241_v50 = vpack.c.bf16 %v18755_v24, %v18755_v24 }
0x16e6   :  { %v8625_v63 = vpack.c.bf16 %v8588_v57, %v8588_v57  ;;  %v8545_v9 = vpop.f32.mrb[135].mxu0  ;;  %v8586_v53 = vpop.f32.mrb[135].mxu1  ;;  %15418 = vmatprep.subr.bf16.mxu1 %v17735_v10  ;;  %v16929_v57 = vld [vmem:[#allocation16 + $0xc0] sm:$0xff]   ;;  %v9047_v52 = vpack.c.bf16 %v18768_v41, %v18768_v41  ;;  %v16931_v43 = vld [vmem:[#allocation16 + $0xd0] sm:$0xff]   ;;  %v16932_v24 = vld [vmem:[#allocation16 + $0xd8] sm:$0xff]  }
0x16e7   :  { %v8836_v30 = vpack.c.bf16 %v18771_v54, %v18771_v54  ;;  %v16930_v54 = vld [vmem:[#allocation16 + $0xc8] sm:$0xff]   ;;  %v16933_v41 = vld [vmem:[#allocation16 + $0xe0] sm:$0xff]  }
0x16e8   :  { %15335 = vmatmul.mubr.bf16.vlgmr.msra.gmra.mrb[136].mxu0 %v8625_v63  ;;  %15395 = vmatmul.mubr.bf16.vlgmr.msra.gmra.mrb[140].mxu1 %v8819_v62  ;;  %v16934_v58 = vld [vmem:[#allocation16 + $0xe8] sm:$0xff]   ;;  %v9258_v62 = vpack.c.bf16 %v18774_v61, %v18774_v61  ;;  %v16940_v61 = vld [vmem:[#allocation22 + $0x18] sm:$0xff]  }
0x16e9   :  { %15359 = vmatpush3.bf16.msra.mxu0 %v16897_v39  ;;  %15419 = vmatpush3.bf16.msra.mxu1 %v16898_v60  ;;  %v16935_v39 = vld [vmem:[#allocation16 + $0xf0] sm:$0xff]   ;;  %v16936_v60 = vld [vmem:[#allocation16 + $0xf8] sm:$0xff]  }
0x16ea   :  { %15360 = vmatprep.subr.bf16.mxu0 %v17735_v10  ;;  %15420 = vmatprep.subr.bf16.mxu1 %v17735_v10 }
0x16eb   :  { %15374 = vmatprep.mubr.msk.bf16.mxu0 %vm17736_vm0, %v17735_v10  ;;  %15434 = vmatprep.mubr.msk.bf16.mxu1 %vm17736_vm0, %v17735_v10 }
0x16ed   :  { %15361 = vmatpush3.bf16.msra.mxu0 %v16899_v2  ;;  %15421 = vmatpush3.bf16.msra.mxu1 %v16900_v4  ;;  %v16937_v2 = vld [vmem:[#allocation22] sm:$0xff]  }
0x16ee   :  { %15362 = vmatprep.subr.bf16.mxu0 %v17735_v10  ;;  %15422 = vmatprep.subr.bf16.mxu1 %v17735_v10 }
0x16f1   :  { %15363 = vmatpush3.bf16.msra.mxu0 %v16901_v45  ;;  %15423 = vmatpush3.bf16.msra.mxu1 %v16902_v1  ;;  %v16938_v45 = vld [vmem:[#allocation22 + $0x8] sm:$0xff]   ;;  %v16939_v1 = vld [vmem:[#allocation22 + $0x10] sm:$0xff]  }
0x16f2   :  { %15364 = vmatprep.subr.bf16.mxu0 %v17735_v10  ;;  %15424 = vmatprep.subr.bf16.mxu1 %v17735_v10 }
0x16f5   :  { %15365 = vmatpush3.bf16.msra.mxu0 %v16903_v12  ;;  %15425 = vmatpush3.bf16.msra.mxu1 %v16904_v36  ;;  %v16941_v12 = vld [vmem:[#allocation22 + $0x20] sm:$0xff]   ;;  %v16942_v36 = vld [vmem:[#allocation22 + $0x28] sm:$0xff]  }
0x16f6   :  { %15366 = vmatprep.subr.bf16.mxu0 %v17735_v10  ;;  %15426 = vmatprep.subr.bf16.mxu1 %v17735_v10 }
0x16f9   :  { %15367 = vmatpush3.bf16.msra.mxu0 %v16905_v13  ;;  %15427 = vmatpush3.bf16.msra.mxu1 %v16906_v14  ;;  %v16943_v13 = vld [vmem:[#allocation22 + $0x30] sm:$0xff]   ;;  %v16944_v14 = vld [vmem:[#allocation22 + $0x38] sm:$0xff]  }
0x16fa   :  { %15368 = vmatprep.subr.bf16.mxu0 %v17735_v10  ;;  %15428 = vmatprep.subr.bf16.mxu1 %v17735_v10 }
0x16fd   :  { %15369 = vmatpush3.bf16.msra.mxu0 %v16907_v22  ;;  %15429 = vmatpush3.bf16.msra.mxu1 %v16908_v8 }
0x16fe   :  { %15370 = vmatprep.subr.bf16.mxu0 %v17735_v10  ;;  %15430 = vmatprep.subr.bf16.mxu1 %v17735_v10 }
0x1701   :  { %15371 = vmatpush3.bf16.msra.mxu0 %v16909_v16  ;;  %15431 = vmatpush3.bf16.msra.mxu1 %v16910_v6 }
0x1702   :  { %15372 = vmatprep.subr.bf16.mxu0 %v17735_v10  ;;  %15432 = vmatprep.subr.bf16.mxu1 %v17735_v10 }
0x1705   :  { %15373 = vmatpush3.bf16.msra.mxu0 %v16911_v18  ;;  %15433 = vmatpush3.bf16.msra.mxu1 %v16912_v59 }
0x1706   :  { %15398 = vmatprep.subr.bf16.mxu0 %v17735_v10  ;;  %15458 = vmatprep.subr.bf16.mxu1 %v17735_v10 }
0x1708   :  { %15375 = vmatmul.mubr.bf16.vlgmr.msra.gmra.mrb[140].mxu0 %v8836_v30  ;;  %15435 = vmatmul.mubr.bf16.vlgmr.msra.gmra.mrb[144].mxu1 %v9030_v20 }
0x1709   :  { %15399 = vmatpush3.bf16.msra.mxu0 %v16913_v15  ;;  %15459 = vmatpush3.bf16.msra.mxu1 %v16914_v23 }
0x170a   :  { %15400 = vmatprep.subr.bf16.mxu0 %v17735_v10  ;;  %15460 = vmatprep.subr.bf16.mxu1 %v17735_v10 }
0x170b   :  { %15414 = vmatprep.mubr.msk.bf16.mxu0 %vm17736_vm0, %v17735_v10  ;;  %15474 = vmatprep.mubr.msk.bf16.mxu1 %vm17736_vm0, %v17735_v10 }
0x170d   :  { %15401 = vmatpush3.bf16.msra.mxu0 %v16915_v31  ;;  %15461 = vmatpush3.bf16.msra.mxu1 %v16916_v44 }
0x170e   :  { %15402 = vmatprep.subr.bf16.mxu0 %v17735_v10  ;;  %15462 = vmatprep.subr.bf16.mxu1 %v17735_v10 }
0x1711   :  { %15403 = vmatpush3.bf16.msra.mxu0 %v16917_v5  ;;  %15463 = vmatpush3.bf16.msra.mxu1 %v16918_v38 }
0x1712   :  { %15404 = vmatprep.subr.bf16.mxu0 %v17735_v10  ;;  %15464 = vmatprep.subr.bf16.mxu1 %v17735_v10 }
0x1715   :  { %15405 = vmatpush3.bf16.msra.mxu0 %v16919_v40  ;;  %15465 = vmatpush3.bf16.msra.mxu1 %v16920_v42 }
0x1716   :  { %15406 = vmatprep.subr.bf16.mxu0 %v17735_v10  ;;  %15466 = vmatprep.subr.bf16.mxu1 %v17735_v10 }
0x1719   :  { %15407 = vmatpush3.bf16.msra.mxu0 %v16921_v19  ;;  %15467 = vmatpush3.bf16.msra.mxu1 %v16922_v11 }
0x171a   :  { %15408 = vmatprep.subr.bf16.mxu0 %v17735_v10  ;;  %15468 = vmatprep.subr.bf16.mxu1 %v17735_v10 }
0x171d   :  { %15409 = vmatpush3.bf16.msra.mxu0 %v16923_v32  ;;  %15469 = vmatpush3.bf16.msra.mxu1 %v16924_v46 }
0x171e   :  { %15410 = vmatprep.subr.bf16.mxu0 %v17735_v10  ;;  %15470 = vmatprep.subr.bf16.mxu1 %v17735_v10 }
0x1721   :  { %15411 = vmatpush3.bf16.msra.mxu0 %v16925_v17  ;;  %15471 = vmatpush3.bf16.msra.mxu1 %v16926_v47 }
0x1722   :  { %15412 = vmatprep.subr.bf16.mxu0 %v17735_v10  ;;  %15472 = vmatprep.subr.bf16.mxu1 %v17735_v10 }
0x1725   :  { %15413 = vmatpush3.bf16.msra.mxu0 %v16927_v48  ;;  %15473 = vmatpush3.bf16.msra.mxu1 %v16928_v49 }
0x1726   :  { %15438 = vmatprep.subr.bf16.mxu0 %v17735_v10 }
0x1728   :  { %15415 = vmatmul.mubr.bf16.vlgmr.msra.gmra.mrb[144].mxu0 %v9047_v52  ;;  %15475 = vmatmul.mubr.bf16.vlgmr.msra.gmra.mrb[148].mxu1 %v9241_v50 }
0x1729   :  { %15439 = vmatpush3.bf16.msra.mxu0 %v16929_v57  ;;  %15454 = vmatprep.mubr.msk.bf16.mxu0 %vm17736_vm0, %v17735_v10 }
0x172a   :  { %15440 = vmatprep.subr.bf16.mxu0 %v17735_v10  ;;  %9820 = vmatprep.mubr.bf16.mxu1 %v17734_v0 }
0x172d   :  { %15441 = vmatpush3.bf16.msra.mxu0 %v16930_v54 }
0x172e   :  { %15442 = vmatprep.subr.bf16.mxu0 %v17735_v10 }
0x1731   :  { %15443 = vmatpush3.bf16.msra.mxu0 %v16931_v43 }
0x1732   :  { %15444 = vmatprep.subr.bf16.mxu0 %v17735_v10 }
0x1735   :  { %15445 = vmatpush3.bf16.msra.mxu0 %v16932_v24 }
0x1736   :  { %15446 = vmatprep.subr.bf16.mxu0 %v17735_v10 }
0x1739   :  { %15447 = vmatpush3.bf16.msra.mxu0 %v16933_v41 }
0x173a   :  { %15448 = vmatprep.subr.bf16.mxu0 %v17735_v10 }
0x173d   :  { %15449 = vmatpush3.bf16.msra.mxu0 %v16934_v58 }
0x173e   :  { %15450 = vmatprep.subr.bf16.mxu0 %v17735_v10 }
0x1741   :  { %15451 = vmatpush3.bf16.msra.mxu0 %v16935_v39 }
0x1742   :  { %15452 = vmatprep.subr.bf16.mxu0 %v17735_v10 }
0x1745   :  { %15453 = vmatpush3.bf16.msra.mxu0 %v16936_v60 }
0x1746   :  { %15478 = vmatprep.subr.bf16.mxu0 %v17735_v10 }
0x1748   :  { %15455 = vmatmul.mubr.bf16.vlgmr.msra.gmra.mrb[148].mxu0 %v9258_v62 }
0x1749   :  { %15494 = vmatprep.mubr.msk.bf16.mxu0 %vm17736_vm0, %v17735_v10  ;;  %15479 = vmatpush3.bf16.msra.mxu0 %v16937_v2 }
0x174a   :  { %15480 = vmatprep.subr.bf16.mxu0 %v17735_v10 }
0x174d   :  { %15481 = vmatpush3.bf16.msra.mxu0 %v16938_v45 }
0x174e   :  { %15482 = vmatprep.subr.bf16.mxu0 %v17735_v10 }
0x1751   :  { %15483 = vmatpush3.bf16.msra.mxu0 %v16939_v1 }
0x1752   :  { %15484 = vmatprep.subr.bf16.mxu0 %v17735_v10 }
0x1755   :  { %15485 = vmatpush3.bf16.msra.mxu0 %v16940_v61 }
0x1756   :  { %15486 = vmatprep.subr.bf16.mxu0 %v17735_v10 }
0x1759   :  { %15487 = vmatpush3.bf16.msra.mxu0 %v16941_v12 }
0x175a   :  { %15488 = vmatprep.subr.bf16.mxu0 %v17735_v10 }
0x175d   :  { %15489 = vmatpush3.bf16.msra.mxu0 %v16942_v36 }
0x175e   :  { %15490 = vmatprep.subr.bf16.mxu0 %v17735_v10 }
0x1761   :  { %15491 = vmatpush3.bf16.msra.mxu0 %v16943_v13 }
0x1762   :  { %15492 = vmatprep.subr.bf16.mxu0 %v17735_v10 }
0x1765   :  { %15493 = vmatpush3.bf16.msra.mxu0 %v16944_v14 }
0x179b   :  { %v8796_v63 = vpop.f32.mrb[136].mxu1 }
0x179c   :  { %v15356_v9 = vpop.f32.mrb[137].mxu1 }
0x179d   :  { %v8799_v53 = vpop.f32.mrb[138].mxu1 }
0x179e   :  { %v15357_v4 = vpop.f32.mrb[139].mxu1 }
0x17bb   :  { %v8708_v22 = vpop.f32.mrb[136].mxu0  ;;  %v9007_v8 = vpop.f32.mrb[140].mxu1 }
0x17bc   :  { %v8797_v16 = vadd.f32 %v8796_v63, %v8708_v22  ;;  %v15336_v6 = vpop.f32.mrb[137].mxu0  ;;  %v15396_v18 = vpop.f32.mrb[141].mxu1 }
0x17bd   :  { %v8711_v59 = vpop.f32.mrb[138].mxu0  ;;  %v9010_v15 = vpop.f32.mrb[142].mxu1 }
0x17be   :  { %v15337_v23 = vpop.f32.mrb[139].mxu0  ;;  %v15397_v20 = vpop.f32.mrb[143].mxu1  ;;  %v8802_v43 = vadd.f32 %v8797_v16, %v18249_v29 }
0x17bf   :  { %v13616_v20 = vld [vmem:[%s19172_s14] ss:$0 sm:$0xff] }
0x17c0   :  { %v13613_v41 = vmul.f32 -1.442695, %v8802_v43  ;;  %v16960_v43 = vld [vmem:[#allocation8 + $0x48] ss:$16 sps:$4 sm:$0xff]  }
0x17db   :  { %v8919_v30 = vpop.f32.mrb[140].mxu0  ;;  %v9218_v31 = vpop.f32.mrb[144].mxu1 }
0x17dc   :  { %v9008_v44 = vadd.f32 %v9007_v8, %v8919_v30  ;;  %v15376_v5 = vpop.f32.mrb[141].mxu0  ;;  %v15436_v38 = vpop.f32.mrb[145].mxu1 }
0x17dd   :  { %v8922_v40 = vpop.f32.mrb[142].mxu0  ;;  %v9221_v42 = vpop.f32.mrb[146].mxu1 }
0x17de   :  { %v15377_v19 = vpop.f32.mrb[143].mxu0  ;;  %v15437_v11 = vpop.f32.mrb[147].mxu1  ;;  %v9013_v54 = vadd.f32 %v9008_v44, %v18246_v51 }
0x17df   :  { %v16945_v11 = vld [vmem:[#allocation8] ss:$16 sps:$4 sm:$0xff]  }
0x17e0   :  { %v13614_v24 = vmul.f32 -1.442695, %v9013_v54  ;;  %v16957_v54 = vld [vmem:[#allocation8 + $0x40] ss:$16 sps:$4 sm:$0xff]  }
0x17e2   :  { %17345 = vpow2.f32 %v13614_v24  ;;  %v16965_v24 = vld [vmem:[#allocation8 + $0x64] ss:$16 sps:$4 sm:$0xff]  }
0x17e3   :  { %17347 = vpow2.f32 %v13613_v41  ;;  %v16968_v41 = vld [vmem:[#allocation8 + $0x6c] ss:$16 sps:$4 sm:$0xff]  }
0x17ec   :  { %v17346_v39 = vpop.eup %17345 }
0x17ed   :  { %v17348_v60 = vpop.eup %17347  ;;  %v9445_v63 = vadd.f32 1.0, %v17346_v39  ;;  %v16966_v39 = vld [vmem:[#allocation8 + $0x68] ss:$16 sps:$4 sm:$0xff]  }
0x17ee   :  { %v9439_v9 = vadd.f32 1.0, %v17348_v60  ;;  %v16971_v60 = vld [vmem:[#allocation8 + $0x84] ss:$16 sps:$4 sm:$0xff]  }
0x17fb   :  { %v9130_v32 = vpop.f32.mrb[144].mxu0  ;;  %v9429_v46 = vpop.f32.mrb[148].mxu1 }
0x17fc   :  { %v9219_v17 = vadd.f32 %v9218_v31, %v9130_v32  ;;  %v15416_v47 = vpop.f32.mrb[145].mxu0  ;;  %v15476_v48 = vpop.f32.mrb[149].mxu1  ;;  %v16947_v32 = vld [vmem:[#allocation8 + $0x4] ss:$16 sps:$4 sm:$0xff]  }
0x17fd   :  { %v9133_v49 = vpop.f32.mrb[146].mxu0  ;;  %v9432_v57 = vpop.f32.mrb[150].mxu1  ;;  %v16953_v47 = vld [vmem:[#allocation8 + $0x24] ss:$16 sps:$4 sm:$0xff]   ;;  %9788 = vmatprep.subr.bf16.mxu1 %v16947_v32  ;;  %v16956_v48 = vld [vmem:[#allocation8 + $0x2c] ss:$16 sps:$4 sm:$0xff]  }
0x17fe   :  { %v15417_v50 = vpop.f32.mrb[147].mxu0  ;;  %v15477_v52 = vpop.f32.mrb[151].mxu1  ;;  %v9224_v58 = vadd.f32 %v9219_v17, %v18257_v55  ;;  %v16950_v17 = vld [vmem:[#allocation8 + $0xc] ss:$16 sps:$4 sm:$0xff]   ;;  %9789 = vmatpush1.bf16.msra.mxu1 %v16945_v11  ;;  %v16951_v49 = vld [vmem:[#allocation8 + $0x20] ss:$16 sps:$4 sm:$0xff]  }
0x17ff   :  { %9829 = vmatprep.subr.bf16.mxu0 %v16950_v17  ;;  %9790 = vmatprep.subr.bf16.mxu1 %v16953_v47  ;;  %v16954_v57 = vld [vmem:[#allocation8 + $0x28] ss:$16 sps:$4 sm:$0xff]   ;;  %v16959_v50 = vld [vmem:[#allocation8 + $0x44] ss:$16 sps:$4 sm:$0xff]   ;;  %v16962_v52 = vld [vmem:[#allocation8 + $0x4c] ss:$16 sps:$4 sm:$0xff]  }
0x1800   :  { %v13615_v62 = vmul.f32 -1.442695, %v9224_v58  ;;  %v16963_v58 = vld [vmem:[#allocation8 + $0x60] ss:$16 sps:$4 sm:$0xff]   ;;  %v17004_v11 = vld [vmem:[#allocation13 + $0x2c] ss:$16 sps:$4 sm:$0xff]  }
0x1801   :  { %v16999_v32 = vld [vmem:[#allocation13 + $0x20] ss:$16 sps:$4 sm:$0xff]   ;;  %v17007_v17 = vld [vmem:[#allocation13 + $0x44] ss:$16 sps:$4 sm:$0xff]   ;;  %v17010_v47 = vld [vmem:[#allocation13 + $0x4c] ss:$16 sps:$4 sm:$0xff]  }
0x1802   :  { %17349 = vpow2.f32 %v13615_v62  ;;  %9791 = vmatpush1.bf16.msra.mxu1 %v16951_v49  ;;  %v16974_v62 = vld [vmem:[#allocation8 + $0x8c] ss:$16 sps:$4 sm:$0xff]   ;;  %v17008_v49 = vld [vmem:[#allocation13 + $0x48] ss:$16 sps:$4 sm:$0xff]  }
0x1803   :  { %17351 = vrcp.f32 %v9445_v63  ;;  %9792 = vmatprep.subr.bf16.mxu1 %v16959_v50  ;;  %v16969_v63 = vld [vmem:[#allocation8 + $0x80] ss:$16 sps:$4 sm:$0xff]   ;;  %v17016_v50 = vld [vmem:[#allocation13 + $0x6c] ss:$16 sps:$4 sm:$0xff]  }
0x1804   :  { %17353 = vrcp.f32 %v9439_v9  ;;  %v16972_v9 = vld [vmem:[#allocation8 + $0x88] ss:$16 sps:$4 sm:$0xff]  }
0x1806   :  { %9793 = vmatpush1.bf16.msra.mxu1 %v16957_v54  ;;  %v17014_v54 = vld [vmem:[#allocation13 + $0x68] ss:$16 sps:$4 sm:$0xff]  }
0x1807   :  { %9794 = vmatprep.subr.bf16.mxu1 %v16965_v24  ;;  %v17022_v24 = vld [vmem:[#allocation13 + $0x8c] ss:$16 sps:$4 sm:$0xff]  }
0x180a   :  { %9795 = vmatpush1.bf16.msra.mxu1 %v16963_v58  ;;  %v17020_v58 = vld [vmem:[#allocation13 + $0x88] ss:$16 sps:$4 sm:$0xff]  }
0x180b   :  { %9796 = vmatprep.subr.bf16.mxu1 %v16971_v60  ;;  %v17028_v60 = vld [vmem:[#allocation13 + $0xac] ss:$16 sps:$4 sm:$0xff]  }
0x180c   :  { %v17350_v12 = vpop.eup %17349 }
0x180d   :  { %v17352_v36 = vpop.eup %17351  ;;  %v9451_v22 = vadd.f32 1.0, %v17350_v12  ;;  %v16981_v12 = vld [vmem:[#allocation8 + $0xc0] ss:$16 sps:$4 sm:$0xff]  }
0x180e   :  { %v17354_v13 = vpop.eup %17353  ;;  %v9455_v8 = vmul.f32 %v17352_v36, %v18705_v3  ;;  %9797 = vmatpush1.bf16.msra.mxu1 %v16969_v63  ;;  %v16984_v36 = vld [vmem:[#allocation8 + $0xc8] ss:$16 sps:$4 sm:$0xff]  }
0x180f   :  { %v17026_v63 = vld [vmem:[#allocation13 + $0xa8] ss:$16 sps:$4 sm:$0xff]  }
0x181b   :  { %v9341_v53 = vpop.f32.mrb[148].mxu0 }
0x181c   :  { %v9430_v2 = vadd.f32 %v9429_v46, %v9341_v53  ;;  %v15456_v4 = vpop.f32.mrb[149].mxu0  ;;  %v16948_v46 = vld [vmem:[#allocation8 + $0x8] ss:$16 sps:$4 sm:$0xff]   ;;  %v16977_v53 = vld [vmem:[#allocation8 + $0xa4] ss:$16 sps:$4 sm:$0xff]  }
0x181d   :  { %v9344_v45 = vpop.f32.mrb[150].mxu0  ;;  %v16975_v4 = vld [vmem:[#allocation8 + $0xa0] ss:$16 sps:$4 sm:$0xff]   ;;  %9798 = vmatprep.subr.bf16.mxu1 %v16977_v53  ;;  %v17034_v53 = vld [vmem:[#allocation13 + $0xcc] ss:$16 sps:$4 sm:$0xff]  }
0x181e   :  { %v9435_v1 = vadd.f32 %v9430_v2, %v18264_v56  ;;  %v15457_v61 = vpop.f32.mrb[151].mxu0  ;;  %v16980_v2 = vld [vmem:[#allocation8 + $0xac] ss:$16 sps:$4 sm:$0xff]   ;;  %v16978_v45 = vld [vmem:[#allocation8 + $0xa8] ss:$16 sps:$4 sm:$0xff]   ;;  %9799 = vmatpush1.bf16.msra.mxu1 %v16975_v4 }
0x181f   :  { %v16986_v61 = vld [vmem:[#allocation8 + $0xcc] ss:$16 sps:$4 sm:$0xff]   ;;  %v17032_v4 = vld [vmem:[#allocation13 + $0xc8] ss:$16 sps:$4 sm:$0xff]  }
0x1820   :  { %17355 = vtanh.f32 %v9435_v1  ;;  %v16983_v1 = vld [vmem:[#allocation8 + $0xc4] ss:$16 sps:$4 sm:$0xff]  }
0x1821   :  { %17357 = vrcp.f32 %v9451_v22  ;;  %9800 = vmatprep.subr.bf16.mxu1 %v16983_v1  ;;  %v17040_v1 = vld [vmem:[#allocation13 + $0xec] ss:$16 sps:$4 sm:$0xff]  }
0x1822   :  { %9801 = vmatpush1.bf16.msra.mxu1 %v16981_v12  ;;  %v17038_v12 = vld [vmem:[#allocation13 + $0xe8] ss:$16 sps:$4 sm:$0xff]  }
0x182a   :  { %v17356_v14 = vpop.eup %17355 }
0x182b   :  { %v9456_v16 = vmul.f32 %v17356_v14, %v17354_v13  ;;  %v17358_v18 = vpop.eup %17357 }
0x182d   :  { %v18851_v6 = vadd.f32 %v9456_v16, %v9455_v8  ;;  %v16989_v16 = vld [vmem:[#allocation8 + $0xe4] ss:$16 sps:$4 sm:$0xff]  }
0x182e   :  { %9802 = vmatprep.subr.bf16.mxu1 %v16989_v16  ;;  %v17047_v16 = vld [vmem:[#allocation11 + $0x30] sm:$0xff]  }
0x182f   :  { %17359 = vtanh.f32 %v18851_v6 }
0x1839   :  { %v17360_v59 = vpop.eup %17359 }
0x183a   :  { %v9459_v15 = vmul.f32 %v17360_v59, %v17358_v18  ;;  %v16992_v18 = vld [vmem:[#allocation8 + $0xec] ss:$16 sps:$4 sm:$0xff]   ;;  %v16987_v59 = vld [vmem:[#allocation8 + $0xe0] ss:$16 sps:$4 sm:$0xff]  }
0x183b   :  { %9803 = vmatpush1.bf16.msra.mxu1 %v16987_v59  ;;  %v17049_v59 = vld [vmem:[#allocation16] sm:$0xff]  }
0x183c   :  { %v18854_v23 = vpack.c.bf16 %v9459_v15, %v9459_v15  ;;  %v16990_v15 = vld [vmem:[#allocation8 + $0xe8] ss:$16 sps:$4 sm:$0xff]  }
0x183e   :  { %15495 = vmatmul.mubr.bf16.vlgmr.msra.gmra.mrb[152].mxu0 %v18854_v23 }
0x183f   :  { %9861 = vmatprep.mubr.bf16.mxu0 %v17734_v0  ;;  %9830 = vmatpush1.bf16.msra.mxu0 %v16948_v46  ;;  %v17002_v46 = vld [vmem:[#allocation13 + $0x28] ss:$16 sps:$4 sm:$0xff]  }
0x1840   :  { %9831 = vmatprep.subr.bf16.mxu0 %v16956_v48  ;;  %v17005_v48 = vld [vmem:[#allocation13 + $0x40] ss:$16 sps:$4 sm:$0xff]  }
0x1843   :  { %9832 = vmatpush1.bf16.msra.mxu0 %v16954_v57  ;;  %v17013_v57 = vld [vmem:[#allocation13 + $0x64] ss:$16 sps:$4 sm:$0xff]  }
0x1844   :  { %9833 = vmatprep.subr.bf16.mxu0 %v16962_v52  ;;  %v17011_v52 = vld [vmem:[#allocation13 + $0x60] ss:$16 sps:$4 sm:$0xff]  }
0x1847   :  { %9834 = vmatpush1.bf16.msra.mxu0 %v16960_v43  ;;  %v17019_v43 = vld [vmem:[#allocation13 + $0x84] ss:$16 sps:$4 sm:$0xff]  }
0x1848   :  { %9835 = vmatprep.subr.bf16.mxu0 %v16968_v41  ;;  %v17017_v41 = vld [vmem:[#allocation13 + $0x80] ss:$16 sps:$4 sm:$0xff]  }
0x184b   :  { %9836 = vmatpush1.bf16.msra.mxu0 %v16966_v39  ;;  %v17025_v39 = vld [vmem:[#allocation13 + $0xa4] ss:$16 sps:$4 sm:$0xff]  }
0x184c   :  { %9837 = vmatprep.subr.bf16.mxu0 %v16974_v62  ;;  %v17023_v62 = vld [vmem:[#allocation13 + $0xa0] ss:$16 sps:$4 sm:$0xff]  }
0x184f   :  { %9838 = vmatpush1.bf16.msra.mxu0 %v16972_v9  ;;  %v17031_v9 = vld [vmem:[#allocation13 + $0xc4] ss:$16 sps:$4 sm:$0xff]  }
0x1850   :  { %9839 = vmatprep.subr.bf16.mxu0 %v16980_v2  ;;  %v17029_v2 = vld [vmem:[#allocation13 + $0xc0] ss:$16 sps:$4 sm:$0xff]  }
0x1853   :  { %9840 = vmatpush1.bf16.msra.mxu0 %v16978_v45  ;;  %v17037_v45 = vld [vmem:[#allocation13 + $0xe4] ss:$16 sps:$4 sm:$0xff]  }
0x1854   :  { %9841 = vmatprep.subr.bf16.mxu0 %v16986_v61  ;;  %v17035_v61 = vld [vmem:[#allocation13 + $0xe0] ss:$16 sps:$4 sm:$0xff]  }
0x1857   :  { %9842 = vmatpush1.bf16.msra.mxu0 %v16984_v36  ;;  %v17041_v36 = vld [vmem:[#allocation11] sm:$0xff]  }
0x1858   :  { %9843 = vmatprep.subr.bf16.mxu0 %v16992_v18  ;;  %v17048_v18 = vld [vmem:[#allocation11 + $0x38] sm:$0xff]  }
0x185b   :  { %9844 = vmatpush1.bf16.msra.mxu0 %v16990_v15  ;;  %v17051_v15 = vld [vmem:[#allocation16 + $0x8] sm:$0xff]  }
0x1911   :  { %v9566_v3 = vpop.f32.mrb[152].mxu0 }
0x1912   :  { %v9567_v30 = vadd.f32 %v13616_v20, %v9566_v3  ;;  %v15496_v31 = vpop.f32.mrb[153].mxu0  ;;  %v16995_v20 = vld [vmem:[#allocation13 + $0x4] ss:$16 sps:$4 sm:$0xff]   ;;  %v16998_v3 = vld [vmem:[#allocation13 + $0xc] ss:$16 sps:$4 sm:$0xff]  }
0x1913   :  { %v9569_v44 = vpop.f32.mrb[154].mxu0  ;;  %10066 = vmatprep.subr.bf16.mxu1 %v16995_v20  ;;  %10107 = vmatprep.subr.bf16.mxu0 %v16998_v3  ;;  %v17053_v20 = vld [vmem:[#allocation16 + $0x10] sm:$0xff]   ;;  %v17055_v3 = vld [vmem:[#allocation16 + $0x18] sm:$0xff]  }
0x1914   :  { %9572 = vmax.xlane.f32.xlu0 %v9567_v30  ;;  %v15497_v5 = vpop.f32.mrb[155].mxu0 }
0x19a1   :  { %v9573_v38 = vpop.xlane.xlu0 %9572 }
0x19a2   :  { %vm9574_vm8 = vcmp.eq.f32.partialorder %v9567_v30, %v9573_v38 }
0x19a3   :  { %v9575_v40 = vsel %vm9574_vm8, %v18089_v21, 128 }
0x19a4   :  { %v9577_v42 = vshra.s32 %v9575_v40, 16  ;;  %v9576_v13 = vand.u32 65535, %v9575_v40  ;;  %v16993_v40 = vld [vmem:[#allocation13] ss:$16 sps:$4 sm:$0xff]  }
0x19a6   :  { %v18862_v19 = vcvt.s32.f32 %v9577_v42  ;;  %v9578_v22 = vcvt.s32.f32 %v9576_v13  ;;  %v16996_v42 = vld [vmem:[#allocation13 + $0x8] ss:$16 sps:$4 sm:$0xff]  }
0x19a7   :  { %v17042_v13 = vld [vmem:[#allocation11 + $0x8] sm:$0xff]  }
0x19a8   :  { %9580 = vmin.xlane.f32.xlu1 %v18862_v19 }
0x1a35   :  { %v9581_v14 = vpop.xlane.xlu1 %9580 }
0x1a36   :  { %vm9582_vm9 = vcmp.eq.f32.partialorder %v18862_v19, %v9581_v14  ;;  %v9587_v30 = vcvt.f32.s32 %v9581_v14  ;;  %v17001_v19 = vld [vmem:[#allocation13 + $0x24] ss:$16 sps:$4 sm:$0xff]  }
0x1a37   :  { %v9583_v8 = vsel %vm9582_vm9, %v9578_v22, inf  ;;  %v17043_v14 = vld [vmem:[#allocation11 + $0x10] sm:$0xff]   ;;  %v17044_v22 = vld [vmem:[#allocation11 + $0x18] sm:$0xff]  }
0x1a38   :  { %9584 = vmin.xlane.f32.xlu0 %v9583_v8  ;;  %v9588_v44 = vshll.u32 %v9587_v30, 16  ;;  %v17046_v8 = vld [vmem:[#allocation11 + $0x28] sm:$0xff]   ;;  %v17057_v30 = vld [vmem:[#allocation16 + $0x20] sm:$0xff]  }
0x1ac5   :  { %v9585_v31 = vpop.xlane.xlu0 %9584 }
0x1ac6   :  { %v9586_v5 = vcvt.f32.s32 %v9585_v31  ;;  %v17059_v31 = vld [vmem:[#allocation16 + $0x28] sm:$0xff]  }
0x1ac8   :  { %v9589_v38 = vadd.s32 %v9588_v44, %v9586_v5  ;;  %v17061_v44 = vld [vmem:[#allocation16 + $0x30] sm:$0xff]   ;;  %v17063_v5 = vld [vmem:[#allocation16 + $0x38] sm:$0xff]  }
0x1aca   :  { %vm9590_vm11 = vcmp.eq.s32.totalorder %v18089_v21, %v9589_v38  ;;  %9595 = vst.msk [vmem:[#allocation23] sm:$0xff] %vm9594_vm10, %v9589_v38 }
0x1acb   :  { %vm13658_vm12 = vmpackc.low %vm9590_vm11, %vm9590_vm11 }
0x1acc   :  { %13659 = vmatmul.mubr.msk.bf16.vlgmr.msra.gmra.mrb[152].mxu1 %vm13658_vm12, %v17737_v7  ;;  %13661 = vmatmul.mubr.msk.bf16.vlgmr.msra.gmra.mrb[156].mxu0 %vm13658_vm12, %v17737_v7 }
0x1acd   :  { %10067 = vmatpush1.bf16.msra.mxu1 %v16993_v40  ;;  %10108 = vmatpush1.bf16.msra.mxu0 %v16996_v42 }
0x1ace   :  { %10068 = vmatprep.subr.bf16.mxu1 %v17001_v19  ;;  %10109 = vmatprep.subr.bf16.mxu0 %v17004_v11 }
0x1acf   :  { %10098 = vmatprep.mubr.bf16.mxu1 %v17734_v0  ;;  %10139 = vmatprep.mubr.bf16.mxu0 %v17734_v0 }
0x1ad1   :  { %10069 = vmatpush1.bf16.msra.mxu1 %v16999_v32  ;;  %10110 = vmatpush1.bf16.msra.mxu0 %v17002_v46 }
0x1ad2   :  { %10070 = vmatprep.subr.bf16.mxu1 %v17007_v17  ;;  %10111 = vmatprep.subr.bf16.mxu0 %v17010_v47 }
0x1ad5   :  { %10071 = vmatpush1.bf16.msra.mxu1 %v17005_v48  ;;  %10112 = vmatpush1.bf16.msra.mxu0 %v17008_v49  ;;  %v17050_v49 = vld [vmem:[#allocation11 + $0x40] sm:$0xff]  }
0x1ad6   :  { %10072 = vmatprep.subr.bf16.mxu1 %v17013_v57  ;;  %10113 = vmatprep.subr.bf16.mxu0 %v17016_v50 }
0x1ad9   :  { %10073 = vmatpush1.bf16.msra.mxu1 %v17011_v52  ;;  %10114 = vmatpush1.bf16.msra.mxu0 %v17014_v54  ;;  %v17052_v54 = vld [vmem:[#allocation11 + $0x48] sm:$0xff]  }
0x1ada   :  { %10074 = vmatprep.subr.bf16.mxu1 %v17019_v43  ;;  %10115 = vmatprep.subr.bf16.mxu0 %v17022_v24  ;;  %v17054_v43 = vld [vmem:[#allocation11 + $0x50] sm:$0xff]   ;;  %v17056_v24 = vld [vmem:[#allocation11 + $0x58] sm:$0xff]  }
0x1add   :  { %10075 = vmatpush1.bf16.msra.mxu1 %v17017_v41  ;;  %10116 = vmatpush1.bf16.msra.mxu0 %v17020_v58  ;;  %v17058_v41 = vld [vmem:[#allocation11 + $0x60] sm:$0xff]   ;;  %v17060_v58 = vld [vmem:[#allocation11 + $0x68] sm:$0xff]  }
0x1ade   :  { %10076 = vmatprep.subr.bf16.mxu1 %v17025_v39  ;;  %10117 = vmatprep.subr.bf16.mxu0 %v17028_v60  ;;  %v17062_v39 = vld [vmem:[#allocation11 + $0x70] sm:$0xff]   ;;  %v17064_v60 = vld [vmem:[#allocation11 + $0x78] sm:$0xff]  }
0x1ae1   :  { %10077 = vmatpush1.bf16.msra.mxu1 %v17023_v62  ;;  %10118 = vmatpush1.bf16.msra.mxu0 %v17026_v63 }
0x1ae2   :  { %10078 = vmatprep.subr.bf16.mxu1 %v17031_v9  ;;  %10119 = vmatprep.subr.bf16.mxu0 %v17034_v53 }
0x1ae5   :  { %10079 = vmatpush1.bf16.msra.mxu1 %v17029_v2  ;;  %10120 = vmatpush1.bf16.msra.mxu0 %v17032_v4 }
0x1ae6   :  { %10080 = vmatprep.subr.bf16.mxu1 %v17037_v45  ;;  %10121 = vmatprep.subr.bf16.mxu0 %v17040_v1 }
0x1ae9   :  { %10081 = vmatpush1.bf16.msra.mxu1 %v17035_v61  ;;  %10122 = vmatpush1.bf16.msra.mxu0 %v17038_v12 }
0x1aea   :  { %15518 = vmatprep.subr.bf16.mxu0 %v17735_v10  ;;  %15498 = vmatprep.subr.bf16.mxu1 %v17735_v10 }
0x1aec   :  { %10099 = vmatmul.mubr.bf16.vlgmr.msra.gmra.mrb[156].mxu1 %v18854_v23  ;;  %10140 = vmatmul.mubr.bf16.vlgmr.msra.gmra.mrb[160].mxu0 %v18854_v23  ;;  %v17045_v23 = vld [vmem:[#allocation11 + $0x20] sm:$0xff]  }
0x1aed   :  { %15519 = vmatpush3.bf16.msra.mxu0 %v17041_v36  ;;  %15534 = vmatprep.mubr.msk.bf16.mxu0 %vm17736_vm0, %v17735_v10  ;;  %v17065_v36 = vld [vmem:[#allocation16 + $0x40] sm:$0xff]  }
0x1aee   :  { %15520 = vmatprep.subr.bf16.mxu0 %v17735_v10  ;;  %15514 = vmatprep.mubr.msk.bf16.mxu1 %vm17736_vm0, %v17735_v10 }
0x1aef   :  { %15499 = vmatpush3.bf16.msra.mxu1 %v17049_v59  ;;  %v17069_v59 = vld [vmem:[#allocation16 + $0x50] sm:$0xff]  }
0x1af0   :  { %15500 = vmatprep.subr.bf16.mxu1 %v17735_v10 }
0x1af1   :  { %15521 = vmatpush3.bf16.msra.mxu0 %v17042_v13  ;;  %v17066_v13 = vld [vmem:[#allocation11 + $0x80] sm:$0xff]  }
0x1af2   :  { %15522 = vmatprep.subr.bf16.mxu0 %v17735_v10 }
0x1af3   :  { %15501 = vmatpush3.bf16.msra.mxu1 %v17051_v15  ;;  %v17070_v15 = vld [vmem:[#allocation11 + $0x90] sm:$0xff]  }
0x1af4   :  { %15502 = vmatprep.subr.bf16.mxu1 %v17735_v10 }
0x1af5   :  { %15523 = vmatpush3.bf16.msra.mxu0 %v17043_v14 }
0x1af6   :  { %15524 = vmatprep.subr.bf16.mxu0 %v17735_v10 }
0x1af7   :  { %15503 = vmatpush3.bf16.msra.mxu1 %v17053_v20  ;;  %v17071_v20 = vld [vmem:[#allocation16 + $0x58] sm:$0xff]  }
0x1af8   :  { %15504 = vmatprep.subr.bf16.mxu1 %v17735_v10 }
0x1af9   :  { %15525 = vmatpush3.bf16.msra.mxu0 %v17044_v22 }
0x1afa   :  { %15526 = vmatprep.subr.bf16.mxu0 %v17735_v10 }
0x1afb   :  { %15505 = vmatpush3.bf16.msra.mxu1 %v17055_v3  ;;  %v17072_v3 = vld [vmem:[#allocation11 + $0x98] sm:$0xff]  }
0x1afc   :  { %15506 = vmatprep.subr.bf16.mxu1 %v17735_v10 }
0x1afd   :  { %15527 = vmatpush3.bf16.msra.mxu0 %v17045_v23 }
0x1afe   :  { %15528 = vmatprep.subr.bf16.mxu0 %v17735_v10 }
0x1aff   :  { %15507 = vmatpush3.bf16.msra.mxu1 %v17057_v30  ;;  %v17073_v30 = vld [vmem:[#allocation16 + $0x60] sm:$0xff]  }
0x1b00   :  { %15508 = vmatprep.subr.bf16.mxu1 %v17735_v10 }
0x1b01   :  { %15529 = vmatpush3.bf16.msra.mxu0 %v17046_v8 }
0x1b02   :  { %15530 = vmatprep.subr.bf16.mxu0 %v17735_v10 }
0x1b03   :  { %15509 = vmatpush3.bf16.msra.mxu1 %v17059_v31  ;;  %v17074_v31 = vld [vmem:[#allocation11 + $0xa0] sm:$0xff]  }
0x1b04   :  { %15510 = vmatprep.subr.bf16.mxu1 %v17735_v10 }
0x1b05   :  { %15531 = vmatpush3.bf16.msra.mxu0 %v17047_v16  ;;  %v17067_v16 = vld [vmem:[#allocation16 + $0x48] sm:$0xff]  }
0x1b06   :  { %15532 = vmatprep.subr.bf16.mxu0 %v17735_v10 }
0x1b07   :  { %15511 = vmatpush3.bf16.msra.mxu1 %v17061_v44  ;;  %v17075_v44 = vld [vmem:[#allocation16 + $0x68] sm:$0xff]  }
0x1b08   :  { %15512 = vmatprep.subr.bf16.mxu1 %v17735_v10 }
0x1b09   :  { %15533 = vmatpush3.bf16.msra.mxu0 %v17048_v18  ;;  %v17068_v18 = vld [vmem:[#allocation11 + $0x88] sm:$0xff]  }
0x1b0a   :  { %15558 = vmatprep.subr.bf16.mxu0 %v17735_v10 }
0x1b0b   :  { %15513 = vmatpush3.bf16.msra.mxu1 %v17063_v5  ;;  %v17076_v5 = vld [vmem:[#allocation11 + $0xa8] sm:$0xff]  }
0x1b0c   :  { %15538 = vmatprep.subr.bf16.mxu1 %v17735_v10 }
0x1b9f   :  { %v9822_v38 = vpop.f32.mrb[152].mxu1  ;;  %v9863_v40 = vpop.f32.mrb[156].mxu0 }
0x1ba0   :  { %v9870_v42 = vmul.f32 %v9822_v38, %v18051_v25  ;;  %v18897_v19 = vmul.f32 %v9863_v40, %v18053_v26  ;;  %v9824_v11 = vpop.f32.mrb[153].mxu1  ;;  %v9865_v32 = vpop.f32.mrb[157].mxu0  ;;  %v17077_v38 = vld [vmem:[#allocation16 + $0x70] sm:$0xff]  }
0x1ba1   :  { %v9871_v46 = vmul.f32 %v9824_v11, %v18055_v27  ;;  %v18901_v17 = vmul.f32 %v9865_v32, %v18057_v28  ;;  %v9826_v47 = vpop.f32.mrb[154].mxu1  ;;  %v9867_v48 = vpop.f32.mrb[158].mxu0  ;;  %v17078_v40 = vld [vmem:[#allocation11 + $0xb0] sm:$0xff]   ;;  %v17080_v11 = vld [vmem:[#allocation11 + $0xb8] sm:$0xff]   ;;  %v17081_v32 = vld [vmem:[#allocation16 + $0x80] sm:$0xff]  }
0x1ba2   :  { %v10168_v57 = vpack.c.bf16 %v9870_v42, %v9870_v42  ;;  %v9827_v50 = vpop.f32.mrb[155].mxu1  ;;  %v9868_v52 = vpop.f32.mrb[159].mxu0  ;;  %v17079_v42 = vld [vmem:[#allocation16 + $0x78] sm:$0xff]   ;;  %v10590_v47 = vpack.c.bf16 %v18897_v19, %v18897_v19  ;;  %v17085_v19 = vld [vmem:[#allocation16 + $0x90] sm:$0xff]  }
0x1ba3   :  { %v10379_v14 = vpack.c.bf16 %v9871_v46, %v9871_v46  ;;  %v17082_v46 = vld [vmem:[#allocation11 + $0xc0] sm:$0xff]   ;;  %v17086_v50 = vld [vmem:[#allocation11 + $0xd0] sm:$0xff]   ;;  %v17087_v52 = vld [vmem:[#allocation16 + $0x98] sm:$0xff]  }
0x1ba4   :  { %15535 = vmatmul.mubr.bf16.vlgmr.msra.gmra.mrb[164].mxu0 %v10168_v57  ;;  %v17084_v57 = vld [vmem:[#allocation11 + $0xc8] sm:$0xff]  }
0x1ba5   :  { %15559 = vmatpush3.bf16.msra.mxu0 %v17050_v49  ;;  %15574 = vmatprep.mubr.msk.bf16.mxu0 %vm17736_vm0, %v17735_v10  ;;  %v17083_v49 = vld [vmem:[#allocation16 + $0x88] sm:$0xff]  }
0x1ba6   :  { %15560 = vmatprep.subr.bf16.mxu0 %v17735_v10 }
0x1ba9   :  { %15561 = vmatpush3.bf16.msra.mxu0 %v17052_v54  ;;  %v17088_v54 = vld [vmem:[#allocation11 + $0xd8] sm:$0xff]  }
0x1baa   :  { %15562 = vmatprep.subr.bf16.mxu0 %v17735_v10 }
0x1bad   :  { %15563 = vmatpush3.bf16.msra.mxu0 %v17054_v43  ;;  %v17089_v43 = vld [vmem:[#allocation16 + $0xa0] sm:$0xff]  }
0x1bae   :  { %15564 = vmatprep.subr.bf16.mxu0 %v17735_v10 }
0x1bb1   :  { %15565 = vmatpush3.bf16.msra.mxu0 %v17056_v24  ;;  %v17090_v24 = vld [vmem:[#allocation11 + $0xe0] sm:$0xff]  }
0x1bb2   :  { %15566 = vmatprep.subr.bf16.mxu0 %v17735_v10 }
0x1bb5   :  { %15567 = vmatpush3.bf16.msra.mxu0 %v17058_v41  ;;  %v17091_v41 = vld [vmem:[#allocation16 + $0xa8] sm:$0xff]  }
0x1bb6   :  { %15568 = vmatprep.subr.bf16.mxu0 %v17735_v10 }
0x1bb9   :  { %15569 = vmatpush3.bf16.msra.mxu0 %v17060_v58  ;;  %v17092_v58 = vld [vmem:[#allocation11 + $0xe8] sm:$0xff]  }
0x1bba   :  { %15570 = vmatprep.subr.bf16.mxu0 %v17735_v10 }
0x1bbd   :  { %15571 = vmatpush3.bf16.msra.mxu0 %v17062_v39  ;;  %v17093_v39 = vld [vmem:[#allocation16 + $0xb0] sm:$0xff]  }
0x1bbe   :  { %15572 = vmatprep.subr.bf16.mxu0 %v17735_v10 }
0x1bbf   :  { %v10100_v62 = vpop.f32.mrb[156].mxu1  ;;  %v10141_v63 = vpop.f32.mrb[160].mxu0 }
0x1bc0   :  { %v10148_v9 = vmul.f32 %v10100_v62, %v18059_v33  ;;  %v18914_v53 = vmul.f32 %v10141_v63, %v18061_v34  ;;  %v10102_v2 = vpop.f32.mrb[157].mxu1  ;;  %v10143_v4 = vpop.f32.mrb[161].mxu0  ;;  %v17095_v62 = vld [vmem:[#allocation16 + $0xb8] sm:$0xff]  }
0x1bc1   :  { %v18917_v45 = vmul.f32 %v10102_v2, %v18063_v35  ;;  %v18920_v1 = vmul.f32 %v10143_v4, %v18065_v37  ;;  %v10104_v61 = vpop.f32.mrb[158].mxu1  ;;  %v10145_v12 = vpop.f32.mrb[162].mxu0  ;;  %15573 = vmatpush3.bf16.msra.mxu0 %v17064_v60  ;;  %v17094_v60 = vld [vmem:[#allocation11 + $0xf0] sm:$0xff]   ;;  %v17096_v63 = vld [vmem:[#allocation11 + $0xf8] sm:$0xff]   ;;  %v10801_v2 = vpack.c.bf16 %v18901_v17, %v18901_v17 }
0x1bc2   :  { %v10185_v22 = vpack.c.bf16 %v10148_v9, %v10148_v9  ;;  %v10105_v23 = vpop.f32.mrb[159].mxu1  ;;  %v10146_v8 = vpop.f32.mrb[163].mxu0  ;;  %15598 = vmatprep.subr.bf16.mxu0 %v17735_v10  ;;  %v17097_v9 = vld [vmem:[#allocation16 + $0xc0] sm:$0xff]   ;;  %v10607_v4 = vpack.c.bf16 %v18914_v53, %v18914_v53  ;;  %v17099_v61 = vld [vmem:[#allocation16 + $0xd0] sm:$0xff]   ;;  %v17100_v17 = vld [vmem:[#allocation16 + $0xd8] sm:$0xff]  }
0x1bc3   :  { %v10396_v48 = vpack.c.bf16 %v18917_v45, %v18917_v45  ;;  %v17098_v45 = vld [vmem:[#allocation16 + $0xc8] sm:$0xff]   ;;  %v17101_v53 = vld [vmem:[#allocation16 + $0xe0] sm:$0xff]  }
0x1bc4   :  { %15515 = vmatmul.mubr.bf16.vlgmr.msra.gmra.mrb[160].mxu1 %v10185_v22  ;;  %15575 = vmatmul.mubr.bf16.vlgmr.msra.gmra.mrb[168].mxu0 %v10379_v14  ;;  %v17102_v12 = vld [vmem:[#allocation16 + $0xe8] sm:$0xff]   ;;  %v10818_v14 = vpack.c.bf16 %v18920_v1, %v18920_v1  ;;  %v17108_v1 = vld [vmem:[#allocation22 + $0x18] sm:$0xff]  }
0x1bc5   :  { %15539 = vmatpush3.bf16.msra.mxu1 %v17065_v36  ;;  %15599 = vmatpush3.bf16.msra.mxu0 %v17066_v13  ;;  %v17103_v36 = vld [vmem:[#allocation16 + $0xf0] sm:$0xff]   ;;  %v17104_v13 = vld [vmem:[#allocation16 + $0xf8] sm:$0xff]  }
0x1bc6   :  { %15540 = vmatprep.subr.bf16.mxu1 %v17735_v10  ;;  %15600 = vmatprep.subr.bf16.mxu0 %v17735_v10 }
0x1bc7   :  { %15554 = vmatprep.mubr.msk.bf16.mxu1 %vm17736_vm0, %v17735_v10  ;;  %15614 = vmatprep.mubr.msk.bf16.mxu0 %vm17736_vm0, %v17735_v10 }
0x1bc9   :  { %15541 = vmatpush3.bf16.msra.mxu1 %v17067_v16  ;;  %15601 = vmatpush3.bf16.msra.mxu0 %v17068_v18  ;;  %v17105_v16 = vld [vmem:[#allocation22] sm:$0xff]  }
0x1bca   :  { %15542 = vmatprep.subr.bf16.mxu1 %v17735_v10  ;;  %15602 = vmatprep.subr.bf16.mxu0 %v17735_v10 }
0x1bcd   :  { %15543 = vmatpush3.bf16.msra.mxu1 %v17069_v59  ;;  %15603 = vmatpush3.bf16.msra.mxu0 %v17070_v15  ;;  %v17106_v59 = vld [vmem:[#allocation22 + $0x8] sm:$0xff]   ;;  %v17107_v15 = vld [vmem:[#allocation22 + $0x10] sm:$0xff]  }
0x1bce   :  { %15544 = vmatprep.subr.bf16.mxu1 %v17735_v10  ;;  %15604 = vmatprep.subr.bf16.mxu0 %v17735_v10 }
0x1bd1   :  { %15545 = vmatpush3.bf16.msra.mxu1 %v17071_v20  ;;  %15605 = vmatpush3.bf16.msra.mxu0 %v17072_v3  ;;  %v17109_v20 = vld [vmem:[#allocation22 + $0x20] sm:$0xff]   ;;  %v17110_v3 = vld [vmem:[#allocation22 + $0x28] sm:$0xff]  }
0x1bd2   :  { %15546 = vmatprep.subr.bf16.mxu1 %v17735_v10  ;;  %15606 = vmatprep.subr.bf16.mxu0 %v17735_v10 }
0x1bd5   :  { %15547 = vmatpush3.bf16.msra.mxu1 %v17073_v30  ;;  %15607 = vmatpush3.bf16.msra.mxu0 %v17074_v31  ;;  %v17111_v30 = vld [vmem:[#allocation22 + $0x30] sm:$0xff]   ;;  %v17112_v31 = vld [vmem:[#allocation22 + $0x38] sm:$0xff]  }
0x1bd6   :  { %15548 = vmatprep.subr.bf16.mxu1 %v17735_v10  ;;  %15608 = vmatprep.subr.bf16.mxu0 %v17735_v10 }
0x1bd9   :  { %15549 = vmatpush3.bf16.msra.mxu1 %v17075_v44  ;;  %15609 = vmatpush3.bf16.msra.mxu0 %v17076_v5 }
0x1bda   :  { %15550 = vmatprep.subr.bf16.mxu1 %v17735_v10  ;;  %15610 = vmatprep.subr.bf16.mxu0 %v17735_v10 }
0x1bdd   :  { %15551 = vmatpush3.bf16.msra.mxu1 %v17077_v38  ;;  %15611 = vmatpush3.bf16.msra.mxu0 %v17078_v40 }
0x1bde   :  { %15552 = vmatprep.subr.bf16.mxu1 %v17735_v10  ;;  %15612 = vmatprep.subr.bf16.mxu0 %v17735_v10 }
0x1be1   :  { %15553 = vmatpush3.bf16.msra.mxu1 %v17079_v42  ;;  %15613 = vmatpush3.bf16.msra.mxu0 %v17080_v11 }
0x1be2   :  { %15578 = vmatprep.subr.bf16.mxu1 %v17735_v10  ;;  %15638 = vmatprep.subr.bf16.mxu0 %v17735_v10 }
0x1be4   :  { %15555 = vmatmul.mubr.bf16.vlgmr.msra.gmra.mrb[164].mxu1 %v10396_v48  ;;  %15615 = vmatmul.mubr.bf16.vlgmr.msra.gmra.mrb[172].mxu0 %v10590_v47 }
0x1be5   :  { %15579 = vmatpush3.bf16.msra.mxu1 %v17081_v32  ;;  %15639 = vmatpush3.bf16.msra.mxu0 %v17082_v46 }
0x1be6   :  { %15580 = vmatprep.subr.bf16.mxu1 %v17735_v10  ;;  %15640 = vmatprep.subr.bf16.mxu0 %v17735_v10 }
0x1be7   :  { %15594 = vmatprep.mubr.msk.bf16.mxu1 %vm17736_vm0, %v17735_v10  ;;  %15654 = vmatprep.mubr.msk.bf16.mxu0 %vm17736_vm0, %v17735_v10 }
0x1be9   :  { %15581 = vmatpush3.bf16.msra.mxu1 %v17083_v49  ;;  %15641 = vmatpush3.bf16.msra.mxu0 %v17084_v57 }
0x1bea   :  { %15582 = vmatprep.subr.bf16.mxu1 %v17735_v10  ;;  %15642 = vmatprep.subr.bf16.mxu0 %v17735_v10 }
0x1bed   :  { %15583 = vmatpush3.bf16.msra.mxu1 %v17085_v19  ;;  %15643 = vmatpush3.bf16.msra.mxu0 %v17086_v50 }
0x1bee   :  { %15584 = vmatprep.subr.bf16.mxu1 %v17735_v10  ;;  %15644 = vmatprep.subr.bf16.mxu0 %v17735_v10 }
0x1bf1   :  { %15585 = vmatpush3.bf16.msra.mxu1 %v17087_v52  ;;  %15645 = vmatpush3.bf16.msra.mxu0 %v17088_v54 }
0x1bf2   :  { %15586 = vmatprep.subr.bf16.mxu1 %v17735_v10  ;;  %15646 = vmatprep.subr.bf16.mxu0 %v17735_v10 }
0x1bf5   :  { %15587 = vmatpush3.bf16.msra.mxu1 %v17089_v43  ;;  %15647 = vmatpush3.bf16.msra.mxu0 %v17090_v24 }
0x1bf6   :  { %15588 = vmatprep.subr.bf16.mxu1 %v17735_v10  ;;  %15648 = vmatprep.subr.bf16.mxu0 %v17735_v10 }
0x1bf9   :  { %15589 = vmatpush3.bf16.msra.mxu1 %v17091_v41  ;;  %15649 = vmatpush3.bf16.msra.mxu0 %v17092_v58 }
0x1bfa   :  { %15590 = vmatprep.subr.bf16.mxu1 %v17735_v10  ;;  %15650 = vmatprep.subr.bf16.mxu0 %v17735_v10 }
0x1bfd   :  { %15591 = vmatpush3.bf16.msra.mxu1 %v17093_v39  ;;  %15651 = vmatpush3.bf16.msra.mxu0 %v17094_v60 }
0x1bfe   :  { %15592 = vmatprep.subr.bf16.mxu1 %v17735_v10  ;;  %15652 = vmatprep.subr.bf16.mxu0 %v17735_v10 }
0x1c01   :  { %15593 = vmatpush3.bf16.msra.mxu1 %v17095_v62  ;;  %15653 = vmatpush3.bf16.msra.mxu0 %v17096_v63 }
0x1c02   :  { %15618 = vmatprep.subr.bf16.mxu1 %v17735_v10 }
0x1c04   :  { %15595 = vmatmul.mubr.bf16.vlgmr.msra.gmra.mrb[168].mxu1 %v10607_v4  ;;  %15655 = vmatmul.mubr.bf16.vlgmr.msra.gmra.mrb[176].mxu0 %v10801_v2 }
0x1c05   :  { %15619 = vmatpush3.bf16.msra.mxu1 %v17097_v9  ;;  %15634 = vmatprep.mubr.msk.bf16.mxu1 %vm17736_vm0, %v17735_v10 }
0x1c06   :  { %15620 = vmatprep.subr.bf16.mxu1 %v17735_v10  ;;  %11380 = vmatprep.mubr.bf16.mxu0 %v17734_v0 }
0x1c09   :  { %15621 = vmatpush3.bf16.msra.mxu1 %v17098_v45 }
0x1c0a   :  { %15622 = vmatprep.subr.bf16.mxu1 %v17735_v10 }
0x1c0d   :  { %15623 = vmatpush3.bf16.msra.mxu1 %v17099_v61 }
0x1c0e   :  { %15624 = vmatprep.subr.bf16.mxu1 %v17735_v10 }
0x1c11   :  { %15625 = vmatpush3.bf16.msra.mxu1 %v17100_v17 }
0x1c12   :  { %15626 = vmatprep.subr.bf16.mxu1 %v17735_v10 }
0x1c15   :  { %15627 = vmatpush3.bf16.msra.mxu1 %v17101_v53 }
0x1c16   :  { %15628 = vmatprep.subr.bf16.mxu1 %v17735_v10 }
0x1c19   :  { %15629 = vmatpush3.bf16.msra.mxu1 %v17102_v12 }
0x1c1a   :  { %15630 = vmatprep.subr.bf16.mxu1 %v17735_v10 }
0x1c1d   :  { %15631 = vmatpush3.bf16.msra.mxu1 %v17103_v36 }
0x1c1e   :  { %15632 = vmatprep.subr.bf16.mxu1 %v17735_v10 }
0x1c21   :  { %15633 = vmatpush3.bf16.msra.mxu1 %v17104_v13 }
0x1c22   :  { %15658 = vmatprep.subr.bf16.mxu1 %v17735_v10 }
0x1c24   :  { %15635 = vmatmul.mubr.bf16.vlgmr.msra.gmra.mrb[172].mxu1 %v10818_v14 }
0x1c25   :  { %15674 = vmatprep.mubr.msk.bf16.mxu1 %vm17736_vm0, %v17735_v10  ;;  %15659 = vmatpush3.bf16.msra.mxu1 %v17105_v16 }
0x1c26   :  { %15660 = vmatprep.subr.bf16.mxu1 %v17735_v10 }
0x1c29   :  { %15661 = vmatpush3.bf16.msra.mxu1 %v17106_v59 }
0x1c2a   :  { %15662 = vmatprep.subr.bf16.mxu1 %v17735_v10 }
0x1c2d   :  { %15663 = vmatpush3.bf16.msra.mxu1 %v17107_v15 }
0x1c2e   :  { %15664 = vmatprep.subr.bf16.mxu1 %v17735_v10 }
0x1c31   :  { %15665 = vmatpush3.bf16.msra.mxu1 %v17108_v1 }
0x1c32   :  { %15666 = vmatprep.subr.bf16.mxu1 %v17735_v10 }
0x1c35   :  { %15667 = vmatpush3.bf16.msra.mxu1 %v17109_v20 }
0x1c36   :  { %15668 = vmatprep.subr.bf16.mxu1 %v17735_v10 }
0x1c39   :  { %15669 = vmatpush3.bf16.msra.mxu1 %v17110_v3 }
0x1c3a   :  { %15670 = vmatprep.subr.bf16.mxu1 %v17735_v10 }
0x1c3d   :  { %15671 = vmatpush3.bf16.msra.mxu1 %v17111_v30 }
0x1c3e   :  { %15672 = vmatprep.subr.bf16.mxu1 %v17735_v10 }
0x1c41   :  { %15673 = vmatpush3.bf16.msra.mxu1 %v17112_v31 }
0x1c77   :  { %v10356_v22 = vpop.f32.mrb[164].mxu0 }
0x1c78   :  { %v15536_v23 = vpop.f32.mrb[165].mxu0 }
0x1c79   :  { %v10359_v8 = vpop.f32.mrb[166].mxu0 }
0x1c7a   :  { %v15537_v18 = vpop.f32.mrb[167].mxu0 }
0x1c97   :  { %v10268_v44 = vpop.f32.mrb[160].mxu1  ;;  %v10567_v5 = vpop.f32.mrb[168].mxu0 }
0x1c98   :  { %v10357_v38 = vadd.f32 %v10356_v22, %v10268_v44  ;;  %v15516_v40 = vpop.f32.mrb[161].mxu1  ;;  %v15576_v42 = vpop.f32.mrb[169].mxu0 }
0x1c99   :  { %v10271_v11 = vpop.f32.mrb[162].mxu1  ;;  %v10570_v32 = vpop.f32.mrb[170].mxu0 }
0x1c9a   :  { %v15517_v46 = vpop.f32.mrb[163].mxu1  ;;  %v15577_v47 = vpop.f32.mrb[171].mxu0  ;;  %v10362_v61 = vadd.f32 %v10357_v38, %v18249_v29 }
0x1c9b   :  { %v13761_v47 = vld [vmem:[%s19172_s14] ss:$0 sm:$0xff] }
0x1c9c   :  { %v13758_v53 = vmul.f32 -1.442695, %v10362_v61  ;;  %v17128_v61 = vld [vmem:[#allocation8 + $0x48] ss:$16 sps:$4 sm:$0xff]  }
0x1cb7   :  { %v10479_v48 = vpop.f32.mrb[164].mxu1  ;;  %v10778_v49 = vpop.f32.mrb[172].mxu0 }
0x1cb8   :  { %v10568_v57 = vadd.f32 %v10567_v5, %v10479_v48  ;;  %v15556_v19 = vpop.f32.mrb[165].mxu1  ;;  %v15616_v50 = vpop.f32.mrb[173].mxu0 }
0x1cb9   :  { %v10482_v52 = vpop.f32.mrb[166].mxu1  ;;  %v10781_v54 = vpop.f32.mrb[174].mxu0 }
0x1cba   :  { %v15557_v43 = vpop.f32.mrb[167].mxu1  ;;  %v15617_v24 = vpop.f32.mrb[175].mxu0  ;;  %v10573_v45 = vadd.f32 %v10568_v57, %v18246_v51 }
0x1cbb   :  { %v17113_v24 = vld [vmem:[#allocation8] ss:$16 sps:$4 sm:$0xff]  }
0x1cbc   :  { %v13759_v17 = vmul.f32 -1.442695, %v10573_v45  ;;  %v17125_v45 = vld [vmem:[#allocation8 + $0x40] ss:$16 sps:$4 sm:$0xff]  }
0x1cbe   :  { %17361 = vpow2.f32 %v13759_v17  ;;  %v17133_v17 = vld [vmem:[#allocation8 + $0x64] ss:$16 sps:$4 sm:$0xff]  }
0x1cbf   :  { %17363 = vpow2.f32 %v13758_v53  ;;  %v17136_v53 = vld [vmem:[#allocation8 + $0x6c] ss:$16 sps:$4 sm:$0xff]  }
0x1cc8   :  { %v17362_v36 = vpop.eup %17361 }
0x1cc9   :  { %v17364_v13 = vpop.eup %17363  ;;  %v11005_v22 = vadd.f32 1.0, %v17362_v36  ;;  %v17134_v36 = vld [vmem:[#allocation8 + $0x68] ss:$16 sps:$4 sm:$0xff]  }
0x1cca   :  { %v10999_v23 = vadd.f32 1.0, %v17364_v13  ;;  %v17139_v13 = vld [vmem:[#allocation8 + $0x84] ss:$16 sps:$4 sm:$0xff]  }
0x1cd7   :  { %v10690_v41 = vpop.f32.mrb[168].mxu1  ;;  %v10989_v58 = vpop.f32.mrb[176].mxu0 }
0x1cd8   :  { %v10779_v39 = vadd.f32 %v10778_v49, %v10690_v41  ;;  %v15596_v60 = vpop.f32.mrb[169].mxu1  ;;  %v15656_v62 = vpop.f32.mrb[177].mxu0  ;;  %v17115_v41 = vld [vmem:[#allocation8 + $0x4] ss:$16 sps:$4 sm:$0xff]  }
0x1cd9   :  { %v10693_v63 = vpop.f32.mrb[170].mxu1  ;;  %v10992_v9 = vpop.f32.mrb[178].mxu0  ;;  %v17121_v60 = vld [vmem:[#allocation8 + $0x24] ss:$16 sps:$4 sm:$0xff]   ;;  %11348 = vmatprep.subr.bf16.mxu0 %v17115_v41  ;;  %v17124_v62 = vld [vmem:[#allocation8 + $0x2c] ss:$16 sps:$4 sm:$0xff]  }
0x1cda   :  { %v15597_v2 = vpop.f32.mrb[171].mxu1  ;;  %v15657_v4 = vpop.f32.mrb[179].mxu0  ;;  %v10784_v12 = vadd.f32 %v10779_v39, %v18257_v55  ;;  %v17118_v39 = vld [vmem:[#allocation8 + $0xc] ss:$16 sps:$4 sm:$0xff]   ;;  %11349 = vmatpush1.bf16.msra.mxu0 %v17113_v24  ;;  %v17119_v63 = vld [vmem:[#allocation8 + $0x20] ss:$16 sps:$4 sm:$0xff]  }
0x1cdb   :  { %11389 = vmatprep.subr.bf16.mxu1 %v17118_v39  ;;  %11350 = vmatprep.subr.bf16.mxu0 %v17121_v60  ;;  %v17122_v9 = vld [vmem:[#allocation8 + $0x28] ss:$16 sps:$4 sm:$0xff]   ;;  %v17127_v2 = vld [vmem:[#allocation8 + $0x44] ss:$16 sps:$4 sm:$0xff]   ;;  %v17130_v4 = vld [vmem:[#allocation8 + $0x4c] ss:$16 sps:$4 sm:$0xff]  }
0x1cdc   :  { %v13760_v14 = vmul.f32 -1.442695, %v10784_v12  ;;  %v17131_v12 = vld [vmem:[#allocation8 + $0x60] ss:$16 sps:$4 sm:$0xff]   ;;  %v17172_v24 = vld [vmem:[#allocation13 + $0x2c] ss:$16 sps:$4 sm:$0xff]  }
0x1cdd   :  { %v17167_v41 = vld [vmem:[#allocation13 + $0x20] ss:$16 sps:$4 sm:$0xff]   ;;  %v17175_v39 = vld [vmem:[#allocation13 + $0x44] ss:$16 sps:$4 sm:$0xff]   ;;  %v17178_v60 = vld [vmem:[#allocation13 + $0x4c] ss:$16 sps:$4 sm:$0xff]  }
0x1cde   :  { %17365 = vpow2.f32 %v13760_v14  ;;  %11351 = vmatpush1.bf16.msra.mxu0 %v17119_v63  ;;  %v17142_v14 = vld [vmem:[#allocation8 + $0x8c] ss:$16 sps:$4 sm:$0xff]   ;;  %v17176_v63 = vld [vmem:[#allocation13 + $0x48] ss:$16 sps:$4 sm:$0xff]  }
0x1cdf   :  { %17367 = vrcp.f32 %v11005_v22  ;;  %11352 = vmatprep.subr.bf16.mxu0 %v17127_v2  ;;  %v17137_v22 = vld [vmem:[#allocation8 + $0x80] ss:$16 sps:$4 sm:$0xff]  }
0x1ce0   :  { %17369 = vrcp.f32 %v10999_v23  ;;  %v17140_v23 = vld [vmem:[#allocation8 + $0x88] ss:$16 sps:$4 sm:$0xff]   ;;  %v17179_v2 = vld [vmem:[#allocation13 + $0x60] ss:$16 sps:$4 sm:$0xff]  }
0x1ce2   :  { %11353 = vmatpush1.bf16.msra.mxu0 %v17125_v45  ;;  %v17187_v45 = vld [vmem:[#allocation13 + $0x84] ss:$16 sps:$4 sm:$0xff]  }
0x1ce3   :  { %11354 = vmatprep.subr.bf16.mxu0 %v17133_v17  ;;  %v17185_v17 = vld [vmem:[#allocation13 + $0x80] ss:$16 sps:$4 sm:$0xff]  }
0x1ce6   :  { %11355 = vmatpush1.bf16.msra.mxu0 %v17131_v12  ;;  %v17196_v12 = vld [vmem:[#allocation13 + $0xac] ss:$16 sps:$4 sm:$0xff]  }
0x1ce7   :  { %11356 = vmatprep.subr.bf16.mxu0 %v17139_v13  ;;  %v17194_v13 = vld [vmem:[#allocation13 + $0xa8] ss:$16 sps:$4 sm:$0xff]  }
0x1ce8   :  { %v17366_v20 = vpop.eup %17365 }
0x1ce9   :  { %v17368_v3 = vpop.eup %17367  ;;  %v11011_v44 = vadd.f32 1.0, %v17366_v20  ;;  %v17149_v20 = vld [vmem:[#allocation8 + $0xc0] ss:$16 sps:$4 sm:$0xff]  }
0x1cea   :  { %v17370_v30 = vpop.eup %17369  ;;  %v11015_v5 = vmul.f32 %v17368_v3, %v18851_v6  ;;  %11357 = vmatpush1.bf16.msra.mxu0 %v17137_v22  ;;  %v17152_v3 = vld [vmem:[#allocation8 + $0xc8] ss:$16 sps:$4 sm:$0xff]   ;;  %v17202_v22 = vld [vmem:[#allocation13 + $0xcc] ss:$16 sps:$4 sm:$0xff]  }
0x1cf7   :  { %v10901_v8 = vpop.f32.mrb[172].mxu1 }
0x1cf8   :  { %v10990_v16 = vadd.f32 %v10989_v58, %v10901_v8  ;;  %v15636_v18 = vpop.f32.mrb[173].mxu1  ;;  %v17116_v58 = vld [vmem:[#allocation8 + $0x8] ss:$16 sps:$4 sm:$0xff]   ;;  %v17145_v8 = vld [vmem:[#allocation8 + $0xa4] ss:$16 sps:$4 sm:$0xff]  }
0x1cf9   :  { %v10904_v59 = vpop.f32.mrb[174].mxu1  ;;  %v17143_v18 = vld [vmem:[#allocation8 + $0xa0] ss:$16 sps:$4 sm:$0xff]   ;;  %11358 = vmatprep.subr.bf16.mxu0 %v17145_v8  ;;  %v17200_v8 = vld [vmem:[#allocation13 + $0xc8] ss:$16 sps:$4 sm:$0xff]  }
0x1cfa   :  { %v10995_v15 = vadd.f32 %v10990_v16, %v18264_v56  ;;  %v15637_v1 = vpop.f32.mrb[175].mxu1  ;;  %v17148_v16 = vld [vmem:[#allocation8 + $0xac] ss:$16 sps:$4 sm:$0xff]   ;;  %v17146_v59 = vld [vmem:[#allocation8 + $0xa8] ss:$16 sps:$4 sm:$0xff]   ;;  %11359 = vmatpush1.bf16.msra.mxu0 %v17143_v18 }
0x1cfb   :  { %v17154_v1 = vld [vmem:[#allocation8 + $0xcc] ss:$16 sps:$4 sm:$0xff]  }
0x1cfc   :  { %17371 = vtanh.f32 %v10995_v15  ;;  %v17151_v15 = vld [vmem:[#allocation8 + $0xc4] ss:$16 sps:$4 sm:$0xff]   ;;  %v17208_v18 = vld [vmem:[#allocation13 + $0xec] ss:$16 sps:$4 sm:$0xff]  }
0x1cfd   :  { %17373 = vrcp.f32 %v11011_v44  ;;  %11360 = vmatprep.subr.bf16.mxu0 %v17151_v15  ;;  %v17206_v15 = vld [vmem:[#allocation13 + $0xe8] ss:$16 sps:$4 sm:$0xff]  }
0x1cfe   :  { %11361 = vmatpush1.bf16.msra.mxu0 %v17149_v20  ;;  %v17210_v20 = vld [vmem:[#allocation11 + $0x8] sm:$0xff]  }
0x1d06   :  { %v17372_v31 = vpop.eup %17371 }
0x1d07   :  { %v11016_v38 = vmul.f32 %v17372_v31, %v17370_v30  ;;  %v17374_v42 = vpop.eup %17373 }
0x1d09   :  { %v18997_v40 = vadd.f32 %v11016_v38, %v11015_v5  ;;  %v17157_v38 = vld [vmem:[#allocation8 + $0xe4] ss:$16 sps:$4 sm:$0xff]  }
0x1d0a   :  { %11362 = vmatprep.subr.bf16.mxu0 %v17157_v38  ;;  %v17217_v38 = vld [vmem:[#allocation16] sm:$0xff]  }
0x1d0b   :  { %17375 = vtanh.f32 %v18997_v40 }
0x1d15   :  { %v17376_v11 = vpop.eup %17375 }
0x1d16   :  { %v11019_v32 = vmul.f32 %v17376_v11, %v17374_v42  ;;  %v17160_v42 = vld [vmem:[#allocation8 + $0xec] ss:$16 sps:$4 sm:$0xff]   ;;  %v17155_v11 = vld [vmem:[#allocation8 + $0xe0] ss:$16 sps:$4 sm:$0xff]  }
0x1d17   :  { %11363 = vmatpush1.bf16.msra.mxu0 %v17155_v11  ;;  %v17221_v11 = vld [vmem:[#allocation16 + $0x10] sm:$0xff]  }
0x1d18   :  { %v19000_v46 = vpack.c.bf16 %v11019_v32, %v11019_v32  ;;  %v17158_v32 = vld [vmem:[#allocation8 + $0xe8] ss:$16 sps:$4 sm:$0xff]  }
0x1d1a   :  { %15675 = vmatmul.mubr.bf16.vlgmr.msra.gmra.mrb[176].mxu1 %v19000_v46 }
0x1d1b   :  { %11421 = vmatprep.mubr.bf16.mxu1 %v17734_v0  ;;  %11390 = vmatpush1.bf16.msra.mxu1 %v17116_v58  ;;  %v17170_v58 = vld [vmem:[#allocation13 + $0x28] ss:$16 sps:$4 sm:$0xff]  }
0x1d1c   :  { %11391 = vmatprep.subr.bf16.mxu1 %v17124_v62  ;;  %v17173_v62 = vld [vmem:[#allocation13 + $0x40] ss:$16 sps:$4 sm:$0xff]  }
0x1d1f   :  { %11392 = vmatpush1.bf16.msra.mxu1 %v17122_v9  ;;  %v17181_v9 = vld [vmem:[#allocation13 + $0x64] ss:$16 sps:$4 sm:$0xff]  }
0x1d20   :  { %11393 = vmatprep.subr.bf16.mxu1 %v17130_v4  ;;  %v17182_v4 = vld [vmem:[#allocation13 + $0x68] ss:$16 sps:$4 sm:$0xff]  }
0x1d23   :  { %11394 = vmatpush1.bf16.msra.mxu1 %v17128_v61  ;;  %v17190_v61 = vld [vmem:[#allocation13 + $0x8c] ss:$16 sps:$4 sm:$0xff]  }
0x1d24   :  { %11395 = vmatprep.subr.bf16.mxu1 %v17136_v53  ;;  %v17193_v53 = vld [vmem:[#allocation13 + $0xa4] ss:$16 sps:$4 sm:$0xff]  }
0x1d27   :  { %11396 = vmatpush1.bf16.msra.mxu1 %v17134_v36  ;;  %v17191_v36 = vld [vmem:[#allocation13 + $0xa0] ss:$16 sps:$4 sm:$0xff]  }
0x1d28   :  { %11397 = vmatprep.subr.bf16.mxu1 %v17142_v14  ;;  %v17199_v14 = vld [vmem:[#allocation13 + $0xc4] ss:$16 sps:$4 sm:$0xff]  }
0x1d2b   :  { %11398 = vmatpush1.bf16.msra.mxu1 %v17140_v23  ;;  %v17197_v23 = vld [vmem:[#allocation13 + $0xc0] ss:$16 sps:$4 sm:$0xff]  }
0x1d2c   :  { %11399 = vmatprep.subr.bf16.mxu1 %v17148_v16  ;;  %v17205_v16 = vld [vmem:[#allocation13 + $0xe4] ss:$16 sps:$4 sm:$0xff]  }
0x1d2f   :  { %11400 = vmatpush1.bf16.msra.mxu1 %v17146_v59  ;;  %v17203_v59 = vld [vmem:[#allocation13 + $0xe0] ss:$16 sps:$4 sm:$0xff]  }
0x1d30   :  { %11401 = vmatprep.subr.bf16.mxu1 %v17154_v1  ;;  %v17209_v1 = vld [vmem:[#allocation11] sm:$0xff]  }
0x1d33   :  { %11402 = vmatpush1.bf16.msra.mxu1 %v17152_v3  ;;  %v17211_v3 = vld [vmem:[#allocation11 + $0x10] sm:$0xff]  }
0x1d34   :  { %11403 = vmatprep.subr.bf16.mxu1 %v17160_v42  ;;  %v17219_v42 = vld [vmem:[#allocation16 + $0x8] sm:$0xff]  }
0x1d37   :  { %11404 = vmatpush1.bf16.msra.mxu1 %v17158_v32  ;;  %v17223_v32 = vld [vmem:[#allocation16 + $0x18] sm:$0xff]  }
0x1ded   :  { %v11126_v6 = vpop.f32.mrb[176].mxu1 }
0x1dee   :  { %v11127_v48 = vadd.f32 %v13761_v47, %v11126_v6  ;;  %v15676_v49 = vpop.f32.mrb[177].mxu1  ;;  %v17163_v47 = vld [vmem:[#allocation13 + $0x4] ss:$16 sps:$4 sm:$0xff]   ;;  %v17166_v6 = vld [vmem:[#allocation13 + $0xc] ss:$16 sps:$4 sm:$0xff]  }
0x1def   :  { %v11129_v57 = vpop.f32.mrb[178].mxu1  ;;  %11626 = vmatprep.subr.bf16.mxu0 %v17163_v47  ;;  %11667 = vmatprep.subr.bf16.mxu1 %v17166_v6  ;;  %v17225_v47 = vld [vmem:[#allocation16 + $0x20] sm:$0xff]   ;;  %v17227_v6 = vld [vmem:[#allocation16 + $0x28] sm:$0xff]  }
0x1df0   :  { %11132 = vmax.xlane.f32.xlu1 %v11127_v48  ;;  %v15677_v19 = vpop.f32.mrb[179].mxu1 }
0x1e7d   :  { %v11133_v50 = vpop.xlane.xlu1 %11132 }
0x1e7e   :  { %vm11134_vm13 = vcmp.eq.f32.partialorder %v11127_v48, %v11133_v50 }
0x1e7f   :  { %v11135_v52 = vsel %vm11134_vm13, %v18089_v21, 128 }
0x1e80   :  { %v11137_v54 = vshra.s32 %v11135_v52, 16  ;;  %v11136_v30 = vand.u32 65535, %v11135_v52  ;;  %v17161_v52 = vld [vmem:[#allocation13] ss:$16 sps:$4 sm:$0xff]  }
0x1e82   :  { %v19008_v43 = vcvt.s32.f32 %v11137_v54  ;;  %v11138_v44 = vcvt.s32.f32 %v11136_v30  ;;  %v17164_v54 = vld [vmem:[#allocation13 + $0x8] ss:$16 sps:$4 sm:$0xff]  }
0x1e83   :  { %v17212_v30 = vld [vmem:[#allocation11 + $0x18] sm:$0xff]  }
0x1e84   :  { %11140 = vmin.xlane.f32.xlu0 %v19008_v43 }
0x1f11   :  { %v11141_v31 = vpop.xlane.xlu0 %11140 }
0x1f12   :  { %vm11142_vm14 = vcmp.eq.f32.partialorder %v19008_v43, %v11141_v31  ;;  %v11147_v48 = vcvt.f32.s32 %v11141_v31  ;;  %v17169_v43 = vld [vmem:[#allocation13 + $0x24] ss:$16 sps:$4 sm:$0xff]   ;;  %v17214_v31 = vld [vmem:[#allocation11 + $0x28] sm:$0xff]  }
0x1f13   :  { %v11143_v5 = vsel %vm11142_vm14, %v11138_v44, inf  ;;  %v17215_v44 = vld [vmem:[#allocation11 + $0x30] sm:$0xff]  }
0x1f14   :  { %11144 = vmin.xlane.f32.xlu1 %v11143_v5  ;;  %v11148_v57 = vshll.u32 %v11147_v48, 16  ;;  %v17216_v5 = vld [vmem:[#allocation11 + $0x38] sm:$0xff]   ;;  %v17229_v48 = vld [vmem:[#allocation16 + $0x30] sm:$0xff]  }
0x1fa1   :  { %v11145_v49 = vpop.xlane.xlu1 %11144 }
0x1fa2   :  { %v11146_v19 = vcvt.f32.s32 %v11145_v49  ;;  %v17231_v49 = vld [vmem:[#allocation16 + $0x38] sm:$0xff]  }
0x1fa4   :  { %v11149_v50 = vadd.s32 %v11148_v57, %v11146_v19 }
0x1fa6   :  { %vm11150_vm1 = vcmp.eq.s32.totalorder %v18089_v21, %v11149_v50  ;;  %11155 = vst.msk [vmem:[#allocation23] sm:$0xff] %vm11154_vm15, %v11149_v50 }
0x1fa7   :  { %vm13803_vm2 = vmpackc.low %vm11150_vm1, %vm11150_vm1 }
0x1fa8   :  { %13804 = vmatmul.mubr.msk.bf16.vlgmr.msra.gmra.mrb[180].mxu0 %vm13803_vm2, %v17737_v7  ;;  %13806 = vmatmul.mubr.msk.bf16.vlgmr.msra.gmra.mrb[180].mxu1 %vm13803_vm2, %v17737_v7  ;;  %v17184_v7 = vld [vmem:[#allocation13 + $0x6c] ss:$16 sps:$4 sm:$0xff]  }
0x1fa9   :  { %11627 = vmatpush1.bf16.msra.mxu0 %v17161_v52  ;;  %11668 = vmatpush1.bf16.msra.mxu1 %v17164_v54 }
0x1faa   :  { %11628 = vmatprep.subr.bf16.mxu0 %v17169_v43  ;;  %11669 = vmatprep.subr.bf16.mxu1 %v17172_v24 }
0x1fab   :  { %11658 = vmatprep.mubr.bf16.mxu0 %v17734_v0  ;;  %11699 = vmatprep.mubr.bf16.mxu1 %v17734_v0  ;;  %v17188_v0 = vld [vmem:[#allocation13 + $0x88] ss:$16 sps:$4 sm:$0xff]  }
0x1fad   :  { %11629 = vmatpush1.bf16.msra.mxu0 %v17167_v41  ;;  %11670 = vmatpush1.bf16.msra.mxu1 %v17170_v58 }
0x1fae   :  { %11630 = vmatprep.subr.bf16.mxu0 %v17175_v39  ;;  %11671 = vmatprep.subr.bf16.mxu1 %v17178_v60  ;;  %v17218_v60 = vld [vmem:[#allocation11 + $0x40] sm:$0xff]  }
0x1fb1   :  { %11631 = vmatpush1.bf16.msra.mxu0 %v17173_v62  ;;  %11672 = vmatpush1.bf16.msra.mxu1 %v17176_v63 }
0x1fb2   :  { %11632 = vmatprep.subr.bf16.mxu0 %v17181_v9  ;;  %11673 = vmatprep.subr.bf16.mxu1 %v17184_v7  ;;  %v17220_v7 = vld [vmem:[#allocation11 + $0x48] sm:$0xff]  }
0x1fb5   :  { %11633 = vmatpush1.bf16.msra.mxu0 %v17179_v2  ;;  %11674 = vmatpush1.bf16.msra.mxu1 %v17182_v4  ;;  %v17230_v2 = vld [vmem:[#allocation11 + $0x70] sm:$0xff]   ;;  %v17232_v4 = vld [vmem:[#allocation11 + $0x78] sm:$0xff]  }
0x1fb6   :  { %11634 = vmatprep.subr.bf16.mxu0 %v17187_v45  ;;  %11675 = vmatprep.subr.bf16.mxu1 %v17190_v61 }
0x1fb9   :  { %11635 = vmatpush1.bf16.msra.mxu0 %v17185_v17  ;;  %11676 = vmatpush1.bf16.msra.mxu1 %v17188_v0 }
0x1fba   :  { %11636 = vmatprep.subr.bf16.mxu0 %v17193_v53  ;;  %11677 = vmatprep.subr.bf16.mxu1 %v17196_v12 }
0x1fbd   :  { %11637 = vmatpush1.bf16.msra.mxu0 %v17191_v36  ;;  %11678 = vmatpush1.bf16.msra.mxu1 %v17194_v13 }
0x1fbe   :  { %11638 = vmatprep.subr.bf16.mxu0 %v17199_v14  ;;  %11679 = vmatprep.subr.bf16.mxu1 %v17202_v22 }
0x1fc1   :  { %11639 = vmatpush1.bf16.msra.mxu0 %v17197_v23  ;;  %11680 = vmatpush1.bf16.msra.mxu1 %v17200_v8  ;;  %v17233_v23 = vld [vmem:[#allocation16 + $0x40] sm:$0xff]  }
0x1fc2   :  { %11640 = vmatprep.subr.bf16.mxu0 %v17205_v16  ;;  %11681 = vmatprep.subr.bf16.mxu1 %v17208_v18  ;;  %v17234_v8 = vld [vmem:[#allocation11 + $0x80] sm:$0xff]  }
0x1fc5   :  { %11641 = vmatpush1.bf16.msra.mxu0 %v17203_v59  ;;  %11682 = vmatpush1.bf16.msra.mxu1 %v17206_v15  ;;  %v17238_v15 = vld [vmem:[#allocation11 + $0x90] sm:$0xff]  }
0x1fc6   :  { %15698 = vmatprep.subr.bf16.mxu1 %v17735_v10  ;;  %15678 = vmatprep.subr.bf16.mxu0 %v17735_v10 }
0x1fc8   :  { %11659 = vmatmul.mubr.bf16.vlgmr.msra.gmra.mrb[184].mxu0 %v19000_v46  ;;  %11700 = vmatmul.mubr.bf16.vlgmr.msra.gmra.mrb[184].mxu1 %v19000_v46  ;;  %v17213_v46 = vld [vmem:[#allocation11 + $0x20] sm:$0xff]  }
0x1fc9   :  { %15699 = vmatpush3.bf16.msra.mxu1 %v17209_v1  ;;  %15714 = vmatprep.mubr.msk.bf16.mxu1 %vm17736_vm0, %v17735_v10  ;;  %v17239_v1 = vld [vmem:[#allocation16 + $0x58] sm:$0xff]  }
0x1fca   :  { %15700 = vmatprep.subr.bf16.mxu1 %v17735_v10  ;;  %15694 = vmatprep.mubr.msk.bf16.mxu0 %vm17736_vm0, %v17735_v10 }
0x1fcb   :  { %15679 = vmatpush3.bf16.msra.mxu0 %v17217_v38  ;;  %v17247_v38 = vld [vmem:[#allocation16 + $0x78] sm:$0xff]  }
0x1fcc   :  { %15680 = vmatprep.subr.bf16.mxu0 %v17735_v10 }
0x1fcd   :  { %15701 = vmatpush3.bf16.msra.mxu1 %v17210_v20  ;;  %v17240_v20 = vld [vmem:[#allocation11 + $0x98] sm:$0xff]  }
0x1fce   :  { %15702 = vmatprep.subr.bf16.mxu1 %v17735_v10 }
0x1fcf   :  { %15681 = vmatpush3.bf16.msra.mxu0 %v17219_v42  ;;  %v17248_v42 = vld [vmem:[#allocation11 + $0xb8] sm:$0xff]  }
0x1fd0   :  { %15682 = vmatprep.subr.bf16.mxu0 %v17735_v10 }
0x1fd1   :  { %15703 = vmatpush3.bf16.msra.mxu1 %v17211_v3  ;;  %v17241_v3 = vld [vmem:[#allocation16 + $0x60] sm:$0xff]  }
0x1fd2   :  { %15704 = vmatprep.subr.bf16.mxu1 %v17735_v10 }
0x1fd3   :  { %15683 = vmatpush3.bf16.msra.mxu0 %v17221_v11  ;;  %v17249_v11 = vld [vmem:[#allocation16 + $0x80] sm:$0xff]  }
0x1fd4   :  { %15684 = vmatprep.subr.bf16.mxu0 %v17735_v10 }
0x1fd5   :  { %15705 = vmatpush3.bf16.msra.mxu1 %v17212_v30  ;;  %v17242_v30 = vld [vmem:[#allocation11 + $0xa0] sm:$0xff]  }
0x1fd6   :  { %15706 = vmatprep.subr.bf16.mxu1 %v17735_v10 }
0x1fd7   :  { %15685 = vmatpush3.bf16.msra.mxu0 %v17223_v32  ;;  %v17250_v32 = vld [vmem:[#allocation11 + $0xc0] sm:$0xff]  }
0x1fd8   :  { %15686 = vmatprep.subr.bf16.mxu0 %v17735_v10 }
0x1fd9   :  { %15707 = vmatpush3.bf16.msra.mxu1 %v17213_v46  ;;  %v17243_v46 = vld [vmem:[#allocation16 + $0x68] sm:$0xff]  }
0x1fda   :  { %15708 = vmatprep.subr.bf16.mxu1 %v17735_v10 }
0x1fdb   :  { %15687 = vmatpush3.bf16.msra.mxu0 %v17225_v47 }
0x1fdc   :  { %15688 = vmatprep.subr.bf16.mxu0 %v17735_v10 }
0x1fdd   :  { %15709 = vmatpush3.bf16.msra.mxu1 %v17214_v31  ;;  %v17244_v31 = vld [vmem:[#allocation11 + $0xa8] sm:$0xff]  }
0x1fde   :  { %15710 = vmatprep.subr.bf16.mxu1 %v17735_v10 }
0x1fdf   :  { %15689 = vmatpush3.bf16.msra.mxu0 %v17227_v6 }
0x1fe0   :  { %15690 = vmatprep.subr.bf16.mxu0 %v17735_v10 }
0x1fe1   :  { %15711 = vmatpush3.bf16.msra.mxu1 %v17215_v44  ;;  %v17245_v44 = vld [vmem:[#allocation16 + $0x70] sm:$0xff]  }
0x1fe2   :  { %15712 = vmatprep.subr.bf16.mxu1 %v17735_v10 }
0x1fe3   :  { %15691 = vmatpush3.bf16.msra.mxu0 %v17229_v48  ;;  %v17251_v48 = vld [vmem:[#allocation16 + $0x88] sm:$0xff]  }
0x1fe4   :  { %15692 = vmatprep.subr.bf16.mxu0 %v17735_v10 }
0x1fe5   :  { %15713 = vmatpush3.bf16.msra.mxu1 %v17216_v5  ;;  %v17246_v5 = vld [vmem:[#allocation11 + $0xb0] sm:$0xff]  }
0x1fe6   :  { %15738 = vmatprep.subr.bf16.mxu1 %v17735_v10 }
0x1fe7   :  { %15693 = vmatpush3.bf16.msra.mxu0 %v17231_v49  ;;  %v17252_v49 = vld [vmem:[#allocation11 + $0xc8] sm:$0xff]  }
0x1fe8   :  { %15718 = vmatprep.subr.bf16.mxu0 %v17735_v10 }
0x207b   :  { %v11382_v57 = vpop.f32.mrb[180].mxu0  ;;  %v11423_v19 = vpop.f32.mrb[180].mxu1 }
0x207c   :  { %v11430_v50 = vmul.f32 %v11382_v57, %v18051_v25  ;;  %v19043_v52 = vmul.f32 %v11423_v19, %v18053_v26  ;;  %v11384_v54 = vpop.f32.mrb[181].mxu0  ;;  %v11425_v43 = vpop.f32.mrb[181].mxu1  ;;  %v17222_v25 = vld [vmem:[#allocation11 + $0x50] sm:$0xff]   ;;  %v17224_v26 = vld [vmem:[#allocation11 + $0x58] sm:$0xff]  }
0x207d   :  { %v11431_v24 = vmul.f32 %v11384_v54, %v18055_v27  ;;  %v19047_v41 = vmul.f32 %v11425_v43, %v18057_v28  ;;  %v11386_v58 = vpop.f32.mrb[182].mxu0  ;;  %v11427_v39 = vpop.f32.mrb[182].mxu1  ;;  %v17226_v27 = vld [vmem:[#allocation11 + $0x60] sm:$0xff]   ;;  %v17228_v28 = vld [vmem:[#allocation11 + $0x68] sm:$0xff]   ;;  %v17253_v57 = vld [vmem:[#allocation16 + $0x90] sm:$0xff]  }
0x207e   :  { %v11728_v62 = vpack.c.bf16 %v11430_v50, %v11430_v50  ;;  %v11387_v63 = vpop.f32.mrb[183].mxu0  ;;  %v11428_v9 = vpop.f32.mrb[183].mxu1  ;;  %v12150_v47 = vpack.c.bf16 %v19043_v52, %v19043_v52  ;;  %v17254_v19 = vld [vmem:[#allocation11 + $0xd0] sm:$0xff]   ;;  %v17255_v50 = vld [vmem:[#allocation16 + $0x98] sm:$0xff]   ;;  %v17257_v54 = vld [vmem:[#allocation16 + $0xa0] sm:$0xff]  }
0x207f   :  { %v11939_v16 = vpack.c.bf16 %v11431_v24, %v11431_v24  ;;  %v17256_v52 = vld [vmem:[#allocation11 + $0xd8] sm:$0xff]   ;;  %v17258_v43 = vld [vmem:[#allocation11 + $0xe0] sm:$0xff]   ;;  %v17259_v24 = vld [vmem:[#allocation16 + $0xa8] sm:$0xff]  }
0x2080   :  { %15715 = vmatmul.mubr.bf16.vlgmr.msra.gmra.mrb[188].mxu1 %v11728_v62  ;;  %v17260_v58 = vld [vmem:[#allocation11 + $0xe8] sm:$0xff]   ;;  %v17261_v39 = vld [vmem:[#allocation16 + $0xb0] sm:$0xff]   ;;  %v17263_v62 = vld [vmem:[#allocation16 + $0xb8] sm:$0xff]  }
0x2081   :  { %15739 = vmatpush3.bf16.msra.mxu1 %v17218_v60  ;;  %15754 = vmatprep.mubr.msk.bf16.mxu1 %vm17736_vm0, %v17735_v10  ;;  %v17262_v60 = vld [vmem:[#allocation11 + $0xf0] sm:$0xff]   ;;  %v17264_v63 = vld [vmem:[#allocation11 + $0xf8] sm:$0xff]   ;;  %v17265_v9 = vld [vmem:[#allocation16 + $0xc0] sm:$0xff]  }
0x2082   :  { %15740 = vmatprep.subr.bf16.mxu1 %v17735_v10 }
0x2085   :  { %15741 = vmatpush3.bf16.msra.mxu1 %v17220_v7  ;;  %v12361_v7 = vpack.c.bf16 %v19047_v41, %v19047_v41  ;;  %v17268_v41 = vld [vmem:[#allocation16 + $0xd8] sm:$0xff]  }
0x2086   :  { %15742 = vmatprep.subr.bf16.mxu1 %v17735_v10 }
0x2089   :  { %15743 = vmatpush3.bf16.msra.mxu1 %v17222_v25 }
0x208a   :  { %15744 = vmatprep.subr.bf16.mxu1 %v17735_v10 }
0x208d   :  { %15745 = vmatpush3.bf16.msra.mxu1 %v17224_v26  ;;  %v17266_v26 = vld [vmem:[#allocation16 + $0xc8] sm:$0xff]  }
0x208e   :  { %15746 = vmatprep.subr.bf16.mxu1 %v17735_v10 }
0x2091   :  { %15747 = vmatpush3.bf16.msra.mxu1 %v17226_v27  ;;  %v17267_v27 = vld [vmem:[#allocation16 + $0xd0] sm:$0xff]  }
0x2092   :  { %15748 = vmatprep.subr.bf16.mxu1 %v17735_v10 }
0x2095   :  { %15749 = vmatpush3.bf16.msra.mxu1 %v17228_v28  ;;  %v17269_v28 = vld [vmem:[#allocation16 + $0xe0] sm:$0xff]  }
0x2096   :  { %15750 = vmatprep.subr.bf16.mxu1 %v17735_v10 }
0x2099   :  { %15751 = vmatpush3.bf16.msra.mxu1 %v17230_v2  ;;  %v17270_v2 = vld [vmem:[#allocation16 + $0xe8] sm:$0xff]  }
0x209a   :  { %15752 = vmatprep.subr.bf16.mxu1 %v17735_v10 }
0x209b   :  { %v11660_v45 = vpop.f32.mrb[184].mxu0  ;;  %v11701_v61 = vpop.f32.mrb[184].mxu1 }
0x209c   :  { %v11708_v17 = vmul.f32 %v11660_v45, %v18059_v33  ;;  %v19060_v0 = vmul.f32 %v11701_v61, %v18061_v34  ;;  %v11662_v53 = vpop.f32.mrb[185].mxu0  ;;  %v11703_v12 = vpop.f32.mrb[185].mxu1  ;;  %v17235_v34 = vld [vmem:[#allocation16 + $0x48] sm:$0xff]   ;;  %v17272_v45 = vld [vmem:[#allocation16 + $0xf8] sm:$0xff]  }
0x209d   :  { %v19063_v36 = vmul.f32 %v11662_v53, %v18063_v35  ;;  %v19066_v13 = vmul.f32 %v11703_v12, %v18065_v37  ;;  %v11664_v14 = vpop.f32.mrb[186].mxu0  ;;  %v11705_v22 = vpop.f32.mrb[186].mxu1  ;;  %15753 = vmatpush3.bf16.msra.mxu1 %v17232_v4  ;;  %v17236_v35 = vld [vmem:[#allocation11 + $0x88] sm:$0xff]   ;;  %v17237_v37 = vld [vmem:[#allocation16 + $0x50] sm:$0xff]   ;;  %v17273_v12 = vld [vmem:[#allocation22] sm:$0xff]  }
0x209e   :  { %v11745_v18 = vpack.c.bf16 %v11708_v17, %v11708_v17  ;;  %v11665_v59 = vpop.f32.mrb[187].mxu0  ;;  %v11706_v33 = vpop.f32.mrb[187].mxu1  ;;  %15778 = vmatprep.subr.bf16.mxu1 %v17735_v10  ;;  %v12167_v25 = vpack.c.bf16 %v19060_v0, %v19060_v0  ;;  %v17271_v4 = vld [vmem:[#allocation16 + $0xf0] sm:$0xff]   ;;  %v17274_v14 = vld [vmem:[#allocation22 + $0x8] sm:$0xff]  }
0x209f   :  { %v11956_v6 = vpack.c.bf16 %v19063_v36, %v19063_v36  ;;  %v12378_v61 = vpack.c.bf16 %v19066_v13, %v19066_v13  ;;  %v17275_v22 = vld [vmem:[#allocation22 + $0x10] sm:$0xff]   ;;  %v17276_v13 = vld [vmem:[#allocation22 + $0x18] sm:$0xff]  }
0x20a0   :  { %15695 = vmatmul.mubr.bf16.vlgmr.msra.gmra.mrb[188].mxu0 %v11745_v18  ;;  %15755 = vmatmul.mubr.bf16.vlgmr.msra.gmra.mrb[192].mxu1 %v11939_v16  ;;  %v17279_v16 = vld [vmem:[#allocation22 + $0x30] sm:$0xff]   ;;  %v17280_v18 = vld [vmem:[#allocation22 + $0x38] sm:$0xff]  }
0x20a1   :  { %15719 = vmatpush3.bf16.msra.mxu0 %v17233_v23  ;;  %15779 = vmatpush3.bf16.msra.mxu1 %v17234_v8  ;;  %v17277_v23 = vld [vmem:[#allocation22 + $0x20] sm:$0xff]   ;;  %v17278_v8 = vld [vmem:[#allocation22 + $0x28] sm:$0xff]  }
0x20a2   :  { %15720 = vmatprep.subr.bf16.mxu0 %v17735_v10  ;;  %15780 = vmatprep.subr.bf16.mxu1 %v17735_v10 }
0x20a3   :  { %15734 = vmatprep.mubr.msk.bf16.mxu0 %vm17736_vm0, %v17735_v10  ;;  %15794 = vmatprep.mubr.msk.bf16.mxu1 %vm17736_vm0, %v17735_v10 }
0x20a5   :  { %15721 = vmatpush3.bf16.msra.mxu0 %v17235_v34  ;;  %15781 = vmatpush3.bf16.msra.mxu1 %v17236_v35 }
0x20a6   :  { %15722 = vmatprep.subr.bf16.mxu0 %v17735_v10  ;;  %15782 = vmatprep.subr.bf16.mxu1 %v17735_v10 }
0x20a9   :  { %15723 = vmatpush3.bf16.msra.mxu0 %v17237_v37  ;;  %15783 = vmatpush3.bf16.msra.mxu1 %v17238_v15 }
0x20aa   :  { %15724 = vmatprep.subr.bf16.mxu0 %v17735_v10  ;;  %15784 = vmatprep.subr.bf16.mxu1 %v17735_v10 }
0x20ad   :  { %15725 = vmatpush3.bf16.msra.mxu0 %v17239_v1  ;;  %15785 = vmatpush3.bf16.msra.mxu1 %v17240_v20 }
0x20ae   :  { %15726 = vmatprep.subr.bf16.mxu0 %v17735_v10  ;;  %15786 = vmatprep.subr.bf16.mxu1 %v17735_v10 }
0x20b1   :  { %15727 = vmatpush3.bf16.msra.mxu0 %v17241_v3  ;;  %15787 = vmatpush3.bf16.msra.mxu1 %v17242_v30 }
0x20b2   :  { %15728 = vmatprep.subr.bf16.mxu0 %v17735_v10  ;;  %15788 = vmatprep.subr.bf16.mxu1 %v17735_v10 }
0x20b5   :  { %15729 = vmatpush3.bf16.msra.mxu0 %v17243_v46  ;;  %15789 = vmatpush3.bf16.msra.mxu1 %v17244_v31 }
0x20b6   :  { %15730 = vmatprep.subr.bf16.mxu0 %v17735_v10  ;;  %15790 = vmatprep.subr.bf16.mxu1 %v17735_v10 }
0x20b9   :  { %15731 = vmatpush3.bf16.msra.mxu0 %v17245_v44  ;;  %15791 = vmatpush3.bf16.msra.mxu1 %v17246_v5 }
0x20ba   :  { %15732 = vmatprep.subr.bf16.mxu0 %v17735_v10  ;;  %15792 = vmatprep.subr.bf16.mxu1 %v17735_v10 }
0x20bd   :  { %15733 = vmatpush3.bf16.msra.mxu0 %v17247_v38  ;;  %15793 = vmatpush3.bf16.msra.mxu1 %v17248_v42 }
0x20be   :  { %15758 = vmatprep.subr.bf16.mxu0 %v17735_v10  ;;  %15818 = vmatprep.subr.bf16.mxu1 %v17735_v10 }
0x20c0   :  { %15735 = vmatmul.mubr.bf16.vlgmr.msra.gmra.mrb[192].mxu0 %v11956_v6  ;;  %15795 = vmatmul.mubr.bf16.vlgmr.msra.gmra.mrb[196].mxu1 %v12150_v47 }
0x20c1   :  { %15759 = vmatpush3.bf16.msra.mxu0 %v17249_v11  ;;  %15819 = vmatpush3.bf16.msra.mxu1 %v17250_v32 }
0x20c2   :  { %15760 = vmatprep.subr.bf16.mxu0 %v17735_v10  ;;  %15820 = vmatprep.subr.bf16.mxu1 %v17735_v10 }
0x20c3   :  { %15774 = vmatprep.mubr.msk.bf16.mxu0 %vm17736_vm0, %v17735_v10  ;;  %15834 = vmatprep.mubr.msk.bf16.mxu1 %vm17736_vm0, %v17735_v10 }
0x20c5   :  { %15761 = vmatpush3.bf16.msra.mxu0 %v17251_v48  ;;  %15821 = vmatpush3.bf16.msra.mxu1 %v17252_v49 }
0x20c6   :  { %15762 = vmatprep.subr.bf16.mxu0 %v17735_v10  ;;  %15822 = vmatprep.subr.bf16.mxu1 %v17735_v10 }
0x20c9   :  { %15763 = vmatpush3.bf16.msra.mxu0 %v17253_v57  ;;  %15823 = vmatpush3.bf16.msra.mxu1 %v17254_v19 }
0x20ca   :  { %15764 = vmatprep.subr.bf16.mxu0 %v17735_v10  ;;  %15824 = vmatprep.subr.bf16.mxu1 %v17735_v10 }
0x20cd   :  { %15765 = vmatpush3.bf16.msra.mxu0 %v17255_v50  ;;  %15825 = vmatpush3.bf16.msra.mxu1 %v17256_v52 }
0x20ce   :  { %15766 = vmatprep.subr.bf16.mxu0 %v17735_v10  ;;  %15826 = vmatprep.subr.bf16.mxu1 %v17735_v10 }
0x20d1   :  { %15767 = vmatpush3.bf16.msra.mxu0 %v17257_v54  ;;  %15827 = vmatpush3.bf16.msra.mxu1 %v17258_v43 }
0x20d2   :  { %15768 = vmatprep.subr.bf16.mxu0 %v17735_v10  ;;  %15828 = vmatprep.subr.bf16.mxu1 %v17735_v10 }
0x20d5   :  { %15769 = vmatpush3.bf16.msra.mxu0 %v17259_v24  ;;  %15829 = vmatpush3.bf16.msra.mxu1 %v17260_v58 }
0x20d6   :  { %15770 = vmatprep.subr.bf16.mxu0 %v17735_v10  ;;  %15830 = vmatprep.subr.bf16.mxu1 %v17735_v10 }
0x20d9   :  { %15771 = vmatpush3.bf16.msra.mxu0 %v17261_v39  ;;  %15831 = vmatpush3.bf16.msra.mxu1 %v17262_v60 }
0x20da   :  { %15772 = vmatprep.subr.bf16.mxu0 %v17735_v10  ;;  %15832 = vmatprep.subr.bf16.mxu1 %v17735_v10 }
0x20dd   :  { %15773 = vmatpush3.bf16.msra.mxu0 %v17263_v62  ;;  %15833 = vmatpush3.bf16.msra.mxu1 %v17264_v63 }
0x20de   :  { %15798 = vmatprep.subr.bf16.mxu0 %v17735_v10 }
0x20e0   :  { %15775 = vmatmul.mubr.bf16.vlgmr.msra.gmra.mrb[196].mxu0 %v12167_v25  ;;  %15835 = vmatmul.mubr.bf16.vlgmr.msra.gmra.mrb[200].mxu1 %v12361_v7 }
0x20e1   :  { %15799 = vmatpush3.bf16.msra.mxu0 %v17265_v9  ;;  %15814 = vmatprep.mubr.msk.bf16.mxu0 %vm17736_vm0, %v17735_v10 }
0x20e2   :  { %15800 = vmatprep.subr.bf16.mxu0 %v17735_v10 }
0x20e5   :  { %15801 = vmatpush3.bf16.msra.mxu0 %v17266_v26 }
0x20e6   :  { %15802 = vmatprep.subr.bf16.mxu0 %v17735_v10 }
0x20e9   :  { %15803 = vmatpush3.bf16.msra.mxu0 %v17267_v27 }
0x20ea   :  { %15804 = vmatprep.subr.bf16.mxu0 %v17735_v10 }
0x20ed   :  { %15805 = vmatpush3.bf16.msra.mxu0 %v17268_v41 }
0x20ee   :  { %15806 = vmatprep.subr.bf16.mxu0 %v17735_v10 }
0x20f1   :  { %15807 = vmatpush3.bf16.msra.mxu0 %v17269_v28 }
0x20f2   :  { %15808 = vmatprep.subr.bf16.mxu0 %v17735_v10 }
0x20f5   :  { %15809 = vmatpush3.bf16.msra.mxu0 %v17270_v2 }
0x20f6   :  { %15810 = vmatprep.subr.bf16.mxu0 %v17735_v10 }
0x20f9   :  { %15811 = vmatpush3.bf16.msra.mxu0 %v17271_v4 }
0x20fa   :  { %15812 = vmatprep.subr.bf16.mxu0 %v17735_v10 }
0x20fd   :  { %15813 = vmatpush3.bf16.msra.mxu0 %v17272_v45 }
0x20fe   :  { %15838 = vmatprep.subr.bf16.mxu0 %v17735_v10 }
0x2100   :  { %15815 = vmatmul.mubr.bf16.vlgmr.msra.gmra.mrb[200].mxu0 %v12378_v61 }
0x2101   :  { %15854 = vmatprep.mubr.msk.bf16.mxu0 %vm17736_vm0, %v17735_v10  ;;  %15839 = vmatpush3.bf16.msra.mxu0 %v17273_v12 }
0x2102   :  { %15840 = vmatprep.subr.bf16.mxu0 %v17735_v10 }
0x2105   :  { %15841 = vmatpush3.bf16.msra.mxu0 %v17274_v14 }
0x2106   :  { %15842 = vmatprep.subr.bf16.mxu0 %v17735_v10 }
0x2109   :  { %15843 = vmatpush3.bf16.msra.mxu0 %v17275_v22 }
0x210a   :  { %15844 = vmatprep.subr.bf16.mxu0 %v17735_v10 }
0x210d   :  { %15845 = vmatpush3.bf16.msra.mxu0 %v17276_v13 }
0x210e   :  { %15846 = vmatprep.subr.bf16.mxu0 %v17735_v10 }
0x2111   :  { %15847 = vmatpush3.bf16.msra.mxu0 %v17277_v23 }
0x2112   :  { %15848 = vmatprep.subr.bf16.mxu0 %v17735_v10 }
0x2115   :  { %15849 = vmatpush3.bf16.msra.mxu0 %v17278_v8 }
0x2116   :  { %15850 = vmatprep.subr.bf16.mxu0 %v17735_v10 }
0x2119   :  { %15851 = vmatpush3.bf16.msra.mxu0 %v17279_v16 }
0x211a   :  { %15852 = vmatprep.subr.bf16.mxu0 %v17735_v10 }
0x211d   :  { %15853 = vmatpush3.bf16.msra.mxu0 %v17280_v18 }
0x2153   :  { %v11916_v17 = vpop.f32.mrb[188].mxu1 }
0x2154   :  { %v15716_v0 = vpop.f32.mrb[189].mxu1 }
0x2155   :  { %v11919_v53 = vpop.f32.mrb[190].mxu1 }
0x2156   :  { %v15717_v36 = vpop.f32.mrb[191].mxu1 }
0x2173   :  { %v11828_v59 = vpop.f32.mrb[188].mxu0  ;;  %v12127_v33 = vpop.f32.mrb[192].mxu1 }
0x2174   :  { %v11917_v34 = vadd.f32 %v11916_v17, %v11828_v59  ;;  %v15696_v35 = vpop.f32.mrb[189].mxu0  ;;  %v15756_v37 = vpop.f32.mrb[193].mxu1 }
0x2175   :  { %v11831_v15 = vpop.f32.mrb[190].mxu0  ;;  %v12130_v1 = vpop.f32.mrb[194].mxu1 }
0x2176   :  { %v15697_v20 = vpop.f32.mrb[191].mxu0  ;;  %v15757_v3 = vpop.f32.mrb[195].mxu1  ;;  %v11922_v43 = vadd.f32 %v11917_v34, %v18249_v29 }
0x2178   :  { %v13903_v58 = vmul.f32 -1.442695, %v11922_v43 }
0x2193   :  { %v12039_v30 = vpop.f32.mrb[192].mxu0  ;;  %v12338_v46 = vpop.f32.mrb[196].mxu1 }
0x2194   :  { %v12128_v31 = vadd.f32 %v12127_v33, %v12039_v30  ;;  %v15736_v44 = vpop.f32.mrb[193].mxu0  ;;  %v15796_v5 = vpop.f32.mrb[197].mxu1 }
0x2195   :  { %v12042_v38 = vpop.f32.mrb[194].mxu0  ;;  %v12341_v42 = vpop.f32.mrb[198].mxu1 }
0x2196   :  { %v15737_v11 = vpop.f32.mrb[195].mxu0  ;;  %v15797_v32 = vpop.f32.mrb[199].mxu1  ;;  %v12133_v54 = vadd.f32 %v12128_v31, %v18246_v51 }
0x2198   :  { %v13904_v24 = vmul.f32 -1.442695, %v12133_v54 }
0x219a   :  { %17377 = vpow2.f32 %v13904_v24 }
0x219b   :  { %17379 = vpow2.f32 %v13903_v58 }
0x21a4   :  { %v17378_v60 = vpop.eup %17377 }
0x21a5   :  { %v17380_v62 = vpop.eup %17379  ;;  %v12565_v9 = vadd.f32 1.0, %v17378_v60 }
0x21a6   :  { %v12559_v7 = vadd.f32 1.0, %v17380_v62 }
0x21b3   :  { %v12250_v10 = vpop.f32.mrb[196].mxu0  ;;  %v12549_v47 = vpop.f32.mrb[200].mxu1 }
0x21b4   :  { %v12339_v6 = vadd.f32 %v12338_v46, %v12250_v10  ;;  %v15776_v48 = vpop.f32.mrb[197].mxu0  ;;  %v15836_v49 = vpop.f32.mrb[201].mxu1 }
0x21b5   :  { %v12253_v57 = vpop.f32.mrb[198].mxu0  ;;  %v12552_v19 = vpop.f32.mrb[202].mxu1 }
0x21b6   :  { %v15777_v50 = vpop.f32.mrb[199].mxu0  ;;  %v15837_v52 = vpop.f32.mrb[203].mxu1  ;;  %v12344_v39 = vadd.f32 %v12339_v6, %v18257_v55 }
0x21b8   :  { %v13905_v63 = vmul.f32 -1.442695, %v12344_v39 }
0x21ba   :  { %17381 = vpow2.f32 %v13905_v63 }
0x21bb   :  { %17383 = vrcp.f32 %v12565_v9 }
0x21bc   :  { %17385 = vrcp.f32 %v12559_v7 }
0x21c4   :  { %v17382_v28 = vpop.eup %17381 }
0x21c5   :  { %v17384_v2 = vpop.eup %17383  ;;  %v12571_v45 = vadd.f32 1.0, %v17382_v28 }
0x21c6   :  { %v17386_v4 = vpop.eup %17385  ;;  %v12575_v61 = vmul.f32 %v17384_v2, %v18997_v40 }
0x21d3   :  { %v12461_v25 = vpop.f32.mrb[200].mxu0 }
0x21d4   :  { %v12550_v26 = vadd.f32 %v12549_v47, %v12461_v25  ;;  %v15816_v27 = vpop.f32.mrb[201].mxu0 }
0x21d5   :  { %v12464_v41 = vpop.f32.mrb[202].mxu0 }
0x21d6   :  { %v12555_v51 = vadd.f32 %v12550_v26, %v18264_v56  ;;  %v15817_v29 = vpop.f32.mrb[203].mxu0  ;;  %v13906_v56 = vld [vmem:[%s19172_s14] ss:$0 sm:$0xff]  ;;  %s17738_s14 = smov [#allocation23]  }
0x21d7   :  { %s12718_s22 = sshll.u32 %s17738_s14, 4  ;;  %s12719_s22 = int_to_ptr.vmem [resolvable:$true] %s12718_s22 }
0x21d8   :  { %17387 = vtanh.f32 %v12555_v51  ;;  %s17679_s7 = scalar_lea.vmem %s12719_s22, 128  ;;  %p17684_p7 = scmp.lt.s32.totalorder %s12719_s22, %s12719_s22 }
0x21d9   :  { %17389 = vrcp.f32 %v12571_v45  ;;  %p17680_p6 = scmp.ne.s32.totalorder %s12719_s22, %s17679_s7  ;;  %p17685_p8 = scmp.lt.s32.totalorder %s17679_s7, %s17679_s7 }
0x21db   :  { %p17686_p9 = por %p17685_p8, %p17684_p7 }
0x21dd   :  { %p17687_p10 = pnand %p17686_p9, %p17680_p6 }
0x21e2   :  { %v17388_v55 = vpop.eup %17387 }
0x21e3   :  { %v12576_v17 = vmul.f32 %v17388_v55, %v17386_v4  ;;  %v17390_v53 = vpop.eup %17389 }
0x21e5   :  { %v12577_v0 = vadd.f32 %v12576_v17, %v12575_v61 }
0x21e7   :  { %17391 = vtanh.f32 %v12577_v0 }
0x21f1   :  { %v17392_v12 = vpop.eup %17391 }
0x21f2   :  { %v12579_v36 = vmul.f32 %v17392_v12, %v17390_v53 }
0x21f4   :  { %v12596_v14 = vpack.c.bf16 %v12579_v36, %v12579_v36 }
0x21f6   :  { %15855 = vmatmul.mubr.bf16.vlgmr.msra.gmra.mrb[204].mxu0 %v12596_v14 }
0x22c9   :  { %v12686_v22 = vpop.f32.mrb[204].mxu0 }
0x22ca   :  { %v12687_v13 = vadd.f32 %v13906_v56, %v12686_v22  ;;  %v15856_v23 = vpop.f32.mrb[205].mxu0 }
0x22cb   :  { %v12689_v8 = vpop.f32.mrb[206].mxu0 }
0x22cc   :  { %12692 = vmax.xlane.f32.xlu0 %v12687_v13  ;;  %v15857_v16 = vpop.f32.mrb[207].mxu0 }
0x2359   :  { %v12693_v40 = vpop.xlane.xlu0 %12692 }
0x235a   :  { %vm12694_vm0 = vcmp.eq.f32.partialorder %v12687_v13, %v12693_v40 }
0x235b   :  { %v12695_v18 = vsel %vm12694_vm0, %v18089_v21, 128 }
0x235c   :  { %v12697_v59 = vshra.s32 %v12695_v18, 16  ;;  %v12696_v34 = vand.u32 65535, %v12695_v18 }
0x235e   :  { %v12699_v33 = vcvt.s32.f32 %v12697_v59  ;;  %v12698_v37 = vcvt.s32.f32 %v12696_v34 }
0x2360   :  { %12700 = vmin.xlane.f32.xlu1 %v12699_v33 }
0x23ed   :  { %v12701_v35 = vpop.xlane.xlu1 %12700 }
0x23ee   :  { %vm12702_vm3 = vcmp.eq.f32.partialorder %v12699_v33, %v12701_v35  ;;  %v12707_v1 = vcvt.f32.s32 %v12701_v35 }
0x23ef   :  { %v12703_v15 = vsel %vm12702_vm3, %v12698_v37, inf }
0x23f0   :  { %12704 = vmin.xlane.f32.xlu0 %v12703_v15  ;;  %v12708_v3 = vshll.u32 %v12707_v1, 16 }
0x247d   :  { %v12705_v20 = vpop.xlane.xlu0 %12704 }
0x247e   :  { %v12706_v30 = vcvt.f32.s32 %v12705_v20 }
0x2480   :  { %v12709_v46 = vadd.s32 %v12708_v3, %v12706_v30 }
0x2482   :  { %12711 = vst.msk [vmem:[#allocation23] sm:$0xff] %vm12710_vm4, %v12709_v46 }
0x2483   :  { %17690 = shalt.err (!%p17687_p10)
}
0x2484   :  { %s17691_s29 = scalar_lea.hbm %s19173_s15, 128 }
0x2485   :  { %p17692_p11 = scmp.ne.s32.totalorder %s19173_s15, %s17691_s29  ;;  %p17695_p12 = scmp.lt.u32.totalorder %s17691_s29, %s19173_s15 }
0x2487   :  { %p17697_p13 = pnand %p17695_p12, %p17692_p11 }
0x2489   :  { %17700 = shalt.err (!%p17697_p13)
}
0x248a   :  { %12721 = dma.vmem_to_hbm [thread:$0]  %s12719_s22, 128, %s19173_s15, [#allocation4]  }
0x248b   :  { %17715 = dma.done.wait [#allocation4], 128  }
0x248c   :  { %17716 = vsyncadd [#allocation4], 4294967168 }
0x248d   :  { %12725 = vsyncpa [#allocation3], 1 }
0x248e   :  { %12726 = vsyncpa [#allocation6], 1 }
0x248f   :  { %12727 = vsyncpa [#allocation9], 1 }
0x2490   :  { %12728 = vsyncpa [#allocation12], 1 }
0x2491   :  { %12729 = vsyncpa [#allocation15], 1 }
0x2492   :  { %12730 = vsyncpa [#allocation18], 1 }
0x2493   :  { %12731 = vsyncpa [#allocation21], 1 }
0x2494   :  { %12732 = vsyncpa [#allocation4], 1 }

</bundles_post_ra>
